<compile_context>
chip_gen: v6e
topology: v6e:2x2x1
jax: 0.10.0
libtpu: 0.0.40
codegen_flags: <defaults>
</compile_context>

<pallas_src>
import math
import functools

import jax
import jax.numpy as jnp
from jax.experimental import pallas as pl
from jax.experimental.pallas import tpu as pltpu

BN_EPS = 0.001

# On v6e / v7x set this to jnp.bfloat16 to halve operand DMA bytes and roughly
# double MXU throughput (accumulation stays f32 via preferred_element_type).
# Kept float32 by default to match the PyTorch float32 numerics.
MATMUL_OPERAND_DTYPE = jnp.float32


# ----------------------------------------------------------------------------
# small helpers
# ----------------------------------------------------------------------------
def _ceil_mul(x, m):
    return ((x + m - 1) // m) * m


def _pick_tm(m):
    """>=2 M-blocks (keeps both TensorCores busy on v7x), 8-aligned, capped."""
    if m <= 16:
        return _ceil_mul(m, 8)
    return min(_ceil_mul((m + 1) // 2, 8), 256)


# ----------------------------------------------------------------------------
# Pallas kernels
# ----------------------------------------------------------------------------
def mm_bias_relu_kernel(a_ref, b_ref, bias_ref, o_ref):
    """O = relu(A @ B + bias); single full-K block, grid over M only."""
    acc = jnp.dot(a_ref[...], b_ref[...], preferred_element_type=jnp.float32)
    o_ref[...] = jnp.maximum(acc + bias_ref[...], 0.0).astype(o_ref.dtype)


def temporal_conv_kernel(x_ref, b_ref, bias_ref, o_ref, *, taps, hw, dhw, cp):
    """Fused (3,1,1)+(5,1,1) conv + BN + ReLU for one batch element.

    x_ref : ((D+4)*H*W, Cp)   D-padded activations, flattened per frame
    b_ref : (taps*Cp, Nout)   BN-scaled weights, row = tap*Cp + channel
    The temporal im2col is done in-kernel: tap `dt` is the row window
    [dt*H*W, dt*H*W + D*H*W) of the padded input (a cheap VMEM slice).
    """
    acc = jnp.dot(x_ref[pl.ds(0, dhw), :], b_ref[pl.ds(0, cp), :],
                  preferred_element_type=jnp.float32)
    for dt in range(1, taps):
        a = x_ref[pl.ds(dt * hw, dhw), :]
        w = b_ref[pl.ds(dt * cp, cp), :]
        acc = acc + jnp.dot(a, w, preferred_element_type=jnp.float32)
    o_ref[...] = jnp.maximum(acc + bias_ref[...], 0.0).astype(o_ref.dtype)


def global_max_kernel(x_ref, o_ref):
    """AdaptiveMaxPool2d((1,1)): reduce the H*W (sublane) axis, C stays in lanes."""
    o_ref[...] = jnp.max(x_ref[...], axis=1)


# ----------------------------------------------------------------------------
# Pallas wrappers
# ----------------------------------------------------------------------------
def matmul_bias_relu(A, B, bias):
    """relu(A @ B + bias).

    A: (M, K), B: (K, Nlog), bias: (Nlog,).
    K is padded only to a multiple of 8 and used as ONE full-K block.
    N is padded to a multiple of 128 (lane dense) and the padded (zero)
    channels are returned so downstream layers never slice/re-pad.
    Returns (M, Np) float32.
    """
    M, K = A.shape
    Kb, Nlog = B.shape
    assert K == Kb
    Kp = _ceil_mul(K, 8)
    Np = _ceil_mul(Nlog, 128)
    tm = _pick_tm(M)
    Mp = _ceil_mul(M, tm)

    Ap = jnp.pad(A, ((0, Mp - M), (0, Kp - K))).astype(MATMUL_OPERAND_DTYPE)
    Bp = jnp.pad(B, ((0, Kp - K), (0, Np - Nlog))).astype(MATMUL_OPERAND_DTYPE)
    biasp = jnp.pad(bias, (0, Np - Nlog)).reshape(1, Np).astype(jnp.float32)

    out = pl.pallas_call(
        mm_bias_relu_kernel,
        out_shape=jax.ShapeDtypeStruct((Mp, Np), jnp.float32),
        grid=(Mp // tm,),
        in_specs=[
            pl.BlockSpec((tm, Kp), lambda i: (i, 0)),
            pl.BlockSpec((Kp, Np), lambda i: (0, 0)),   # revisited -> DMA'd once
            pl.BlockSpec((1, Np), lambda i: (0, 0)),
        ],
        out_specs=pl.BlockSpec((tm, Np), lambda i: (i, 0)),
        compiler_params=pltpu.CompilerParams(
            dimension_semantics=("parallel",)),
    )(Ap, Bp, biasp)
    return out[:M] if Mp != M else out


def temporal_conv_fused(x, B, bias):
    """Fused temporal (3,1,1)+(5,1,1) conv + BN + ReLU.

    x: (N, D, H, W, Cp) where channels [0:Cout] = 3x3 branch, [Cout:2Cout] =
    5x5 branch (the rest are zero padding).  B: (5*Cp, Nlog), bias: (Nlog,).
    """
    N, D, H, W, Cp = x.shape
    Nlog = B.shape[1]
    Np = _ceil_mul(Nlog, 128)
    HW, DHW = H * W, D * H * W
    R = (D + 4) * HW

    xp = jnp.pad(x, ((0, 0), (2, 2), (0, 0), (0, 0), (0, 0)))    # pad D by 2|2
    xf = xp.reshape(N, R, Cp).astype(MATMUL_OPERAND_DTYPE)
    Bp = jnp.pad(B, ((0, 0), (0, Np - Nlog))).astype(MATMUL_OPERAND_DTYPE)
    biasp = jnp.pad(bias, (0, Np - Nlog)).reshape(1, Np).astype(jnp.float32)

    kernel = functools.partial(temporal_conv_kernel,
                               taps=5, hw=HW, dhw=DHW, cp=Cp)
    out = pl.pallas_call(
        kernel,
        out_shape=jax.ShapeDtypeStruct((N, DHW, Np), jnp.float32),
        grid=(N,),
        in_specs=[
            pl.BlockSpec((None, R, Cp), lambda n: (n, 0, 0)),
            pl.BlockSpec((5 * Cp, Np), lambda n: (0, 0)),
            pl.BlockSpec((1, Np), lambda n: (0, 0)),
        ],
        out_specs=pl.BlockSpec((None, DHW, Np), lambda n: (n, 0, 0)),
        compiler_params=pltpu.CompilerParams(
            dimension_semantics=("parallel",)),
    )(xf, Bp, biasp)
    return out.reshape(N, D, H, W, Np)


def global_max_pool(x3d):
    """x3d: (N*D, H*W, C) -> (N*D, C) max over H*W; C stays lane-dense."""
    ND, HW, C = x3d.shape
    return pl.pallas_call(
        global_max_kernel,
        out_shape=jax.ShapeDtypeStruct((ND, C), x3d.dtype),
        grid=(1,),
        in_specs=[pl.BlockSpec((ND, HW, C), lambda i: (0, 0, 0))],
        out_specs=pl.BlockSpec((ND, C), lambda i: (0, 0)),
    )(x3d)


# ----------------------------------------------------------------------------
# fused weight builders (BN scale folded into B; zero rows/cols for padding)
# ----------------------------------------------------------------------------
def build_spatial_B(p, cin_phys):
    """Fused [3x3 ; 5x5] spatial weights -> (25*cin_phys, 2*Cout) + bias."""
    w3, w5 = p["s3_w"], p["s5_w"]            # (Co,Ci,1,3,3), (Co,Ci,1,5,5)
    cout, cin = w3.shape[0], w3.shape[1]
    w3e = jnp.pad(w3[:, :, 0], ((0, 0), (0, 0), (1, 1), (1, 1)))  # 3x3 -> 5x5
    wcat = jnp.concatenate([w3e, w5[:, :, 0]], axis=0)            # (2Co,Ci,5,5)
    wk = jnp.transpose(wcat, (2, 3, 1, 0))                        # (5,5,Ci,2Co)
    wk = jnp.pad(wk, ((0, 0), (0, 0), (0, cin_phys - cin), (0, 0)))
    B = wk.reshape(25 * cin_phys, 2 * cout)
    scale = jnp.concatenate([p["bn_s3"]["scale"], p["bn_s5"]["scale"]])
    bias = jnp.concatenate([p["bn_s3"]["bias"], p["bn_s5"]["bias"]])
    return B * scale[None, :], bias


def build_temporal_B(p, cp_in, cout):
    """Fused [t3 ; t5] temporal weights -> (5*cp_in, 2*Cout) + bias."""
    t3, t5 = p["t3_w"], p["t5_w"]            # (Co,Co,3,1,1), (Co,Co,5,1,1)
    t3k = jnp.pad(jnp.transpose(t3[:, :, :, 0, 0], (2, 1, 0)),
                  ((1, 1), (0, 0), (0, 0)))                       # (5,Co,Co)
    t5k = jnp.transpose(t5[:, :, :, 0, 0], (2, 1, 0))             # (5,Co,Co)
    B = jnp.zeros((5, cp_in, 2 * cout), jnp.float32)
    B = B.at[:, :cout, :cout].set(t3k)                 # 3x3 branch channels
    B = B.at[:, cout:2 * cout, cout:2 * cout].set(t5k)  # 5x5 branch channels
    scale = jnp.concatenate([p["bn_t3"]["scale"], p["bn_t5"]["scale"]])
    bias = jnp.concatenate([p["bn_t3"]["bias"], p["bn_t5"]["bias"]])
    return B.reshape(5 * cp_in, 2 * cout) * scale[None, :], bias


def build_last_B(p, cp_in, cout):
    """(x3 + x5) @ W_last  ==  [x3 ; x5] @ [W_last ; W_last]."""
    wl = jnp.transpose(p["last_w"][:, :, 0, 0, 0], (1, 0))        # (Co, Co)
    B = jnp.zeros((cp_in, cout), jnp.float32)
    B = B.at[:cout, :].set(wl)
    B = B.at[cout:2 * cout, :].set(wl)
    return B * p["bn_last"]["scale"][None, :], p["bn_last"]["bias"]


# ----------------------------------------------------------------------------
# conv wrappers / pooling glue
# ----------------------------------------------------------------------------
def spatial_conv_fused(x, B, bias, stride):
    """Fused 3x3/5x5 spatial conv + BN + ReLU.  x: (N, D, H, W, Cp)."""
    N, D, H, W, Cp = x.shape
    pad = 2
    xp = jnp.pad(x, ((0, 0), (0, 0), (pad, pad), (pad, pad), (0, 0)))
    Ho = (H + 2 * pad - 5) // stride + 1
    Wo = (W + 2 * pad - 5) // stride + 1
    # TODO(synk): the 25-tap spatial im2col is still materialized host-side
    #             (strided 2-D windows); move it in-kernel if it dominates.
    cols = []
    for i in range(5):
        for j in range(5):
            cols.append(xp[:, :, i:i + stride * Ho:stride,
                           j:j + stride * Wo:stride, :])
    A = jnp.concatenate(cols, axis=-1).reshape(N * D * Ho * Wo, 25 * Cp)
    out = matmul_bias_relu(A, B, bias)
    return out.reshape(N, D, Ho, Wo, out.shape[-1])


def maxpool2d_3x3_s2_p1(x):
    """MaxPool2d(3, stride=2, padding=1) per frame.  (Plain-JAX glue.)"""
    return jax.lax.reduce_window(
        x, -jnp.inf, jax.lax.max,
        window_dimensions=(1, 1, 3, 3, 1),
        window_strides=(1, 1, 2, 2, 1),
        padding=((0, 0), (0, 0), (1, 1), (1, 1), (0, 0)))


# ----------------------------------------------------------------------------
# Visual_Block and visual_encoder forward
# ----------------------------------------------------------------------------
def visual_block(x, p, is_down):
    stride = 2 if is_down else 1
    cin_phys = x.shape[-1]
    cout = p["s3_w"].shape[0]

    # 1) fused spatial 3x3 + 5x5  (cols [0:Cout]=x3 branch, [Cout:2Cout]=x5)
    B_sp, bias_sp = build_spatial_B(p, cin_phys)
    x = spatial_conv_fused(x, B_sp, bias_sp, stride)

    # 2) fused temporal (3,1,1) + (5,1,1), im2col in-kernel
    B_t, bias_t = build_temporal_B(p, x.shape[-1], cout)
    x = temporal_conv_fused(x, B_t, bias_t)

    # 3) branch add + 1x1 conv, fused into one matmul
    B_l, bias_l = build_last_B(p, x.shape[-1], cout)
    N, D, H, W, Cp = x.shape
    y = matmul_bias_relu(x.reshape(N * D * H * W, Cp), B_l, bias_l)
    return y.reshape(N, D, H, W, y.shape[-1])


def visual_encoder_forward(x_ncdhw, params):
    x = jnp.transpose(x_ncdhw, (0, 2, 3, 4, 1))       # NCDHW -> NDHWC

    x = visual_block(x, params["block1"], is_down=True)
    x = maxpool2d_3x3_s2_p1(x)
    x = visual_block(x, params["block2"], is_down=False)
    x = maxpool2d_3x3_s2_p1(x)
    x = visual_block(x, params["block3"], is_down=False)

    # AdaptiveMaxPool2d((1,1)): global max over (H, W); C=128 stays in lanes.
    N, D, H, W, C = x.shape
    out = global_max_pool(x.reshape(N * D, H * W, C)).reshape(N, D, C)
    cout_final = params["block3"]["last_w"].shape[0]
    return out[:, :, :cout_final]


# ----------------------------------------------------------------------------
# pure-JAX (unfused) reference, used only for the correctness check
# ----------------------------------------------------------------------------
def _ref_conv_spatial(x, w, k, stride, pad):
    N, D, H, W, Cin = x.shape
    xp = jnp.pad(x, ((0, 0), (0, 0), (pad, pad), (pad, pad), (0, 0)))
    Ho = (H + 2 * pad - k) // stride + 1
    Wo = (W + 2 * pad - k) // stride + 1
    cols = [xp[:, :, i:i + stride * Ho:stride, j:j + stride * Wo:stride, :]
            for i in range(k) for j in range(k)]
    A = jnp.concatenate(cols, -1).reshape(-1, k * k * Cin)
    B = jnp.transpose(w[:, :, 0], (2, 3, 1, 0)).reshape(k * k * Cin, -1)
    return (A @ B).reshape(N, D, Ho, Wo, -1)


def _ref_conv_temporal(x, w, k, pad):
    N, D, H, W, Cin = x.shape
    xp = jnp.pad(x, ((0, 0), (pad, pad), (0, 0), (0, 0), (0, 0)))
    cols = [xp[:, dt:dt + D] for dt in range(k)]
    A = jnp.concatenate(cols, -1).reshape(-1, k * Cin)
    B = jnp.transpose(w[:, :, :, 0, 0], (2, 1, 0)).reshape(k * Cin, -1)
    return (A @ B).reshape(N, D, H, W, -1)


def _ref_bn_relu(x, bn):
    return jnp.maximum(x * bn["scale"] + bn["bias"], 0.0)


def _ref_block(x, p, is_down):
    s = 2 if is_down else 1
    x3 = _ref_bn_relu(_ref_conv_spatial(x, p["s3_w"], 3, s, 1), p["bn_s3"])
    x3 = _ref_bn_relu(_ref_conv_temporal(x3, p["t3_w"], 3, 1), p["bn_t3"])
    x5 = _ref_bn_relu(_ref_conv_spatial(x, p["s5_w"], 5, s, 2), p["bn_s5"])
    x5 = _ref_bn_relu(_ref_conv_temporal(x5, p["t5_w"], 5, 2), p["bn_t5"])
    xs = x3 + x5
    wl = jnp.transpose(p["last_w"][:, :, 0, 0, 0], (1, 0))
    return _ref_bn_relu(jnp.einsum("ndhwc,co->ndhwo", xs, wl), p["bn_last"])


def visual_encoder_reference(x_ncdhw, params):
    x = jnp.transpose(x_ncdhw, (0, 2, 3, 4, 1))
    x = _ref_block(x, params["block1"], True)
    x = maxpool2d_3x3_s2_p1(x)
    x = _ref_block(x, params["block2"], False)
    x = maxpool2d_3x3_s2_p1(x)
    x = _ref_block(x, params["block3"], False)
    return jnp.max(x, axis=(2, 3))


# ----------------------------------------------------------------------------
# deterministic parameter init (mirrors __init_weight)
# ----------------------------------------------------------------------------
def kaiming_normal(key, shape):
    fan_in = shape[1] * shape[2] * shape[3] * shape[4]
    std = math.sqrt(2.0 / fan_in)
    return jax.random.normal(key, shape, jnp.float32) * std


def bn_affine(cout):
    # inference affine under default init: gamma=1, beta=0, mean=0, var=1
    scale = jnp.full((cout,), 1.0 / math.sqrt(1.0 + BN_EPS), jnp.float32)
    bias = jnp.zeros((cout,), jnp.float32)
    return {"scale": scale, "bias": bias}


def init_block_params(key, cin, cout):
    ks = jax.random.split(key, 5)
    return dict(
        s3_w=kaiming_normal(ks[0], (cout, cin, 1, 3, 3)),
        t3_w=kaiming_normal(ks[1], (cout, cout, 3, 1, 1)),
        s5_w=kaiming_normal(ks[2], (cout, cin, 1, 5, 5)),
        t5_w=kaiming_normal(ks[3], (cout, cout, 5, 1, 1)),
        last_w=kaiming_normal(ks[4], (cout, cout, 1, 1, 1)),
        bn_s3=bn_affine(cout), bn_t3=bn_affine(cout),
        bn_s5=bn_affine(cout), bn_t5=bn_affine(cout),
        bn_last=bn_affine(cout),
    )


def init_encoder_params(key):
    k1, k2, k3 = jax.random.split(key, 3)
    return dict(
        block1=init_block_params(k1, 1, 32),
        block2=init_block_params(k2, 32, 64),
        block3=init_block_params(k3, 64, 128),
    )


# ----------------------------------------------------------------------------
if __name__ == "__main__":
    key = jax.random.PRNGKey(0)
    pkey, xkey = jax.random.split(key)

    params = init_encoder_params(pkey)
    # Input: (N=2, C=1, D=4, H=16, W=16)  (NCDHW, as the PyTorch module expects)
    x = jax.random.normal(xkey, (2, 1, 4, 16, 16), jnp.float32)

    fwd = jax.jit(visual_encoder_forward)
    out = jax.block_until_ready(fwd(x, params))

    assert out.shape == (2, 4, 128), out.shape
    assert bool(jnp.all(jnp.isfinite(out)))

    # Correctness: compare the fused Pallas path against the unfused pure-JAX
    # reference of the original module (both in f32).
    ref = jax.block_until_ready(jax.jit(visual_encoder_reference)(x, params))
    err = float(jnp.max(jnp.abs(out - ref)))
    scale = 1.0 + float(jnp.max(jnp.abs(ref)))
    tol = (2e-3 if MATMUL_OPERAND_DTYPE == jnp.float32 else 5e-2) * scale
    assert err < tol, f"mismatch vs reference: max|diff|={err}, tol={tol}"

    print("KERNEL_OK")
</pallas_src>

<mosaic_0001>
module attributes {stable_mosaic.version = 11 : i64} {
  func.func @mm_bias_relu_kernel(%arg0: i32, %arg1: memref<256x32xf32, #tpu.memory_space<vmem>>, %arg2: memref<32x128xf32, #tpu.memory_space<vmem>>, %arg3: memref<1x128xf32, #tpu.memory_space<vmem>>, %arg4: memref<256x128xf32, #tpu.memory_space<vmem>>) attributes {dimension_semantics = [#tpu.dimension_semantics<parallel>], iteration_bounds = array<i64: 2>, scalar_prefetch = 0 : i64, scratch_operands = 0 : i64, tpu.core_type = #tpu.core_type<tc>, window_params = [{transform_indices = @transform_0, window_bounds = array<i64: 256, 32>}, {pipeline_mode = #tpu.pipeline_mode<synchronous>, transform_indices = @transform_1, window_bounds = array<i64: 32, 128>}, {pipeline_mode = #tpu.pipeline_mode<synchronous>, transform_indices = @transform_2, window_bounds = array<i64: 1, 128>}, {transform_indices = @transform_3, window_bounds = array<i64: 256, 128>}]} {
    %c0 = arith.constant 0 : index
    %c0_0 = arith.constant 0 : index
    %0 = vector.load %arg1[%c0, %c0_0] : memref<256x32xf32, #tpu.memory_space<vmem>>, vector<256x32xf32>
    %c0_1 = arith.constant 0 : index
    %c0_2 = arith.constant 0 : index
    %1 = vector.load %arg2[%c0_1, %c0_2] : memref<32x128xf32, #tpu.memory_space<vmem>>, vector<32x128xf32>
    %cst = arith.constant dense<0.000000e+00> : vector<256x128xf32>
    %2 = tpu.matmul %0, %1, %cst {dimension_numbers = #tpu.dot_dimension_numbers<[1], [0], [0], [1], [0, 0, 1, 1], [], []>} : vector<256x32xf32>, vector<32x128xf32>, vector<256x128xf32> -> vector<256x128xf32>
    %c0_3 = arith.constant 0 : index
    %c0_4 = arith.constant 0 : index
    %3 = vector.load %arg3[%c0_3, %c0_4] : memref<1x128xf32, #tpu.memory_space<vmem>>, vector<1x128xf32>
    %4 = vector.broadcast %3 : vector<1x128xf32> to vector<256x128xf32>
    %5 = arith.addf %2, %4 : vector<256x128xf32>
    %cst_5 = arith.constant 0.000000e+00 : f32
    %6 = vector.broadcast %cst_5 : f32 to vector<256x128xf32>
    %7 = arith.maximumf %5, %6 : vector<256x128xf32>
    %c0_6 = arith.constant 0 : index
    %c0_7 = arith.constant 0 : index
    %8 = vector.load %arg4[%c0_6, %c0_7] : memref<256x128xf32, #tpu.memory_space<vmem>>, vector<256x128xf32>
    tpu.vector_store %arg4[%c0_6, %c0_7], %7 {strides = array<i32>} : memref<256x128xf32, #tpu.memory_space<vmem>>, vector<256x128xf32>,
    return
  }
  func.func @transform_0(%arg0: i32) -> (i32, i32) {
    %c0_i32 = arith.constant 0 : i32
    %c0_i32_0 = arith.constant 0 : i32
    return %arg0, %c0_i32 : i32, i32
  }
  func.func @transform_1(%arg0: i32) -> (i32, i32) {
    %c0_i32 = arith.constant 0 : i32
    %c0_i32_0 = arith.constant 0 : i32
    %c0_i32_1 = arith.constant 0 : i32
    return %c0_i32, %c0_i32_0 : i32, i32
  }
  func.func @transform_2(%arg0: i32) -> (i32, i32) {
    %c0_i32 = arith.constant 0 : i32
    %c0_i32_0 = arith.constant 0 : i32
    %c0_i32_1 = arith.constant 0 : i32
    return %c0_i32, %c0_i32_0 : i32, i32
  }
  func.func @transform_3(%arg0: i32) -> (i32, i32) {
    %c0_i32 = arith.constant 0 : i32
    %c0_i32_0 = arith.constant 0 : i32
    return %arg0, %c0_i32 : i32, i32
  }
}

module attributes {stable_mosaic.version = 11 : i64} {
  func.func @temporal_conv_kernel(%arg0: i32, %arg1: memref<1x512x128xf32, #tpu.memory_space<vmem>>, %arg2: memref<640x128xf32, #tpu.memory_space<vmem>>, %arg3: memref<1x128xf32, #tpu.memory_space<vmem>>, %arg4: memref<1x256x128xf32, #tpu.memory_space<vmem>>) attributes {dimension_semantics = [#tpu.dimension_semantics<parallel>], iteration_bounds = array<i64: 2>, scalar_prefetch = 0 : i64, scratch_operands = 0 : i64, tpu.core_type = #tpu.core_type<tc>, window_params = [{transform_indices = @transform_0, window_bounds = array<i64: 1, 512, 128>}, {pipeline_mode = #tpu.pipeline_mode<synchronous>, transform_indices = @transform_1, window_bounds = array<i64: 640, 128>}, {pipeline_mode = #tpu.pipeline_mode<synchronous>, transform_indices = @transform_2, window_bounds = array<i64: 1, 128>}, {transform_indices = @transform_3, window_bounds = array<i64: 1, 256, 128>}]} {
    %c0 = arith.constant 0 : index
    %c0_0 = arith.constant 0 : index
    %c0_1 = arith.constant 0 : index
    %0 = vector.load %arg1[%c0, %c0_0, %c0_1] : memref<1x512x128xf32, #tpu.memory_space<vmem>>, vector<1x256x128xf32>
    %1 = vector.shape_cast %0 : vector<1x256x128xf32> to vector<256x128xf32>
    %c0_2 = arith.constant 0 : index
    %c0_3 = arith.constant 0 : index
    %2 = vector.load %arg2[%c0_2, %c0_3] : memref<640x128xf32, #tpu.memory_space<vmem>>, vector<128x128xf32>
    %cst = arith.constant dense<0.000000e+00> : vector<256x128xf32>
    %3 = tpu.matmul %1, %2, %cst {dimension_numbers = #tpu.dot_dimension_numbers<[1], [0], [0], [1], [0, 0, 1, 1], [], []>} : vector<256x128xf32>, vector<128x128xf32>, vector<256x128xf32> -> vector<256x128xf32>
    %c0_4 = arith.constant 0 : index
    %c64 = arith.constant 64 : index
    %c0_5 = arith.constant 0 : index
    %4 = vector.load %arg1[%c0_4, %c64, %c0_5] : memref<1x512x128xf32, #tpu.memory_space<vmem>>, vector<1x256x128xf32>
    %5 = vector.shape_cast %4 : vector<1x256x128xf32> to vector<256x128xf32>
    %c128 = arith.constant 128 : index
    %c0_6 = arith.constant 0 : index
    %6 = vector.load %arg2[%c128, %c0_6] : memref<640x128xf32, #tpu.memory_space<vmem>>, vector<128x128xf32>
    %cst_7 = arith.constant dense<0.000000e+00> : vector<256x128xf32>
    %7 = tpu.matmul %5, %6, %cst_7 {dimension_numbers = #tpu.dot_dimension_numbers<[1], [0], [0], [1], [0, 0, 1, 1], [], []>} : vector<256x128xf32>, vector<128x128xf32>, vector<256x128xf32> -> vector<256x128xf32>
    %8 = arith.addf %3, %7 : vector<256x128xf32>
    %c0_8 = arith.constant 0 : index
    %c128_9 = arith.constant 128 : index
    %c0_10 = arith.constant 0 : index
    %9 = vector.load %arg1[%c0_8, %c128_9, %c0_10] : memref<1x512x128xf32, #tpu.memory_space<vmem>>, vector<1x256x128xf32>
    %10 = vector.shape_cast %9 : vector<1x256x128xf32> to vector<256x128xf32>
    %c256 = arith.constant 256 : index
    %c0_11 = arith.constant 0 : index
    %11 = vector.load %arg2[%c256, %c0_11] : memref<640x128xf32, #tpu.memory_space<vmem>>, vector<128x128xf32>
    %cst_12 = arith.constant dense<0.000000e+00> : vector<256x128xf32>
    %12 = tpu.matmul %10, %11, %cst_12 {dimension_numbers = #tpu.dot_dimension_numbers<[1], [0], [0], [1], [0, 0, 1, 1], [], []>} : vector<256x128xf32>, vector<128x128xf32>, vector<256x128xf32> -> vector<256x128xf32>
    %13 = arith.addf %8, %12 : vector<256x128xf32>
    %c0_13 = arith.constant 0 : index
    %c192 = arith.constant 192 : index
    %c0_14 = arith.constant 0 : index
    %14 = vector.load %arg1[%c0_13, %c192, %c0_14] : memref<1x512x128xf32, #tpu.memory_space<vmem>>, vector<1x256x128xf32>
    %15 = vector.shape_cast %14 : vector<1x256x128xf32> to vector<256x128xf32>
    %c384 = arith.constant 384 : index
    %c0_15 = arith.constant 0 : index
    %16 = vector.load %arg2[%c384, %c0_15] : memref<640x128xf32, #tpu.memory_space<vmem>>, vector<128x128xf32>
    %cst_16 = arith.constant dense<0.000000e+00> : vector<256x128xf32>
    %17 = tpu.matmul %15, %16, %cst_16 {dimension_numbers = #tpu.dot_dimension_numbers<[1], [0], [0], [1], [0, 0, 1, 1], [], []>} : vector<256x128xf32>, vector<128x128xf32>, vector<256x128xf32> -> vector<256x128xf32>
    %18 = arith.addf %13, %17 : vector<256x128xf32>
    %c0_17 = arith.constant 0 : index
    %c256_18 = arith.constant 256 : index
    %c0_19 = arith.constant 0 : index
    %19 = vector.load %arg1[%c0_17, %c256_18, %c0_19] : memref<1x512x128xf32, #tpu.memory_space<vmem>>, vector<1x256x128xf32>
    %20 = vector.shape_cast %19 : vector<1x256x128xf32> to vector<256x128xf32>
    %c512 = arith.constant 512 : index
    %c0_20 = arith.constant 0 : index
    %21 = vector.load %arg2[%c512, %c0_20] : memref<640x128xf32, #tpu.memory_space<vmem>>, vector<128x128xf32>
    %cst_21 = arith.constant dense<0.000000e+00> : vector<256x128xf32>
    %22 = tpu.matmul %20, %21, %cst_21 {dimension_numbers = #tpu.dot_dimension_numbers<[1], [0], [0], [1], [0, 0, 1, 1], [], []>} : vector<256x128xf32>, vector<128x128xf32>, vector<256x128xf32> -> vector<256x128xf32>
    %23 = arith.addf %18, %22 : vector<256x128xf32>
    %c0_22 = arith.constant 0 : index
    %c0_23 = arith.constant 0 : index
    %24 = vector.load %arg3[%c0_22, %c0_23] : memref<1x128xf32, #tpu.memory_space<vmem>>, vector<1x128xf32>
    %25 = vector.broadcast %24 : vector<1x128xf32> to vector<256x128xf32>
    %26 = arith.addf %23, %25 : vector<256x128xf32>
    %cst_24 = arith.constant 0.000000e+00 : f32
    %27 = vector.broadcast %cst_24 : f32 to vector<256x128xf32>
    %28 = arith.maximumf %26, %27 : vector<256x128xf32>
    %c0_25 = arith.constant 0 : index
    %c0_26 = arith.constant 0 : index
    %c0_27 = arith.constant 0 : index
    %29 = vector.load %arg4[%c0_25, %c0_26, %c0_27] : memref<1x256x128xf32, #tpu.memory_space<vmem>>, vector<1x256x128xf32>
    %30 = vector.shape_cast %29 : vector<1x256x128xf32> to vector<256x128xf32>
    %31 = vector.shape_cast %28 : vector<256x128xf32> to vector<1x256x128xf32>
    tpu.vector_store %arg4[%c0_25, %c0_26, %c0_27], %31 {strides = array<i32>} : memref<1x256x128xf32, #tpu.memory_space<vmem>>, vector<1x256x128xf32>,
    return
  }
  func.func @transform_0(%arg0: i32) -> (i32, i32, i32) {
    %c0_i32 = arith.constant 0 : i32
    %c0_i32_0 = arith.constant 0 : i32
    %c0_i32_1 = arith.constant 0 : i32
    return %arg0, %c0_i32, %c0_i32_0 : i32, i32, i32
  }
  func.func @transform_1(%arg0: i32) -> (i32, i32) {
    %c0_i32 = arith.constant 0 : i32
    %c0_i32_0 = arith.constant 0 : i32
    %c0_i32_1 = arith.constant 0 : i32
    return %c0_i32, %c0_i32_0 : i32, i32
  }
  func.func @transform_2(%arg0: i32) -> (i32, i32) {
    %c0_i32 = arith.constant 0 : i32
    %c0_i32_0 = arith.constant 0 : i32
    %c0_i32_1 = arith.constant 0 : i32
    return %c0_i32, %c0_i32_0 : i32, i32
  }
  func.func @transform_3(%arg0: i32) -> (i32, i32, i32) {
    %c0_i32 = arith.constant 0 : i32
    %c0_i32_0 = arith.constant 0 : i32
    %c0_i32_1 = arith.constant 0 : i32
    return %arg0, %c0_i32, %c0_i32_0 : i32, i32, i32
  }
}

module attributes {stable_mosaic.version = 11 : i64} {
  func.func @mm_bias_relu_kernel(%arg0: i32, %arg1: memref<256x128xf32, #tpu.memory_space<vmem>>, %arg2: memref<128x128xf32, #tpu.memory_space<vmem>>, %arg3: memref<1x128xf32, #tpu.memory_space<vmem>>, %arg4: memref<256x128xf32, #tpu.memory_space<vmem>>) attributes {dimension_semantics = [#tpu.dimension_semantics<parallel>], iteration_bounds = array<i64: 2>, scalar_prefetch = 0 : i64, scratch_operands = 0 : i64, tpu.core_type = #tpu.core_type<tc>, window_params = [{transform_indices = @transform_0, window_bounds = array<i64: 256, 128>}, {pipeline_mode = #tpu.pipeline_mode<synchronous>, transform_indices = @transform_1, window_bounds = array<i64: 128, 128>}, {pipeline_mode = #tpu.pipeline_mode<synchronous>, transform_indices = @transform_2, window_bounds = array<i64: 1, 128>}, {transform_indices = @transform_3, window_bounds = array<i64: 256, 128>}]} {
    %c0 = arith.constant 0 : index
    %c0_0 = arith.constant 0 : index
    %0 = vector.load %arg1[%c0, %c0_0] : memref<256x128xf32, #tpu.memory_space<vmem>>, vector<256x128xf32>
    %c0_1 = arith.constant 0 : index
    %c0_2 = arith.constant 0 : index
    %1 = vector.load %arg2[%c0_1, %c0_2] : memref<128x128xf32, #tpu.memory_space<vmem>>, vector<128x128xf32>
    %cst = arith.constant dense<0.000000e+00> : vector<256x128xf32>
    %2 = tpu.matmul %0, %1, %cst {dimension_numbers = #tpu.dot_dimension_numbers<[1], [0], [0], [1], [0, 0, 1, 1], [], []>} : vector<256x128xf32>, vector<128x128xf32>, vector<256x128xf32> -> vector<256x128xf32>
    %c0_3 = arith.constant 0 : index
    %c0_4 = arith.constant 0 : index
    %3 = vector.load %arg3[%c0_3, %c0_4] : memref<1x128xf32, #tpu.memory_space<vmem>>, vector<1x128xf32>
    %4 = vector.broadcast %3 : vector<1x128xf32> to vector<256x128xf32>
    %5 = arith.addf %2, %4 : vector<256x128xf32>
    %cst_5 = arith.constant 0.000000e+00 : f32
    %6 = vector.broadcast %cst_5 : f32 to vector<256x128xf32>
    %7 = arith.maximumf %5, %6 : vector<256x128xf32>
    %c0_6 = arith.constant 0 : index
    %c0_7 = arith.constant 0 : index
    %8 = vector.load %arg4[%c0_6, %c0_7] : memref<256x128xf32, #tpu.memory_space<vmem>>, vector<256x128xf32>
    tpu.vector_store %arg4[%c0_6, %c0_7], %7 {strides = array<i32>} : memref<256x128xf32, #tpu.memory_space<vmem>>, vector<256x128xf32>,
    return
  }
  func.func @transform_0(%arg0: i32) -> (i32, i32) {
    %c0_i32 = arith.constant 0 : i32
    %c0_i32_0 = arith.constant 0 : i32
    return %arg0, %c0_i32 : i32, i32
  }
  func.func @transform_1(%arg0: i32) -> (i32, i32) {
    %c0_i32 = arith.constant 0 : i32
    %c0_i32_0 = arith.constant 0 : i32
    %c0_i32_1 = arith.constant 0 : i32
    return %c0_i32, %c0_i32_0 : i32, i32
  }
  func.func @transform_2(%arg0: i32) -> (i32, i32) {
    %c0_i32 = arith.constant 0 : i32
    %c0_i32_0 = arith.constant 0 : i32
    %c0_i32_1 = arith.constant 0 : i32
    return %c0_i32, %c0_i32_0 : i32, i32
  }
  func.func @transform_3(%arg0: i32) -> (i32, i32) {
    %c0_i32 = arith.constant 0 : i32
    %c0_i32_0 = arith.constant 0 : i32
    return %arg0, %c0_i32 : i32, i32
  }
}

module attributes {stable_mosaic.version = 11 : i64} {
  func.func @mm_bias_relu_kernel(%arg0: i32, %arg1: memref<64x3200xf32, #tpu.memory_space<vmem>>, %arg2: memref<3200x128xf32, #tpu.memory_space<vmem>>, %arg3: memref<1x128xf32, #tpu.memory_space<vmem>>, %arg4: memref<64x128xf32, #tpu.memory_space<vmem>>) attributes {dimension_semantics = [#tpu.dimension_semantics<parallel>], iteration_bounds = array<i64: 2>, scalar_prefetch = 0 : i64, scratch_operands = 0 : i64, tpu.core_type = #tpu.core_type<tc>, window_params = [{transform_indices = @transform_0, window_bounds = array<i64: 64, 3200>}, {pipeline_mode = #tpu.pipeline_mode<synchronous>, transform_indices = @transform_1, window_bounds = array<i64: 3200, 128>}, {pipeline_mode = #tpu.pipeline_mode<synchronous>, transform_indices = @transform_2, window_bounds = array<i64: 1, 128>}, {transform_indices = @transform_3, window_bounds = array<i64: 64, 128>}]} {
    %c0 = arith.constant 0 : index
    %c0_0 = arith.constant 0 : index
    %0 = vector.load %arg1[%c0, %c0_0] : memref<64x3200xf32, #tpu.memory_space<vmem>>, vector<64x3200xf32>
    %c0_1 = arith.constant 0 : index
    %c0_2 = arith.constant 0 : index
    %1 = vector.load %arg2[%c0_1, %c0_2] : memref<3200x128xf32, #tpu.memory_space<vmem>>, vector<3200x128xf32>
    %cst = arith.constant dense<0.000000e+00> : vector<64x128xf32>
    %2 = tpu.matmul %0, %1, %cst {dimension_numbers = #tpu.dot_dimension_numbers<[1], [0], [0], [1], [0, 0, 1, 1], [], []>} : vector<64x3200xf32>, vector<3200x128xf32>, vector<64x128xf32> -> vector<64x128xf32>
    %c0_3 = arith.constant 0 : index
    %c0_4 = arith.constant 0 : index
    %3 = vector.load %arg3[%c0_3, %c0_4] : memref<1x128xf32, #tpu.memory_space<vmem>>, vector<1x128xf32>
    %4 = vector.broadcast %3 : vector<1x128xf32> to vector<64x128xf32>
    %5 = arith.addf %2, %4 : vector<64x128xf32>
    %cst_5 = arith.constant 0.000000e+00 : f32
    %6 = vector.broadcast %cst_5 : f32 to vector<64x128xf32>
    %7 = arith.maximumf %5, %6 : vector<64x128xf32>
    %c0_6 = arith.constant 0 : index
    %c0_7 = arith.constant 0 : index
    %8 = vector.load %arg4[%c0_6, %c0_7] : memref<64x128xf32, #tpu.memory_space<vmem>>, vector<64x128xf32>
    tpu.vector_store %arg4[%c0_6, %c0_7], %7 {strides = array<i32>} : memref<64x128xf32, #tpu.memory_space<vmem>>, vector<64x128xf32>,
    return
  }
  func.func @transform_0(%arg0: i32) -> (i32, i32) {
    %c0_i32 = arith.constant 0 : i32
    %c0_i32_0 = arith.constant 0 : i32
    return %arg0, %c0_i32 : i32, i32
  }
  func.func @transform_1(%arg0: i32) -> (i32, i32) {
    %c0_i32 = arith.constant 0 : i32
    %c0_i32_0 = arith.constant 0 : i32
    %c0_i32_1 = arith.constant 0 : i32
    return %c0_i32, %c0_i32_0 : i32, i32
  }
  func.func @transform_2(%arg0: i32) -> (i32, i32) {
    %c0_i32 = arith.constant 0 : i32
    %c0_i32_0 = arith.constant 0 : i32
    %c0_i32_1 = arith.constant 0 : i32
    return %c0_i32, %c0_i32_0 : i32, i32
  }
  func.func @transform_3(%arg0: i32) -> (i32, i32) {
    %c0_i32 = arith.constant 0 : i32
    %c0_i32_0 = arith.constant 0 : i32
    return %arg0, %c0_i32 : i32, i32
  }
}

module attributes {stable_mosaic.version = 11 : i64} {
  func.func @temporal_conv_kernel(%arg0: i32, %arg1: memref<1x128x128xf32, #tpu.memory_space<vmem>>, %arg2: memref<640x128xf32, #tpu.memory_space<vmem>>, %arg3: memref<1x128xf32, #tpu.memory_space<vmem>>, %arg4: memref<1x64x128xf32, #tpu.memory_space<vmem>>) attributes {dimension_semantics = [#tpu.dimension_semantics<parallel>], iteration_bounds = array<i64: 2>, scalar_prefetch = 0 : i64, scratch_operands = 0 : i64, tpu.core_type = #tpu.core_type<tc>, window_params = [{transform_indices = @transform_0, window_bounds = array<i64: 1, 128, 128>}, {pipeline_mode = #tpu.pipeline_mode<synchronous>, transform_indices = @transform_1, window_bounds = array<i64: 640, 128>}, {pipeline_mode = #tpu.pipeline_mode<synchronous>, transform_indices = @transform_2, window_bounds = array<i64: 1, 128>}, {transform_indices = @transform_3, window_bounds = array<i64: 1, 64, 128>}]} {
    %c0 = arith.constant 0 : index
    %c0_0 = arith.constant 0 : index
    %c0_1 = arith.constant 0 : index
    %0 = vector.load %arg1[%c0, %c0_0, %c0_1] : memref<1x128x128xf32, #tpu.memory_space<vmem>>, vector<1x64x128xf32>
    %1 = vector.shape_cast %0 : vector<1x64x128xf32> to vector<64x128xf32>
    %c0_2 = arith.constant 0 : index
    %c0_3 = arith.constant 0 : index
    %2 = vector.load %arg2[%c0_2, %c0_3] : memref<640x128xf32, #tpu.memory_space<vmem>>, vector<128x128xf32>
    %cst = arith.constant dense<0.000000e+00> : vector<64x128xf32>
    %3 = tpu.matmul %1, %2, %cst {dimension_numbers = #tpu.dot_dimension_numbers<[1], [0], [0], [1], [0, 0, 1, 1], [], []>} : vector<64x128xf32>, vector<128x128xf32>, vector<64x128xf32> -> vector<64x128xf32>
    %c0_4 = arith.constant 0 : index
    %c16 = arith.constant 16 : index
    %c0_5 = arith.constant 0 : index
    %4 = vector.load %arg1[%c0_4, %c16, %c0_5] : memref<1x128x128xf32, #tpu.memory_space<vmem>>, vector<1x64x128xf32>
    %5 = vector.shape_cast %4 : vector<1x64x128xf32> to vector<64x128xf32>
    %c128 = arith.constant 128 : index
    %c0_6 = arith.constant 0 : index
    %6 = vector.load %arg2[%c128, %c0_6] : memref<640x128xf32, #tpu.memory_space<vmem>>, vector<128x128xf32>
    %cst_7 = arith.constant dense<0.000000e+00> : vector<64x128xf32>
    %7 = tpu.matmul %5, %6, %cst_7 {dimension_numbers = #tpu.dot_dimension_numbers<[1], [0], [0], [1], [0, 0, 1, 1], [], []>} : vector<64x128xf32>, vector<128x128xf32>, vector<64x128xf32> -> vector<64x128xf32>
    %8 = arith.addf %3, %7 : vector<64x128xf32>
    %c0_8 = arith.constant 0 : index
    %c32 = arith.constant 32 : index
    %c0_9 = arith.constant 0 : index
    %9 = vector.load %arg1[%c0_8, %c32, %c0_9] : memref<1x128x128xf32, #tpu.memory_space<vmem>>, vector<1x64x128xf32>
    %10 = vector.shape_cast %9 : vector<1x64x128xf32> to vector<64x128xf32>
    %c256 = arith.constant 256 : index
    %c0_10 = arith.constant 0 : index
    %11 = vector.load %arg2[%c256, %c0_10] : memref<640x128xf32, #tpu.memory_space<vmem>>, vector<128x128xf32>
    %cst_11 = arith.constant dense<0.000000e+00> : vector<64x128xf32>
    %12 = tpu.matmul %10, %11, %cst_11 {dimension_numbers = #tpu.dot_dimension_numbers<[1], [0], [0], [1], [0, 0, 1, 1], [], []>} : vector<64x128xf32>, vector<128x128xf32>, vector<64x128xf32> -> vector<64x128xf32>
    %13 = arith.addf %8, %12 : vector<64x128xf32>
    %c0_12 = arith.constant 0 : index
    %c48 = arith.constant 48 : index
    %c0_13 = arith.constant 0 : index
    %14 = vector.load %arg1[%c0_12, %c48, %c0_13] : memref<1x128x128xf32, #tpu.memory_space<vmem>>, vector<1x64x128xf32>
    %15 = vector.shape_cast %14 : vector<1x64x128xf32> to vector<64x128xf32>
    %c384 = arith.constant 384 : index
    %c0_14 = arith.constant 0 : index
    %16 = vector.load %arg2[%c384, %c0_14] : memref<640x128xf32, #tpu.memory_space<vmem>>, vector<128x128xf32>
    %cst_15 = arith.constant dense<0.000000e+00> : vector<64x128xf32>
    %17 = tpu.matmul %15, %16, %cst_15 {dimension_numbers = #tpu.dot_dimension_numbers<[1], [0], [0], [1], [0, 0, 1, 1], [], []>} : vector<64x128xf32>, vector<128x128xf32>, vector<64x128xf32> -> vector<64x128xf32>
    %18 = arith.addf %13, %17 : vector<64x128xf32>
    %c0_16 = arith.constant 0 : index
    %c64 = arith.constant 64 : index
    %c0_17 = arith.constant 0 : index
    %19 = vector.load %arg1[%c0_16, %c64, %c0_17] : memref<1x128x128xf32, #tpu.memory_space<vmem>>, vector<1x64x128xf32>
    %20 = vector.shape_cast %19 : vector<1x64x128xf32> to vector<64x128xf32>
    %c512 = arith.constant 512 : index
    %c0_18 = arith.constant 0 : index
    %21 = vector.load %arg2[%c512, %c0_18] : memref<640x128xf32, #tpu.memory_space<vmem>>, vector<128x128xf32>
    %cst_19 = arith.constant dense<0.000000e+00> : vector<64x128xf32>
    %22 = tpu.matmul %20, %21, %cst_19 {dimension_numbers = #tpu.dot_dimension_numbers<[1], [0], [0], [1], [0, 0, 1, 1], [], []>} : vector<64x128xf32>, vector<128x128xf32>, vector<64x128xf32> -> vector<64x128xf32>
    %23 = arith.addf %18, %22 : vector<64x128xf32>
    %c0_20 = arith.constant 0 : index
    %c0_21 = arith.constant 0 : index
    %24 = vector.load %arg3[%c0_20, %c0_21] : memref<1x128xf32, #tpu.memory_space<vmem>>, vector<1x128xf32>
    %25 = vector.broadcast %24 : vector<1x128xf32> to vector<64x128xf32>
    %26 = arith.addf %23, %25 : vector<64x128xf32>
    %cst_22 = arith.constant 0.000000e+00 : f32
    %27 = vector.broadcast %cst_22 : f32 to vector<64x128xf32>
    %28 = arith.maximumf %26, %27 : vector<64x128xf32>
    %c0_23 = arith.constant 0 : index
    %c0_24 = arith.constant 0 : index
    %c0_25 = arith.constant 0 : index
    %29 = vector.load %arg4[%c0_23, %c0_24, %c0_25] : memref<1x64x128xf32, #tpu.memory_space<vmem>>, vector<1x64x128xf32>
    %30 = vector.shape_cast %29 : vector<1x64x128xf32> to vector<64x128xf32>
    %31 = vector.shape_cast %28 : vector<64x128xf32> to vector<1x64x128xf32>
    tpu.vector_store %arg4[%c0_23, %c0_24, %c0_25], %31 {strides = array<i32>} : memref<1x64x128xf32, #tpu.memory_space<vmem>>, vector<1x64x128xf32>,
    return
  }
  func.func @transform_0(%arg0: i32) -> (i32, i32, i32) {
    %c0_i32 = arith.constant 0 : i32
    %c0_i32_0 = arith.constant 0 : i32
    %c0_i32_1 = arith.constant 0 : i32
    return %arg0, %c0_i32, %c0_i32_0 : i32, i32, i32
  }
  func.func @transform_1(%arg0: i32) -> (i32, i32) {
    %c0_i32 = arith.constant 0 : i32
    %c0_i32_0 = arith.constant 0 : i32
    %c0_i32_1 = arith.constant 0 : i32
    return %c0_i32, %c0_i32_0 : i32, i32
  }
  func.func @transform_2(%arg0: i32) -> (i32, i32) {
    %c0_i32 = arith.constant 0 : i32
    %c0_i32_0 = arith.constant 0 : i32
    %c0_i32_1 = arith.constant 0 : i32
    return %c0_i32, %c0_i32_0 : i32, i32
  }
  func.func @transform_3(%arg0: i32) -> (i32, i32, i32) {
    %c0_i32 = arith.constant 0 : i32
    %c0_i32_0 = arith.constant 0 : i32
    %c0_i32_1 = arith.constant 0 : i32
    return %arg0, %c0_i32, %c0_i32_0 : i32, i32, i32
  }
}

module attributes {stable_mosaic.version = 11 : i64} {
  func.func @mm_bias_relu_kernel(%arg0: i32, %arg1: memref<64x128xf32, #tpu.memory_space<vmem>>, %arg2: memref<128x128xf32, #tpu.memory_space<vmem>>, %arg3: memref<1x128xf32, #tpu.memory_space<vmem>>, %arg4: memref<64x128xf32, #tpu.memory_space<vmem>>) attributes {dimension_semantics = [#tpu.dimension_semantics<parallel>], iteration_bounds = array<i64: 2>, scalar_prefetch = 0 : i64, scratch_operands = 0 : i64, tpu.core_type = #tpu.core_type<tc>, window_params = [{transform_indices = @transform_0, window_bounds = array<i64: 64, 128>}, {pipeline_mode = #tpu.pipeline_mode<synchronous>, transform_indices = @transform_1, window_bounds = array<i64: 128, 128>}, {pipeline_mode = #tpu.pipeline_mode<synchronous>, transform_indices = @transform_2, window_bounds = array<i64: 1, 128>}, {transform_indices = @transform_3, window_bounds = array<i64: 64, 128>}]} {
    %c0 = arith.constant 0 : index
    %c0_0 = arith.constant 0 : index
    %0 = vector.load %arg1[%c0, %c0_0] : memref<64x128xf32, #tpu.memory_space<vmem>>, vector<64x128xf32>
    %c0_1 = arith.constant 0 : index
    %c0_2 = arith.constant 0 : index
    %1 = vector.load %arg2[%c0_1, %c0_2] : memref<128x128xf32, #tpu.memory_space<vmem>>, vector<128x128xf32>
    %cst = arith.constant dense<0.000000e+00> : vector<64x128xf32>
    %2 = tpu.matmul %0, %1, %cst {dimension_numbers = #tpu.dot_dimension_numbers<[1], [0], [0], [1], [0, 0, 1, 1], [], []>} : vector<64x128xf32>, vector<128x128xf32>, vector<64x128xf32> -> vector<64x128xf32>
    %c0_3 = arith.constant 0 : index
    %c0_4 = arith.constant 0 : index
    %3 = vector.load %arg3[%c0_3, %c0_4] : memref<1x128xf32, #tpu.memory_space<vmem>>, vector<1x128xf32>
    %4 = vector.broadcast %3 : vector<1x128xf32> to vector<64x128xf32>
    %5 = arith.addf %2, %4 : vector<64x128xf32>
    %cst_5 = arith.constant 0.000000e+00 : f32
    %6 = vector.broadcast %cst_5 : f32 to vector<64x128xf32>
    %7 = arith.maximumf %5, %6 : vector<64x128xf32>
    %c0_6 = arith.constant 0 : index
    %c0_7 = arith.constant 0 : index
    %8 = vector.load %arg4[%c0_6, %c0_7] : memref<64x128xf32, #tpu.memory_space<vmem>>, vector<64x128xf32>
    tpu.vector_store %arg4[%c0_6, %c0_7], %7 {strides = array<i32>} : memref<64x128xf32, #tpu.memory_space<vmem>>, vector<64x128xf32>,
    return
  }
  func.func @transform_0(%arg0: i32) -> (i32, i32) {
    %c0_i32 = arith.constant 0 : i32
    %c0_i32_0 = arith.constant 0 : i32
    return %arg0, %c0_i32 : i32, i32
  }
  func.func @transform_1(%arg0: i32) -> (i32, i32) {
    %c0_i32 = arith.constant 0 : i32
    %c0_i32_0 = arith.constant 0 : i32
    %c0_i32_1 = arith.constant 0 : i32
    return %c0_i32, %c0_i32_0 : i32, i32
  }
  func.func @transform_2(%arg0: i32) -> (i32, i32) {
    %c0_i32 = arith.constant 0 : i32
    %c0_i32_0 = arith.constant 0 : i32
    %c0_i32_1 = arith.constant 0 : i32
    return %c0_i32, %c0_i32_0 : i32, i32
  }
  func.func @transform_3(%arg0: i32) -> (i32, i32) {
    %c0_i32 = arith.constant 0 : i32
    %c0_i32_0 = arith.constant 0 : i32
    return %arg0, %c0_i32 : i32, i32
  }
}

module attributes {stable_mosaic.version = 11 : i64} {
  func.func @mm_bias_relu_kernel(%arg0: i32, %arg1: memref<16x3200xf32, #tpu.memory_space<vmem>>, %arg2: memref<3200x256xf32, #tpu.memory_space<vmem>>, %arg3: memref<1x256xf32, #tpu.memory_space<vmem>>, %arg4: memref<16x256xf32, #tpu.memory_space<vmem>>) attributes {dimension_semantics = [#tpu.dimension_semantics<parallel>], iteration_bounds = array<i64: 2>, scalar_prefetch = 0 : i64, scratch_operands = 0 : i64, tpu.core_type = #tpu.core_type<tc>, window_params = [{transform_indices = @transform_0, window_bounds = array<i64: 16, 3200>}, {pipeline_mode = #tpu.pipeline_mode<synchronous>, transform_indices = @transform_1, window_bounds = array<i64: 3200, 256>}, {pipeline_mode = #tpu.pipeline_mode<synchronous>, transform_indices = @transform_2, window_bounds = array<i64: 1, 256>}, {transform_indices = @transform_3, window_bounds = array<i64: 16, 256>}]} {
    %c0 = arith.constant 0 : index
    %c0_0 = arith.constant 0 : index
    %0 = vector.load %arg1[%c0, %c0_0] : memref<16x3200xf32, #tpu.memory_space<vmem>>, vector<16x3200xf32>
    %c0_1 = arith.constant 0 : index
    %c0_2 = arith.constant 0 : index
    %1 = vector.load %arg2[%c0_1, %c0_2] : memref<3200x256xf32, #tpu.memory_space<vmem>>, vector<3200x256xf32>
    %cst = arith.constant dense<0.000000e+00> : vector<16x256xf32>
    %2 = tpu.matmul %0, %1, %cst {dimension_numbers = #tpu.dot_dimension_numbers<[1], [0], [0], [1], [0, 0, 1, 1], [], []>} : vector<16x3200xf32>, vector<3200x256xf32>, vector<16x256xf32> -> vector<16x256xf32>
    %c0_3 = arith.constant 0 : index
    %c0_4 = arith.constant 0 : index
    %3 = vector.load %arg3[%c0_3, %c0_4] : memref<1x256xf32, #tpu.memory_space<vmem>>, vector<1x256xf32>
    %4 = vector.broadcast %3 : vector<1x256xf32> to vector<16x256xf32>
    %5 = arith.addf %2, %4 : vector<16x256xf32>
    %cst_5 = arith.constant 0.000000e+00 : f32
    %6 = vector.broadcast %cst_5 : f32 to vector<16x256xf32>
    %7 = arith.maximumf %5, %6 : vector<16x256xf32>
    %c0_6 = arith.constant 0 : index
    %c0_7 = arith.constant 0 : index
    %8 = vector.load %arg4[%c0_6, %c0_7] : memref<16x256xf32, #tpu.memory_space<vmem>>, vector<16x256xf32>
    tpu.vector_store %arg4[%c0_6, %c0_7], %7 {strides = array<i32>} : memref<16x256xf32, #tpu.memory_space<vmem>>, vector<16x256xf32>,
    return
  }
  func.func @transform_0(%arg0: i32) -> (i32, i32) {
    %c0_i32 = arith.constant 0 : i32
    %c0_i32_0 = arith.constant 0 : i32
    return %arg0, %c0_i32 : i32, i32
  }
  func.func @transform_1(%arg0: i32) -> (i32, i32) {
    %c0_i32 = arith.constant 0 : i32
    %c0_i32_0 = arith.constant 0 : i32
    %c0_i32_1 = arith.constant 0 : i32
    return %c0_i32, %c0_i32_0 : i32, i32
  }
  func.func @transform_2(%arg0: i32) -> (i32, i32) {
    %c0_i32 = arith.constant 0 : i32
    %c0_i32_0 = arith.constant 0 : i32
    %c0_i32_1 = arith.constant 0 : i32
    return %c0_i32, %c0_i32_0 : i32, i32
  }
  func.func @transform_3(%arg0: i32) -> (i32, i32) {
    %c0_i32 = arith.constant 0 : i32
    %c0_i32_0 = arith.constant 0 : i32
    return %arg0, %c0_i32 : i32, i32
  }
}

module attributes {stable_mosaic.version = 11 : i64} {
  func.func @temporal_conv_kernel(%arg0: i32, %arg1: memref<1x32x256xf32, #tpu.memory_space<vmem>>, %arg2: memref<1280x256xf32, #tpu.memory_space<vmem>>, %arg3: memref<1x256xf32, #tpu.memory_space<vmem>>, %arg4: memref<1x16x256xf32, #tpu.memory_space<vmem>>) attributes {dimension_semantics = [#tpu.dimension_semantics<parallel>], iteration_bounds = array<i64: 2>, scalar_prefetch = 0 : i64, scratch_operands = 0 : i64, tpu.core_type = #tpu.core_type<tc>, window_params = [{transform_indices = @transform_0, window_bounds = array<i64: 1, 32, 256>}, {pipeline_mode = #tpu.pipeline_mode<synchronous>, transform_indices = @transform_1, window_bounds = array<i64: 1280, 256>}, {pipeline_mode = #tpu.pipeline_mode<synchronous>, transform_indices = @transform_2, window_bounds = array<i64: 1, 256>}, {transform_indices = @transform_3, window_bounds = array<i64: 1, 16, 256>}]} {
    %c0 = arith.constant 0 : index
    %c0_0 = arith.constant 0 : index
    %c0_1 = arith.constant 0 : index
    %0 = vector.load %arg1[%c0, %c0_0, %c0_1] : memref<1x32x256xf32, #tpu.memory_space<vmem>>, vector<1x16x256xf32>
    %1 = vector.shape_cast %0 : vector<1x16x256xf32> to vector<16x256xf32>
    %c0_2 = arith.constant 0 : index
    %c0_3 = arith.constant 0 : index
    %2 = vector.load %arg2[%c0_2, %c0_3] : memref<1280x256xf32, #tpu.memory_space<vmem>>, vector<256x256xf32>
    %cst = arith.constant dense<0.000000e+00> : vector<16x256xf32>
    %3 = tpu.matmul %1, %2, %cst {dimension_numbers = #tpu.dot_dimension_numbers<[1], [0], [0], [1], [0, 0, 1, 1], [], []>} : vector<16x256xf32>, vector<256x256xf32>, vector<16x256xf32> -> vector<16x256xf32>
    %c0_4 = arith.constant 0 : index
    %c4 = arith.constant 4 : index
    %c0_5 = arith.constant 0 : index
    %4 = vector.load %arg1[%c0_4, %c4, %c0_5] : memref<1x32x256xf32, #tpu.memory_space<vmem>>, vector<1x16x256xf32>
    %5 = vector.shape_cast %4 : vector<1x16x256xf32> to vector<16x256xf32>
    %c256 = arith.constant 256 : index
    %c0_6 = arith.constant 0 : index
    %6 = vector.load %arg2[%c256, %c0_6] : memref<1280x256xf32, #tpu.memory_space<vmem>>, vector<256x256xf32>
    %cst_7 = arith.constant dense<0.000000e+00> : vector<16x256xf32>
    %7 = tpu.matmul %5, %6, %cst_7 {dimension_numbers = #tpu.dot_dimension_numbers<[1], [0], [0], [1], [0, 0, 1, 1], [], []>} : vector<16x256xf32>, vector<256x256xf32>, vector<16x256xf32> -> vector<16x256xf32>
    %8 = arith.addf %3, %7 : vector<16x256xf32>
    %c0_8 = arith.constant 0 : index
    %c8 = arith.constant 8 : index
    %c0_9 = arith.constant 0 : index
    %9 = vector.load %arg1[%c0_8, %c8, %c0_9] : memref<1x32x256xf32, #tpu.memory_space<vmem>>, vector<1x16x256xf32>
    %10 = vector.shape_cast %9 : vector<1x16x256xf32> to vector<16x256xf32>
    %c512 = arith.constant 512 : index
    %c0_10 = arith.constant 0 : index
    %11 = vector.load %arg2[%c512, %c0_10] : memref<1280x256xf32, #tpu.memory_space<vmem>>, vector<256x256xf32>
    %cst_11 = arith.constant dense<0.000000e+00> : vector<16x256xf32>
    %12 = tpu.matmul %10, %11, %cst_11 {dimension_numbers = #tpu.dot_dimension_numbers<[1], [0], [0], [1], [0, 0, 1, 1], [], []>} : vector<16x256xf32>, vector<256x256xf32>, vector<16x256xf32> -> vector<16x256xf32>
    %13 = arith.addf %8, %12 : vector<16x256xf32>
    %c0_12 = arith.constant 0 : index
    %c12 = arith.constant 12 : index
    %c0_13 = arith.constant 0 : index
    %14 = vector.load %arg1[%c0_12, %c12, %c0_13] : memref<1x32x256xf32, #tpu.memory_space<vmem>>, vector<1x16x256xf32>
    %15 = vector.shape_cast %14 : vector<1x16x256xf32> to vector<16x256xf32>
    %c768 = arith.constant 768 : index
    %c0_14 = arith.constant 0 : index
    %16 = vector.load %arg2[%c768, %c0_14] : memref<1280x256xf32, #tpu.memory_space<vmem>>, vector<256x256xf32>
    %cst_15 = arith.constant dense<0.000000e+00> : vector<16x256xf32>
    %17 = tpu.matmul %15, %16, %cst_15 {dimension_numbers = #tpu.dot_dimension_numbers<[1], [0], [0], [1], [0, 0, 1, 1], [], []>} : vector<16x256xf32>, vector<256x256xf32>, vector<16x256xf32> -> vector<16x256xf32>
    %18 = arith.addf %13, %17 : vector<16x256xf32>
    %c0_16 = arith.constant 0 : index
    %c16 = arith.constant 16 : index
    %c0_17 = arith.constant 0 : index
    %19 = vector.load %arg1[%c0_16, %c16, %c0_17] : memref<1x32x256xf32, #tpu.memory_space<vmem>>, vector<1x16x256xf32>
    %20 = vector.shape_cast %19 : vector<1x16x256xf32> to vector<16x256xf32>
    %c1024 = arith.constant 1024 : index
    %c0_18 = arith.constant 0 : index
    %21 = vector.load %arg2[%c1024, %c0_18] : memref<1280x256xf32, #tpu.memory_space<vmem>>, vector<256x256xf32>
    %cst_19 = arith.constant dense<0.000000e+00> : vector<16x256xf32>
    %22 = tpu.matmul %20, %21, %cst_19 {dimension_numbers = #tpu.dot_dimension_numbers<[1], [0], [0], [1], [0, 0, 1, 1], [], []>} : vector<16x256xf32>, vector<256x256xf32>, vector<16x256xf32> -> vector<16x256xf32>
    %23 = arith.addf %18, %22 : vector<16x256xf32>
    %c0_20 = arith.constant 0 : index
    %c0_21 = arith.constant 0 : index
    %24 = vector.load %arg3[%c0_20, %c0_21] : memref<1x256xf32, #tpu.memory_space<vmem>>, vector<1x256xf32>
    %25 = vector.broadcast %24 : vector<1x256xf32> to vector<16x256xf32>
    %26 = arith.addf %23, %25 : vector<16x256xf32>
    %cst_22 = arith.constant 0.000000e+00 : f32
    %27 = vector.broadcast %cst_22 : f32 to vector<16x256xf32>
    %28 = arith.maximumf %26, %27 : vector<16x256xf32>
    %c0_23 = arith.constant 0 : index
    %c0_24 = arith.constant 0 : index
    %c0_25 = arith.constant 0 : index
    %29 = vector.load %arg4[%c0_23, %c0_24, %c0_25] : memref<1x16x256xf32, #tpu.memory_space<vmem>>, vector<1x16x256xf32>
    %30 = vector.shape_cast %29 : vector<1x16x256xf32> to vector<16x256xf32>
    %31 = vector.shape_cast %28 : vector<16x256xf32> to vector<1x16x256xf32>
    tpu.vector_store %arg4[%c0_23, %c0_24, %c0_25], %31 {strides = array<i32>} : memref<1x16x256xf32, #tpu.memory_space<vmem>>, vector<1x16x256xf32>,
    return
  }
  func.func @transform_0(%arg0: i32) -> (i32, i32, i32) {
    %c0_i32 = arith.constant 0 : i32
    %c0_i32_0 = arith.constant 0 : i32
    %c0_i32_1 = arith.constant 0 : i32
    return %arg0, %c0_i32, %c0_i32_0 : i32, i32, i32
  }
  func.func @transform_1(%arg0: i32) -> (i32, i32) {
    %c0_i32 = arith.constant 0 : i32
    %c0_i32_0 = arith.constant 0 : i32
    %c0_i32_1 = arith.constant 0 : i32
    return %c0_i32, %c0_i32_0 : i32, i32
  }
  func.func @transform_2(%arg0: i32) -> (i32, i32) {
    %c0_i32 = arith.constant 0 : i32
    %c0_i32_0 = arith.constant 0 : i32
    %c0_i32_1 = arith.constant 0 : i32
    return %c0_i32, %c0_i32_0 : i32, i32
  }
  func.func @transform_3(%arg0: i32) -> (i32, i32, i32) {
    %c0_i32 = arith.constant 0 : i32
    %c0_i32_0 = arith.constant 0 : i32
    %c0_i32_1 = arith.constant 0 : i32
    return %arg0, %c0_i32, %c0_i32_0 : i32, i32, i32
  }
}

module attributes {stable_mosaic.version = 11 : i64} {
  func.func @global_max_kernel(%arg0: i32, %arg1: memref<8x4x128xf32, #tpu.memory_space<vmem>>, %arg2: memref<8x128xf32, #tpu.memory_space<vmem>>) attributes {dimension_semantics = [#tpu.dimension_semantics<arbitrary>], iteration_bounds = array<i64: 1>, scalar_prefetch = 0 : i64, scratch_operands = 0 : i64, tpu.core_type = #tpu.core_type<tc>, window_params = [{pipeline_mode = #tpu.pipeline_mode<synchronous>, transform_indices = @transform_0, window_bounds = array<i64: 8, 4, 128>}, {pipeline_mode = #tpu.pipeline_mode<synchronous>, transform_indices = @transform_1, window_bounds = array<i64: 8, 128>}]} {
    %c0 = arith.constant 0 : index
    %c0_0 = arith.constant 0 : index
    %c0_1 = arith.constant 0 : index
    %0 = vector.load %arg1[%c0, %c0_0, %c0_1] : memref<8x4x128xf32, #tpu.memory_space<vmem>>, vector<8x4x128xf32>
    %cst = arith.constant dense<0xFF800000> : vector<8x128xf32>
    %1 = vector.multi_reduction <maximumf>, %0, %cst [1] : vector<8x4x128xf32> to vector<8x128xf32>
    %c0_2 = arith.constant 0 : index
    %c0_3 = arith.constant 0 : index
    %2 = vector.load %arg2[%c0_2, %c0_3] : memref<8x128xf32, #tpu.memory_space<vmem>>, vector<8x128xf32>
    tpu.vector_store %arg2[%c0_2, %c0_3], %1 {strides = array<i32>} : memref<8x128xf32, #tpu.memory_space<vmem>>, vector<8x128xf32>,
    return
  }
  func.func @transform_0(%arg0: i32) -> (i32, i32, i32) {
    %c0_i32 = arith.constant 0 : i32
    %c0_i32_0 = arith.constant 0 : i32
    %c0_i32_1 = arith.constant 0 : i32
    %c0_i32_2 = arith.constant 0 : i32
    return %c0_i32, %c0_i32_0, %c0_i32_1 : i32, i32, i32
  }
  func.func @transform_1(%arg0: i32) -> (i32, i32) {
    %c0_i32 = arith.constant 0 : i32
    %c0_i32_0 = arith.constant 0 : i32
    %c0_i32_1 = arith.constant 0 : i32
    return %c0_i32, %c0_i32_0 : i32, i32
  }
}

module attributes {stable_mosaic.version = 11 : i64} {
  func.func @mm_bias_relu_kernel(%arg0: i32, %arg1: memref<16x256xf32, #tpu.memory_space<vmem>>, %arg2: memref<256x128xf32, #tpu.memory_space<vmem>>, %arg3: memref<1x128xf32, #tpu.memory_space<vmem>>, %arg4: memref<16x128xf32, #tpu.memory_space<vmem>>) attributes {dimension_semantics = [#tpu.dimension_semantics<parallel>], iteration_bounds = array<i64: 2>, scalar_prefetch = 0 : i64, scratch_operands = 0 : i64, tpu.core_type = #tpu.core_type<tc>, window_params = [{transform_indices = @transform_0, window_bounds = array<i64: 16, 256>}, {pipeline_mode = #tpu.pipeline_mode<synchronous>, transform_indices = @transform_1, window_bounds = array<i64: 256, 128>}, {pipeline_mode = #tpu.pipeline_mode<synchronous>, transform_indices = @transform_2, window_bounds = array<i64: 1, 128>}, {transform_indices = @transform_3, window_bounds = array<i64: 16, 128>}]} {
    %c0 = arith.constant 0 : index
    %c0_0 = arith.constant 0 : index
    %0 = vector.load %arg1[%c0, %c0_0] : memref<16x256xf32, #tpu.memory_space<vmem>>, vector<16x256xf32>
    %c0_1 = arith.constant 0 : index
    %c0_2 = arith.constant 0 : index
    %1 = vector.load %arg2[%c0_1, %c0_2] : memref<256x128xf32, #tpu.memory_space<vmem>>, vector<256x128xf32>
    %cst = arith.constant dense<0.000000e+00> : vector<16x128xf32>
    %2 = tpu.matmul %0, %1, %cst {dimension_numbers = #tpu.dot_dimension_numbers<[1], [0], [0], [1], [0, 0, 1, 1], [], []>} : vector<16x256xf32>, vector<256x128xf32>, vector<16x128xf32> -> vector<16x128xf32>
    %c0_3 = arith.constant 0 : index
    %c0_4 = arith.constant 0 : index
    %3 = vector.load %arg3[%c0_3, %c0_4] : memref<1x128xf32, #tpu.memory_space<vmem>>, vector<1x128xf32>
    %4 = vector.broadcast %3 : vector<1x128xf32> to vector<16x128xf32>
    %5 = arith.addf %2, %4 : vector<16x128xf32>
    %cst_5 = arith.constant 0.000000e+00 : f32
    %6 = vector.broadcast %cst_5 : f32 to vector<16x128xf32>
    %7 = arith.maximumf %5, %6 : vector<16x128xf32>
    %c0_6 = arith.constant 0 : index
    %c0_7 = arith.constant 0 : index
    %8 = vector.load %arg4[%c0_6, %c0_7] : memref<16x128xf32, #tpu.memory_space<vmem>>, vector<16x128xf32>
    tpu.vector_store %arg4[%c0_6, %c0_7], %7 {strides = array<i32>} : memref<16x128xf32, #tpu.memory_space<vmem>>, vector<16x128xf32>,
    return
  }
  func.func @transform_0(%arg0: i32) -> (i32, i32) {
    %c0_i32 = arith.constant 0 : i32
    %c0_i32_0 = arith.constant 0 : i32
    return %arg0, %c0_i32 : i32, i32
  }
  func.func @transform_1(%arg0: i32) -> (i32, i32) {
    %c0_i32 = arith.constant 0 : i32
    %c0_i32_0 = arith.constant 0 : i32
    %c0_i32_1 = arith.constant 0 : i32
    return %c0_i32, %c0_i32_0 : i32, i32
  }
  func.func @transform_2(%arg0: i32) -> (i32, i32) {
    %c0_i32 = arith.constant 0 : i32
    %c0_i32_0 = arith.constant 0 : i32
    %c0_i32_1 = arith.constant 0 : i32
    return %c0_i32, %c0_i32_0 : i32, i32
  }
  func.func @transform_3(%arg0: i32) -> (i32, i32) {
    %c0_i32 = arith.constant 0 : i32
    %c0_i32_0 = arith.constant 0 : i32
    return %arg0, %c0_i32 : i32, i32
  }
}

</mosaic_0001>

<bundles_post_ra>
// kernel: visual_encoder_forward.10
= control target key start
LH: loop header
LB: loop body
LE: loop exit
PB: predicated region body
PF: predicated region fallthrough
CT: control target
= control target key end

     0   :  { %s839_s12 = smov 0   ;;  %s1012_s0 = inlined_call_operand.vmem [shape: f32[512,32], index: 0, kind: input, shape index: {}]   ;;  %s1013_s1 = inlined_call_operand.vmem [shape: f32[32,128], index: 1, kind: input, shape index: {}]   ;;  %s1014_s2 = inlined_call_operand.vmem [shape: f32[1,128], index: 2, kind: input, shape index: {}]   ;;  %s1015_s3 = inlined_call_operand.vmem [shape: f32[512,128], index: 3, kind: output, shape index: {}]  }
   0x1 LB: > { %s659_s13 = sadd.s32 4294967295, %s817_s12   ;;  %p663_p0 = scmp.ge.s32.totalorder %s817_s12, 1  ;;  %s817_s12 = sphi %s839_s12, %s13_s12  }
   0x2   : > { %p138_p1 = scmp.lt.s32.totalorder %s817_s12, 3 }
   0x4   : > { %p139_p2 = pnand %p663_p0, %p138_p1 }
   0x5   : > { %s664_s18 = sshll.u32 (!%p139_p2), %s659_s13, 5 }
   0x6   : > { %142 = sbr.rel (%p139_p2) target bundleno = 249 (0xf9), region = 32  ;;  %p163_p3 = scmp.lt.s32.totalorder (!%p139_p2), %s664_s18, 63 }
   0xb   : > { %v209_v0 = vld [vmem:[%s1013_s1 + $0x18] sm:$0xff]  ;;  %v208_v1 = vld [vmem:[%s1013_s1 + $0x10] sm:$0xff]  ;;  %v207_v2 = vld [vmem:[%s1013_s1 + $0x8] sm:$0xff]  ;;  %s1017_s18 = smov (!%p163_p3, %s664_s18), 63  ;;  %vm217_vm0 = vcmask 261120  }
   0xc   : > { %739 = vmatprep.subr.mxu0 %v209_v0  ;;  %795 = vmatprep.subr.mxu1 %v209_v0  ;;  %v206_v3 = vld [vmem:[%s1013_s1] sm:$0xff]  ;;  %s665_s23 = sshll.u32 %s1017_s18, 3 }
   0xd   : > { %740 = vmatpush3.msra.mxu0 %v209_v0  ;;  %799 = vmatpush3.msra.mxu1 %v209_v0  ;;  %s867_s26 = scalar_lea.vmem %s1012_s0, %s665_s23  ;;  %v936_v36 = vld [vmem:[%s1014_s2] ss:$0 sm:$0xff]  ;;  %s945_s4 = scalar_lea.vmem %s1015_s3, %s665_s23 }
   0xe   : > { %741 = vmatprep.subr.mxu0 %v208_v1  ;;  %796 = vmatprep.subr.mxu1 %v208_v1  ;;  %v174_v4 = vld [vmem:[%s867_s26] sm:$0xff]  ;;  %v175_v6 = vld [vmem:[%s867_s26 + $0x8] sm:$0xff]  ;;  %v176_v8 = vld [vmem:[%s867_s26 + $0x10] sm:$0xff] }
   0xf   : > { %742 = vmatpush3.msra.mxu0 %v208_v1  ;;  %800 = vmatpush3.msra.mxu1 %v208_v1  ;;  %v190_v5 = vld [vmem:[%s867_s26 + $0x80] sm:$0xff]  ;;  %v191_v7 = vld [vmem:[%s867_s26 + $0x88] sm:$0xff]  ;;  %v192_v9 = vld [vmem:[%s867_s26 + $0x90] sm:$0xff] }
  0x10   : > { %743 = vmatprep.subr.mxu0 %v207_v2  ;;  %797 = vmatprep.subr.mxu1 %v207_v2  ;;  %v177_v10 = vld [vmem:[%s867_s26 + $0x18] sm:$0xff]  ;;  %v178_v12 = vld [vmem:[%s867_s26 + $0x20] sm:$0xff]  ;;  %v179_v14 = vld [vmem:[%s867_s26 + $0x28] sm:$0xff] }
  0x11   : > { %744 = vmatpush3.msra.mxu0 %v207_v2  ;;  %801 = vmatpush3.msra.mxu1 %v207_v2  ;;  %v193_v11 = vld [vmem:[%s867_s26 + $0x98] sm:$0xff]  ;;  %v194_v13 = vld [vmem:[%s867_s26 + $0xa0] sm:$0xff]  ;;  %v195_v15 = vld [vmem:[%s867_s26 + $0xa8] sm:$0xff] }
  0x12   : > { %745 = vmatprep.subr.mxu0 %v206_v3  ;;  %798 = vmatprep.subr.mxu1 %v206_v3  ;;  %v180_v16 = vld [vmem:[%s867_s26 + $0x30] sm:$0xff]  ;;  %v181_v18 = vld [vmem:[%s867_s26 + $0x38] sm:$0xff]  ;;  %v182_v20 = vld [vmem:[%s867_s26 + $0x40] sm:$0xff] }
  0x13   : > { %746 = vmatpush3.msra.mxu0 %v206_v3  ;;  %802 = vmatpush3.msra.mxu1 %v206_v3  ;;  %v196_v17 = vld [vmem:[%s867_s26 + $0xb0] sm:$0xff]  ;;  %v197_v19 = vld [vmem:[%s867_s26 + $0xb8] sm:$0xff]  ;;  %v198_v21 = vld [vmem:[%s867_s26 + $0xc0] sm:$0xff] }
  0x14   : > { %747 = vmatprep.mubr.msk.f32.mxu0 %vm217_vm0, %v174_v4  ;;  %771 = vmatprep.mubr.msk.f32.mxu1 %vm217_vm0, %v190_v5  ;;  %v183_v22 = vld [vmem:[%s867_s26 + $0x48] sm:$0xff]  ;;  %v184_v24 = vld [vmem:[%s867_s26 + $0x50] sm:$0xff]  ;;  %v185_v26 = vld [vmem:[%s867_s26 + $0x58] sm:$0xff] }
  0x15   : > { %748 = vmatmul.mubr.msk.f32.vlgmr.msra.gmra.mxu0 %vm217_vm0, %v175_v6  ;;  %772 = vmatmul.mubr.msk.f32.vlgmr.msra.gmra.mxu1 %vm217_vm0, %v191_v7  ;;  %v199_v23 = vld [vmem:[%s867_s26 + $0xc8] sm:$0xff]  ;;  %v200_v25 = vld [vmem:[%s867_s26 + $0xd0] sm:$0xff]  ;;  %v201_v27 = vld [vmem:[%s867_s26 + $0xd8] sm:$0xff] }
  0x16   : > { %750 = vmatprep.mubr.msk.f32.mxu0 %vm217_vm0, %v176_v8  ;;  %774 = vmatprep.mubr.msk.f32.mxu1 %vm217_vm0, %v192_v9  ;;  %v186_v28 = vld [vmem:[%s867_s26 + $0x60] sm:$0xff]  ;;  %v187_v30 = vld [vmem:[%s867_s26 + $0x68] sm:$0xff]  ;;  %v188_v32 = vld [vmem:[%s867_s26 + $0x70] sm:$0xff] }
  0x17   : > { %v202_v29 = vld [vmem:[%s867_s26 + $0xe0] sm:$0xff]  ;;  %v203_v31 = vld [vmem:[%s867_s26 + $0xe8] sm:$0xff]  ;;  %v204_v33 = vld [vmem:[%s867_s26 + $0xf0] sm:$0xff] }
  0x18   : > { %v189_v34 = vld [vmem:[%s867_s26 + $0x78] sm:$0xff] }
  0x19   : > { %751 = vmatmul.mubr.msk.f32.gmra.mxu0 %vm217_vm0, %v177_v10  ;;  %775 = vmatmul.mubr.msk.f32.gmra.mxu1 %vm217_vm0, %v193_v11  ;;  %v205_v35 = vld [vmem:[%s867_s26 + $0xf8] sm:$0xff] }
  0x1a   : > { %753 = vmatprep.mubr.msk.f32.mxu0 %vm217_vm0, %v178_v12  ;;  %777 = vmatprep.mubr.msk.f32.mxu1 %vm217_vm0, %v194_v13 }
  0x1d   : > { %754 = vmatmul.mubr.msk.f32.gmra.mxu0 %vm217_vm0, %v179_v14  ;;  %778 = vmatmul.mubr.msk.f32.gmra.mxu1 %vm217_vm0, %v195_v15 }
  0x1e   : > { %756 = vmatprep.mubr.msk.f32.mxu0 %vm217_vm0, %v180_v16  ;;  %780 = vmatprep.mubr.msk.f32.mxu1 %vm217_vm0, %v196_v17 }
  0x21   : > { %757 = vmatmul.mubr.msk.f32.gmra.mxu0 %vm217_vm0, %v181_v18  ;;  %781 = vmatmul.mubr.msk.f32.gmra.mxu1 %vm217_vm0, %v197_v19 }
  0x22   : > { %759 = vmatprep.mubr.msk.f32.mxu0 %vm217_vm0, %v182_v20  ;;  %783 = vmatprep.mubr.msk.f32.mxu1 %vm217_vm0, %v198_v21 }
  0x25   : > { %760 = vmatmul.mubr.msk.f32.gmra.mxu0 %vm217_vm0, %v183_v22  ;;  %784 = vmatmul.mubr.msk.f32.gmra.mxu1 %vm217_vm0, %v199_v23 }
  0x26   : > { %762 = vmatprep.mubr.msk.f32.mxu0 %vm217_vm0, %v184_v24  ;;  %786 = vmatprep.mubr.msk.f32.mxu1 %vm217_vm0, %v200_v25 }
  0x29   : > { %763 = vmatmul.mubr.msk.f32.gmra.mxu0 %vm217_vm0, %v185_v26  ;;  %787 = vmatmul.mubr.msk.f32.gmra.mxu1 %vm217_vm0, %v201_v27 }
  0x2a   : > { %765 = vmatprep.mubr.msk.f32.mxu0 %vm217_vm0, %v186_v28  ;;  %789 = vmatprep.mubr.msk.f32.mxu1 %vm217_vm0, %v202_v29 }
  0x2d   : > { %766 = vmatmul.mubr.msk.f32.gmra.mxu0 %vm217_vm0, %v187_v30  ;;  %790 = vmatmul.mubr.msk.f32.gmra.mxu1 %vm217_vm0, %v203_v31 }
  0x2e   : > { %768 = vmatprep.mubr.msk.f32.mxu0 %vm217_vm0, %v188_v32  ;;  %792 = vmatprep.mubr.msk.f32.mxu1 %vm217_vm0, %v204_v33 }
  0x31   : > { %769 = vmatmul.mubr.msk.f32.gmra.mxu0 %vm217_vm0, %v189_v34  ;;  %793 = vmatmul.mubr.msk.f32.gmra.mxu1 %vm217_vm0, %v205_v35 }
  0xd5   : > { %v749_v37 = vpop.f32.mrf.mxu0  ;;  %v773_v38 = vpop.f32.mrf.mxu1 }
  0xd6   : > { %v386_v39 = vadd.f32 %v749_v37, %v936_v36  ;;  %v466_v40 = vadd.f32 %v773_v38, %v936_v36 }
  0xd7   : > { %v380_v41 = vpop.f32.mrf.mxu0  ;;  %v460_v42 = vpop.f32.mrf.mxu1 }
  0xd8   : > { %v540_v43 = vmax.f32 %v386_v39, 0.0  ;;  %v556_v44 = vmax.f32 %v466_v40, 0.0  ;;  %v381_v45 = vadd.f32 %v936_v36, %v380_v41  ;;  %v461_v46 = vadd.f32 %v936_v36, %v460_v42 }
  0xd9   : > { %v752_v47 = vpop.f32.mrf.mxu0  ;;  %v776_v48 = vpop.f32.mrf.mxu1 }
  0xda   : > { %572 = vst [vmem:[%s945_s4 + $0x8] sm:$0xff] %v540_v43  ;;  %588 = vst [vmem:[%s945_s4 + $0x88] sm:$0xff] %v556_v44  ;;  %v539_v49 = vmax.f32 %v381_v45, 0.0  ;;  %v555_v50 = vmax.f32 %v461_v46, 0.0  ;;  %v396_v51 = vadd.f32 %v752_v47, %v936_v36  ;;  %v476_v52 = vadd.f32 %v776_v48, %v936_v36 }
  0xdb   : > { %v390_v53 = vpop.f32.mrf.mxu0  ;;  %v470_v54 = vpop.f32.mrf.mxu1 }
  0xdc   : > { %571 = vst [vmem:[%s945_s4] sm:$0xff] %v539_v49  ;;  %587 = vst [vmem:[%s945_s4 + $0x80] sm:$0xff] %v555_v50  ;;  %v542_v55 = vmax.f32 %v396_v51, 0.0  ;;  %v558_v56 = vmax.f32 %v476_v52, 0.0  ;;  %v391_v57 = vadd.f32 %v936_v36, %v390_v53  ;;  %v471_v58 = vadd.f32 %v936_v36, %v470_v54 }
  0xdd   : > { %v755_v59 = vpop.f32.mrf.mxu0  ;;  %v779_v60 = vpop.f32.mrf.mxu1 }
  0xde   : > { %574 = vst [vmem:[%s945_s4 + $0x18] sm:$0xff] %v542_v55  ;;  %590 = vst [vmem:[%s945_s4 + $0x98] sm:$0xff] %v558_v56  ;;  %v541_v61 = vmax.f32 %v391_v57, 0.0  ;;  %v557_v62 = vmax.f32 %v471_v58, 0.0  ;;  %v406_v63 = vadd.f32 %v755_v59, %v936_v36  ;;  %v486_v0 = vadd.f32 %v779_v60, %v936_v36 }
  0xdf   : > { %v400_v1 = vpop.f32.mrf.mxu0  ;;  %v480_v2 = vpop.f32.mrf.mxu1 }
  0xe0   : > { %573 = vst [vmem:[%s945_s4 + $0x10] sm:$0xff] %v541_v61  ;;  %589 = vst [vmem:[%s945_s4 + $0x90] sm:$0xff] %v557_v62  ;;  %v544_v3 = vmax.f32 %v406_v63, 0.0  ;;  %v560_v4 = vmax.f32 %v486_v0, 0.0  ;;  %v401_v5 = vadd.f32 %v936_v36, %v400_v1  ;;  %v481_v6 = vadd.f32 %v936_v36, %v480_v2 }
  0xe1   : > { %v758_v7 = vpop.f32.mrf.mxu0  ;;  %v782_v8 = vpop.f32.mrf.mxu1 }
  0xe2   : > { %576 = vst [vmem:[%s945_s4 + $0x28] sm:$0xff] %v544_v3  ;;  %592 = vst [vmem:[%s945_s4 + $0xa8] sm:$0xff] %v560_v4  ;;  %v543_v9 = vmax.f32 %v401_v5, 0.0  ;;  %v559_v10 = vmax.f32 %v481_v6, 0.0  ;;  %v416_v11 = vadd.f32 %v758_v7, %v936_v36  ;;  %v496_v12 = vadd.f32 %v782_v8, %v936_v36 }
  0xe3   : > { %v410_v13 = vpop.f32.mrf.mxu0  ;;  %v490_v14 = vpop.f32.mrf.mxu1 }
  0xe4   : > { %575 = vst [vmem:[%s945_s4 + $0x20] sm:$0xff] %v543_v9  ;;  %591 = vst [vmem:[%s945_s4 + $0xa0] sm:$0xff] %v559_v10  ;;  %v546_v15 = vmax.f32 %v416_v11, 0.0  ;;  %v562_v16 = vmax.f32 %v496_v12, 0.0  ;;  %v411_v17 = vadd.f32 %v936_v36, %v410_v13  ;;  %v491_v18 = vadd.f32 %v936_v36, %v490_v14 }
  0xe5   : > { %v761_v19 = vpop.f32.mrf.mxu0  ;;  %v785_v20 = vpop.f32.mrf.mxu1 }
  0xe6   : > { %578 = vst [vmem:[%s945_s4 + $0x38] sm:$0xff] %v546_v15  ;;  %594 = vst [vmem:[%s945_s4 + $0xb8] sm:$0xff] %v562_v16  ;;  %v545_v21 = vmax.f32 %v411_v17, 0.0  ;;  %v561_v22 = vmax.f32 %v491_v18, 0.0  ;;  %v426_v23 = vadd.f32 %v761_v19, %v936_v36  ;;  %v506_v24 = vadd.f32 %v785_v20, %v936_v36 }
  0xe7   : > { %v420_v25 = vpop.f32.mrf.mxu0  ;;  %v500_v26 = vpop.f32.mrf.mxu1 }
  0xe8   : > { %577 = vst [vmem:[%s945_s4 + $0x30] sm:$0xff] %v545_v21  ;;  %593 = vst [vmem:[%s945_s4 + $0xb0] sm:$0xff] %v561_v22  ;;  %v548_v27 = vmax.f32 %v426_v23, 0.0  ;;  %v564_v28 = vmax.f32 %v506_v24, 0.0  ;;  %v421_v29 = vadd.f32 %v936_v36, %v420_v25  ;;  %v501_v30 = vadd.f32 %v936_v36, %v500_v26 }
  0xe9   : > { %v764_v31 = vpop.f32.mrf.mxu0  ;;  %v788_v32 = vpop.f32.mrf.mxu1 }
  0xea   : > { %580 = vst [vmem:[%s945_s4 + $0x48] sm:$0xff] %v548_v27  ;;  %596 = vst [vmem:[%s945_s4 + $0xc8] sm:$0xff] %v564_v28  ;;  %v547_v33 = vmax.f32 %v421_v29, 0.0  ;;  %v563_v34 = vmax.f32 %v501_v30, 0.0  ;;  %v436_v35 = vadd.f32 %v764_v31, %v936_v36  ;;  %v516_v37 = vadd.f32 %v788_v32, %v936_v36 }
  0xeb   : > { %v430_v38 = vpop.f32.mrf.mxu0  ;;  %v510_v39 = vpop.f32.mrf.mxu1 }
  0xec   : > { %579 = vst [vmem:[%s945_s4 + $0x40] sm:$0xff] %v547_v33  ;;  %595 = vst [vmem:[%s945_s4 + $0xc0] sm:$0xff] %v563_v34  ;;  %v550_v40 = vmax.f32 %v436_v35, 0.0  ;;  %v566_v41 = vmax.f32 %v516_v37, 0.0  ;;  %v431_v42 = vadd.f32 %v936_v36, %v430_v38  ;;  %v511_v43 = vadd.f32 %v936_v36, %v510_v39 }
  0xed   : > { %v767_v44 = vpop.f32.mrf.mxu0  ;;  %v791_v45 = vpop.f32.mrf.mxu1 }
  0xee   : > { %582 = vst [vmem:[%s945_s4 + $0x58] sm:$0xff] %v550_v40  ;;  %598 = vst [vmem:[%s945_s4 + $0xd8] sm:$0xff] %v566_v41  ;;  %v549_v46 = vmax.f32 %v431_v42, 0.0  ;;  %v565_v47 = vmax.f32 %v511_v43, 0.0  ;;  %v446_v48 = vadd.f32 %v767_v44, %v936_v36  ;;  %v526_v49 = vadd.f32 %v791_v45, %v936_v36 }
  0xef   : > { %v440_v50 = vpop.f32.mrf.mxu0  ;;  %v520_v51 = vpop.f32.mrf.mxu1 }
  0xf0   : > { %581 = vst [vmem:[%s945_s4 + $0x50] sm:$0xff] %v549_v46  ;;  %597 = vst [vmem:[%s945_s4 + $0xd0] sm:$0xff] %v565_v47  ;;  %v552_v52 = vmax.f32 %v446_v48, 0.0  ;;  %v568_v53 = vmax.f32 %v526_v49, 0.0  ;;  %v441_v54 = vadd.f32 %v936_v36, %v440_v50  ;;  %v521_v55 = vadd.f32 %v936_v36, %v520_v51 }
  0xf1   : > { %v770_v56 = vpop.f32.mrf.mxu0  ;;  %v794_v57 = vpop.f32.mrf.mxu1 }
  0xf2   : > { %584 = vst [vmem:[%s945_s4 + $0x68] sm:$0xff] %v552_v52  ;;  %600 = vst [vmem:[%s945_s4 + $0xe8] sm:$0xff] %v568_v53  ;;  %v551_v58 = vmax.f32 %v441_v54, 0.0  ;;  %v567_v59 = vmax.f32 %v521_v55, 0.0  ;;  %v456_v60 = vadd.f32 %v770_v56, %v936_v36  ;;  %v536_v61 = vadd.f32 %v794_v57, %v936_v36 }
  0xf3   : > { %v450_v62 = vpop.f32.mrf.mxu0  ;;  %v530_v63 = vpop.f32.mrf.mxu1 }
  0xf4   : > { %583 = vst [vmem:[%s945_s4 + $0x60] sm:$0xff] %v551_v58  ;;  %599 = vst [vmem:[%s945_s4 + $0xe0] sm:$0xff] %v567_v59  ;;  %v554_v0 = vmax.f32 %v456_v60, 0.0  ;;  %v570_v1 = vmax.f32 %v536_v61, 0.0  ;;  %v451_v2 = vadd.f32 %v936_v36, %v450_v62  ;;  %v531_v3 = vadd.f32 %v936_v36, %v530_v63 }
  0xf6   : > { %586 = vst [vmem:[%s945_s4 + $0x78] sm:$0xff] %v554_v0  ;;  %602 = vst [vmem:[%s945_s4 + $0xf8] sm:$0xff] %v570_v1  ;;  %v553_v4 = vmax.f32 %v451_v2, 0.0  ;;  %v569_v5 = vmax.f32 %v531_v3, 0.0 }
  0xf8   : > { %585 = vst [vmem:[%s945_s4 + $0x70] sm:$0xff] %v553_v4  ;;  %601 = vst [vmem:[%s945_s4 + $0xf0] sm:$0xff] %v569_v5 }
  0xf9 PF: > { %s13_s12 = sadd.s32 1, %s817_s12  }
  0xfa   : > { %p10_p4 = scmp.ge.s32.totalorder %s13_s12, 4  }
  0xfc   :  { %12 = sbr.rel (!%p10_p4) target bundleno = 1 (0x1), region = 62 }

// kernel: visual_encoder_forward.12
= control target key start
LH: loop header
LB: loop body
LE: loop exit
PB: predicated region body
PF: predicated region fallthrough
CT: control target
= control target key end

     0   :  { %s782_s12 = smov 0   ;;  %s961_s0 = inlined_call_operand.vmem [shape: f32[512,128], index: 0, kind: input, shape index: {}]   ;;  %s962_s1 = inlined_call_operand.vmem [shape: f32[128,128], index: 1, kind: input, shape index: {}]   ;;  %s963_s2 = inlined_call_operand.vmem [shape: f32[1,128], index: 2, kind: input, shape index: {}]   ;;  %s964_s3 = inlined_call_operand.vmem [shape: f32[512,128], index: 3, kind: output, shape index: {}]  }
   0x1 LB: > { %s574_s13 = sadd.s32 4294967295, %s760_s12   ;;  %p578_p0 = scmp.ge.s32.totalorder %s760_s12, 1  ;;  %s760_s12 = sphi %s782_s12, %s13_s12  }
   0x2   : > { %p138_p1 = scmp.lt.s32.totalorder %s760_s12, 3 }
   0x4   : > { %p139_p2 = pnand %p578_p0, %p138_p1 }
   0x5   : > { %s579_s30 = sshll.u32 (!%p139_p2), %s574_s13, 5 }
   0x6   : > { %142 = sbr.rel (%p139_p2) target bundleno = 273 (0x111), region = 32  ;;  %p163_p3 = scmp.lt.s32.totalorder (!%p139_p2), %s579_s30, 63 }
   0xb   : > { %v221_v0 = vld [vmem:[%s962_s1 + $0x78] sm:$0xff]  ;;  %v220_v1 = vld [vmem:[%s962_s1 + $0x70] sm:$0xff]  ;;  %v219_v2 = vld [vmem:[%s962_s1 + $0x68] sm:$0xff]  ;;  %s966_s30 = smov (!%p163_p3, %s579_s30), 63 }
   0xc   : > { %634 = vmatprep.subr.mxu0 %v221_v0  ;;  %714 = vmatprep.subr.mxu1 %v221_v0  ;;  %v218_v3 = vld [vmem:[%s962_s1 + $0x60] sm:$0xff]  ;;  %v217_v4 = vld [vmem:[%s962_s1 + $0x58] sm:$0xff]  ;;  %v216_v5 = vld [vmem:[%s962_s1 + $0x50] sm:$0xff]  ;;  %s580_s17 = sshll.u32 %s966_s30, 3 }
   0xd   : > { %635 = vmatpush3.msra.mxu0 %v221_v0  ;;  %730 = vmatpush3.msra.mxu1 %v221_v0  ;;  %v215_v6 = vld [vmem:[%s962_s1 + $0x48] sm:$0xff]  ;;  %v214_v7 = vld [vmem:[%s962_s1 + $0x40] sm:$0xff]  ;;  %v213_v8 = vld [vmem:[%s962_s1 + $0x38] sm:$0xff]  ;;  %s845_s22 = scalar_lea.vmem %s961_s0, %s580_s17  ;;  %s894_s29 = scalar_lea.vmem %s964_s3, %s580_s17 }
   0xe   : > { %636 = vmatprep.subr.mxu0 %v220_v1  ;;  %715 = vmatprep.subr.mxu1 %v220_v1  ;;  %v212_v9 = vld [vmem:[%s962_s1 + $0x30] sm:$0xff]  ;;  %v211_v10 = vld [vmem:[%s962_s1 + $0x28] sm:$0xff]  ;;  %v210_v11 = vld [vmem:[%s962_s1 + $0x20] sm:$0xff] }
   0xf   : > { %637 = vmatpush3.msra.mxu0 %v220_v1  ;;  %731 = vmatpush3.msra.mxu1 %v220_v1  ;;  %v209_v12 = vld [vmem:[%s962_s1 + $0x18] sm:$0xff]  ;;  %v208_v13 = vld [vmem:[%s962_s1 + $0x10] sm:$0xff]  ;;  %v207_v14 = vld [vmem:[%s962_s1 + $0x8] sm:$0xff] }
  0x10   : > { %638 = vmatprep.subr.mxu0 %v219_v2  ;;  %716 = vmatprep.subr.mxu1 %v219_v2  ;;  %v206_v15 = vld [vmem:[%s962_s1] sm:$0xff]  ;;  %v175_v18 = vld [vmem:[%s845_s22 + $0x8] sm:$0xff]  ;;  %v176_v20 = vld [vmem:[%s845_s22 + $0x10] sm:$0xff] }
  0x11   : > { %639 = vmatpush3.msra.mxu0 %v219_v2  ;;  %732 = vmatpush3.msra.mxu1 %v219_v2  ;;  %v174_v16 = vld [vmem:[%s845_s22] sm:$0xff]  ;;  %v191_v19 = vld [vmem:[%s845_s22 + $0x88] sm:$0xff]  ;;  %v192_v21 = vld [vmem:[%s845_s22 + $0x90] sm:$0xff] }
  0x12   : > { %640 = vmatprep.subr.mxu0 %v218_v3  ;;  %717 = vmatprep.subr.mxu1 %v218_v3  ;;  %v190_v17 = vld [vmem:[%s845_s22 + $0x80] sm:$0xff]  ;;  %v177_v22 = vld [vmem:[%s845_s22 + $0x18] sm:$0xff]  ;;  %v179_v26 = vld [vmem:[%s845_s22 + $0x28] sm:$0xff] }
  0x13   : > { %641 = vmatpush3.msra.mxu0 %v218_v3  ;;  %733 = vmatpush3.msra.mxu1 %v218_v3  ;;  %v193_v23 = vld [vmem:[%s845_s22 + $0x98] sm:$0xff]  ;;  %v178_v24 = vld [vmem:[%s845_s22 + $0x20] sm:$0xff]  ;;  %v195_v27 = vld [vmem:[%s845_s22 + $0xa8] sm:$0xff] }
  0x14   : > { %642 = vmatprep.subr.mxu0 %v217_v4  ;;  %718 = vmatprep.subr.mxu1 %v217_v4  ;;  %v194_v25 = vld [vmem:[%s845_s22 + $0xa0] sm:$0xff]  ;;  %v180_v28 = vld [vmem:[%s845_s22 + $0x30] sm:$0xff]  ;;  %v181_v30 = vld [vmem:[%s845_s22 + $0x38] sm:$0xff] }
  0x15   : > { %643 = vmatpush3.msra.mxu0 %v217_v4  ;;  %734 = vmatpush3.msra.mxu1 %v217_v4  ;;  %v196_v29 = vld [vmem:[%s845_s22 + $0xb0] sm:$0xff]  ;;  %v197_v31 = vld [vmem:[%s845_s22 + $0xb8] sm:$0xff]  ;;  %v182_v32 = vld [vmem:[%s845_s22 + $0x40] sm:$0xff] }
  0x16   : > { %644 = vmatprep.subr.mxu0 %v216_v5  ;;  %719 = vmatprep.subr.mxu1 %v216_v5  ;;  %v198_v33 = vld [vmem:[%s845_s22 + $0xc0] sm:$0xff]  ;;  %v183_v34 = vld [vmem:[%s845_s22 + $0x48] sm:$0xff]  ;;  %v184_v36 = vld [vmem:[%s845_s22 + $0x50] sm:$0xff] }
  0x17   : > { %645 = vmatpush3.msra.mxu0 %v216_v5  ;;  %735 = vmatpush3.msra.mxu1 %v216_v5  ;;  %v199_v35 = vld [vmem:[%s845_s22 + $0xc8] sm:$0xff]  ;;  %v200_v37 = vld [vmem:[%s845_s22 + $0xd0] sm:$0xff]  ;;  %v185_v38 = vld [vmem:[%s845_s22 + $0x58] sm:$0xff] }
  0x18   : > { %646 = vmatprep.subr.mxu0 %v215_v6  ;;  %720 = vmatprep.subr.mxu1 %v215_v6  ;;  %v201_v39 = vld [vmem:[%s845_s22 + $0xd8] sm:$0xff]  ;;  %v186_v40 = vld [vmem:[%s845_s22 + $0x60] sm:$0xff]  ;;  %v187_v42 = vld [vmem:[%s845_s22 + $0x68] sm:$0xff] }
  0x19   : > { %647 = vmatpush3.msra.mxu0 %v215_v6  ;;  %736 = vmatpush3.msra.mxu1 %v215_v6  ;;  %v202_v41 = vld [vmem:[%s845_s22 + $0xe0] sm:$0xff]  ;;  %v203_v43 = vld [vmem:[%s845_s22 + $0xe8] sm:$0xff]  ;;  %v188_v44 = vld [vmem:[%s845_s22 + $0x70] sm:$0xff] }
  0x1a   : > { %648 = vmatprep.subr.mxu0 %v214_v7  ;;  %721 = vmatprep.subr.mxu1 %v214_v7  ;;  %v204_v45 = vld [vmem:[%s845_s22 + $0xf0] sm:$0xff]  ;;  %v189_v46 = vld [vmem:[%s845_s22 + $0x78] sm:$0xff]  ;;  %v885_v48 = vld [vmem:[%s963_s2] ss:$0 sm:$0xff] }
  0x1b   : > { %649 = vmatpush3.msra.mxu0 %v214_v7  ;;  %737 = vmatpush3.msra.mxu1 %v214_v7  ;;  %v205_v47 = vld [vmem:[%s845_s22 + $0xf8] sm:$0xff] }
  0x1c   : > { %650 = vmatprep.subr.mxu0 %v213_v8  ;;  %722 = vmatprep.subr.mxu1 %v213_v8 }
  0x1d   : > { %651 = vmatpush3.msra.mxu0 %v213_v8  ;;  %738 = vmatpush3.msra.mxu1 %v213_v8 }
  0x1e   : > { %652 = vmatprep.subr.mxu0 %v212_v9  ;;  %723 = vmatprep.subr.mxu1 %v212_v9 }
  0x1f   : > { %653 = vmatpush3.msra.mxu0 %v212_v9  ;;  %739 = vmatpush3.msra.mxu1 %v212_v9 }
  0x20   : > { %654 = vmatprep.subr.mxu0 %v211_v10  ;;  %724 = vmatprep.subr.mxu1 %v211_v10 }
  0x21   : > { %655 = vmatpush3.msra.mxu0 %v211_v10  ;;  %740 = vmatpush3.msra.mxu1 %v211_v10 }
  0x22   : > { %656 = vmatprep.subr.mxu0 %v210_v11  ;;  %725 = vmatprep.subr.mxu1 %v210_v11 }
  0x23   : > { %657 = vmatpush3.msra.mxu0 %v210_v11  ;;  %741 = vmatpush3.msra.mxu1 %v210_v11 }
  0x24   : > { %658 = vmatprep.subr.mxu0 %v209_v12  ;;  %726 = vmatprep.subr.mxu1 %v209_v12 }
  0x25   : > { %659 = vmatpush3.msra.mxu0 %v209_v12  ;;  %742 = vmatpush3.msra.mxu1 %v209_v12 }
  0x26   : > { %660 = vmatprep.subr.mxu0 %v208_v13  ;;  %727 = vmatprep.subr.mxu1 %v208_v13 }
  0x27   : > { %661 = vmatpush3.msra.mxu0 %v208_v13  ;;  %743 = vmatpush3.msra.mxu1 %v208_v13 }
  0x28   : > { %662 = vmatprep.subr.mxu0 %v207_v14  ;;  %728 = vmatprep.subr.mxu1 %v207_v14 }
  0x29   : > { %663 = vmatpush3.msra.mxu0 %v207_v14  ;;  %744 = vmatpush3.msra.mxu1 %v207_v14 }
  0x2a   : > { %664 = vmatprep.subr.mxu0 %v206_v15  ;;  %729 = vmatprep.subr.mxu1 %v206_v15 }
  0x2b   : > { %665 = vmatpush3.msra.mxu0 %v206_v15  ;;  %745 = vmatpush3.msra.mxu1 %v206_v15 }
  0x2c   : > { %666 = vmatprep.mubr.f32.mxu0 %v174_v16  ;;  %690 = vmatprep.mubr.f32.mxu1 %v190_v17 }
  0x2d   : > { %667 = vmatmul.mubr.f32.vlgmr.msra.gmra.mxu0 %v175_v18  ;;  %691 = vmatmul.mubr.f32.vlgmr.msra.gmra.mxu1 %v191_v19 }
  0x2e   : > { %669 = vmatprep.mubr.f32.mxu0 %v176_v20  ;;  %693 = vmatprep.mubr.f32.mxu1 %v192_v21 }
  0x31   : > { %670 = vmatmul.mubr.f32.gmra.mxu0 %v177_v22  ;;  %694 = vmatmul.mubr.f32.gmra.mxu1 %v193_v23 }
  0x32   : > { %672 = vmatprep.mubr.f32.mxu0 %v178_v24  ;;  %696 = vmatprep.mubr.f32.mxu1 %v194_v25 }
  0x35   : > { %673 = vmatmul.mubr.f32.gmra.mxu0 %v179_v26  ;;  %697 = vmatmul.mubr.f32.gmra.mxu1 %v195_v27 }
  0x36   : > { %675 = vmatprep.mubr.f32.mxu0 %v180_v28  ;;  %699 = vmatprep.mubr.f32.mxu1 %v196_v29 }
  0x39   : > { %676 = vmatmul.mubr.f32.gmra.mxu0 %v181_v30  ;;  %700 = vmatmul.mubr.f32.gmra.mxu1 %v197_v31 }
  0x3a   : > { %678 = vmatprep.mubr.f32.mxu0 %v182_v32  ;;  %702 = vmatprep.mubr.f32.mxu1 %v198_v33 }
  0x3d   : > { %679 = vmatmul.mubr.f32.gmra.mxu0 %v183_v34  ;;  %703 = vmatmul.mubr.f32.gmra.mxu1 %v199_v35 }
  0x3e   : > { %681 = vmatprep.mubr.f32.mxu0 %v184_v36  ;;  %705 = vmatprep.mubr.f32.mxu1 %v200_v37 }
  0x41   : > { %682 = vmatmul.mubr.f32.gmra.mxu0 %v185_v38  ;;  %706 = vmatmul.mubr.f32.gmra.mxu1 %v201_v39 }
  0x42   : > { %684 = vmatprep.mubr.f32.mxu0 %v186_v40  ;;  %708 = vmatprep.mubr.f32.mxu1 %v202_v41 }
  0x45   : > { %685 = vmatmul.mubr.f32.gmra.mxu0 %v187_v42  ;;  %709 = vmatmul.mubr.f32.gmra.mxu1 %v203_v43 }
  0x46   : > { %687 = vmatprep.mubr.f32.mxu0 %v188_v44  ;;  %711 = vmatprep.mubr.f32.mxu1 %v204_v45 }
  0x49   : > { %688 = vmatmul.mubr.f32.gmra.mxu0 %v189_v46  ;;  %712 = vmatmul.mubr.f32.gmra.mxu1 %v205_v47 }
  0xed   : > { %v668_v49 = vpop.f32.mrf.mxu0  ;;  %v692_v50 = vpop.f32.mrf.mxu1 }
  0xee   : > { %v301_v51 = vadd.f32 %v668_v49, %v885_v48  ;;  %v381_v52 = vadd.f32 %v692_v50, %v885_v48 }
  0xef   : > { %v295_v53 = vpop.f32.mrf.mxu0  ;;  %v375_v54 = vpop.f32.mrf.mxu1 }
  0xf0   : > { %v455_v55 = vmax.f32 %v301_v51, 0.0  ;;  %v471_v56 = vmax.f32 %v381_v52, 0.0  ;;  %v296_v57 = vadd.f32 %v885_v48, %v295_v53  ;;  %v376_v58 = vadd.f32 %v885_v48, %v375_v54 }
  0xf1   : > { %v671_v59 = vpop.f32.mrf.mxu0  ;;  %v695_v60 = vpop.f32.mrf.mxu1 }
  0xf2   : > { %487 = vst [vmem:[%s894_s29 + $0x8] sm:$0xff] %v455_v55  ;;  %503 = vst [vmem:[%s894_s29 + $0x88] sm:$0xff] %v471_v56  ;;  %v454_v61 = vmax.f32 %v296_v57, 0.0  ;;  %v470_v62 = vmax.f32 %v376_v58, 0.0  ;;  %v311_v63 = vadd.f32 %v671_v59, %v885_v48  ;;  %v391_v0 = vadd.f32 %v695_v60, %v885_v48 }
  0xf3   : > { %v305_v1 = vpop.f32.mrf.mxu0  ;;  %v385_v2 = vpop.f32.mrf.mxu1 }
  0xf4   : > { %486 = vst [vmem:[%s894_s29] sm:$0xff] %v454_v61  ;;  %502 = vst [vmem:[%s894_s29 + $0x80] sm:$0xff] %v470_v62  ;;  %v457_v3 = vmax.f32 %v311_v63, 0.0  ;;  %v473_v4 = vmax.f32 %v391_v0, 0.0  ;;  %v306_v5 = vadd.f32 %v885_v48, %v305_v1  ;;  %v386_v6 = vadd.f32 %v885_v48, %v385_v2 }
  0xf5   : > { %v674_v7 = vpop.f32.mrf.mxu0  ;;  %v698_v8 = vpop.f32.mrf.mxu1 }
  0xf6   : > { %489 = vst [vmem:[%s894_s29 + $0x18] sm:$0xff] %v457_v3  ;;  %505 = vst [vmem:[%s894_s29 + $0x98] sm:$0xff] %v473_v4  ;;  %v456_v9 = vmax.f32 %v306_v5, 0.0  ;;  %v472_v10 = vmax.f32 %v386_v6, 0.0  ;;  %v321_v11 = vadd.f32 %v674_v7, %v885_v48  ;;  %v401_v12 = vadd.f32 %v698_v8, %v885_v48 }
  0xf7   : > { %v315_v13 = vpop.f32.mrf.mxu0  ;;  %v395_v14 = vpop.f32.mrf.mxu1 }
  0xf8   : > { %488 = vst [vmem:[%s894_s29 + $0x10] sm:$0xff] %v456_v9  ;;  %504 = vst [vmem:[%s894_s29 + $0x90] sm:$0xff] %v472_v10  ;;  %v459_v15 = vmax.f32 %v321_v11, 0.0  ;;  %v475_v16 = vmax.f32 %v401_v12, 0.0  ;;  %v316_v17 = vadd.f32 %v885_v48, %v315_v13  ;;  %v396_v18 = vadd.f32 %v885_v48, %v395_v14 }
  0xf9   : > { %v677_v19 = vpop.f32.mrf.mxu0  ;;  %v701_v20 = vpop.f32.mrf.mxu1 }
  0xfa   : > { %491 = vst [vmem:[%s894_s29 + $0x28] sm:$0xff] %v459_v15  ;;  %507 = vst [vmem:[%s894_s29 + $0xa8] sm:$0xff] %v475_v16  ;;  %v458_v21 = vmax.f32 %v316_v17, 0.0  ;;  %v474_v22 = vmax.f32 %v396_v18, 0.0  ;;  %v331_v23 = vadd.f32 %v677_v19, %v885_v48  ;;  %v411_v24 = vadd.f32 %v701_v20, %v885_v48 }
  0xfb   : > { %v325_v25 = vpop.f32.mrf.mxu0  ;;  %v405_v26 = vpop.f32.mrf.mxu1 }
  0xfc   : > { %490 = vst [vmem:[%s894_s29 + $0x20] sm:$0xff] %v458_v21  ;;  %506 = vst [vmem:[%s894_s29 + $0xa0] sm:$0xff] %v474_v22  ;;  %v461_v27 = vmax.f32 %v331_v23, 0.0  ;;  %v477_v28 = vmax.f32 %v411_v24, 0.0  ;;  %v326_v29 = vadd.f32 %v885_v48, %v325_v25  ;;  %v406_v30 = vadd.f32 %v885_v48, %v405_v26 }
  0xfd   : > { %v680_v31 = vpop.f32.mrf.mxu0  ;;  %v704_v32 = vpop.f32.mrf.mxu1 }
  0xfe   : > { %493 = vst [vmem:[%s894_s29 + $0x38] sm:$0xff] %v461_v27  ;;  %509 = vst [vmem:[%s894_s29 + $0xb8] sm:$0xff] %v477_v28  ;;  %v460_v33 = vmax.f32 %v326_v29, 0.0  ;;  %v476_v34 = vmax.f32 %v406_v30, 0.0  ;;  %v341_v35 = vadd.f32 %v680_v31, %v885_v48  ;;  %v421_v36 = vadd.f32 %v704_v32, %v885_v48 }
  0xff   : > { %v335_v37 = vpop.f32.mrf.mxu0  ;;  %v415_v38 = vpop.f32.mrf.mxu1 }
 0x100   : > { %492 = vst [vmem:[%s894_s29 + $0x30] sm:$0xff] %v460_v33  ;;  %508 = vst [vmem:[%s894_s29 + $0xb0] sm:$0xff] %v476_v34  ;;  %v463_v39 = vmax.f32 %v341_v35, 0.0  ;;  %v479_v40 = vmax.f32 %v421_v36, 0.0  ;;  %v336_v41 = vadd.f32 %v885_v48, %v335_v37  ;;  %v416_v42 = vadd.f32 %v885_v48, %v415_v38 }
 0x101   : > { %v683_v43 = vpop.f32.mrf.mxu0  ;;  %v707_v44 = vpop.f32.mrf.mxu1 }
 0x102   : > { %495 = vst [vmem:[%s894_s29 + $0x48] sm:$0xff] %v463_v39  ;;  %511 = vst [vmem:[%s894_s29 + $0xc8] sm:$0xff] %v479_v40  ;;  %v462_v45 = vmax.f32 %v336_v41, 0.0  ;;  %v478_v46 = vmax.f32 %v416_v42, 0.0  ;;  %v351_v47 = vadd.f32 %v683_v43, %v885_v48  ;;  %v431_v49 = vadd.f32 %v707_v44, %v885_v48 }
 0x103   : > { %v345_v50 = vpop.f32.mrf.mxu0  ;;  %v425_v51 = vpop.f32.mrf.mxu1 }
 0x104   : > { %494 = vst [vmem:[%s894_s29 + $0x40] sm:$0xff] %v462_v45  ;;  %510 = vst [vmem:[%s894_s29 + $0xc0] sm:$0xff] %v478_v46  ;;  %v465_v52 = vmax.f32 %v351_v47, 0.0  ;;  %v481_v53 = vmax.f32 %v431_v49, 0.0  ;;  %v346_v54 = vadd.f32 %v885_v48, %v345_v50  ;;  %v426_v55 = vadd.f32 %v885_v48, %v425_v51 }
 0x105   : > { %v686_v56 = vpop.f32.mrf.mxu0  ;;  %v710_v57 = vpop.f32.mrf.mxu1 }
 0x106   : > { %497 = vst [vmem:[%s894_s29 + $0x58] sm:$0xff] %v465_v52  ;;  %513 = vst [vmem:[%s894_s29 + $0xd8] sm:$0xff] %v481_v53  ;;  %v464_v58 = vmax.f32 %v346_v54, 0.0  ;;  %v480_v59 = vmax.f32 %v426_v55, 0.0  ;;  %v361_v60 = vadd.f32 %v686_v56, %v885_v48  ;;  %v441_v61 = vadd.f32 %v710_v57, %v885_v48 }
 0x107   : > { %v355_v62 = vpop.f32.mrf.mxu0  ;;  %v435_v63 = vpop.f32.mrf.mxu1 }
 0x108   : > { %496 = vst [vmem:[%s894_s29 + $0x50] sm:$0xff] %v464_v58  ;;  %512 = vst [vmem:[%s894_s29 + $0xd0] sm:$0xff] %v480_v59  ;;  %v467_v0 = vmax.f32 %v361_v60, 0.0  ;;  %v483_v1 = vmax.f32 %v441_v61, 0.0  ;;  %v356_v2 = vadd.f32 %v885_v48, %v355_v62  ;;  %v436_v3 = vadd.f32 %v885_v48, %v435_v63 }
 0x109   : > { %v689_v4 = vpop.f32.mrf.mxu0  ;;  %v713_v5 = vpop.f32.mrf.mxu1 }
 0x10a   : > { %499 = vst [vmem:[%s894_s29 + $0x68] sm:$0xff] %v467_v0  ;;  %515 = vst [vmem:[%s894_s29 + $0xe8] sm:$0xff] %v483_v1  ;;  %v466_v6 = vmax.f32 %v356_v2, 0.0  ;;  %v482_v7 = vmax.f32 %v436_v3, 0.0  ;;  %v371_v8 = vadd.f32 %v689_v4, %v885_v48  ;;  %v451_v9 = vadd.f32 %v713_v5, %v885_v48 }
 0x10b   : > { %v365_v10 = vpop.f32.mrf.mxu0  ;;  %v445_v11 = vpop.f32.mrf.mxu1 }
 0x10c   : > { %498 = vst [vmem:[%s894_s29 + $0x60] sm:$0xff] %v466_v6  ;;  %514 = vst [vmem:[%s894_s29 + $0xe0] sm:$0xff] %v482_v7  ;;  %v469_v12 = vmax.f32 %v371_v8, 0.0  ;;  %v485_v13 = vmax.f32 %v451_v9, 0.0  ;;  %v366_v14 = vadd.f32 %v885_v48, %v365_v10  ;;  %v446_v15 = vadd.f32 %v885_v48, %v445_v11 }
 0x10e   : > { %501 = vst [vmem:[%s894_s29 + $0x78] sm:$0xff] %v469_v12  ;;  %517 = vst [vmem:[%s894_s29 + $0xf8] sm:$0xff] %v485_v13  ;;  %v468_v16 = vmax.f32 %v366_v14, 0.0  ;;  %v484_v17 = vmax.f32 %v446_v15, 0.0 }
 0x110   : > { %500 = vst [vmem:[%s894_s29 + $0x70] sm:$0xff] %v468_v16  ;;  %516 = vst [vmem:[%s894_s29 + $0xf0] sm:$0xff] %v484_v17 }
 0x111 PF: > { %s13_s12 = sadd.s32 1, %s760_s12  }
 0x112   : > { %p10_p4 = scmp.ge.s32.totalorder %s13_s12, 4  }
 0x114   :  { %12 = sbr.rel (!%p10_p4) target bundleno = 1 (0x1), region = 62 }

// kernel: visual_encoder_forward.11
= control target key start
LH: loop header
LB: loop body
LE: loop exit
PB: predicated region body
PF: predicated region fallthrough
CT: control target
= control target key end

     0   :  { %s2488_s12 = smov 0   ;;  %s3377_s0 = inlined_call_operand.vmem [shape: f32[2,512,128], index: 0, kind: input, shape index: {}]   ;;  %s3378_s1 = inlined_call_operand.vmem [shape: f32[640,128], index: 1, kind: input, shape index: {}]   ;;  %s3379_s2 = inlined_call_operand.vmem [shape: f32[1,128], index: 2, kind: input, shape index: {}]   ;;  %s3380_s3 = inlined_call_operand.vmem [shape: f32[2,256,128], index: 3, kind: output, shape index: {}]  }
   0x1 LB: > { %s1766_s13 = sadd.s32 4294967295, %s2466_s12   ;;  %p1770_p0 = scmp.ge.s32.totalorder %s2466_s12, 1  ;;  %s2466_s12 = sphi %s2488_s12, %s13_s12  }
   0x2   : > { %p137_p1 = scmp.lt.s32.totalorder %s2466_s12, 3 }
   0x4   : > { %p138_p2 = pnand %p1770_p0, %p137_p1 }
   0x6   : > { %141 = sbr.rel (%p138_p2) target bundleno = 420 (0x1a4), region = 32 }
   0xb   : > { %v242_v0 = vld [vmem:[%s3378_s1 + $0xf8] sm:$0xff]  ;;  %v241_v1 = vld [vmem:[%s3378_s1 + $0xf0] sm:$0xff]  ;;  %v240_v2 = vld [vmem:[%s3378_s1 + $0xe8] sm:$0xff]  ;;  %p161_p3 = scmp.lt.s32.totalorder %s1766_s13, 1 }
   0xc   : > { %2420 = vmatprep.subr.mxu1 %v242_v0  ;;  %2020 = vmatprep.subr.mxu0 %v242_v0  ;;  %v239_v3 = vld [vmem:[%s3378_s1 + $0xe0] sm:$0xff]  ;;  %v238_v4 = vld [vmem:[%s3378_s1 + $0xd8] sm:$0xff]  ;;  %v237_v5 = vld [vmem:[%s3378_s1 + $0xd0] sm:$0xff] }
   0xd   : > { %2436 = vmatpush3.msra.mxu1 %v242_v0  ;;  %2021 = vmatpush3.msra.mxu0 %v242_v0  ;;  %v236_v6 = vld [vmem:[%s3378_s1 + $0xc8] sm:$0xff]  ;;  %v235_v7 = vld [vmem:[%s3378_s1 + $0xc0] sm:$0xff]  ;;  %v234_v8 = vld [vmem:[%s3378_s1 + $0xb8] sm:$0xff]  ;;  %s3462_s13 = smov (!%p161_p3, %s1766_s13), 1 }
   0xe   : > { %2421 = vmatprep.subr.mxu1 %v241_v1  ;;  %2022 = vmatprep.subr.mxu0 %v241_v1  ;;  %v233_v9 = vld [vmem:[%s3378_s1 + $0xb0] sm:$0xff]  ;;  %v232_v10 = vld [vmem:[%s3378_s1 + $0xa8] sm:$0xff]  ;;  %v231_v11 = vld [vmem:[%s3378_s1 + $0xa0] sm:$0xff]  ;;  %s1778_s15 = sshll.u32 %s3462_s13, 9  ;;  %s1779_s7 = sshll.u32 %s3462_s13, 8 }
   0xf   : > { %2437 = vmatpush3.msra.mxu1 %v241_v1  ;;  %2023 = vmatpush3.msra.mxu0 %v241_v1  ;;  %v230_v12 = vld [vmem:[%s3378_s1 + $0x98] sm:$0xff]  ;;  %v229_v13 = vld [vmem:[%s3378_s1 + $0x90] sm:$0xff]  ;;  %v228_v14 = vld [vmem:[%s3378_s1 + $0x88] sm:$0xff]  ;;  %s2551_s22 = scalar_lea.vmem %s3377_s0, %s1778_s15  ;;  %s3232_s9 = scalar_lea.vmem %s3380_s3, %s1779_s7 }
  0x10   : > { %2422 = vmatprep.subr.mxu1 %v240_v2  ;;  %2024 = vmatprep.subr.mxu0 %v240_v2  ;;  %v227_v15 = vld [vmem:[%s3378_s1 + $0x80] sm:$0xff]  ;;  %v2563_v18 = vld [vmem:[%s2551_s22 + $0xc8] sm:$0xff]  ;;  %v218_v19 = vld [vmem:[%s3378_s1 + $0x78] sm:$0xff] }
  0x11   : > { %2438 = vmatpush3.msra.mxu1 %v240_v2  ;;  %2025 = vmatpush3.msra.mxu0 %v240_v2  ;;  %v2557_v16 = vld [vmem:[%s2551_s22 + $0xc0] sm:$0xff]  ;;  %v2570_v20 = vld [vmem:[%s2551_s22 + $0x48] sm:$0xff]  ;;  %v740_v21 = vld [vmem:[%s3378_s1 + $0x178] sm:$0xff] }
  0x12   : > { %2423 = vmatprep.subr.mxu1 %v239_v3  ;;  %2026 = vmatprep.subr.mxu0 %v239_v3  ;;  %v2560_v17 = vld [vmem:[%s2551_s22 + $0x40] sm:$0xff]  ;;  %v217_v22 = vld [vmem:[%s3378_s1 + $0x70] sm:$0xff]  ;;  %v2591_v26 = vld [vmem:[%s2551_s22 + $0xd8] sm:$0xff] }
  0x13   : > { %2439 = vmatpush3.msra.mxu1 %v239_v3  ;;  %2027 = vmatpush3.msra.mxu0 %v239_v3  ;;  %v2581_v23 = vld [vmem:[%s2551_s22 + $0xd0] sm:$0xff]  ;;  %v216_v27 = vld [vmem:[%s3378_s1 + $0x68] sm:$0xff]  ;;  %v2598_v28 = vld [vmem:[%s2551_s22 + $0x58] sm:$0xff] }
  0x14   : > { %2424 = vmatprep.subr.mxu1 %v238_v4  ;;  %2028 = vmatprep.subr.mxu0 %v238_v4  ;;  %v739_v24 = vld [vmem:[%s3378_s1 + $0x170] sm:$0xff]  ;;  %v738_v29 = vld [vmem:[%s3378_s1 + $0x168] sm:$0xff]  ;;  %v215_v30 = vld [vmem:[%s3378_s1 + $0x60] sm:$0xff] }
  0x15   : > { %2440 = vmatpush3.msra.mxu1 %v238_v4  ;;  %2029 = vmatpush3.msra.mxu0 %v238_v4  ;;  %v2588_v25 = vld [vmem:[%s2551_s22 + $0x50] sm:$0xff]  ;;  %v2609_v31 = vld [vmem:[%s2551_s22 + $0xe0] sm:$0xff]  ;;  %v2619_v34 = vld [vmem:[%s2551_s22 + $0xe8] sm:$0xff] }
  0x16   : > { %2425 = vmatprep.subr.mxu1 %v237_v5  ;;  %2030 = vmatprep.subr.mxu0 %v237_v5  ;;  %v737_v32 = vld [vmem:[%s3378_s1 + $0x160] sm:$0xff]  ;;  %v214_v35 = vld [vmem:[%s3378_s1 + $0x58] sm:$0xff]  ;;  %v2626_v36 = vld [vmem:[%s2551_s22 + $0x68] sm:$0xff] }
  0x17   : > { %2441 = vmatpush3.msra.mxu1 %v237_v5  ;;  %2031 = vmatpush3.msra.mxu0 %v237_v5  ;;  %v2616_v33 = vld [vmem:[%s2551_s22 + $0x60] sm:$0xff]  ;;  %v736_v37 = vld [vmem:[%s3378_s1 + $0x158] sm:$0xff]  ;;  %v213_v38 = vld [vmem:[%s3378_s1 + $0x50] sm:$0xff] }
  0x18   : > { %2426 = vmatprep.subr.mxu1 %v236_v6  ;;  %2032 = vmatprep.subr.mxu0 %v236_v6  ;;  %v2637_v39 = vld [vmem:[%s2551_s22 + $0xf0] sm:$0xff]  ;;  %v2647_v42 = vld [vmem:[%s2551_s22 + $0xf8] sm:$0xff]  ;;  %v212_v43 = vld [vmem:[%s3378_s1 + $0x48] sm:$0xff] }
  0x19   : > { %2442 = vmatpush3.msra.mxu1 %v236_v6  ;;  %2033 = vmatpush3.msra.mxu0 %v236_v6  ;;  %v735_v40 = vld [vmem:[%s3378_s1 + $0x150] sm:$0xff]  ;;  %v2654_v44 = vld [vmem:[%s2551_s22 + $0x78] sm:$0xff]  ;;  %v734_v45 = vld [vmem:[%s3378_s1 + $0x148] sm:$0xff] }
  0x1a   : > { %2427 = vmatprep.subr.mxu1 %v235_v7  ;;  %2034 = vmatprep.subr.mxu0 %v235_v7  ;;  %v2644_v41 = vld [vmem:[%s2551_s22 + $0x70] sm:$0xff]  ;;  %v211_v46 = vld [vmem:[%s3378_s1 + $0x40] sm:$0xff]  ;;  %v2675_v50 = vld [vmem:[%s2551_s22 + $0x108] sm:$0xff] }
  0x1b   : > { %2443 = vmatpush3.msra.mxu1 %v235_v7  ;;  %2035 = vmatpush3.msra.mxu0 %v235_v7  ;;  %v2665_v47 = vld [vmem:[%s2551_s22 + $0x100] sm:$0xff]  ;;  %v210_v51 = vld [vmem:[%s3378_s1 + $0x38] sm:$0xff]  ;;  %v2682_v52 = vld [vmem:[%s2551_s22 + $0x88] sm:$0xff] }
  0x1c   : > { %2428 = vmatprep.subr.mxu1 %v234_v8  ;;  %2036 = vmatprep.subr.mxu0 %v234_v8  ;;  %v733_v48 = vld [vmem:[%s3378_s1 + $0x140] sm:$0xff]  ;;  %v732_v53 = vld [vmem:[%s3378_s1 + $0x138] sm:$0xff]  ;;  %v209_v54 = vld [vmem:[%s3378_s1 + $0x30] sm:$0xff] }
  0x1d   : > { %2444 = vmatpush3.msra.mxu1 %v234_v8  ;;  %2037 = vmatpush3.msra.mxu0 %v234_v8  ;;  %v2672_v49 = vld [vmem:[%s2551_s22 + $0x80] sm:$0xff]  ;;  %v2693_v55 = vld [vmem:[%s2551_s22 + $0x110] sm:$0xff]  ;;  %v2703_v58 = vld [vmem:[%s2551_s22 + $0x118] sm:$0xff] }
  0x1e   : > { %2429 = vmatprep.subr.mxu1 %v233_v9  ;;  %2038 = vmatprep.subr.mxu0 %v233_v9  ;;  %v731_v56 = vld [vmem:[%s3378_s1 + $0x130] sm:$0xff]  ;;  %v208_v59 = vld [vmem:[%s3378_s1 + $0x28] sm:$0xff]  ;;  %v2710_v60 = vld [vmem:[%s2551_s22 + $0x98] sm:$0xff] }
  0x1f   : > { %2445 = vmatpush3.msra.mxu1 %v233_v9  ;;  %2039 = vmatpush3.msra.mxu0 %v233_v9  ;;  %v2700_v57 = vld [vmem:[%s2551_s22 + $0x90] sm:$0xff]  ;;  %v730_v61 = vld [vmem:[%s3378_s1 + $0x128] sm:$0xff]  ;;  %v207_v62 = vld [vmem:[%s3378_s1 + $0x20] sm:$0xff] }
  0x20   : > { %2430 = vmatprep.subr.mxu1 %v232_v10  ;;  %2040 = vmatprep.subr.mxu0 %v232_v10  ;;  %v2721_v63 = vld [vmem:[%s2551_s22 + $0x120] sm:$0xff]  ;;  %v2731_v2 = vld [vmem:[%s2551_s22 + $0x128] sm:$0xff]  ;;  %v206_v3 = vld [vmem:[%s3378_s1 + $0x18] sm:$0xff] }
  0x21   : > { %2446 = vmatpush3.msra.mxu1 %v232_v10  ;;  %2041 = vmatpush3.msra.mxu0 %v232_v10  ;;  %v729_v0 = vld [vmem:[%s3378_s1 + $0x120] sm:$0xff]  ;;  %v2738_v4 = vld [vmem:[%s2551_s22 + $0xa8] sm:$0xff]  ;;  %v728_v5 = vld [vmem:[%s3378_s1 + $0x118] sm:$0xff] }
  0x22   : > { %2431 = vmatprep.subr.mxu1 %v231_v11  ;;  %2042 = vmatprep.subr.mxu0 %v231_v11  ;;  %v2728_v1 = vld [vmem:[%s2551_s22 + $0xa0] sm:$0xff]  ;;  %v205_v6 = vld [vmem:[%s3378_s1 + $0x10] sm:$0xff]  ;;  %v2759_v10 = vld [vmem:[%s2551_s22 + $0x138] sm:$0xff] }
  0x23   : > { %2447 = vmatpush3.msra.mxu1 %v231_v11  ;;  %2043 = vmatpush3.msra.mxu0 %v231_v11  ;;  %v2749_v7 = vld [vmem:[%s2551_s22 + $0x130] sm:$0xff]  ;;  %v204_v11 = vld [vmem:[%s3378_s1 + $0x8] sm:$0xff] }
  0x24   : > { %2432 = vmatprep.subr.mxu1 %v230_v12  ;;  %2044 = vmatprep.subr.mxu0 %v230_v12  ;;  %v727_v8 = vld [vmem:[%s3378_s1 + $0x110] sm:$0xff] }
  0x25   : > { %2448 = vmatpush3.msra.mxu1 %v230_v12  ;;  %2045 = vmatpush3.msra.mxu0 %v230_v12  ;;  %v2756_v9 = vld [vmem:[%s2551_s22 + $0xb0] sm:$0xff]  ;;  %v2766_v12 = vld [vmem:[%s2551_s22 + $0xb8] sm:$0xff] }
  0x26   : > { %2433 = vmatprep.subr.mxu1 %v229_v13  ;;  %2046 = vmatprep.subr.mxu0 %v229_v13 }
  0x27   : > { %2449 = vmatpush3.msra.mxu1 %v229_v13  ;;  %2047 = vmatpush3.msra.mxu0 %v229_v13  ;;  %v726_v13 = vld [vmem:[%s3378_s1 + $0x108] sm:$0xff] }
  0x28   : > { %2434 = vmatprep.subr.mxu1 %v228_v14  ;;  %2048 = vmatprep.subr.mxu0 %v228_v14 }
  0x29   : > { %2450 = vmatpush3.msra.mxu1 %v228_v14  ;;  %2049 = vmatpush3.msra.mxu0 %v228_v14  ;;  %v203_v14 = vld [vmem:[%s3378_s1] sm:$0xff] }
  0x2a   : > { %2435 = vmatprep.subr.mxu1 %v227_v15  ;;  %2050 = vmatprep.subr.mxu0 %v227_v15 }
  0x2b   : > { %2451 = vmatpush3.msra.mxu1 %v227_v15  ;;  %2076 = vmatprep.mubr.f32.mxu1 %v2557_v16 }
  0x2c   : > { %2051 = vmatpush3.msra.mxu0 %v227_v15  ;;  %2052 = vmatprep.mubr.f32.mxu0 %v2560_v17  ;;  %v171_v15 = vld [vmem:[%s2551_s22] sm:$0xff] }
  0x2d   : > { %2077 = vmatmul.mubr.f32.vlgmr.msra.gmra.mxu1 %v2563_v18  ;;  %2100 = vmatprep.subr.mxu1 %v218_v19 }
  0x2e   : > { %2053 = vmatmul.mubr.f32.vlgmr.msra.gmra.mxu0 %v2570_v20  ;;  %2101 = vmatpush3.msra.mxu1 %v218_v19  ;;  %v725_v19 = vld [vmem:[%s3378_s1 + $0x100] sm:$0xff] }
  0x2f   : > { %2180 = vmatprep.subr.mxu0 %v740_v21  ;;  %2102 = vmatprep.subr.mxu1 %v217_v22 }
  0x30   : > { %2181 = vmatpush3.msra.mxu0 %v740_v21  ;;  %2079 = vmatprep.mubr.f32.mxu1 %v2581_v23  ;;  %v172_v21 = vld [vmem:[%s2551_s22 + $0x8] sm:$0xff] }
  0x31   : > { %2103 = vmatpush3.msra.mxu1 %v217_v22  ;;  %2182 = vmatprep.subr.mxu0 %v739_v24  ;;  %v1045_v22 = vld [vmem:[%s3378_s1 + $0x1f8] sm:$0xff] }
  0x32   : > { %2055 = vmatprep.mubr.f32.mxu0 %v2588_v25  ;;  %2080 = vmatmul.mubr.f32.gmra.mxu1 %v2591_v26 }
  0x33   : > { %2104 = vmatprep.subr.mxu1 %v216_v27  ;;  %2183 = vmatpush3.msra.mxu0 %v739_v24  ;;  %v1350_v24 = vld [vmem:[%s3378_s1 + $0x278] sm:$0xff] }
  0x34   : > { %2056 = vmatmul.mubr.f32.gmra.mxu0 %v2598_v28  ;;  %2105 = vmatpush3.msra.mxu1 %v216_v27  ;;  %v173_v27 = vld [vmem:[%s2551_s22 + $0x10] sm:$0xff] }
  0x35   : > { %2184 = vmatprep.subr.mxu0 %v738_v29  ;;  %2106 = vmatprep.subr.mxu1 %v215_v30 }
  0x36   : > { %2185 = vmatpush3.msra.mxu0 %v738_v29  ;;  %2082 = vmatprep.mubr.f32.mxu1 %v2609_v31  ;;  %v174_v29 = vld [vmem:[%s2551_s22 + $0x18] sm:$0xff] }
  0x37   : > { %2107 = vmatpush3.msra.mxu1 %v215_v30  ;;  %2186 = vmatprep.subr.mxu0 %v737_v32  ;;  %v1044_v30 = vld [vmem:[%s3378_s1 + $0x1f0] sm:$0xff] }
  0x38   : > { %2058 = vmatprep.mubr.f32.mxu0 %v2616_v33  ;;  %2083 = vmatmul.mubr.f32.gmra.mxu1 %v2619_v34 }
  0x39   : > { %2108 = vmatprep.subr.mxu1 %v214_v35  ;;  %2187 = vmatpush3.msra.mxu0 %v737_v32  ;;  %v1349_v32 = vld [vmem:[%s3378_s1 + $0x270] sm:$0xff] }
  0x3a   : > { %2059 = vmatmul.mubr.f32.gmra.mxu0 %v2626_v36  ;;  %2109 = vmatpush3.msra.mxu1 %v214_v35  ;;  %v175_v35 = vld [vmem:[%s2551_s22 + $0x20] sm:$0xff] }
  0x3b   : > { %2188 = vmatprep.subr.mxu0 %v736_v37  ;;  %2110 = vmatprep.subr.mxu1 %v213_v38 }
  0x3c   : > { %2189 = vmatpush3.msra.mxu0 %v736_v37  ;;  %2085 = vmatprep.mubr.f32.mxu1 %v2637_v39  ;;  %v176_v37 = vld [vmem:[%s2551_s22 + $0x28] sm:$0xff] }
  0x3d   : > { %2111 = vmatpush3.msra.mxu1 %v213_v38  ;;  %2190 = vmatprep.subr.mxu0 %v735_v40  ;;  %v1043_v38 = vld [vmem:[%s3378_s1 + $0x1e8] sm:$0xff] }
  0x3e   : > { %2061 = vmatprep.mubr.f32.mxu0 %v2644_v41  ;;  %2086 = vmatmul.mubr.f32.gmra.mxu1 %v2647_v42 }
  0x3f   : > { %2112 = vmatprep.subr.mxu1 %v212_v43  ;;  %2191 = vmatpush3.msra.mxu0 %v735_v40  ;;  %v1348_v40 = vld [vmem:[%s3378_s1 + $0x268] sm:$0xff] }
  0x40   : > { %2062 = vmatmul.mubr.f32.gmra.mxu0 %v2654_v44  ;;  %2113 = vmatpush3.msra.mxu1 %v212_v43  ;;  %v177_v43 = vld [vmem:[%s2551_s22 + $0x30] sm:$0xff] }
  0x41   : > { %2192 = vmatprep.subr.mxu0 %v734_v45  ;;  %2114 = vmatprep.subr.mxu1 %v211_v46 }
  0x42   : > { %2193 = vmatpush3.msra.mxu0 %v734_v45  ;;  %2088 = vmatprep.mubr.f32.mxu1 %v2665_v47  ;;  %v178_v45 = vld [vmem:[%s2551_s22 + $0x38] sm:$0xff] }
  0x43   : > { %2115 = vmatpush3.msra.mxu1 %v211_v46  ;;  %2194 = vmatprep.subr.mxu0 %v733_v48  ;;  %v1042_v46 = vld [vmem:[%s3378_s1 + $0x1e0] sm:$0xff] }
  0x44   : > { %2064 = vmatprep.mubr.f32.mxu0 %v2672_v49  ;;  %2089 = vmatmul.mubr.f32.gmra.mxu1 %v2675_v50 }
  0x45   : > { %2116 = vmatprep.subr.mxu1 %v210_v51  ;;  %2195 = vmatpush3.msra.mxu0 %v733_v48  ;;  %v1347_v48 = vld [vmem:[%s3378_s1 + $0x260] sm:$0xff] }
  0x46   : > { %2065 = vmatmul.mubr.f32.gmra.mxu0 %v2682_v52  ;;  %2117 = vmatpush3.msra.mxu1 %v210_v51  ;;  %v1041_v51 = vld [vmem:[%s3378_s1 + $0x1d8] sm:$0xff] }
  0x47   : > { %2196 = vmatprep.subr.mxu0 %v732_v53  ;;  %2118 = vmatprep.subr.mxu1 %v209_v54 }
  0x48   : > { %2197 = vmatpush3.msra.mxu0 %v732_v53  ;;  %2091 = vmatprep.mubr.f32.mxu1 %v2693_v55  ;;  %v1346_v53 = vld [vmem:[%s3378_s1 + $0x258] sm:$0xff] }
  0x49   : > { %2119 = vmatpush3.msra.mxu1 %v209_v54  ;;  %2198 = vmatprep.subr.mxu0 %v731_v56  ;;  %v1040_v54 = vld [vmem:[%s3378_s1 + $0x1d0] sm:$0xff] }
  0x4a   : > { %2067 = vmatprep.mubr.f32.mxu0 %v2700_v57  ;;  %2092 = vmatmul.mubr.f32.gmra.mxu1 %v2703_v58 }
  0x4b   : > { %2120 = vmatprep.subr.mxu1 %v208_v59  ;;  %2199 = vmatpush3.msra.mxu0 %v731_v56  ;;  %v1340_v56 = vld [vmem:[%s3378_s1 + $0x228] sm:$0xff] }
  0x4c   : > { %2068 = vmatmul.mubr.f32.gmra.mxu0 %v2710_v60  ;;  %2121 = vmatpush3.msra.mxu1 %v208_v59  ;;  %v1339_v59 = vld [vmem:[%s3378_s1 + $0x220] sm:$0xff] }
  0x4d   : > { %2200 = vmatprep.subr.mxu0 %v730_v61  ;;  %2122 = vmatprep.subr.mxu1 %v207_v62 }
  0x4e   : > { %2201 = vmatpush3.msra.mxu0 %v730_v61  ;;  %2094 = vmatprep.mubr.f32.mxu1 %v2721_v63  ;;  %v1033_v61 = vld [vmem:[%s3378_s1 + $0x198] sm:$0xff] }
  0x4f   : > { %2123 = vmatpush3.msra.mxu1 %v207_v62  ;;  %2202 = vmatprep.subr.mxu0 %v729_v0  ;;  %v2908_v62 = vld [vmem:[%s2551_s22 + $0x148] sm:$0xff] }
  0x50   : > { %2070 = vmatprep.mubr.f32.mxu0 %v2728_v1  ;;  %2095 = vmatmul.mubr.f32.gmra.mxu1 %v2731_v2 }
  0x51   : > { %2124 = vmatprep.subr.mxu1 %v206_v3  ;;  %2203 = vmatpush3.msra.mxu0 %v729_v0  ;;  %v1338_v0 = vld [vmem:[%s3378_s1 + $0x218] sm:$0xff] }
  0x52   : > { %2071 = vmatmul.mubr.f32.gmra.mxu0 %v2738_v4  ;;  %2125 = vmatpush3.msra.mxu1 %v206_v3  ;;  %v1032_v3 = vld [vmem:[%s3378_s1 + $0x190] sm:$0xff] }
  0x53   : > { %2204 = vmatprep.subr.mxu0 %v728_v5  ;;  %2126 = vmatprep.subr.mxu1 %v205_v6 }
  0x54   : > { %2205 = vmatpush3.msra.mxu0 %v728_v5  ;;  %2097 = vmatprep.mubr.f32.mxu1 %v2749_v7  ;;  %v1337_v5 = vld [vmem:[%s3378_s1 + $0x210] sm:$0xff] }
  0x55   : > { %2127 = vmatpush3.msra.mxu1 %v205_v6  ;;  %2206 = vmatprep.subr.mxu0 %v727_v8  ;;  %v2933_v6 = vld [vmem:[%s2551_s22 + $0x160] sm:$0xff] }
  0x56   : > { %2073 = vmatprep.mubr.f32.mxu0 %v2756_v9  ;;  %2098 = vmatmul.mubr.f32.gmra.mxu1 %v2759_v10 }
  0x57   : > { %2128 = vmatprep.subr.mxu1 %v204_v11  ;;  %2207 = vmatpush3.msra.mxu0 %v727_v8  ;;  %v1031_v8 = vld [vmem:[%s3378_s1 + $0x188] sm:$0xff] }
  0x58   : > { %2074 = vmatmul.mubr.f32.gmra.mxu0 %v2766_v12  ;;  %2129 = vmatpush3.msra.mxu1 %v204_v11  ;;  %v1336_v11 = vld [vmem:[%s3378_s1 + $0x208] sm:$0xff] }
  0x59   : > { %2208 = vmatprep.subr.mxu0 %v726_v13  ;;  %2130 = vmatprep.subr.mxu1 %v203_v14 }
  0x5a   : > { %2209 = vmatpush3.msra.mxu0 %v726_v13  ;;  %2131 = vmatpush3.msra.mxu1 %v203_v14  ;;  %v1030_v13 = vld [vmem:[%s3378_s1 + $0x180] sm:$0xff]  ;;  %v2956_v14 = vld [vmem:[%s2551_s22 + $0x178] sm:$0xff] }
  0x5b   : > { %2132 = vmatprep.mubr.f32.mxu1 %v171_v15  ;;  %2210 = vmatprep.subr.mxu0 %v725_v19  ;;  %v1335_v15 = vld [vmem:[%s3378_s1 + $0x200] sm:$0xff] }
  0x5c   : > { %2133 = vmatmul.mubr.f32.vlgmr.msra.gmra.mxu1 %v172_v21  ;;  %2211 = vmatpush3.msra.mxu0 %v725_v19 }
  0x5d   : > { %2212 = vmatprep.mubr.f32.mxu0 %v2672_v49  ;;  %2260 = vmatprep.subr.mxu1 %v1045_v22 }
  0x5e   : > { %2213 = vmatmul.mubr.f32.vlgmr.msra.gmra.mxu0 %v2682_v52  ;;  %2261 = vmatpush3.msra.mxu1 %v1045_v22 }
  0x5f   : > { %2340 = vmatprep.subr.mxu0 %v1350_v24  ;;  %2135 = vmatprep.mubr.f32.mxu1 %v173_v27 }
  0x60   : > { %2341 = vmatpush3.msra.mxu0 %v1350_v24  ;;  %2136 = vmatmul.mubr.f32.gmra.mxu1 %v174_v29 }
  0x61   : > { %2215 = vmatprep.mubr.f32.mxu0 %v2700_v57  ;;  %2262 = vmatprep.subr.mxu1 %v1044_v30 }
  0x62   : > { %2216 = vmatmul.mubr.f32.gmra.mxu0 %v2710_v60  ;;  %2263 = vmatpush3.msra.mxu1 %v1044_v30 }
  0x63   : > { %2342 = vmatprep.subr.mxu0 %v1349_v32  ;;  %2138 = vmatprep.mubr.f32.mxu1 %v175_v35 }
  0x64   : > { %2343 = vmatpush3.msra.mxu0 %v1349_v32  ;;  %2139 = vmatmul.mubr.f32.gmra.mxu1 %v176_v37 }
  0x65   : > { %2218 = vmatprep.mubr.f32.mxu0 %v2728_v1  ;;  %2264 = vmatprep.subr.mxu1 %v1043_v38 }
  0x66   : > { %2219 = vmatmul.mubr.f32.gmra.mxu0 %v2738_v4  ;;  %2265 = vmatpush3.msra.mxu1 %v1043_v38 }
  0x67   : > { %2344 = vmatprep.subr.mxu0 %v1348_v40  ;;  %2141 = vmatprep.mubr.f32.mxu1 %v177_v43 }
  0x68   : > { %2345 = vmatpush3.msra.mxu0 %v1348_v40  ;;  %2142 = vmatmul.mubr.f32.gmra.mxu1 %v178_v45 }
  0x69   : > { %2221 = vmatprep.mubr.f32.mxu0 %v2756_v9  ;;  %2266 = vmatprep.subr.mxu1 %v1042_v46 }
  0x6a   : > { %2222 = vmatmul.mubr.f32.gmra.mxu0 %v2766_v12  ;;  %2267 = vmatpush3.msra.mxu1 %v1042_v46 }
  0x6b   : > { %2346 = vmatprep.subr.mxu0 %v1347_v48  ;;  %2144 = vmatprep.mubr.f32.mxu1 %v2560_v17  ;;  %v1345_v17 = vld [vmem:[%s3378_s1 + $0x250] sm:$0xff] }
  0x6c   : > { %2347 = vmatpush3.msra.mxu0 %v1347_v48  ;;  %2145 = vmatmul.mubr.f32.gmra.mxu1 %v2570_v20  ;;  %v1039_v20 = vld [vmem:[%s3378_s1 + $0x1c8] sm:$0xff] }
  0x6d   : > { %2224 = vmatprep.mubr.f32.mxu0 %v2557_v16  ;;  %2268 = vmatprep.subr.mxu1 %v1041_v51 }
  0x6e   : > { %2225 = vmatmul.mubr.f32.gmra.mxu0 %v2563_v18  ;;  %2269 = vmatpush3.msra.mxu1 %v1041_v51 }
  0x6f   : > { %2348 = vmatprep.subr.mxu0 %v1346_v53  ;;  %2147 = vmatprep.mubr.f32.mxu1 %v2588_v25  ;;  %v1344_v25 = vld [vmem:[%s3378_s1 + $0x248] sm:$0xff] }
  0x70   : > { %2349 = vmatpush3.msra.mxu0 %v1346_v53  ;;  %2148 = vmatmul.mubr.f32.gmra.mxu1 %v2598_v28  ;;  %v1038_v28 = vld [vmem:[%s3378_s1 + $0x1c0] sm:$0xff] }
  0x71   : > { %2227 = vmatprep.mubr.f32.mxu0 %v2581_v23  ;;  %2270 = vmatprep.subr.mxu1 %v1040_v54 }
  0x72   : > { %2228 = vmatmul.mubr.f32.gmra.mxu0 %v2591_v26  ;;  %2271 = vmatpush3.msra.mxu1 %v1040_v54 }
  0x73   : > { %2350 = vmatprep.subr.mxu0 %v1345_v17  ;;  %2150 = vmatprep.mubr.f32.mxu1 %v2616_v33  ;;  %v1343_v33 = vld [vmem:[%s3378_s1 + $0x240] sm:$0xff] }
  0x74   : > { %2351 = vmatpush3.msra.mxu0 %v1345_v17  ;;  %2151 = vmatmul.mubr.f32.gmra.mxu1 %v2626_v36  ;;  %v1037_v36 = vld [vmem:[%s3378_s1 + $0x1b8] sm:$0xff] }
  0x75   : > { %2230 = vmatprep.mubr.f32.mxu0 %v2609_v31  ;;  %2272 = vmatprep.subr.mxu1 %v1039_v20 }
  0x76   : > { %2231 = vmatmul.mubr.f32.gmra.mxu0 %v2619_v34  ;;  %2273 = vmatpush3.msra.mxu1 %v1039_v20 }
  0x77   : > { %2352 = vmatprep.subr.mxu0 %v1344_v25  ;;  %2153 = vmatprep.mubr.f32.mxu1 %v2644_v41  ;;  %v1342_v41 = vld [vmem:[%s3378_s1 + $0x238] sm:$0xff] }
  0x78   : > { %2353 = vmatpush3.msra.mxu0 %v1344_v25  ;;  %2154 = vmatmul.mubr.f32.gmra.mxu1 %v2654_v44  ;;  %v1036_v44 = vld [vmem:[%s3378_s1 + $0x1b0] sm:$0xff] }
  0x79   : > { %2233 = vmatprep.mubr.f32.mxu0 %v2637_v39  ;;  %2274 = vmatprep.subr.mxu1 %v1038_v28 }
  0x7a   : > { %2234 = vmatmul.mubr.f32.gmra.mxu0 %v2647_v42  ;;  %2275 = vmatpush3.msra.mxu1 %v1038_v28 }
  0x7b   : > { %2354 = vmatprep.subr.mxu0 %v1343_v33  ;;  %2156 = vmatprep.mubr.f32.mxu1 %v2672_v49  ;;  %v1341_v49 = vld [vmem:[%s3378_s1 + $0x230] sm:$0xff] }
  0x7c   : > { %2355 = vmatpush3.msra.mxu0 %v1343_v33  ;;  %2157 = vmatmul.mubr.f32.gmra.mxu1 %v2682_v52  ;;  %v1035_v52 = vld [vmem:[%s3378_s1 + $0x1a8] sm:$0xff] }
  0x7d   : > { %2236 = vmatprep.mubr.f32.mxu0 %v2665_v47  ;;  %2276 = vmatprep.subr.mxu1 %v1037_v36 }
  0x7e   : > { %2237 = vmatmul.mubr.f32.gmra.mxu0 %v2675_v50  ;;  %2277 = vmatpush3.msra.mxu1 %v1037_v36 }
  0x7f   : > { %2356 = vmatprep.subr.mxu0 %v1342_v41  ;;  %2159 = vmatprep.mubr.f32.mxu1 %v2700_v57  ;;  %v1034_v57 = vld [vmem:[%s3378_s1 + $0x1a0] sm:$0xff] }
  0x80   : > { %2357 = vmatpush3.msra.mxu0 %v1342_v41  ;;  %2160 = vmatmul.mubr.f32.gmra.mxu1 %v2710_v60  ;;  %v2901_v60 = vld [vmem:[%s2551_s22 + $0x140] sm:$0xff] }
  0x81   : > { %2239 = vmatprep.mubr.f32.mxu0 %v2693_v55  ;;  %2278 = vmatprep.subr.mxu1 %v1036_v44 }
  0x82   : > { %2240 = vmatmul.mubr.f32.gmra.mxu0 %v2703_v58  ;;  %2279 = vmatpush3.msra.mxu1 %v1036_v44 }
  0x83   : > { %2358 = vmatprep.subr.mxu0 %v1341_v49  ;;  %2162 = vmatprep.mubr.f32.mxu1 %v2728_v1  ;;  %v2917_v1 = vld [vmem:[%s2551_s22 + $0x150] sm:$0xff] }
  0x84   : > { %2359 = vmatpush3.msra.mxu0 %v1341_v49  ;;  %2163 = vmatmul.mubr.f32.gmra.mxu1 %v2738_v4  ;;  %v2924_v4 = vld [vmem:[%s2551_s22 + $0x158] sm:$0xff] }
  0x85   : > { %2242 = vmatprep.mubr.f32.mxu0 %v2721_v63  ;;  %2280 = vmatprep.subr.mxu1 %v1035_v52 }
  0x86   : > { %2243 = vmatmul.mubr.f32.gmra.mxu0 %v2731_v2  ;;  %2281 = vmatpush3.msra.mxu1 %v1035_v52 }
  0x87   : > { %2360 = vmatprep.subr.mxu0 %v1340_v56  ;;  %2165 = vmatprep.mubr.f32.mxu1 %v2756_v9  ;;  %v2940_v9 = vld [vmem:[%s2551_s22 + $0x168] sm:$0xff] }
  0x88   : > { %2361 = vmatpush3.msra.mxu0 %v1340_v56  ;;  %2166 = vmatmul.mubr.f32.gmra.mxu1 %v2766_v12  ;;  %v2949_v12 = vld [vmem:[%s2551_s22 + $0x170] sm:$0xff] }
  0x89   : > { %2245 = vmatprep.mubr.f32.mxu0 %v2749_v7  ;;  %2282 = vmatprep.subr.mxu1 %v1034_v57 }
  0x8a   : > { %2246 = vmatmul.mubr.f32.gmra.mxu0 %v2759_v10  ;;  %2283 = vmatpush3.msra.mxu1 %v1034_v57 }
  0x8b   : > { %2362 = vmatprep.subr.mxu0 %v1339_v59  ;;  %2168 = vmatprep.mubr.f32.mxu1 %v2557_v16 }
  0x8c   : > { %2363 = vmatpush3.msra.mxu0 %v1339_v59  ;;  %2169 = vmatmul.mubr.f32.gmra.mxu1 %v2563_v18 }
  0x8d   : > { %2248 = vmatprep.mubr.f32.mxu0 %v2901_v60  ;;  %2284 = vmatprep.subr.mxu1 %v1033_v61 }
  0x8e   : > { %2249 = vmatmul.mubr.f32.gmra.mxu0 %v2908_v62  ;;  %2285 = vmatpush3.msra.mxu1 %v1033_v61 }
  0x8f   : > { %2364 = vmatprep.subr.mxu0 %v1338_v0  ;;  %2171 = vmatprep.mubr.f32.mxu1 %v2581_v23 }
  0x90   : > { %2365 = vmatpush3.msra.mxu0 %v1338_v0  ;;  %2172 = vmatmul.mubr.f32.gmra.mxu1 %v2591_v26 }
  0x91   : > { %2251 = vmatprep.mubr.f32.mxu0 %v2917_v1  ;;  %2286 = vmatprep.subr.mxu1 %v1032_v3 }
  0x92   : > { %2252 = vmatmul.mubr.f32.gmra.mxu0 %v2924_v4  ;;  %2287 = vmatpush3.msra.mxu1 %v1032_v3 }
  0x93   : > { %2366 = vmatprep.subr.mxu0 %v1337_v5  ;;  %2174 = vmatprep.mubr.f32.mxu1 %v2609_v31 }
  0x94   : > { %2367 = vmatpush3.msra.mxu0 %v1337_v5  ;;  %2175 = vmatmul.mubr.f32.gmra.mxu1 %v2619_v34 }
  0x95   : > { %2254 = vmatprep.mubr.f32.mxu0 %v2933_v6  ;;  %2288 = vmatprep.subr.mxu1 %v1031_v8 }
  0x96   : > { %2255 = vmatmul.mubr.f32.gmra.mxu0 %v2940_v9  ;;  %2289 = vmatpush3.msra.mxu1 %v1031_v8 }
  0x97   : > { %2368 = vmatprep.subr.mxu0 %v1336_v11  ;;  %2177 = vmatprep.mubr.f32.mxu1 %v2637_v39 }
  0x98   : > { %2369 = vmatpush3.msra.mxu0 %v1336_v11  ;;  %2178 = vmatmul.mubr.f32.gmra.mxu1 %v2647_v42 }
  0x99   : > { %2257 = vmatprep.mubr.f32.mxu0 %v2949_v12  ;;  %2290 = vmatprep.subr.mxu1 %v1030_v13 }
  0x9a   : > { %2258 = vmatmul.mubr.f32.gmra.mxu0 %v2956_v14  ;;  %2291 = vmatpush3.msra.mxu1 %v1030_v13 }
  0x9b   : > { %2370 = vmatprep.subr.mxu0 %v1335_v15  ;;  %2292 = vmatprep.mubr.f32.mxu1 %v2557_v16  ;;  %v1319_v16 = vld [vmem:[%s2551_s22 + $0x180] sm:$0xff] }
  0x9c   : > { %2371 = vmatpush3.msra.mxu0 %v1335_v15  ;;  %2293 = vmatmul.mubr.f32.vlgmr.msra.gmra.mxu1 %v2563_v18  ;;  %v1320_v18 = vld [vmem:[%s2551_s22 + $0x188] sm:$0xff] }
  0x9d   : > { %2372 = vmatprep.mubr.f32.mxu0 %v2665_v47  ;;  %2295 = vmatprep.mubr.f32.mxu1 %v2581_v23  ;;  %v1321_v23 = vld [vmem:[%s2551_s22 + $0x190] sm:$0xff] }
  0x9e   : > { %2373 = vmatmul.mubr.f32.vlgmr.msra.gmra.mxu0 %v2675_v50 }
  0x9f   : > { %2375 = vmatprep.mubr.f32.mxu0 %v2693_v55 }
  0xa0   : > { %2296 = vmatmul.mubr.f32.gmra.mxu1 %v2591_v26  ;;  %v1322_v26 = vld [vmem:[%s2551_s22 + $0x198] sm:$0xff] }
  0xa1   : > { %2298 = vmatprep.mubr.f32.mxu1 %v2609_v31  ;;  %v1323_v31 = vld [vmem:[%s2551_s22 + $0x1a0] sm:$0xff] }
  0xa2   : > { %2376 = vmatmul.mubr.f32.gmra.mxu0 %v2703_v58 }
  0xa3   : > { %2378 = vmatprep.mubr.f32.mxu0 %v2721_v63 }
  0xa4   : > { %2299 = vmatmul.mubr.f32.gmra.mxu1 %v2619_v34  ;;  %v1324_v34 = vld [vmem:[%s2551_s22 + $0x1a8] sm:$0xff] }
  0xa5   : > { %2301 = vmatprep.mubr.f32.mxu1 %v2637_v39  ;;  %v1325_v39 = vld [vmem:[%s2551_s22 + $0x1b0] sm:$0xff] }
  0xa6   : > { %2379 = vmatmul.mubr.f32.gmra.mxu0 %v2731_v2 }
  0xa7   : > { %2381 = vmatprep.mubr.f32.mxu0 %v2749_v7 }
  0xa8   : > { %2302 = vmatmul.mubr.f32.gmra.mxu1 %v2647_v42  ;;  %v1326_v42 = vld [vmem:[%s2551_s22 + $0x1b8] sm:$0xff] }
  0xa9   : > { %2304 = vmatprep.mubr.f32.mxu1 %v2665_v47  ;;  %v1327_v47 = vld [vmem:[%s2551_s22 + $0x1c0] sm:$0xff] }
  0xaa   : > { %2382 = vmatmul.mubr.f32.gmra.mxu0 %v2759_v10 }
  0xab   : > { %2384 = vmatprep.mubr.f32.mxu0 %v2901_v60 }
  0xac   : > { %2305 = vmatmul.mubr.f32.gmra.mxu1 %v2675_v50  ;;  %v1328_v50 = vld [vmem:[%s2551_s22 + $0x1c8] sm:$0xff] }
  0xad   : > { %2307 = vmatprep.mubr.f32.mxu1 %v2693_v55  ;;  %v1329_v55 = vld [vmem:[%s2551_s22 + $0x1d0] sm:$0xff] }
  0xae   : > { %2385 = vmatmul.mubr.f32.gmra.mxu0 %v2908_v62 }
  0xaf   : > { %2387 = vmatprep.mubr.f32.mxu0 %v2917_v1 }
  0xb0   : > { %2308 = vmatmul.mubr.f32.gmra.mxu1 %v2703_v58  ;;  %v1330_v58 = vld [vmem:[%s2551_s22 + $0x1d8] sm:$0xff] }
  0xb1   : > { %2310 = vmatprep.mubr.f32.mxu1 %v2721_v63  ;;  %v1331_v63 = vld [vmem:[%s2551_s22 + $0x1e0] sm:$0xff] }
  0xb2   : > { %2388 = vmatmul.mubr.f32.gmra.mxu0 %v2924_v4 }
  0xb3   : > { %2390 = vmatprep.mubr.f32.mxu0 %v2933_v6 }
  0xb4   : > { %2311 = vmatmul.mubr.f32.gmra.mxu1 %v2731_v2  ;;  %v1332_v2 = vld [vmem:[%s2551_s22 + $0x1e8] sm:$0xff] }
  0xb5   : > { %2313 = vmatprep.mubr.f32.mxu1 %v2749_v7  ;;  %v1333_v7 = vld [vmem:[%s2551_s22 + $0x1f0] sm:$0xff] }
  0xb6   : > { %2391 = vmatmul.mubr.f32.gmra.mxu0 %v2940_v9 }
  0xb7   : > { %2393 = vmatprep.mubr.f32.mxu0 %v2949_v12 }
  0xb8   : > { %2314 = vmatmul.mubr.f32.gmra.mxu1 %v2759_v10  ;;  %v1334_v10 = vld [vmem:[%s2551_s22 + $0x1f8] sm:$0xff] }
  0xb9   : > { %2316 = vmatprep.mubr.f32.mxu1 %v2901_v60 }
  0xba   : > { %2394 = vmatmul.mubr.f32.gmra.mxu0 %v2956_v14 }
  0xbb   : > { %2396 = vmatprep.mubr.f32.mxu0 %v1319_v16 }
  0xbc   : > { %2317 = vmatmul.mubr.f32.gmra.mxu1 %v2908_v62 }
  0xbd   : > { %2319 = vmatprep.mubr.f32.mxu1 %v2917_v1 }
  0xbe   : > { %2397 = vmatmul.mubr.f32.gmra.mxu0 %v1320_v18 }
  0xbf   : > { %2399 = vmatprep.mubr.f32.mxu0 %v1321_v23 }
  0xc0   : > { %2320 = vmatmul.mubr.f32.gmra.mxu1 %v2924_v4 }
  0xc1   : > { %2322 = vmatprep.mubr.f32.mxu1 %v2933_v6 }
  0xc2   : > { %2400 = vmatmul.mubr.f32.gmra.mxu0 %v1322_v26 }
  0xc3   : > { %2402 = vmatprep.mubr.f32.mxu0 %v1323_v31 }
  0xc4   : > { %2323 = vmatmul.mubr.f32.gmra.mxu1 %v2940_v9 }
  0xc5   : > { %2325 = vmatprep.mubr.f32.mxu1 %v2949_v12 }
  0xc6   : > { %2403 = vmatmul.mubr.f32.gmra.mxu0 %v1324_v34 }
  0xc7   : > { %2405 = vmatprep.mubr.f32.mxu0 %v1325_v39 }
  0xc8   : > { %2326 = vmatmul.mubr.f32.gmra.mxu1 %v2956_v14 }
  0xc9   : > { %2328 = vmatprep.mubr.f32.mxu1 %v1319_v16 }
  0xca   : > { %2406 = vmatmul.mubr.f32.gmra.mxu0 %v1326_v42 }
  0xcb   : > { %2408 = vmatprep.mubr.f32.mxu0 %v1327_v47 }
  0xcc   : > { %2329 = vmatmul.mubr.f32.gmra.mxu1 %v1320_v18 }
  0xcd   : > { %2331 = vmatprep.mubr.f32.mxu1 %v1321_v23 }
  0xce   : > { %2409 = vmatmul.mubr.f32.gmra.mxu0 %v1328_v50 }
  0xcf   : > { %2411 = vmatprep.mubr.f32.mxu0 %v1329_v55 }
  0xd0   : > { %2332 = vmatmul.mubr.f32.gmra.mxu1 %v1322_v26 }
  0xd1   : > { %2334 = vmatprep.mubr.f32.mxu1 %v1323_v31 }
  0xd2   : > { %2412 = vmatmul.mubr.f32.gmra.mxu0 %v1330_v58 }
  0xd3   : > { %2414 = vmatprep.mubr.f32.mxu0 %v1331_v63 }
  0xd4   : > { %2335 = vmatmul.mubr.f32.gmra.mxu1 %v1324_v34 }
  0xd5   : > { %2337 = vmatprep.mubr.f32.mxu1 %v1325_v39 }
  0xd6   : > { %2415 = vmatmul.mubr.f32.gmra.mxu0 %v1332_v2 }
  0xd7   : > { %2417 = vmatprep.mubr.f32.mxu0 %v1333_v7 }
  0xd8   : > { %2338 = vmatmul.mubr.f32.gmra.mxu1 %v1326_v42 }
  0xda   : > { %2418 = vmatmul.mubr.f32.gmra.mxu0 %v1334_v10 }
  0xed   : > { %v3020_v19 = vpop.f32.mrf.mxu1 }
  0xee   : > { %v3022_v21 = vpop.f32.mrf.mxu0 }
  0xef   : > { %v3024_v22 = vpop.f32.mrf.mxu1 }
  0xf0   : > { %v3026_v24 = vpop.f32.mrf.mxu0 }
  0xf2   : > { %v3028_v27 = vpop.f32.mrf.mxu1 }
  0xf3   : > { %3381 = vst [vmem:[#allocation2_spill] sm:$0xff] %v3028_v27 }
  0xf4   : > { %v3030_v29 = vpop.f32.mrf.mxu0  ;;  %v3032_v30 = vpop.f32.mrf.mxu1 }
  0xf5   : > { %3382 = vst [vmem:[#allocation3_spill] sm:$0xff] %v3032_v30 }
  0xf6   : > { %v3034_v32 = vpop.f32.mrf.mxu0 }
  0xf8   : > { %v3036_v35 = vpop.f32.mrf.mxu1 }
  0xf9   : > { %3383 = vst [vmem:[#allocation4_spill] sm:$0xff] %v3036_v35 }
  0xfa   : > { %v3038_v37 = vpop.f32.mrf.mxu0  ;;  %v3040_v38 = vpop.f32.mrf.mxu1 }
  0xfb   : > { %3384 = vst [vmem:[#allocation5_spill] sm:$0xff] %v3040_v38 }
  0xfc   : > { %v3042_v40 = vpop.f32.mrf.mxu0 }
  0xfe   : > { %v3044_v43 = vpop.f32.mrf.mxu1 }
  0xff   : > { %3385 = vst [vmem:[#allocation6_spill] sm:$0xff] %v3044_v43 }
 0x100   : > { %v3046_v45 = vpop.f32.mrf.mxu0  ;;  %v3048_v46 = vpop.f32.mrf.mxu1 }
 0x101   : > { %3386 = vst [vmem:[#allocation7_spill] sm:$0xff] %v3048_v46 }
 0x102   : > { %v3050_v48 = vpop.f32.mrf.mxu0 }
 0x104   : > { %v3052_v51 = vpop.f32.mrf.mxu1 }
 0x105   : > { %3387 = vst [vmem:[#allocation8_spill] sm:$0xff] %v3052_v51 }
 0x106   : > { %v3054_v53 = vpop.f32.mrf.mxu0  ;;  %v3056_v54 = vpop.f32.mrf.mxu1 }
 0x107   : > { %3388 = vst [vmem:[#allocation9_spill] sm:$0xff] %v3056_v54 }
 0x108   : > { %v3058_v17 = vpop.f32.mrf.mxu0 }
 0x10a   : > { %v3060_v20 = vpop.f32.mrf.mxu1 }
 0x10b   : > { %3389 = vst [vmem:[#allocation10_spill] sm:$0xff] %v3060_v20 }
 0x10c   : > { %v3062_v25 = vpop.f32.mrf.mxu0  ;;  %v3064_v28 = vpop.f32.mrf.mxu1 }
 0x10d   : > { %3390 = vst [vmem:[#allocation11_spill] sm:$0xff] %v3064_v28 }
 0x10e   : > { %v3066_v33 = vpop.f32.mrf.mxu0 }
 0x110   : > { %v3068_v36 = vpop.f32.mrf.mxu1 }
 0x111   : > { %3391 = vst [vmem:[#allocation12_spill] sm:$0xff] %v3068_v36 }
 0x112   : > { %v3070_v41 = vpop.f32.mrf.mxu0  ;;  %v3072_v44 = vpop.f32.mrf.mxu1 }
 0x113   : > { %3392 = vst [vmem:[#allocation13_spill] sm:$0xff] %v3072_v44 }
 0x114   : > { %v3074_v49 = vpop.f32.mrf.mxu0 }
 0x116   : > { %v3076_v52 = vpop.f32.mrf.mxu1 }
 0x117   : > { %3393 = vst [vmem:[#allocation14_spill] sm:$0xff] %v3076_v52 }
 0x118   : > { %v3078_v56 = vpop.f32.mrf.mxu0  ;;  %v3080_v57 = vpop.f32.mrf.mxu1 }
 0x119   : > { %3394 = vst [vmem:[#allocation15_spill] sm:$0xff] %v3080_v57 }
 0x11a   : > { %v3082_v59 = vpop.f32.mrf.mxu0 }
 0x11c   : > { %v2134_v60 = vpop.f32.mrf.mxu1 }
 0x11e   : > { %v3084_v61 = vpop.f32.mrf.mxu0  ;;  %v534_v62 = vpop.f32.mrf.mxu1 }
 0x120   : > { %v3086_v0 = vpop.f32.mrf.mxu0  ;;  %v2137_v1 = vpop.f32.mrf.mxu1 }
 0x122   : > { %v3088_v3 = vpop.f32.mrf.mxu0  ;;  %v3090_v4 = vpop.f32.mrf.mxu1 }
 0x124   : > { %v3092_v5 = vpop.f32.mrf.mxu0  ;;  %v3094_v6 = vpop.f32.mrf.mxu1 }
 0x126   : > { %v3096_v8 = vpop.f32.mrf.mxu0  ;;  %v3098_v9 = vpop.f32.mrf.mxu1 }
 0x128   : > { %v3100_v11 = vpop.f32.mrf.mxu0  ;;  %v3102_v12 = vpop.f32.mrf.mxu1 }
 0x12a   : > { %v3104_v13 = vpop.f32.mrf.mxu0  ;;  %v3106_v14 = vpop.f32.mrf.mxu1 }
 0x12c   : > { %v3108_v15 = vpop.f32.mrf.mxu0  ;;  %v3110_v16 = vpop.f32.mrf.mxu1 }
 0x12e   : > { %v3112_v18 = vpop.f32.mrf.mxu0  ;;  %v3114_v23 = vpop.f32.mrf.mxu1 }
 0x130   : > { %v3116_v26 = vpop.f32.mrf.mxu0  ;;  %v3118_v31 = vpop.f32.mrf.mxu1 }
 0x132   : > { %v3120_v34 = vpop.f32.mrf.mxu0  ;;  %v3122_v39 = vpop.f32.mrf.mxu1 }
 0x134   : > { %v3124_v42 = vpop.f32.mrf.mxu0  ;;  %v3126_v47 = vpop.f32.mrf.mxu1 }
 0x136   : > { %v3128_v50 = vpop.f32.mrf.mxu0  ;;  %v3130_v55 = vpop.f32.mrf.mxu1 }
 0x138   : > { %v3132_v58 = vpop.f32.mrf.mxu0  ;;  %v3134_v63 = vpop.f32.mrf.mxu1 }
 0x13a   : > { %v3136_v2 = vpop.f32.mrf.mxu0  ;;  %v3138_v7 = vpop.f32.mrf.mxu1 }
 0x13c   : > { %v3140_v10 = vpop.f32.mrf.mxu0  ;;  %v3142_v57 = vpop.f32.mrf.mxu1 }
 0x13e   : > { %v3144_v52 = vpop.f32.mrf.mxu0  ;;  %v3146_v44 = vpop.f32.mrf.mxu1 }
 0x140   : > { %v3148_v36 = vpop.f32.mrf.mxu0  ;;  %v3150_v28 = vpop.f32.mrf.mxu1 }
 0x141   : > { %3395 = vst [vmem:[#allocation16_spill] sm:$0xff] %v3148_v36  ;;  %3396 = vst [vmem:[#allocation17_spill] sm:$0xff] %v3150_v28 }
 0x142   : > { %v3152_v20 = vpop.f32.mrf.mxu0  ;;  %v3154_v54 = vpop.f32.mrf.mxu1 }
 0x143   : > { %3397 = vst [vmem:[#allocation18_spill] sm:$0xff] %v3152_v20  ;;  %3398 = vst [vmem:[#allocation19_spill] sm:$0xff] %v3154_v54 }
 0x144   : > { %v3156_v51 = vpop.f32.mrf.mxu0  ;;  %v3158_v46 = vpop.f32.mrf.mxu1 }
 0x145   : > { %3399 = vst [vmem:[#allocation20_spill] sm:$0xff] %v3156_v51  ;;  %3400 = vst [vmem:[#allocation21_spill] sm:$0xff] %v3158_v46 }
 0x146   : > { %v3160_v43 = vpop.f32.mrf.mxu0  ;;  %v3162_v38 = vpop.f32.mrf.mxu1 }
 0x147   : > { %3401 = vst [vmem:[#allocation22_spill] sm:$0xff] %v3160_v43  ;;  %3402 = vst [vmem:[#allocation23_spill] sm:$0xff] %v3162_v38 }
 0x148   : > { %v3164_v35 = vpop.f32.mrf.mxu0  ;;  %v3166_v30 = vpop.f32.mrf.mxu1 }
 0x149   : > { %3403 = vst [vmem:[#allocation24_spill] sm:$0xff] %v3164_v35  ;;  %3404 = vst [vmem:[#allocation25_spill] sm:$0xff] %v3166_v30 }
 0x14a   : > { %v3168_v27 = vpop.f32.mrf.mxu0  ;;  %v3170_v36 = vpop.f32.mrf.mxu1 }
 0x14b   : > { %3405 = vst [vmem:[#allocation26_spill] sm:$0xff] %v3168_v27  ;;  %3406 = vst [vmem:[#allocation27_spill] sm:$0xff] %v3170_v36 }
 0x14c   : > { %v3172_v28 = vpop.f32.mrf.mxu0  ;;  %v3174_v20 = vpop.f32.mrf.mxu1 }
 0x14d   : > { %3407 = vst [vmem:[#allocation28_spill] sm:$0xff] %v3172_v28  ;;  %3408 = vst [vmem:[#allocation29_spill] sm:$0xff] %v3174_v20 }
 0x14e   : > { %v3176_v54 = vpop.f32.mrf.mxu0  ;;  %v3178_v51 = vpop.f32.mrf.mxu1 }
 0x14f   : > { %3409 = vst [vmem:[#allocation30_spill] sm:$0xff] %v3176_v54  ;;  %3410 = vst [vmem:[#allocation31_spill] sm:$0xff] %v3178_v51  ;;  %v540_v54 = vadd.f32 %v2134_v60, %v3022_v21  ;;  %v545_v60 = vadd.f32 %v3090_v4, %v3034_v32 }
 0x150   : > { %v3180_v46 = vpop.f32.mrf.mxu0  ;;  %v3182_v43 = vpop.f32.mrf.mxu1 }
 0x151   : > { %3411 = vst [vmem:[#allocation32_spill] sm:$0xff] %v3180_v46  ;;  %v535_v46 = vadd.f32 %v534_v62, %v3026_v24  ;;  %v560_v24 = vadd.f32 %v3094_v6, %v3038_v37 }
 0x152   : > { %v3184_v38 = vpop.f32.mrf.mxu0  ;;  %v3186_v35 = vpop.f32.mrf.mxu1 }
 0x153   : > { %3412 = vst [vmem:[#allocation33_spill] sm:$0xff] %v3184_v38  ;;  %3413 = vst [vmem:[#allocation34_spill] sm:$0xff] %v3186_v35  ;;  %v966_v21 = vadd.f32 %v3086_v0, %v535_v46  ;;  %v555_v46 = vadd.f32 %v3098_v9, %v3042_v40  ;;  %v971_v6 = vadd.f32 %v3096_v8, %v560_v24 }
 0x154   : > { %v3188_v30 = vpop.f32.mrf.mxu0  ;;  %v3190_v27 = vpop.f32.mrf.mxu1  ;;  %v565_v8 = vadd.f32 %v3106_v14, %v3050_v48 }
 0x155   : > { %3414 = vst [vmem:[#allocation35_spill] sm:$0xff] %v3188_v30  ;;  %3415 = vst [vmem:[#allocation36_spill] sm:$0xff] %v3190_v27  ;;  %v967_v30 = vadd.f32 %v3084_v61, %v540_v54  ;;  %v550_v27 = vadd.f32 %v2137_v1, %v3030_v29 }
 0x156   : > { %v3192_v36 = vpop.f32.mrf.mxu0  ;;  %v3194_v28 = vpop.f32.mrf.mxu1 }
 0x157   : > { %3416 = vst [vmem:[#allocation37_spill] sm:$0xff] %v3192_v36  ;;  %3417 = vst [vmem:[#allocation38_spill] sm:$0xff] %v3194_v28  ;;  %v969_v29 = vadd.f32 %v3088_v3, %v550_v27 }
 0x158   : > { %v3197_v20 = vpop.f32.mrf.mxu0  ;;  %v3199_v51 = vpop.f32.mrf.mxu1 }
 0x159   : > { %3418 = vst [vmem:[#allocation39_spill] sm:$0xff] %v3197_v20 }
 0x15a   : > { %v3202_v38 = vpop.f32.mrf.mxu0  ;;  %v3204_v35 = vpop.f32.mrf.mxu1 }
 0x15b   : > { %3419 = vst [vmem:[#allocation40_spill] sm:$0xff] %v3202_v38  ;;  %v3218_v38 = vld [vmem:[%s3379_s2] ss:$0 sm:$0xff] }
 0x15c   : > { %v3208_v36 = vpop.f32.mrf.mxu0  ;;  %v2294_v28 = vpop.f32.mrf.mxu1 }
 0x15d   : > { %3420 = vst [vmem:[#allocation41_spill] sm:$0xff] %v3208_v36  ;;  %v1272_v20 = vadd.f32 %v2294_v28, %v967_v30  ;;  %v968_v28 = vadd.f32 %v3092_v5, %v545_v60  ;;  %v570_v36 = vadd.f32 %v3102_v12, %v3046_v45 }
 0x15e   : > { %v2374_v62 = vpop.f32.mrf.mxu0  ;;  %v1112_v54 = vpop.f32.mrf.mxu1 }
 0x15f   : > { %v1577_v61 = vadd.f32 %v2374_v62, %v1272_v20  ;;  %v1271_v1 = vadd.f32 %v1112_v54, %v966_v21  ;;  %v970_v21 = vadd.f32 %v3100_v11, %v555_v46 }
 0x160   : > { %v1417_v32 = vpop.f32.mrf.mxu0  ;;  %v2297_v30 = vpop.f32.mrf.mxu1 }
 0x161   : > { %v1616_v37 = vadd.f32 %v3218_v38, %v1577_v61  ;;  %v1576_v0 = vadd.f32 %v1417_v32, %v1271_v1  ;;  %v1274_v4 = vadd.f32 %v2297_v30, %v969_v29  ;;  %v973_v29 = vadd.f32 %v3104_v13, %v570_v36 }
 0x162   : > { %v2377_v27 = vpop.f32.mrf.mxu0  ;;  %v1122_v40 = vpop.f32.mrf.mxu1  ;;  %v580_v61 = vadd.f32 %v3110_v16, %v3054_v53  ;;  %v972_v30 = vadd.f32 %v3108_v15, %v565_v8 }
 0x163   : > { %v1648_v20 = vmax.f32 %v1616_v37, 0.0  ;;  %v1615_v3 = vadd.f32 %v3218_v38, %v1576_v0  ;;  %v1579_v5 = vadd.f32 %v2377_v27, %v1274_v4  ;;  %v1273_v9 = vadd.f32 %v1122_v40, %v968_v28 }
 0x164   : > { %v1427_v45 = vpop.f32.mrf.mxu0  ;;  %v2300_v12 = vpop.f32.mrf.mxu1  ;;  %v575_v28 = vadd.f32 %v3114_v23, %v3058_v17  ;;  %v975_v4 = vadd.f32 %v3112_v18, %v580_v61 }
 0x165   : > { %1680 = vst [vmem:[%s3232_s9 + $0x8] sm:$0xff] %v1648_v20  ;;  %v1647_v60 = vmax.f32 %v1615_v3, 0.0  ;;  %v1618_v24 = vadd.f32 %v3218_v38, %v1579_v5  ;;  %v1578_v62 = vadd.f32 %v1427_v45, %v1273_v9  ;;  %v1276_v54 = vadd.f32 %v2300_v12, %v971_v6 }
 0x166   : > { %v2380_v1 = vpop.f32.mrf.mxu0  ;;  %v1132_v32 = vpop.f32.mrf.mxu1  ;;  %v590_v6 = vadd.f32 %v3118_v31, %v3062_v25  ;;  %v974_v3 = vadd.f32 %v3116_v26, %v575_v28  ;;  %v585_v5 = vadd.f32 %v3122_v39, %v3066_v33  ;;  %v600_v12 = vadd.f32 %v3126_v47, %v3070_v41 }
 0x167   : > { %1679 = vst [vmem:[%s3232_s9] sm:$0xff] %v1647_v60  ;;  %v1650_v11 = vmax.f32 %v1618_v24, 0.0  ;;  %v1617_v48 = vadd.f32 %v3218_v38, %v1578_v62  ;;  %v1581_v14 = vadd.f32 %v2380_v1, %v1276_v54  ;;  %v1275_v46 = vadd.f32 %v1132_v32, %v970_v21 }
 0x168   : > { %v1437_v37 = vpop.f32.mrf.mxu0  ;;  %v2303_v0 = vpop.f32.mrf.mxu1  ;;  %v977_v45 = vadd.f32 %v3120_v34, %v590_v6  ;;  %v976_v54 = vadd.f32 %v3124_v42, %v585_v5  ;;  %v3421_v5 = vld [vmem:[#allocation2_spill] sm:$0xff] }
 0x169   : > { %1682 = vst [vmem:[%s3232_s9 + $0x18] sm:$0xff] %v1650_v11  ;;  %v1649_v36 = vmax.f32 %v1617_v48, 0.0  ;;  %v1620_v53 = vadd.f32 %v3218_v38, %v1581_v14  ;;  %v1580_v13 = vadd.f32 %v1437_v37, %v1275_v46  ;;  %v1278_v16 = vadd.f32 %v2303_v0, %v973_v29 }
 0x16a   : > { %v2383_v27 = vpop.f32.mrf.mxu0  ;;  %v1142_v40 = vpop.f32.mrf.mxu1  ;;  %v595_v29 = vadd.f32 %v3130_v55, %v3074_v49  ;;  %v979_v11 = vadd.f32 %v3128_v50, %v600_v12  ;;  %v610_v48 = vadd.f32 %v3134_v63, %v3078_v56  ;;  %v605_v37 = vadd.f32 %v3138_v7, %v3082_v59  ;;  %v3424_v12 = vld [vmem:[#allocation3_spill] sm:$0xff] }
 0x16b   : > { %1681 = vst [vmem:[%s3232_s9 + $0x10] sm:$0xff] %v1649_v36  ;;  %v1652_v15 = vmax.f32 %v1620_v53, 0.0  ;;  %v1619_v17 = vadd.f32 %v3218_v38, %v1580_v13  ;;  %v1583_v23 = vadd.f32 %v2383_v27, %v1278_v16  ;;  %v1277_v20 = vadd.f32 %v1142_v40, %v972_v30 }
 0x16c   : > { %v1447_v9 = vpop.f32.mrf.mxu0  ;;  %v2306_v21 = vpop.f32.mrf.mxu1  ;;  %v978_v28 = vadd.f32 %v3132_v58, %v595_v29  ;;  %v981_v13 = vadd.f32 %v3136_v2, %v610_v48  ;;  %v620_v16 = vadd.f32 %v3142_v57, %v3020_v19  ;;  %v980_v40 = vadd.f32 %v3140_v10, %v605_v37  ;;  %v3426_v29 = vld [vmem:[#allocation18_spill] sm:$0xff] }
 0x16d   : > { %1684 = vst [vmem:[%s3232_s9 + $0x28] sm:$0xff] %v1652_v15  ;;  %v1651_v18 = vmax.f32 %v1619_v17, 0.0  ;;  %v1622_v25 = vadd.f32 %v3218_v38, %v1583_v23  ;;  %v1582_v31 = vadd.f32 %v1447_v9, %v1277_v20  ;;  %v1280_v8 = vadd.f32 %v2306_v21, %v975_v4  ;;  %v3422_v9 = vld [vmem:[#allocation17_spill] sm:$0xff] }
 0x16e   : > { %v2386_v60 = vpop.f32.mrf.mxu0  ;;  %v1152_v24 = vpop.f32.mrf.mxu1  ;;  %v615_v15 = vadd.f32 %v3146_v44, %v3024_v22  ;;  %v630_v21 = vadd.f32 %v3422_v9, %v3421_v5 }
 0x16f   : > { %1683 = vst [vmem:[%s3232_s9 + $0x20] sm:$0xff] %v1651_v18  ;;  %v1654_v26 = vmax.f32 %v1622_v25, 0.0  ;;  %v1621_v33 = vadd.f32 %v3218_v38, %v1582_v31  ;;  %v1585_v39 = vadd.f32 %v2386_v60, %v1280_v8  ;;  %v1279_v62 = vadd.f32 %v1152_v24, %v974_v3  ;;  %v3423_v8 = vld [vmem:[#allocation16_spill] sm:$0xff]  ;;  %v3425_v60 = vld [vmem:[#allocation19_spill] sm:$0xff] }
 0x170   : > { %v1457_v61 = vpop.f32.mrf.mxu0  ;;  %v2309_v1 = vpop.f32.mrf.mxu1  ;;  %v983_v3 = vadd.f32 %v3144_v52, %v620_v16  ;;  %v625_v24 = vadd.f32 %v3425_v60, %v3424_v12  ;;  %v3433_v16 = vld [vmem:[#allocation6_spill] sm:$0xff] }
 0x171   : > { %1686 = vst [vmem:[%s3232_s9 + $0x38] sm:$0xff] %v1654_v26  ;;  %v1653_v34 = vmax.f32 %v1621_v33, 0.0  ;;  %v1624_v41 = vadd.f32 %v3218_v38, %v1585_v39  ;;  %v1584_v47 = vadd.f32 %v1457_v61, %v1279_v62  ;;  %v1282_v32 = vadd.f32 %v2309_v1, %v977_v45  ;;  %v3427_v1 = vld [vmem:[#allocation4_spill] sm:$0xff] }
 0x172   : > { %v2389_v14 = vpop.f32.mrf.mxu0  ;;  %v1162_v46 = vpop.f32.mrf.mxu1  ;;  %v982_v45 = vadd.f32 %v3423_v8, %v615_v15  ;;  %v985_v61 = vadd.f32 %v3426_v29, %v630_v21 }
 0x173   : > { %1685 = vst [vmem:[%s3232_s9 + $0x30] sm:$0xff] %v1653_v34  ;;  %v1656_v42 = vmax.f32 %v1624_v41, 0.0  ;;  %v1623_v49 = vadd.f32 %v3218_v38, %v1584_v47  ;;  %v1587_v55 = vadd.f32 %v2389_v14, %v1282_v32  ;;  %v1281_v30 = vadd.f32 %v1162_v46, %v976_v54  ;;  %v3428_v34 = vld [vmem:[#allocation21_spill] sm:$0xff] }
 0x174   : > { %v1467_v0 = vpop.f32.mrf.mxu0  ;;  %v2312_v36 = vpop.f32.mrf.mxu1  ;;  %v640_v41 = vadd.f32 %v3428_v34, %v3427_v1 }
 0x175   : > { %1688 = vst [vmem:[%s3232_s9 + $0x48] sm:$0xff] %v1656_v42  ;;  %v1655_v50 = vmax.f32 %v1623_v49, 0.0  ;;  %v1626_v56 = vadd.f32 %v3218_v38, %v1587_v55  ;;  %v1586_v63 = vadd.f32 %v1467_v0, %v1281_v30  ;;  %v1284_v53 = vadd.f32 %v2312_v36, %v979_v11  ;;  %v3429_v42 = vld [vmem:[#allocation20_spill] sm:$0xff]  ;;  %v3430_v55 = vld [vmem:[#allocation5_spill] sm:$0xff]  ;;  %v3431_v30 = vld [vmem:[#allocation23_spill] sm:$0xff] }
 0x176   : > { %v2392_v4 = vpop.f32.mrf.mxu0  ;;  %v1172_v6 = vpop.f32.mrf.mxu1  ;;  %v984_v49 = vadd.f32 %v3429_v42, %v625_v24 }
 0x177   : > { %1687 = vst [vmem:[%s3232_s9 + $0x40] sm:$0xff] %v1655_v50  ;;  %v1658_v58 = vmax.f32 %v1626_v56, 0.0  ;;  %v1625_v59 = vadd.f32 %v3218_v38, %v1586_v63  ;;  %v1589_v7 = vadd.f32 %v2392_v4, %v1284_v53  ;;  %v1283_v27 = vadd.f32 %v1172_v6, %v978_v28  ;;  %v3432_v53 = vld [vmem:[#allocation22_spill] sm:$0xff]  ;;  %v3434_v4 = vld [vmem:[#allocation25_spill] sm:$0xff] }
 0x178   : > { %v1477_v17 = vpop.f32.mrf.mxu0  ;;  %v2315_v23 = vpop.f32.mrf.mxu1  ;;  %v635_v28 = vadd.f32 %v3431_v30, %v3430_v55  ;;  %v650_v6 = vadd.f32 %v3434_v4, %v3433_v16 }
 0x179   : > { %1690 = vst [vmem:[%s3232_s9 + $0x58] sm:$0xff] %v1658_v58  ;;  %v1657_v2 = vmax.f32 %v1625_v59, 0.0  ;;  %v1628_v19 = vadd.f32 %v3218_v38, %v1589_v7  ;;  %v1588_v57 = vadd.f32 %v1477_v17, %v1283_v27  ;;  %v1286_v20 = vadd.f32 %v2315_v23, %v981_v13  ;;  %v3435_v17 = vld [vmem:[#allocation24_spill] sm:$0xff] }
 0x17a   : > { %v2395_v18 = vpop.f32.mrf.mxu0  ;;  %v1182_v25 = vpop.f32.mrf.mxu1  ;;  %v987_v13 = vadd.f32 %v3432_v53, %v640_v41  ;;  %v986_v23 = vadd.f32 %v3435_v17, %v635_v28 }
 0x17b   : > { %1689 = vst [vmem:[%s3232_s9 + $0x50] sm:$0xff] %v1657_v2  ;;  %v1660_v10 = vmax.f32 %v1628_v19, 0.0  ;;  %v1627_v22 = vadd.f32 %v3218_v38, %v1588_v57  ;;  %v1591_v44 = vadd.f32 %v2395_v18, %v1286_v20  ;;  %v1285_v31 = vadd.f32 %v1182_v25, %v980_v40  ;;  %v3436_v2 = vld [vmem:[#allocation7_spill] sm:$0xff]  ;;  %v3438_v25 = vld [vmem:[#allocation26_spill] sm:$0xff] }
 0x17c   : > { %v1487_v26 = vpop.f32.mrf.mxu0  ;;  %v2318_v33 = vpop.f32.mrf.mxu1  ;;  %v3437_v19 = vld [vmem:[#allocation27_spill] sm:$0xff] }
 0x17d   : > { %1692 = vst [vmem:[%s3232_s9 + $0x68] sm:$0xff] %v1660_v10  ;;  %v1659_v52 = vmax.f32 %v1627_v22, 0.0  ;;  %v1630_v39 = vadd.f32 %v3218_v38, %v1591_v44  ;;  %v1590_v62 = vadd.f32 %v1487_v26, %v1285_v31  ;;  %v1288_v54 = vadd.f32 %v2318_v33, %v983_v3  ;;  %v3439_v22 = vld [vmem:[#allocation8_spill] sm:$0xff]  ;;  %v3440_v44 = vld [vmem:[#allocation29_spill] sm:$0xff] }
 0x17e   : > { %v2398_v47 = vpop.f32.mrf.mxu0  ;;  %v1192_v32 = vpop.f32.mrf.mxu1  ;;  %v645_v57 = vadd.f32 %v3437_v19, %v3436_v2  ;;  %v989_v10 = vadd.f32 %v3438_v25, %v650_v6  ;;  %v660_v31 = vadd.f32 %v3440_v44, %v3439_v22  ;;  %v3441_v33 = vld [vmem:[#allocation28_spill] sm:$0xff]  ;;  %v3449_v6 = vld [vmem:[#allocation33_spill] sm:$0xff] }
 0x17f   : > { %1691 = vst [vmem:[%s3232_s9 + $0x60] sm:$0xff] %v1659_v52  ;;  %v1662_v11 = vmax.f32 %v1630_v39, 0.0  ;;  %v1629_v48 = vadd.f32 %v3218_v38, %v1590_v62  ;;  %v1593_v14 = vadd.f32 %v2398_v47, %v1288_v54  ;;  %v1287_v46 = vadd.f32 %v1192_v32, %v982_v45  ;;  %v3442_v39 = vld [vmem:[#allocation9_spill] sm:$0xff]  ;;  %v3443_v62 = vld [vmem:[#allocation31_spill] sm:$0xff]  ;;  %v3444_v32 = vld [vmem:[#allocation30_spill] sm:$0xff] }
 0x180   : > { %v1497_v37 = vpop.f32.mrf.mxu0  ;;  %v2321_v0 = vpop.f32.mrf.mxu1  ;;  %v988_v52 = vadd.f32 %v3441_v33, %v645_v57  ;;  %v655_v54 = vadd.f32 %v3443_v62, %v3442_v39  ;;  %v3452_v57 = vld [vmem:[#allocation35_spill] sm:$0xff] }
 0x181   : > { %1694 = vst [vmem:[%s3232_s9 + $0x78] sm:$0xff] %v1662_v11  ;;  %v1661_v36 = vmax.f32 %v1629_v48, 0.0  ;;  %v1632_v50 = vadd.f32 %v3218_v38, %v1593_v14  ;;  %v1592_v56 = vadd.f32 %v1497_v37, %v1287_v46  ;;  %v1290_v63 = vadd.f32 %v2321_v0, %v985_v61  ;;  %v3445_v48 = vld [vmem:[#allocation10_spill] sm:$0xff]  ;;  %v3446_v37 = vld [vmem:[#allocation32_spill] sm:$0xff]  ;;  %v3457_v62 = vld [vmem:[#allocation39_spill] sm:$0xff] }
 0x182   : > { %v2401_v58 = vpop.f32.mrf.mxu0  ;;  %v1202_v59 = vpop.f32.mrf.mxu1  ;;  %v991_v11 = vadd.f32 %v3444_v32, %v660_v31  ;;  %v670_v14 = vadd.f32 %v3182_v43, %v3445_v48  ;;  %v990_v0 = vadd.f32 %v3446_v37, %v655_v54  ;;  %v3455_v31 = vld [vmem:[#allocation37_spill] sm:$0xff] }
 0x183   : > { %1693 = vst [vmem:[%s3232_s9 + $0x70] sm:$0xff] %v1661_v36  ;;  %v1664_v7 = vmax.f32 %v1632_v50, 0.0  ;;  %v1631_v27 = vadd.f32 %v3218_v38, %v1592_v56  ;;  %v1595_v40 = vadd.f32 %v2401_v58, %v1290_v63  ;;  %v1289_v15 = vadd.f32 %v1202_v59, %v984_v49  ;;  %v3447_v36 = vld [vmem:[#allocation11_spill] sm:$0xff]  ;;  %v3448_v50 = vld [vmem:[#allocation34_spill] sm:$0xff]  ;;  %v3450_v59 = vld [vmem:[#allocation12_spill] sm:$0xff] }
 0x184   : > { %v1507_v20 = vpop.f32.mrf.mxu0  ;;  %v2324_v3 = vpop.f32.mrf.mxu1  ;;  %v665_v56 = vadd.f32 %v3448_v50, %v3447_v36  ;;  %v993_v58 = vadd.f32 %v3449_v6, %v670_v14 }
 0x185   : > { %1696 = vst [vmem:[%s3232_s9 + $0x88] sm:$0xff] %v1664_v7  ;;  %v1663_v5 = vmax.f32 %v1631_v27, 0.0  ;;  %v1634_v9 = vadd.f32 %v3218_v38, %v1595_v40  ;;  %v1594_v21 = vadd.f32 %v1507_v20, %v1289_v15  ;;  %v1292_v18 = vadd.f32 %v2324_v3, %v987_v13  ;;  %v3451_v7 = vld [vmem:[#allocation36_spill] sm:$0xff]  ;;  %v3453_v3 = vld [vmem:[#allocation13_spill] sm:$0xff] }
 0x186   : > { %v2404_v8 = vpop.f32.mrf.mxu0  ;;  %v1212_v45 = vpop.f32.mrf.mxu1  ;;  %v680_v27 = vadd.f32 %v3451_v7, %v3450_v59  ;;  %v992_v20 = vadd.f32 %v3452_v57, %v665_v56 }
 0x187   : > { %1695 = vst [vmem:[%s3232_s9 + $0x80] sm:$0xff] %v1663_v5  ;;  %v1666_v12 = vmax.f32 %v1634_v9, 0.0  ;;  %v1633_v60 = vadd.f32 %v3218_v38, %v1594_v21  ;;  %v1597_v24 = vadd.f32 %v2404_v8, %v1292_v18  ;;  %v1291_v26 = vadd.f32 %v1212_v45, %v986_v23  ;;  %v3454_v5 = vld [vmem:[#allocation38_spill] sm:$0xff] }
 0x188   : > { %v1517_v29 = vpop.f32.mrf.mxu0  ;;  %v2327_v61 = vpop.f32.mrf.mxu1  ;;  %v675_v9 = vadd.f32 %v3454_v5, %v3453_v3  ;;  %v995_v8 = vadd.f32 %v3455_v31, %v680_v27  ;;  %v3456_v45 = vld [vmem:[#allocation14_spill] sm:$0xff] }
 0x189   : > { %1698 = vst [vmem:[%s3232_s9 + $0x98] sm:$0xff] %v1666_v12  ;;  %v1665_v1 = vmax.f32 %v1633_v60, 0.0  ;;  %v1636_v34 = vadd.f32 %v3218_v38, %v1597_v24  ;;  %v1596_v41 = vadd.f32 %v1517_v29, %v1291_v26  ;;  %v1294_v47 = vadd.f32 %v2327_v61, %v989_v10  ;;  %v3458_v29 = vld [vmem:[#allocation15_spill] sm:$0xff] }
 0x18a   : > { %v2407_v46 = vpop.f32.mrf.mxu0  ;;  %v1222_v42 = vpop.f32.mrf.mxu1  ;;  %v690_v12 = vadd.f32 %v3199_v51, %v3456_v45  ;;  %v994_v54 = vadd.f32 %v3457_v62, %v675_v9  ;;  %v685_v61 = vadd.f32 %v3204_v35, %v3458_v29 }
 0x18b   : > { %1697 = vst [vmem:[%s3232_s9 + $0x90] sm:$0xff] %v1665_v1  ;;  %v1668_v49 = vmax.f32 %v1636_v34, 0.0  ;;  %v1635_v55 = vadd.f32 %v3218_v38, %v1596_v41  ;;  %v1599_v30 = vadd.f32 %v2407_v46, %v1294_v47  ;;  %v1293_v28 = vadd.f32 %v1222_v42, %v988_v52 }
 0x18c   : > { %v1527_v63 = vpop.f32.mrf.mxu0  ;;  %v2330_v53 = vpop.f32.mrf.mxu1 }
 0x18d   : > { %1700 = vst [vmem:[%s3232_s9 + $0xa8] sm:$0xff] %v1668_v49  ;;  %v1667_v13 = vmax.f32 %v1635_v55, 0.0  ;;  %v1638_v43 = vadd.f32 %v3218_v38, %v1599_v30  ;;  %v1598_v16 = vadd.f32 %v1527_v63, %v1293_v28  ;;  %v1296_v4 = vadd.f32 %v2330_v53, %v991_v11  ;;  %v3459_v11 = vld [vmem:[#allocation40_spill] sm:$0xff]  ;;  %v3460_v30 = vld [vmem:[#allocation41_spill] sm:$0xff] }
 0x18e   : > { %v2410_v40 = vpop.f32.mrf.mxu0  ;;  %v1232_v15 = vpop.f32.mrf.mxu1  ;;  %v997_v48 = vadd.f32 %v3459_v11, %v690_v12  ;;  %v996_v28 = vadd.f32 %v3460_v30, %v685_v61 }
 0x18f   : > { %1699 = vst [vmem:[%s3232_s9 + $0xa0] sm:$0xff] %v1667_v13  ;;  %v1670_v17 = vmax.f32 %v1638_v43, 0.0  ;;  %v1637_v23 = vadd.f32 %v3218_v38, %v1598_v16  ;;  %v1601_v2 = vadd.f32 %v2410_v40, %v1296_v4  ;;  %v1295_v19 = vadd.f32 %v1232_v15, %v990_v0 }
 0x190   : > { %v1537_v21 = vpop.f32.mrf.mxu0  ;;  %v2333_v18 = vpop.f32.mrf.mxu1 }
 0x191   : > { %1702 = vst [vmem:[%s3232_s9 + $0xb8] sm:$0xff] %v1670_v17  ;;  %v1669_v25 = vmax.f32 %v1637_v23, 0.0  ;;  %v1640_v10 = vadd.f32 %v3218_v38, %v1601_v2  ;;  %v1600_v22 = vadd.f32 %v1537_v21, %v1295_v19  ;;  %v1298_v44 = vadd.f32 %v2333_v18, %v993_v58 }
 0x192   : > { %v2413_v60 = vpop.f32.mrf.mxu0  ;;  %v1242_v24 = vpop.f32.mrf.mxu1 }
 0x193   : > { %1701 = vst [vmem:[%s3232_s9 + $0xb0] sm:$0xff] %v1669_v25  ;;  %v1672_v26 = vmax.f32 %v1640_v10, 0.0  ;;  %v1639_v33 = vadd.f32 %v3218_v38, %v1600_v22  ;;  %v1603_v52 = vadd.f32 %v2413_v60, %v1298_v44  ;;  %v1297_v39 = vadd.f32 %v1242_v24, %v992_v20 }
 0x194   : > { %v1547_v1 = vpop.f32.mrf.mxu0  ;;  %v2336_v34 = vpop.f32.mrf.mxu1 }
 0x195   : > { %1704 = vst [vmem:[%s3232_s9 + $0xc8] sm:$0xff] %v1672_v26  ;;  %v1671_v41 = vmax.f32 %v1639_v33, 0.0  ;;  %v1642_v51 = vadd.f32 %v3218_v38, %v1603_v52  ;;  %v1602_v47 = vadd.f32 %v1547_v1, %v1297_v39  ;;  %v1300_v32 = vadd.f32 %v2336_v34, %v995_v8 }
 0x196   : > { %v2416_v14 = vpop.f32.mrf.mxu0  ;;  %v1252_v46 = vpop.f32.mrf.mxu1 }
 0x197   : > { %1703 = vst [vmem:[%s3232_s9 + $0xc0] sm:$0xff] %v1671_v41  ;;  %v1674_v42 = vmax.f32 %v1642_v51, 0.0  ;;  %v1641_v49 = vadd.f32 %v3218_v38, %v1602_v47  ;;  %v1605_v55 = vadd.f32 %v2416_v14, %v1300_v32  ;;  %v1299_v35 = vadd.f32 %v1252_v46, %v994_v54 }
 0x198   : > { %v1557_v37 = vpop.f32.mrf.mxu0  ;;  %v2339_v0 = vpop.f32.mrf.mxu1 }
 0x199   : > { %1706 = vst [vmem:[%s3232_s9 + $0xd8] sm:$0xff] %v1674_v42  ;;  %v1673_v36 = vmax.f32 %v1641_v49, 0.0  ;;  %v1644_v50 = vadd.f32 %v3218_v38, %v1605_v55  ;;  %v1604_v56 = vadd.f32 %v1557_v37, %v1299_v35  ;;  %v1302_v63 = vadd.f32 %v2339_v0, %v997_v48 }
 0x19a   : > { %v2419_v53 = vpop.f32.mrf.mxu0  ;;  %v1262_v13 = vpop.f32.mrf.mxu1 }
 0x19b   : > { %1705 = vst [vmem:[%s3232_s9 + $0xd0] sm:$0xff] %v1673_v36  ;;  %v1676_v43 = vmax.f32 %v1644_v50, 0.0  ;;  %v1643_v16 = vadd.f32 %v3218_v38, %v1604_v56  ;;  %v1607_v4 = vadd.f32 %v2419_v53, %v1302_v63  ;;  %v1301_v6 = vadd.f32 %v1262_v13, %v996_v28 }
 0x19c   : > { %v1567_v58 = vpop.f32.mrf.mxu0 }
 0x19d   : > { %1708 = vst [vmem:[%s3232_s9 + $0xe8] sm:$0xff] %v1676_v43  ;;  %v1675_v59 = vmax.f32 %v1643_v16, 0.0  ;;  %v1646_v7 = vadd.f32 %v3218_v38, %v1607_v4  ;;  %v1606_v27 = vadd.f32 %v1567_v58, %v1301_v6 }
 0x19f   : > { %1707 = vst [vmem:[%s3232_s9 + $0xe0] sm:$0xff] %v1675_v59  ;;  %v1678_v40 = vmax.f32 %v1646_v7, 0.0  ;;  %v1645_v15 = vadd.f32 %v3218_v38, %v1606_v27 }
 0x1a1   : > { %1710 = vst [vmem:[%s3232_s9 + $0xf8] sm:$0xff] %v1678_v40  ;;  %v1677_v17 = vmax.f32 %v1645_v15, 0.0 }
 0x1a3   : > { %1709 = vst [vmem:[%s3232_s9 + $0xf0] sm:$0xff] %v1677_v17 }
 0x1a4 PF: > { %s13_s12 = sadd.s32 1, %s2466_s12  }
 0x1a5   : > { %p10_p4 = scmp.ge.s32.totalorder %s13_s12, 4  }
 0x1a7   :  { %12 = sbr.rel (!%p10_p4) target bundleno = 1 (0x1), region = 62 }

// kernel: visual_encoder_forward.13
= control target key start
LH: loop header
LB: loop body
LE: loop exit
PB: predicated region body
PF: predicated region fallthrough
CT: control target
= control target key end

     0   :  { %s3042_s12 = smov 0   ;;  %s4655_s0 = inlined_call_operand.vmem [shape: f32[128,3200], index: 0, kind: input, shape index: {}]   ;;  %s4656_s1 = inlined_call_operand.vmem [shape: f32[3200,128], index: 1, kind: input, shape index: {}]   ;;  %s4657_s2 = inlined_call_operand.vmem [shape: f32[1,128], index: 2, kind: input, shape index: {}]   ;;  %s4658_s3 = inlined_call_operand.vmem [shape: f32[128,128], index: 3, kind: output, shape index: {}]  }
   0x1 LB: > { %s2221_s13 = sadd.s32 4294967295, %s3020_s12   ;;  %p2225_p0 = scmp.ge.s32.totalorder %s3020_s12, 1  ;;  %s3020_s12 = sphi %s3042_s12, %s13_s12  }
   0x2   : > { %p139_p1 = scmp.lt.s32.totalorder %s3020_s12, 3 }
   0x4   : > { %p140_p2 = pnand %p2225_p0, %p139_p1 }
   0x6   : > { %143 = sbr.rel (%p140_p2) target bundleno = 539 (0x21b), region = 32 }
   0xb   : > { %v408_v0 = vld [vmem:[%s4656_s1 + $0xf8] sm:$0xff]  ;;  %v407_v4 = vld [vmem:[%s4656_s1 + $0xf0] sm:$0xff]  ;;  %v406_v8 = vld [vmem:[%s4656_s1 + $0xe8] sm:$0xff]  ;;  %s3136_s20 = sshll.u32 %s2221_s13, 3 }
   0xc   : > { %v440_v1 = vld [vmem:[%s4656_s1 + $0x1f8] sm:$0xff]  ;;  %2233 = vmatprep.subr.mxu0 %v408_v0  ;;  %v439_v5 = vld [vmem:[%s4656_s1 + $0x1f0] sm:$0xff]  ;;  %v438_v9 = vld [vmem:[%s4656_s1 + $0x1e8] sm:$0xff]  ;;  %p165_p3 = scmp.lt.s32.totalorder %s3136_s20, 15 }
   0xd   : > { %v392_v2 = vld [vmem:[%s4656_s1 + $0x78] sm:$0xff]  ;;  %2289 = vmatprep.subr.mxu1 %v440_v1  ;;  %v391_v6 = vld [vmem:[%s4656_s1 + $0x70] sm:$0xff]  ;;  %v390_v10 = vld [vmem:[%s4656_s1 + $0x68] sm:$0xff] }
   0xe   : > { %v424_v3 = vld [vmem:[%s4656_s1 + $0x178] sm:$0xff]  ;;  %2234 = vmatpush3.msra.mxu0 %v392_v2  ;;  %v423_v7 = vld [vmem:[%s4656_s1 + $0x170] sm:$0xff]  ;;  %v422_v11 = vld [vmem:[%s4656_s1 + $0x168] sm:$0xff]  ;;  %s4690_s20 = smov (!%p165_p3, %s3136_s20), 15 }
   0xf   : > { %2290 = vmatpush3.msra.mxu1 %v424_v3  ;;  %2235 = vmatprep.subr.mxu0 %v407_v4  ;;  %v405_v12 = vld [vmem:[%s4656_s1 + $0xe0] sm:$0xff]  ;;  %v404_v16 = vld [vmem:[%s4656_s1 + $0xd8] sm:$0xff]  ;;  %v403_v20 = vld [vmem:[%s4656_s1 + $0xd0] sm:$0xff]  ;;  %s3005_s14 = smul.u32 200, %s4690_s20 }
  0x10   : > { %2291 = vmatprep.subr.mxu1 %v439_v5  ;;  %2236 = vmatpush3.msra.mxu0 %v391_v6  ;;  %v437_v13 = vld [vmem:[%s4656_s1 + $0x1e0] sm:$0xff]  ;;  %v436_v17 = vld [vmem:[%s4656_s1 + $0x1d8] sm:$0xff]  ;;  %v435_v21 = vld [vmem:[%s4656_s1 + $0x1d0] sm:$0xff] }
  0x11   : > { %2292 = vmatpush3.msra.mxu1 %v423_v7  ;;  %2237 = vmatprep.subr.mxu0 %v406_v8  ;;  %v389_v14 = vld [vmem:[%s4656_s1 + $0x60] sm:$0xff]  ;;  %v388_v18 = vld [vmem:[%s4656_s1 + $0x58] sm:$0xff]  ;;  %v387_v22 = vld [vmem:[%s4656_s1 + $0x50] sm:$0xff]  ;;  %s3238_s6 = scalar_lea.vmem %s4655_s0, %s3005_s14 }
  0x12   : > { %2293 = vmatprep.subr.mxu1 %v438_v9  ;;  %v421_v15 = vld [vmem:[%s4656_s1 + $0x160] sm:$0xff]  ;;  %2238 = vmatpush3.msra.mxu0 %v390_v10  ;;  %v420_v19 = vld [vmem:[%s4656_s1 + $0x158] sm:$0xff]  ;;  %v419_v23 = vld [vmem:[%s4656_s1 + $0x150] sm:$0xff] }
  0x13   : > { %2294 = vmatpush3.msra.mxu1 %v422_v11  ;;  %2239 = vmatprep.subr.mxu0 %v405_v12  ;;  %v402_v24 = vld [vmem:[%s4656_s1 + $0xc8] sm:$0xff]  ;;  %v401_v28 = vld [vmem:[%s4656_s1 + $0xc0] sm:$0xff]  ;;  %v400_v32 = vld [vmem:[%s4656_s1 + $0xb8] sm:$0xff] }
  0x14   : > { %2295 = vmatprep.subr.mxu1 %v437_v13  ;;  %2240 = vmatpush3.msra.mxu0 %v389_v14  ;;  %v434_v25 = vld [vmem:[%s4656_s1 + $0x1c8] sm:$0xff]  ;;  %v433_v29 = vld [vmem:[%s4656_s1 + $0x1c0] sm:$0xff]  ;;  %v432_v33 = vld [vmem:[%s4656_s1 + $0x1b8] sm:$0xff] }
  0x15   : > { %2296 = vmatpush3.msra.mxu1 %v421_v15  ;;  %2241 = vmatprep.subr.mxu0 %v404_v16  ;;  %v386_v26 = vld [vmem:[%s4656_s1 + $0x48] sm:$0xff]  ;;  %v385_v30 = vld [vmem:[%s4656_s1 + $0x40] sm:$0xff]  ;;  %v384_v34 = vld [vmem:[%s4656_s1 + $0x38] sm:$0xff] }
  0x16   : > { %2297 = vmatprep.subr.mxu1 %v436_v17  ;;  %2242 = vmatpush3.msra.mxu0 %v388_v18  ;;  %v418_v27 = vld [vmem:[%s4656_s1 + $0x148] sm:$0xff]  ;;  %v417_v31 = vld [vmem:[%s4656_s1 + $0x140] sm:$0xff]  ;;  %v416_v35 = vld [vmem:[%s4656_s1 + $0x138] sm:$0xff] }
  0x17   : > { %2298 = vmatpush3.msra.mxu1 %v420_v19  ;;  %2243 = vmatprep.subr.mxu0 %v403_v20  ;;  %v399_v36 = vld [vmem:[%s4656_s1 + $0xb0] sm:$0xff]  ;;  %v398_v40 = vld [vmem:[%s4656_s1 + $0xa8] sm:$0xff]  ;;  %v397_v44 = vld [vmem:[%s4656_s1 + $0xa0] sm:$0xff] }
  0x18   : > { %2299 = vmatprep.subr.mxu1 %v435_v21  ;;  %2244 = vmatpush3.msra.mxu0 %v387_v22  ;;  %v431_v37 = vld [vmem:[%s4656_s1 + $0x1b0] sm:$0xff]  ;;  %v430_v41 = vld [vmem:[%s4656_s1 + $0x1a8] sm:$0xff]  ;;  %v429_v45 = vld [vmem:[%s4656_s1 + $0x1a0] sm:$0xff] }
  0x19   : > { %2300 = vmatpush3.msra.mxu1 %v419_v23  ;;  %2245 = vmatprep.subr.mxu0 %v402_v24  ;;  %v383_v38 = vld [vmem:[%s4656_s1 + $0x30] sm:$0xff]  ;;  %v382_v42 = vld [vmem:[%s4656_s1 + $0x28] sm:$0xff]  ;;  %v381_v46 = vld [vmem:[%s4656_s1 + $0x20] sm:$0xff] }
  0x1a   : > { %2301 = vmatprep.subr.mxu1 %v434_v25  ;;  %2246 = vmatpush3.msra.mxu0 %v386_v26  ;;  %v415_v39 = vld [vmem:[%s4656_s1 + $0x130] sm:$0xff]  ;;  %v414_v43 = vld [vmem:[%s4656_s1 + $0x128] sm:$0xff]  ;;  %v413_v47 = vld [vmem:[%s4656_s1 + $0x120] sm:$0xff] }
  0x1b   : > { %2302 = vmatpush3.msra.mxu1 %v418_v27  ;;  %2247 = vmatprep.subr.mxu0 %v401_v28  ;;  %v396_v48 = vld [vmem:[%s4656_s1 + $0x98] sm:$0xff]  ;;  %v395_v52 = vld [vmem:[%s4656_s1 + $0x90] sm:$0xff]  ;;  %v394_v56 = vld [vmem:[%s4656_s1 + $0x88] sm:$0xff] }
  0x1c   : > { %2303 = vmatprep.subr.mxu1 %v433_v29  ;;  %2248 = vmatpush3.msra.mxu0 %v385_v30  ;;  %v428_v49 = vld [vmem:[%s4656_s1 + $0x198] sm:$0xff]  ;;  %v427_v53 = vld [vmem:[%s4656_s1 + $0x190] sm:$0xff]  ;;  %v426_v57 = vld [vmem:[%s4656_s1 + $0x188] sm:$0xff] }
  0x1d   : > { %2304 = vmatpush3.msra.mxu1 %v417_v31  ;;  %2249 = vmatprep.subr.mxu0 %v400_v32  ;;  %v380_v50 = vld [vmem:[%s4656_s1 + $0x18] sm:$0xff]  ;;  %v379_v54 = vld [vmem:[%s4656_s1 + $0x10] sm:$0xff]  ;;  %v378_v58 = vld [vmem:[%s4656_s1 + $0x8] sm:$0xff] }
  0x1e   : > { %2305 = vmatprep.subr.mxu1 %v432_v33  ;;  %2250 = vmatpush3.msra.mxu0 %v384_v34  ;;  %v412_v51 = vld [vmem:[%s4656_s1 + $0x118] sm:$0xff]  ;;  %v411_v55 = vld [vmem:[%s4656_s1 + $0x110] sm:$0xff]  ;;  %v410_v59 = vld [vmem:[%s4656_s1 + $0x108] sm:$0xff] }
  0x1f   : > { %2306 = vmatpush3.msra.mxu1 %v416_v35  ;;  %2251 = vmatprep.subr.mxu0 %v399_v36  ;;  %v393_v60 = vld [vmem:[%s4656_s1 + $0x80] sm:$0xff]  ;;  %v178_v63 = vld [vmem:[%s3238_s6 + $0x8] sm:$0xff]  ;;  %v180_v1 = vld [vmem:[%s3238_s6 + $0x18] sm:$0xff] }
  0x20   : > { %2307 = vmatprep.subr.mxu1 %v431_v37  ;;  %2252 = vmatpush3.msra.mxu0 %v383_v38  ;;  %v425_v61 = vld [vmem:[%s4656_s1 + $0x180] sm:$0xff]  ;;  %v179_v3 = vld [vmem:[%s3238_s6 + $0x10] sm:$0xff]  ;;  %v472_v4 = vld [vmem:[%s4656_s1 + $0x2f8] sm:$0xff] }
  0x21   : > { %2308 = vmatpush3.msra.mxu1 %v415_v39  ;;  %2253 = vmatprep.subr.mxu0 %v398_v40  ;;  %v377_v62 = vld [vmem:[%s4656_s1] sm:$0xff]  ;;  %v504_v5 = vld [vmem:[%s4656_s1 + $0x3f8] sm:$0xff]  ;;  %v471_v8 = vld [vmem:[%s4656_s1 + $0x2f0] sm:$0xff] }
  0x22   : > { %2309 = vmatprep.subr.mxu1 %v430_v41  ;;  %2254 = vmatpush3.msra.mxu0 %v382_v42  ;;  %v409_v0 = vld [vmem:[%s4656_s1 + $0x100] sm:$0xff]  ;;  %v456_v6 = vld [vmem:[%s4656_s1 + $0x278] sm:$0xff]  ;;  %v503_v9 = vld [vmem:[%s4656_s1 + $0x3f0] sm:$0xff] }
  0x23   : > { %2310 = vmatpush3.msra.mxu1 %v414_v43  ;;  %2255 = vmatprep.subr.mxu0 %v397_v44  ;;  %v177_v2 = vld [vmem:[%s3238_s6] sm:$0xff]  ;;  %v488_v7 = vld [vmem:[%s4656_s1 + $0x378] sm:$0xff]  ;;  %v203_v10 = vld [vmem:[%s3238_s6 + $0xd0] sm:$0xff] }
  0x24   : > { %2311 = vmatprep.subr.mxu1 %v429_v45  ;;  %2256 = vmatpush3.msra.mxu0 %v381_v46  ;;  %v205_v11 = vld [vmem:[%s3238_s6 + $0xe0] sm:$0xff]  ;;  %v455_v12 = vld [vmem:[%s4656_s1 + $0x270] sm:$0xff]  ;;  %v202_v14 = vld [vmem:[%s3238_s6 + $0xc8] sm:$0xff] }
  0x25   : > { %2312 = vmatpush3.msra.mxu1 %v413_v47  ;;  %2257 = vmatprep.subr.mxu0 %v396_v48  ;;  %v487_v13 = vld [vmem:[%s4656_s1 + $0x370] sm:$0xff]  ;;  %v204_v15 = vld [vmem:[%s3238_s6 + $0xd8] sm:$0xff]  ;;  %v470_v16 = vld [vmem:[%s4656_s1 + $0x2e8] sm:$0xff] }
  0x26   : > { %2313 = vmatprep.subr.mxu1 %v428_v49  ;;  %2258 = vmatpush3.msra.mxu0 %v380_v50  ;;  %v502_v17 = vld [vmem:[%s4656_s1 + $0x3e8] sm:$0xff]  ;;  %v469_v20 = vld [vmem:[%s4656_s1 + $0x2e0] sm:$0xff]  ;;  %v228_v22 = vld [vmem:[%s3238_s6 + $0x198] sm:$0xff] }
  0x27   : > { %2314 = vmatpush3.msra.mxu1 %v412_v51  ;;  %2259 = vmatprep.subr.mxu0 %v395_v52  ;;  %v454_v18 = vld [vmem:[%s4656_s1 + $0x268] sm:$0xff]  ;;  %v501_v21 = vld [vmem:[%s4656_s1 + $0x3e0] sm:$0xff]  ;;  %v227_v26 = vld [vmem:[%s3238_s6 + $0x190] sm:$0xff] }
  0x28   : > { %2315 = vmatprep.subr.mxu1 %v427_v53  ;;  %2260 = vmatpush3.msra.mxu0 %v379_v54  ;;  %v486_v19 = vld [vmem:[%s4656_s1 + $0x368] sm:$0xff]  ;;  %v453_v24 = vld [vmem:[%s4656_s1 + $0x260] sm:$0xff]  ;;  %v468_v28 = vld [vmem:[%s4656_s1 + $0x2d8] sm:$0xff] }
  0x29   : > { %2316 = vmatpush3.msra.mxu1 %v411_v55  ;;  %2261 = vmatprep.subr.mxu0 %v394_v56  ;;  %v230_v23 = vld [vmem:[%s3238_s6 + $0x1a8] sm:$0xff]  ;;  %v485_v25 = vld [vmem:[%s4656_s1 + $0x360] sm:$0xff]  ;;  %v500_v29 = vld [vmem:[%s4656_s1 + $0x3d8] sm:$0xff] }
  0x2a   : > { %2317 = vmatprep.subr.mxu1 %v426_v57  ;;  %2262 = vmatpush3.msra.mxu0 %v378_v58  ;;  %v229_v27 = vld [vmem:[%s3238_s6 + $0x1a0] sm:$0xff]  ;;  %v452_v30 = vld [vmem:[%s4656_s1 + $0x258] sm:$0xff]  ;;  %v467_v32 = vld [vmem:[%s4656_s1 + $0x2d0] sm:$0xff] }
  0x2b   : > { %2318 = vmatpush3.msra.mxu1 %v410_v59  ;;  %2263 = vmatprep.subr.mxu0 %v393_v60  ;;  %v484_v31 = vld [vmem:[%s4656_s1 + $0x358] sm:$0xff]  ;;  %v499_v33 = vld [vmem:[%s4656_s1 + $0x3d0] sm:$0xff]  ;;  %v253_v34 = vld [vmem:[%s3238_s6 + $0x260] sm:$0xff] }
  0x2c   : > { %2319 = vmatprep.subr.mxu1 %v425_v61  ;;  %2264 = vmatpush3.msra.mxu0 %v377_v62  ;;  %v255_v35 = vld [vmem:[%s3238_s6 + $0x270] sm:$0xff]  ;;  %v252_v38 = vld [vmem:[%s3238_s6 + $0x258] sm:$0xff]  ;;  %v254_v39 = vld [vmem:[%s3238_s6 + $0x268] sm:$0xff] }
  0x2d   : > { %848 = vmatprep.mubr.f32.mxu0 %v178_v63  ;;  %2320 = vmatpush3.msra.mxu1 %v409_v0  ;;  %v451_v36 = vld [vmem:[%s4656_s1 + $0x250] sm:$0xff]  ;;  %v466_v40 = vld [vmem:[%s4656_s1 + $0x2c8] sm:$0xff]  ;;  %v465_v44 = vld [vmem:[%s4656_s1 + $0x2c0] sm:$0xff] }
  0x2e   : > { %953 = vmatprep.mubr.f32.mxu1 %v180_v1  ;;  %849 = vmatmul.mubr.f32.vlgmr.msra.gmra.mxu0 %v177_v2  ;;  %v483_v37 = vld [vmem:[%s4656_s1 + $0x350] sm:$0xff]  ;;  %v498_v41 = vld [vmem:[%s4656_s1 + $0x3c8] sm:$0xff]  ;;  %v497_v45 = vld [vmem:[%s4656_s1 + $0x3c0] sm:$0xff] }
  0x2f   : > { %954 = vmatmul.mubr.f32.vlgmr.msra.gmra.mxu1 %v179_v3  ;;  %2345 = vmatprep.subr.mxu0 %v472_v4  ;;  %v450_v42 = vld [vmem:[%s4656_s1 + $0x248] sm:$0xff]  ;;  %v280_v47 = vld [vmem:[%s3238_s6 + $0x338] sm:$0xff]  ;;  %v449_v48 = vld [vmem:[%s4656_s1 + $0x240] sm:$0xff] }
  0x30   : > { %2401 = vmatprep.subr.mxu1 %v504_v5  ;;  %2346 = vmatpush3.msra.mxu0 %v456_v6  ;;  %v482_v43 = vld [vmem:[%s4656_s1 + $0x348] sm:$0xff]  ;;  %v481_v49 = vld [vmem:[%s4656_s1 + $0x340] sm:$0xff]  ;;  %v279_v51 = vld [vmem:[%s3238_s6 + $0x330] sm:$0xff] }
  0x31   : > { %2402 = vmatpush3.msra.mxu1 %v488_v7  ;;  %2347 = vmatprep.subr.mxu0 %v471_v8  ;;  %v278_v46 = vld [vmem:[%s3238_s6 + $0x328] sm:$0xff]  ;;  %v277_v50 = vld [vmem:[%s3238_s6 + $0x320] sm:$0xff]  ;;  %v464_v52 = vld [vmem:[%s4656_s1 + $0x2b8] sm:$0xff] }
  0x32   : > { %2403 = vmatprep.subr.mxu1 %v503_v9  ;;  %853 = vmatprep.mubr.f32.mxu0 %v203_v10  ;;  %v496_v53 = vld [vmem:[%s4656_s1 + $0x3b8] sm:$0xff]  ;;  %v463_v56 = vld [vmem:[%s4656_s1 + $0x2b0] sm:$0xff]  ;;  %v305_v59 = vld [vmem:[%s3238_s6 + $0x400] sm:$0xff] }
  0x33   : > { %958 = vmatprep.mubr.f32.mxu1 %v205_v11  ;;  %2348 = vmatpush3.msra.mxu0 %v455_v12  ;;  %v448_v54 = vld [vmem:[%s4656_s1 + $0x238] sm:$0xff]  ;;  %v495_v57 = vld [vmem:[%s4656_s1 + $0x3b0] sm:$0xff]  ;;  %v302_v62 = vld [vmem:[%s3238_s6 + $0x3e8] sm:$0xff] }
  0x34   : > { %2404 = vmatpush3.msra.mxu1 %v487_v13  ;;  %854 = vmatmul.mubr.f32.gmra.mxu0 %v202_v14  ;;  %v480_v55 = vld [vmem:[%s4656_s1 + $0x338] sm:$0xff]  ;;  %v303_v58 = vld [vmem:[%s3238_s6 + $0x3f0] sm:$0xff]  ;;  %v462_v0 = vld [vmem:[%s4656_s1 + $0x2a8] sm:$0xff] }
  0x35   : > { %959 = vmatmul.mubr.f32.gmra.mxu1 %v204_v15  ;;  %2349 = vmatprep.subr.mxu0 %v470_v16  ;;  %v447_v60 = vld [vmem:[%s4656_s1 + $0x230] sm:$0xff]  ;;  %v304_v63 = vld [vmem:[%s3238_s6 + $0x3f8] sm:$0xff]  ;;  %v494_v1 = vld [vmem:[%s4656_s1 + $0x3a8] sm:$0xff] }
  0x36   : > { %2405 = vmatprep.subr.mxu1 %v502_v17  ;;  %2350 = vmatpush3.msra.mxu0 %v454_v18  ;;  %v479_v61 = vld [vmem:[%s4656_s1 + $0x330] sm:$0xff]  ;;  %v446_v2 = vld [vmem:[%s4656_s1 + $0x228] sm:$0xff]  ;;  %v461_v4 = vld [vmem:[%s4656_s1 + $0x2a0] sm:$0xff] }
  0x37   : > { %2406 = vmatpush3.msra.mxu1 %v486_v19  ;;  %2351 = vmatprep.subr.mxu0 %v469_v20  ;;  %v478_v3 = vld [vmem:[%s4656_s1 + $0x328] sm:$0xff]  ;;  %v493_v5 = vld [vmem:[%s4656_s1 + $0x3a0] sm:$0xff]  ;;  %v328_v6 = vld [vmem:[%s3238_s6 + $0x4b8] sm:$0xff] }
  0x38   : > { %2407 = vmatprep.subr.mxu1 %v501_v21  ;;  %858 = vmatprep.mubr.f32.mxu0 %v228_v22  ;;  %v330_v7 = vld [vmem:[%s3238_s6 + $0x4c8] sm:$0xff]  ;;  %v445_v8 = vld [vmem:[%s4656_s1 + $0x220] sm:$0xff]  ;;  %v327_v10 = vld [vmem:[%s3238_s6 + $0x4b0] sm:$0xff] }
  0x39   : > { %963 = vmatprep.mubr.f32.mxu1 %v230_v23  ;;  %2352 = vmatpush3.msra.mxu0 %v453_v24  ;;  %v477_v9 = vld [vmem:[%s4656_s1 + $0x320] sm:$0xff]  ;;  %v460_v12 = vld [vmem:[%s4656_s1 + $0x298] sm:$0xff]  ;;  %v459_v16 = vld [vmem:[%s4656_s1 + $0x290] sm:$0xff] }
  0x3a   : > { %2408 = vmatpush3.msra.mxu1 %v485_v25  ;;  %859 = vmatmul.mubr.f32.gmra.mxu0 %v227_v26  ;;  %v329_v11 = vld [vmem:[%s3238_s6 + $0x4c0] sm:$0xff]  ;;  %v492_v13 = vld [vmem:[%s4656_s1 + $0x398] sm:$0xff]  ;;  %v491_v17 = vld [vmem:[%s4656_s1 + $0x390] sm:$0xff] }
  0x3b   : > { %964 = vmatmul.mubr.f32.gmra.mxu1 %v229_v27  ;;  %2353 = vmatprep.subr.mxu0 %v468_v28  ;;  %v444_v14 = vld [vmem:[%s4656_s1 + $0x218] sm:$0xff]  ;;  %v353_v18 = vld [vmem:[%s3238_s6 + $0x580] sm:$0xff]  ;;  %v355_v19 = vld [vmem:[%s3238_s6 + $0x590] sm:$0xff] }
  0x3c   : > { %2409 = vmatprep.subr.mxu1 %v500_v29  ;;  %2354 = vmatpush3.msra.mxu0 %v452_v30  ;;  %v476_v15 = vld [vmem:[%s4656_s1 + $0x318] sm:$0xff]  ;;  %v443_v20 = vld [vmem:[%s4656_s1 + $0x210] sm:$0xff]  ;;  %v354_v23 = vld [vmem:[%s3238_s6 + $0x588] sm:$0xff] }
  0x3d   : > { %2410 = vmatpush3.msra.mxu1 %v484_v31  ;;  %2355 = vmatprep.subr.mxu0 %v467_v32  ;;  %v475_v21 = vld [vmem:[%s4656_s1 + $0x310] sm:$0xff]  ;;  %v352_v22 = vld [vmem:[%s3238_s6 + $0x578] sm:$0xff]  ;;  %v458_v24 = vld [vmem:[%s4656_s1 + $0x288] sm:$0xff] }
  0x3e   : > { %2411 = vmatprep.subr.mxu1 %v499_v33  ;;  %863 = vmatprep.mubr.f32.mxu0 %v253_v34  ;;  %v490_v25 = vld [vmem:[%s4656_s1 + $0x388] sm:$0xff]  ;;  %v457_v28 = vld [vmem:[%s4656_s1 + $0x280] sm:$0xff]  ;;  %v184_v33 = vld [vmem:[%s3238_s6 + $0x38] sm:$0xff] }
  0x3f   : > { %968 = vmatprep.mubr.f32.mxu1 %v255_v35  ;;  %2356 = vmatpush3.msra.mxu0 %v451_v36  ;;  %v442_v26 = vld [vmem:[%s4656_s1 + $0x208] sm:$0xff]  ;;  %v489_v29 = vld [vmem:[%s4656_s1 + $0x380] sm:$0xff]  ;;  %v183_v35 = vld [vmem:[%s3238_s6 + $0x30] sm:$0xff] }
  0x40   : > { %2412 = vmatpush3.msra.mxu1 %v483_v37  ;;  %864 = vmatmul.mubr.f32.gmra.mxu0 %v252_v38  ;;  %v474_v27 = vld [vmem:[%s4656_s1 + $0x308] sm:$0xff]  ;;  %v441_v30 = vld [vmem:[%s4656_s1 + $0x200] sm:$0xff]  ;;  %v536_v36 = vld [vmem:[%s4656_s1 + $0x4f8] sm:$0xff] }
  0x41   : > { %969 = vmatmul.mubr.f32.gmra.mxu1 %v254_v39  ;;  %2357 = vmatprep.subr.mxu0 %v466_v40  ;;  %v182_v31 = vld [vmem:[%s3238_s6 + $0x28] sm:$0xff]  ;;  %v473_v32 = vld [vmem:[%s4656_s1 + $0x300] sm:$0xff]  ;;  %v568_v37 = vld [vmem:[%s4656_s1 + $0x5f8] sm:$0xff] }
  0x42   : > { %2413 = vmatprep.subr.mxu1 %v498_v41  ;;  %2358 = vmatpush3.msra.mxu0 %v450_v42  ;;  %v181_v34 = vld [vmem:[%s3238_s6 + $0x20] sm:$0xff]  ;;  %v520_v38 = vld [vmem:[%s4656_s1 + $0x478] sm:$0xff]  ;;  %v535_v40 = vld [vmem:[%s4656_s1 + $0x4f0] sm:$0xff] }
  0x43   : > { %2414 = vmatpush3.msra.mxu1 %v482_v43  ;;  %2359 = vmatprep.subr.mxu0 %v465_v44  ;;  %v552_v39 = vld [vmem:[%s4656_s1 + $0x578] sm:$0xff]  ;;  %v567_v41 = vld [vmem:[%s4656_s1 + $0x5f0] sm:$0xff]  ;;  %v209_v43 = vld [vmem:[%s3238_s6 + $0x100] sm:$0xff] }
  0x44   : > { %2415 = vmatprep.subr.mxu1 %v497_v45  ;;  %868 = vmatprep.mubr.f32.mxu0 %v278_v46  ;;  %v207_v42 = vld [vmem:[%s3238_s6 + $0xf0] sm:$0xff]  ;;  %v206_v46 = vld [vmem:[%s3238_s6 + $0xe8] sm:$0xff] }
  0x45   : > { %973 = vmatprep.mubr.f32.mxu1 %v280_v47  ;;  %2360 = vmatpush3.msra.mxu0 %v449_v48  ;;  %v519_v44 = vld [vmem:[%s4656_s1 + $0x470] sm:$0xff]  ;;  %v208_v47 = vld [vmem:[%s3238_s6 + $0xf8] sm:$0xff]  ;;  %v534_v48 = vld [vmem:[%s4656_s1 + $0x4e8] sm:$0xff] }
  0x46   : > { %2416 = vmatpush3.msra.mxu1 %v481_v49  ;;  %869 = vmatmul.mubr.f32.gmra.mxu0 %v277_v50  ;;  %v551_v45 = vld [vmem:[%s4656_s1 + $0x570] sm:$0xff]  ;;  %v566_v49 = vld [vmem:[%s4656_s1 + $0x5e8] sm:$0xff] }
  0x47   : > { %974 = vmatmul.mubr.f32.gmra.mxu1 %v279_v51  ;;  %2361 = vmatprep.subr.mxu0 %v464_v52  ;;  %v518_v50 = vld [vmem:[%s4656_s1 + $0x468] sm:$0xff]  ;;  %v533_v52 = vld [vmem:[%s4656_s1 + $0x4e0] sm:$0xff] }
  0x48   : > { %2417 = vmatprep.subr.mxu1 %v496_v53  ;;  %2362 = vmatpush3.msra.mxu0 %v448_v54  ;;  %v550_v51 = vld [vmem:[%s4656_s1 + $0x568] sm:$0xff]  ;;  %v565_v53 = vld [vmem:[%s4656_s1 + $0x5e0] sm:$0xff]  ;;  %v232_v54 = vld [vmem:[%s3238_s6 + $0x1b8] sm:$0xff] }
  0x49   : > { %2418 = vmatpush3.msra.mxu1 %v480_v55  ;;  %2363 = vmatprep.subr.mxu0 %v463_v56  ;;  %v234_v55 = vld [vmem:[%s3238_s6 + $0x1c8] sm:$0xff]  ;;  %v517_v56 = vld [vmem:[%s4656_s1 + $0x460] sm:$0xff] }
  0x4a   : > { %2419 = vmatprep.subr.mxu1 %v495_v57  ;;  %873 = vmatprep.mubr.f32.mxu0 %v303_v58  ;;  %v549_v57 = vld [vmem:[%s4656_s1 + $0x560] sm:$0xff]  ;;  %v231_v58 = vld [vmem:[%s3238_s6 + $0x1b0] sm:$0xff] }
  0x4b   : > { %978 = vmatprep.mubr.f32.mxu1 %v305_v59  ;;  %2364 = vmatpush3.msra.mxu0 %v447_v60  ;;  %v233_v59 = vld [vmem:[%s3238_s6 + $0x1c0] sm:$0xff]  ;;  %v532_v60 = vld [vmem:[%s4656_s1 + $0x4d8] sm:$0xff] }
  0x4c   : > { %2420 = vmatpush3.msra.mxu1 %v479_v61  ;;  %874 = vmatmul.mubr.f32.gmra.mxu0 %v302_v62  ;;  %v564_v61 = vld [vmem:[%s4656_s1 + $0x5d8] sm:$0xff] }
  0x4d   : > { %979 = vmatmul.mubr.f32.gmra.mxu1 %v304_v63  ;;  %2365 = vmatprep.subr.mxu0 %v462_v0  ;;  %v516_v62 = vld [vmem:[%s4656_s1 + $0x458] sm:$0xff]  ;;  %v531_v0 = vld [vmem:[%s4656_s1 + $0x4d0] sm:$0xff] }
  0x4e   : > { %2421 = vmatprep.subr.mxu1 %v494_v1  ;;  %2366 = vmatpush3.msra.mxu0 %v446_v2  ;;  %v548_v63 = vld [vmem:[%s4656_s1 + $0x558] sm:$0xff]  ;;  %v563_v1 = vld [vmem:[%s4656_s1 + $0x5d0] sm:$0xff]  ;;  %v257_v2 = vld [vmem:[%s3238_s6 + $0x280] sm:$0xff] }
  0x4f   : > { %2422 = vmatpush3.msra.mxu1 %v478_v3  ;;  %2367 = vmatprep.subr.mxu0 %v461_v4  ;;  %v259_v3 = vld [vmem:[%s3238_s6 + $0x290] sm:$0xff] }
  0x50   : > { %2423 = vmatprep.subr.mxu1 %v493_v5  ;;  %878 = vmatprep.mubr.f32.mxu0 %v328_v6  ;;  %v515_v4 = vld [vmem:[%s4656_s1 + $0x450] sm:$0xff]  ;;  %v256_v6 = vld [vmem:[%s3238_s6 + $0x278] sm:$0xff] }
  0x51   : > { %983 = vmatprep.mubr.f32.mxu1 %v330_v7  ;;  %2368 = vmatpush3.msra.mxu0 %v445_v8  ;;  %v547_v5 = vld [vmem:[%s4656_s1 + $0x550] sm:$0xff]  ;;  %v258_v7 = vld [vmem:[%s3238_s6 + $0x288] sm:$0xff] }
  0x52   : > { %2424 = vmatpush3.msra.mxu1 %v477_v9  ;;  %879 = vmatmul.mubr.f32.gmra.mxu0 %v327_v10  ;;  %v530_v8 = vld [vmem:[%s4656_s1 + $0x4c8] sm:$0xff] }
  0x53   : > { %984 = vmatmul.mubr.f32.gmra.mxu1 %v329_v11  ;;  %2369 = vmatprep.subr.mxu0 %v460_v12  ;;  %v562_v9 = vld [vmem:[%s4656_s1 + $0x5c8] sm:$0xff]  ;;  %v529_v12 = vld [vmem:[%s4656_s1 + $0x4c0] sm:$0xff] }
  0x54   : > { %2425 = vmatprep.subr.mxu1 %v492_v13  ;;  %2370 = vmatpush3.msra.mxu0 %v444_v14  ;;  %v514_v10 = vld [vmem:[%s4656_s1 + $0x448] sm:$0xff]  ;;  %v561_v13 = vld [vmem:[%s4656_s1 + $0x5c0] sm:$0xff] }
  0x55   : > { %2426 = vmatpush3.msra.mxu1 %v476_v15  ;;  %2371 = vmatprep.subr.mxu0 %v459_v16  ;;  %v546_v11 = vld [vmem:[%s4656_s1 + $0x548] sm:$0xff]  ;;  %v284_v15 = vld [vmem:[%s3238_s6 + $0x358] sm:$0xff]  ;;  %v513_v16 = vld [vmem:[%s4656_s1 + $0x440] sm:$0xff] }
  0x56   : > { %2427 = vmatprep.subr.mxu1 %v491_v17  ;;  %883 = vmatprep.mubr.f32.mxu0 %v353_v18  ;;  %v282_v14 = vld [vmem:[%s3238_s6 + $0x348] sm:$0xff]  ;;  %v545_v17 = vld [vmem:[%s4656_s1 + $0x540] sm:$0xff] }
  0x57   : > { %988 = vmatprep.mubr.f32.mxu1 %v355_v19  ;;  %2372 = vmatpush3.msra.mxu0 %v443_v20  ;;  %v281_v18 = vld [vmem:[%s3238_s6 + $0x340] sm:$0xff]  ;;  %v283_v19 = vld [vmem:[%s3238_s6 + $0x350] sm:$0xff]  ;;  %v528_v20 = vld [vmem:[%s4656_s1 + $0x4b8] sm:$0xff] }
  0x58   : > { %2428 = vmatpush3.msra.mxu1 %v475_v21  ;;  %884 = vmatmul.mubr.f32.gmra.mxu0 %v352_v22  ;;  %v560_v21 = vld [vmem:[%s4656_s1 + $0x5b8] sm:$0xff] }
  0x59   : > { %989 = vmatmul.mubr.f32.gmra.mxu1 %v354_v23  ;;  %2373 = vmatprep.subr.mxu0 %v458_v24  ;;  %v512_v22 = vld [vmem:[%s4656_s1 + $0x438] sm:$0xff]  ;;  %v527_v24 = vld [vmem:[%s4656_s1 + $0x4b0] sm:$0xff] }
  0x5a   : > { %2429 = vmatprep.subr.mxu1 %v490_v25  ;;  %2374 = vmatpush3.msra.mxu0 %v442_v26  ;;  %v544_v23 = vld [vmem:[%s4656_s1 + $0x538] sm:$0xff]  ;;  %v559_v25 = vld [vmem:[%s4656_s1 + $0x5b0] sm:$0xff] }
  0x5b   : > { %2430 = vmatpush3.msra.mxu1 %v474_v27  ;;  %2375 = vmatprep.subr.mxu0 %v457_v28  ;;  %v307_v26 = vld [vmem:[%s3238_s6 + $0x410] sm:$0xff]  ;;  %v309_v27 = vld [vmem:[%s3238_s6 + $0x420] sm:$0xff] }
  0x5c   : > { %2431 = vmatprep.subr.mxu1 %v489_v29  ;;  %2376 = vmatpush3.msra.mxu0 %v441_v30  ;;  %v511_v28 = vld [vmem:[%s4656_s1 + $0x430] sm:$0xff]  ;;  %v306_v30 = vld [vmem:[%s3238_s6 + $0x408] sm:$0xff] }
  0x5d   : > { %1058 = vmatprep.mubr.f32.mxu0 %v182_v31  ;;  %2432 = vmatpush3.msra.mxu1 %v473_v32  ;;  %v543_v29 = vld [vmem:[%s4656_s1 + $0x530] sm:$0xff]  ;;  %v308_v31 = vld [vmem:[%s3238_s6 + $0x418] sm:$0xff]  ;;  %v526_v32 = vld [vmem:[%s4656_s1 + $0x4a8] sm:$0xff] }
  0x5e   : > { %1163 = vmatprep.mubr.f32.mxu1 %v184_v33  ;;  %1059 = vmatmul.mubr.f32.vlgmr.msra.gmra.mxu0 %v181_v34  ;;  %v558_v33 = vld [vmem:[%s4656_s1 + $0x5a8] sm:$0xff] }
  0x5f   : > { %1164 = vmatmul.mubr.f32.vlgmr.msra.gmra.mxu1 %v183_v35  ;;  %2457 = vmatprep.subr.mxu0 %v536_v36  ;;  %v510_v34 = vld [vmem:[%s4656_s1 + $0x428] sm:$0xff]  ;;  %v525_v36 = vld [vmem:[%s4656_s1 + $0x4a0] sm:$0xff] }
  0x60   : > { %2513 = vmatprep.subr.mxu1 %v568_v37  ;;  %2458 = vmatpush3.msra.mxu0 %v520_v38  ;;  %v542_v35 = vld [vmem:[%s4656_s1 + $0x528] sm:$0xff]  ;;  %v557_v37 = vld [vmem:[%s4656_s1 + $0x5a0] sm:$0xff]  ;;  %v332_v38 = vld [vmem:[%s3238_s6 + $0x4d8] sm:$0xff] }
  0x61   : > { %2514 = vmatpush3.msra.mxu1 %v552_v39  ;;  %2459 = vmatprep.subr.mxu0 %v535_v40  ;;  %v334_v39 = vld [vmem:[%s3238_s6 + $0x4e8] sm:$0xff]  ;;  %v509_v40 = vld [vmem:[%s4656_s1 + $0x420] sm:$0xff] }
  0x62   : > { %2515 = vmatprep.subr.mxu1 %v567_v41  ;;  %1063 = vmatprep.mubr.f32.mxu0 %v207_v42  ;;  %v541_v41 = vld [vmem:[%s4656_s1 + $0x520] sm:$0xff]  ;;  %v331_v42 = vld [vmem:[%s3238_s6 + $0x4d0] sm:$0xff] }
  0x63   : > { %1168 = vmatprep.mubr.f32.mxu1 %v209_v43  ;;  %2460 = vmatpush3.msra.mxu0 %v519_v44  ;;  %v333_v43 = vld [vmem:[%s3238_s6 + $0x4e0] sm:$0xff]  ;;  %v524_v44 = vld [vmem:[%s4656_s1 + $0x498] sm:$0xff] }
  0x64   : > { %2516 = vmatpush3.msra.mxu1 %v551_v45  ;;  %1064 = vmatmul.mubr.f32.gmra.mxu0 %v206_v46  ;;  %v556_v45 = vld [vmem:[%s4656_s1 + $0x598] sm:$0xff] }
  0x65   : > { %1169 = vmatmul.mubr.f32.gmra.mxu1 %v208_v47  ;;  %2461 = vmatprep.subr.mxu0 %v534_v48  ;;  %v508_v46 = vld [vmem:[%s4656_s1 + $0x418] sm:$0xff]  ;;  %v523_v48 = vld [vmem:[%s4656_s1 + $0x490] sm:$0xff] }
  0x66   : > { %2517 = vmatprep.subr.mxu1 %v566_v49  ;;  %2462 = vmatpush3.msra.mxu0 %v518_v50  ;;  %v540_v47 = vld [vmem:[%s4656_s1 + $0x518] sm:$0xff]  ;;  %v555_v49 = vld [vmem:[%s4656_s1 + $0x590] sm:$0xff]  ;;  %v357_v50 = vld [vmem:[%s3238_s6 + $0x5a0] sm:$0xff] }
  0x67   : > { %2518 = vmatpush3.msra.mxu1 %v550_v51  ;;  %2463 = vmatprep.subr.mxu0 %v533_v52  ;;  %v359_v51 = vld [vmem:[%s3238_s6 + $0x5b0] sm:$0xff] }
  0x68   : > { %2519 = vmatprep.subr.mxu1 %v565_v53  ;;  %1068 = vmatprep.mubr.f32.mxu0 %v232_v54  ;;  %v507_v52 = vld [vmem:[%s4656_s1 + $0x410] sm:$0xff]  ;;  %v356_v54 = vld [vmem:[%s3238_s6 + $0x598] sm:$0xff] }
  0x69   : > { %1173 = vmatprep.mubr.f32.mxu1 %v234_v55  ;;  %2464 = vmatpush3.msra.mxu0 %v517_v56  ;;  %v539_v53 = vld [vmem:[%s4656_s1 + $0x510] sm:$0xff]  ;;  %v358_v55 = vld [vmem:[%s3238_s6 + $0x5a8] sm:$0xff] }
  0x6a   : > { %2520 = vmatpush3.msra.mxu1 %v549_v57  ;;  %1069 = vmatmul.mubr.f32.gmra.mxu0 %v231_v58  ;;  %v522_v56 = vld [vmem:[%s4656_s1 + $0x488] sm:$0xff] }
  0x6b   : > { %1174 = vmatmul.mubr.f32.gmra.mxu1 %v233_v59  ;;  %2465 = vmatprep.subr.mxu0 %v532_v60  ;;  %v554_v57 = vld [vmem:[%s4656_s1 + $0x588] sm:$0xff]  ;;  %v521_v60 = vld [vmem:[%s4656_s1 + $0x480] sm:$0xff] }
  0x6c   : > { %2521 = vmatprep.subr.mxu1 %v564_v61  ;;  %2466 = vmatpush3.msra.mxu0 %v516_v62  ;;  %v506_v58 = vld [vmem:[%s4656_s1 + $0x408] sm:$0xff]  ;;  %v553_v61 = vld [vmem:[%s4656_s1 + $0x580] sm:$0xff] }
  0x6d   : > { %2522 = vmatpush3.msra.mxu1 %v548_v63  ;;  %2467 = vmatprep.subr.mxu0 %v531_v0  ;;  %v538_v59 = vld [vmem:[%s4656_s1 + $0x508] sm:$0xff]  ;;  %v505_v62 = vld [vmem:[%s4656_s1 + $0x400] sm:$0xff] }
  0x6e   : > { %2523 = vmatprep.subr.mxu1 %v563_v1  ;;  %1073 = vmatprep.mubr.f32.mxu0 %v257_v2  ;;  %v186_v63 = vld [vmem:[%s3238_s6 + $0x48] sm:$0xff]  ;;  %v537_v0 = vld [vmem:[%s4656_s1 + $0x500] sm:$0xff]  ;;  %v188_v1 = vld [vmem:[%s3238_s6 + $0x58] sm:$0xff] }
  0x6f   : > { %1178 = vmatprep.mubr.f32.mxu1 %v259_v3  ;;  %2468 = vmatpush3.msra.mxu0 %v515_v4  ;;  %v185_v2 = vld [vmem:[%s3238_s6 + $0x40] sm:$0xff]  ;;  %v187_v3 = vld [vmem:[%s3238_s6 + $0x50] sm:$0xff]  ;;  %v600_v4 = vld [vmem:[%s4656_s1 + $0x6f8] sm:$0xff] }
  0x70   : > { %2524 = vmatpush3.msra.mxu1 %v547_v5  ;;  %1074 = vmatmul.mubr.f32.gmra.mxu0 %v256_v6  ;;  %v632_v5 = vld [vmem:[%s4656_s1 + $0x7f8] sm:$0xff] }
  0x71   : > { %1179 = vmatmul.mubr.f32.gmra.mxu1 %v258_v7  ;;  %2469 = vmatprep.subr.mxu0 %v530_v8  ;;  %v584_v6 = vld [vmem:[%s4656_s1 + $0x678] sm:$0xff]  ;;  %v599_v8 = vld [vmem:[%s4656_s1 + $0x6f0] sm:$0xff] }
  0x72   : > { %2525 = vmatprep.subr.mxu1 %v562_v9  ;;  %2470 = vmatpush3.msra.mxu0 %v514_v10  ;;  %v616_v7 = vld [vmem:[%s4656_s1 + $0x778] sm:$0xff]  ;;  %v631_v9 = vld [vmem:[%s4656_s1 + $0x7f0] sm:$0xff] }
  0x73   : > { %2526 = vmatpush3.msra.mxu1 %v546_v11  ;;  %2471 = vmatprep.subr.mxu0 %v529_v12  ;;  %v211_v10 = vld [vmem:[%s3238_s6 + $0x110] sm:$0xff]  ;;  %v213_v11 = vld [vmem:[%s3238_s6 + $0x120] sm:$0xff] }
  0x74   : > { %2527 = vmatprep.subr.mxu1 %v561_v13  ;;  %1078 = vmatprep.mubr.f32.mxu0 %v282_v14  ;;  %v583_v12 = vld [vmem:[%s4656_s1 + $0x670] sm:$0xff]  ;;  %v210_v14 = vld [vmem:[%s3238_s6 + $0x108] sm:$0xff] }
  0x75   : > { %1183 = vmatprep.mubr.f32.mxu1 %v284_v15  ;;  %2472 = vmatpush3.msra.mxu0 %v513_v16  ;;  %v615_v13 = vld [vmem:[%s4656_s1 + $0x770] sm:$0xff]  ;;  %v212_v15 = vld [vmem:[%s3238_s6 + $0x118] sm:$0xff]  ;;  %v598_v16 = vld [vmem:[%s4656_s1 + $0x6e8] sm:$0xff] }
  0x76   : > { %2528 = vmatpush3.msra.mxu1 %v545_v17  ;;  %1079 = vmatmul.mubr.f32.gmra.mxu0 %v281_v18  ;;  %v630_v17 = vld [vmem:[%s4656_s1 + $0x7e8] sm:$0xff] }
  0x77   : > { %1184 = vmatmul.mubr.f32.gmra.mxu1 %v283_v19  ;;  %2473 = vmatprep.subr.mxu0 %v528_v20  ;;  %v582_v18 = vld [vmem:[%s4656_s1 + $0x668] sm:$0xff]  ;;  %v597_v20 = vld [vmem:[%s4656_s1 + $0x6e0] sm:$0xff] }
  0x78   : > { %2529 = vmatprep.subr.mxu1 %v560_v21  ;;  %2474 = vmatpush3.msra.mxu0 %v512_v22  ;;  %v614_v19 = vld [vmem:[%s4656_s1 + $0x768] sm:$0xff]  ;;  %v629_v21 = vld [vmem:[%s4656_s1 + $0x7e0] sm:$0xff]  ;;  %v236_v22 = vld [vmem:[%s3238_s6 + $0x1d8] sm:$0xff] }
  0x79   : > { %2530 = vmatpush3.msra.mxu1 %v544_v23  ;;  %2475 = vmatprep.subr.mxu0 %v527_v24  ;;  %v238_v23 = vld [vmem:[%s3238_s6 + $0x1e8] sm:$0xff]  ;;  %v581_v24 = vld [vmem:[%s4656_s1 + $0x660] sm:$0xff] }
  0x7a   : > { %2531 = vmatprep.subr.mxu1 %v559_v25  ;;  %1083 = vmatprep.mubr.f32.mxu0 %v307_v26  ;;  %v613_v25 = vld [vmem:[%s4656_s1 + $0x760] sm:$0xff]  ;;  %v235_v26 = vld [vmem:[%s3238_s6 + $0x1d0] sm:$0xff] }
  0x7b   : > { %1188 = vmatprep.mubr.f32.mxu1 %v309_v27  ;;  %2476 = vmatpush3.msra.mxu0 %v511_v28  ;;  %v237_v27 = vld [vmem:[%s3238_s6 + $0x1e0] sm:$0xff]  ;;  %v596_v28 = vld [vmem:[%s4656_s1 + $0x6d8] sm:$0xff] }
  0x7c   : > { %2532 = vmatpush3.msra.mxu1 %v543_v29  ;;  %1084 = vmatmul.mubr.f32.gmra.mxu0 %v306_v30  ;;  %v628_v29 = vld [vmem:[%s4656_s1 + $0x7d8] sm:$0xff] }
  0x7d   : > { %1189 = vmatmul.mubr.f32.gmra.mxu1 %v308_v31  ;;  %2477 = vmatprep.subr.mxu0 %v526_v32  ;;  %v580_v30 = vld [vmem:[%s4656_s1 + $0x658] sm:$0xff]  ;;  %v595_v32 = vld [vmem:[%s4656_s1 + $0x6d0] sm:$0xff] }
  0x7e   : > { %2533 = vmatprep.subr.mxu1 %v558_v33  ;;  %2478 = vmatpush3.msra.mxu0 %v510_v34  ;;  %v612_v31 = vld [vmem:[%s4656_s1 + $0x758] sm:$0xff]  ;;  %v627_v33 = vld [vmem:[%s4656_s1 + $0x7d0] sm:$0xff]  ;;  %v261_v34 = vld [vmem:[%s3238_s6 + $0x2a0] sm:$0xff] }
  0x7f   : > { %2534 = vmatpush3.msra.mxu1 %v542_v35  ;;  %2479 = vmatprep.subr.mxu0 %v525_v36  ;;  %v263_v35 = vld [vmem:[%s3238_s6 + $0x2b0] sm:$0xff] }
  0x80   : > { %2535 = vmatprep.subr.mxu1 %v557_v37  ;;  %1088 = vmatprep.mubr.f32.mxu0 %v332_v38  ;;  %v579_v36 = vld [vmem:[%s4656_s1 + $0x650] sm:$0xff]  ;;  %v260_v38 = vld [vmem:[%s3238_s6 + $0x298] sm:$0xff] }
  0x81   : > { %1193 = vmatprep.mubr.f32.mxu1 %v334_v39  ;;  %2480 = vmatpush3.msra.mxu0 %v509_v40  ;;  %v611_v37 = vld [vmem:[%s4656_s1 + $0x750] sm:$0xff]  ;;  %v262_v39 = vld [vmem:[%s3238_s6 + $0x2a8] sm:$0xff] }
  0x82   : > { %2536 = vmatpush3.msra.mxu1 %v541_v41  ;;  %1089 = vmatmul.mubr.f32.gmra.mxu0 %v331_v42  ;;  %v594_v40 = vld [vmem:[%s4656_s1 + $0x6c8] sm:$0xff] }
  0x83   : > { %1194 = vmatmul.mubr.f32.gmra.mxu1 %v333_v43  ;;  %2481 = vmatprep.subr.mxu0 %v524_v44  ;;  %v626_v41 = vld [vmem:[%s4656_s1 + $0x7c8] sm:$0xff]  ;;  %v593_v44 = vld [vmem:[%s4656_s1 + $0x6c0] sm:$0xff] }
  0x84   : > { %2537 = vmatprep.subr.mxu1 %v556_v45  ;;  %2482 = vmatpush3.msra.mxu0 %v508_v46  ;;  %v578_v42 = vld [vmem:[%s4656_s1 + $0x648] sm:$0xff]  ;;  %v625_v45 = vld [vmem:[%s4656_s1 + $0x7c0] sm:$0xff] }
  0x85   : > { %2538 = vmatpush3.msra.mxu1 %v540_v47  ;;  %2483 = vmatprep.subr.mxu0 %v523_v48  ;;  %v610_v43 = vld [vmem:[%s4656_s1 + $0x748] sm:$0xff]  ;;  %v288_v47 = vld [vmem:[%s3238_s6 + $0x378] sm:$0xff]  ;;  %v577_v48 = vld [vmem:[%s4656_s1 + $0x640] sm:$0xff] }
  0x86   : > { %2539 = vmatprep.subr.mxu1 %v555_v49  ;;  %1093 = vmatprep.mubr.f32.mxu0 %v357_v50  ;;  %v286_v46 = vld [vmem:[%s3238_s6 + $0x368] sm:$0xff]  ;;  %v609_v49 = vld [vmem:[%s4656_s1 + $0x740] sm:$0xff] }
  0x87   : > { %1198 = vmatprep.mubr.f32.mxu1 %v359_v51  ;;  %2484 = vmatpush3.msra.mxu0 %v507_v52  ;;  %v285_v50 = vld [vmem:[%s3238_s6 + $0x360] sm:$0xff]  ;;  %v287_v51 = vld [vmem:[%s3238_s6 + $0x370] sm:$0xff]  ;;  %v592_v52 = vld [vmem:[%s4656_s1 + $0x6b8] sm:$0xff] }
  0x88   : > { %2540 = vmatpush3.msra.mxu1 %v539_v53  ;;  %1094 = vmatmul.mubr.f32.gmra.mxu0 %v356_v54  ;;  %v624_v53 = vld [vmem:[%s4656_s1 + $0x7b8] sm:$0xff] }
  0x89   : > { %1199 = vmatmul.mubr.f32.gmra.mxu1 %v358_v55  ;;  %2485 = vmatprep.subr.mxu0 %v522_v56  ;;  %v576_v54 = vld [vmem:[%s4656_s1 + $0x638] sm:$0xff]  ;;  %v591_v56 = vld [vmem:[%s4656_s1 + $0x6b0] sm:$0xff] }
  0x8a   : > { %2541 = vmatprep.subr.mxu1 %v554_v57  ;;  %2486 = vmatpush3.msra.mxu0 %v506_v58  ;;  %v608_v55 = vld [vmem:[%s4656_s1 + $0x738] sm:$0xff]  ;;  %v623_v57 = vld [vmem:[%s4656_s1 + $0x7b0] sm:$0xff] }
  0x8b   : > { %2542 = vmatpush3.msra.mxu1 %v538_v59  ;;  %2487 = vmatprep.subr.mxu0 %v521_v60  ;;  %v311_v58 = vld [vmem:[%s3238_s6 + $0x430] sm:$0xff]  ;;  %v313_v59 = vld [vmem:[%s3238_s6 + $0x440] sm:$0xff] }
  0x8c   : > { %2543 = vmatprep.subr.mxu1 %v553_v61  ;;  %2488 = vmatpush3.msra.mxu0 %v505_v62  ;;  %v575_v60 = vld [vmem:[%s4656_s1 + $0x630] sm:$0xff]  ;;  %v310_v62 = vld [vmem:[%s3238_s6 + $0x428] sm:$0xff] }
  0x8d   : > { %1268 = vmatprep.mubr.f32.mxu0 %v186_v63  ;;  %2544 = vmatpush3.msra.mxu1 %v537_v0  ;;  %v607_v61 = vld [vmem:[%s4656_s1 + $0x730] sm:$0xff]  ;;  %v312_v63 = vld [vmem:[%s3238_s6 + $0x438] sm:$0xff]  ;;  %v590_v0 = vld [vmem:[%s4656_s1 + $0x6a8] sm:$0xff] }
  0x8e   : > { %1373 = vmatprep.mubr.f32.mxu1 %v188_v1  ;;  %1269 = vmatmul.mubr.f32.vlgmr.msra.gmra.mxu0 %v185_v2  ;;  %v622_v1 = vld [vmem:[%s4656_s1 + $0x7a8] sm:$0xff] }
  0x8f   : > { %1374 = vmatmul.mubr.f32.vlgmr.msra.gmra.mxu1 %v187_v3  ;;  %2569 = vmatprep.subr.mxu0 %v600_v4  ;;  %v574_v2 = vld [vmem:[%s4656_s1 + $0x628] sm:$0xff]  ;;  %v589_v4 = vld [vmem:[%s4656_s1 + $0x6a0] sm:$0xff] }
  0x90   : > { %2625 = vmatprep.subr.mxu1 %v632_v5  ;;  %2570 = vmatpush3.msra.mxu0 %v584_v6  ;;  %v606_v3 = vld [vmem:[%s4656_s1 + $0x728] sm:$0xff]  ;;  %v621_v5 = vld [vmem:[%s4656_s1 + $0x7a0] sm:$0xff]  ;;  %v336_v6 = vld [vmem:[%s3238_s6 + $0x4f8] sm:$0xff] }
  0x91   : > { %2626 = vmatpush3.msra.mxu1 %v616_v7  ;;  %2571 = vmatprep.subr.mxu0 %v599_v8  ;;  %v338_v7 = vld [vmem:[%s3238_s6 + $0x508] sm:$0xff]  ;;  %v573_v8 = vld [vmem:[%s4656_s1 + $0x620] sm:$0xff] }
  0x92   : > { %2627 = vmatprep.subr.mxu1 %v631_v9  ;;  %1273 = vmatprep.mubr.f32.mxu0 %v211_v10  ;;  %v605_v9 = vld [vmem:[%s4656_s1 + $0x720] sm:$0xff]  ;;  %v335_v10 = vld [vmem:[%s3238_s6 + $0x4f0] sm:$0xff] }
  0x93   : > { %1378 = vmatprep.mubr.f32.mxu1 %v213_v11  ;;  %2572 = vmatpush3.msra.mxu0 %v583_v12  ;;  %v337_v11 = vld [vmem:[%s3238_s6 + $0x500] sm:$0xff]  ;;  %v588_v12 = vld [vmem:[%s4656_s1 + $0x698] sm:$0xff] }
  0x94   : > { %2628 = vmatpush3.msra.mxu1 %v615_v13  ;;  %1274 = vmatmul.mubr.f32.gmra.mxu0 %v210_v14  ;;  %v620_v13 = vld [vmem:[%s4656_s1 + $0x798] sm:$0xff] }
  0x95   : > { %1379 = vmatmul.mubr.f32.gmra.mxu1 %v212_v15  ;;  %2573 = vmatprep.subr.mxu0 %v598_v16  ;;  %v572_v14 = vld [vmem:[%s4656_s1 + $0x618] sm:$0xff]  ;;  %v587_v16 = vld [vmem:[%s4656_s1 + $0x690] sm:$0xff] }
  0x96   : > { %2629 = vmatprep.subr.mxu1 %v630_v17  ;;  %2574 = vmatpush3.msra.mxu0 %v582_v18  ;;  %v604_v15 = vld [vmem:[%s4656_s1 + $0x718] sm:$0xff]  ;;  %v619_v17 = vld [vmem:[%s4656_s1 + $0x790] sm:$0xff]  ;;  %v361_v18 = vld [vmem:[%s3238_s6 + $0x5c0] sm:$0xff] }
  0x97   : > { %2630 = vmatpush3.msra.mxu1 %v614_v19  ;;  %2575 = vmatprep.subr.mxu0 %v597_v20  ;;  %v363_v19 = vld [vmem:[%s3238_s6 + $0x5d0] sm:$0xff] }
  0x98   : > { %2631 = vmatprep.subr.mxu1 %v629_v21  ;;  %1278 = vmatprep.mubr.f32.mxu0 %v236_v22  ;;  %v571_v20 = vld [vmem:[%s4656_s1 + $0x610] sm:$0xff]  ;;  %v360_v22 = vld [vmem:[%s3238_s6 + $0x5b8] sm:$0xff] }
  0x99   : > { %1383 = vmatprep.mubr.f32.mxu1 %v238_v23  ;;  %2576 = vmatpush3.msra.mxu0 %v581_v24  ;;  %v603_v21 = vld [vmem:[%s4656_s1 + $0x710] sm:$0xff]  ;;  %v362_v23 = vld [vmem:[%s3238_s6 + $0x5c8] sm:$0xff] }
  0x9a   : > { %2632 = vmatpush3.msra.mxu1 %v613_v25  ;;  %1279 = vmatmul.mubr.f32.gmra.mxu0 %v235_v26  ;;  %v586_v24 = vld [vmem:[%s4656_s1 + $0x688] sm:$0xff] }
  0x9b   : > { %1384 = vmatmul.mubr.f32.gmra.mxu1 %v237_v27  ;;  %2577 = vmatprep.subr.mxu0 %v596_v28  ;;  %v618_v25 = vld [vmem:[%s4656_s1 + $0x788] sm:$0xff]  ;;  %v585_v28 = vld [vmem:[%s4656_s1 + $0x680] sm:$0xff] }
  0x9c   : > { %2633 = vmatprep.subr.mxu1 %v628_v29  ;;  %2578 = vmatpush3.msra.mxu0 %v580_v30  ;;  %v570_v26 = vld [vmem:[%s4656_s1 + $0x608] sm:$0xff]  ;;  %v617_v29 = vld [vmem:[%s4656_s1 + $0x780] sm:$0xff] }
  0x9d   : > { %2634 = vmatpush3.msra.mxu1 %v612_v31  ;;  %2579 = vmatprep.subr.mxu0 %v595_v32  ;;  %v602_v27 = vld [vmem:[%s4656_s1 + $0x708] sm:$0xff]  ;;  %v569_v30 = vld [vmem:[%s4656_s1 + $0x600] sm:$0xff] }
  0x9e   : > { %2635 = vmatprep.subr.mxu1 %v627_v33  ;;  %1283 = vmatprep.mubr.f32.mxu0 %v261_v34  ;;  %v190_v31 = vld [vmem:[%s3238_s6 + $0x68] sm:$0xff]  ;;  %v601_v32 = vld [vmem:[%s4656_s1 + $0x700] sm:$0xff]  ;;  %v192_v33 = vld [vmem:[%s3238_s6 + $0x78] sm:$0xff] }
  0x9f   : > { %1388 = vmatprep.mubr.f32.mxu1 %v263_v35  ;;  %2580 = vmatpush3.msra.mxu0 %v579_v36  ;;  %v189_v34 = vld [vmem:[%s3238_s6 + $0x60] sm:$0xff]  ;;  %v191_v35 = vld [vmem:[%s3238_s6 + $0x70] sm:$0xff]  ;;  %v664_v36 = vld [vmem:[%s4656_s1 + $0x8f8] sm:$0xff] }
  0xa0   : > { %2636 = vmatpush3.msra.mxu1 %v611_v37  ;;  %1284 = vmatmul.mubr.f32.gmra.mxu0 %v260_v38  ;;  %v696_v37 = vld [vmem:[%s4656_s1 + $0x9f8] sm:$0xff] }
  0xa1   : > { %1389 = vmatmul.mubr.f32.gmra.mxu1 %v262_v39  ;;  %2581 = vmatprep.subr.mxu0 %v594_v40  ;;  %v648_v38 = vld [vmem:[%s4656_s1 + $0x878] sm:$0xff]  ;;  %v663_v40 = vld [vmem:[%s4656_s1 + $0x8f0] sm:$0xff] }
  0xa2   : > { %2637 = vmatprep.subr.mxu1 %v626_v41  ;;  %2582 = vmatpush3.msra.mxu0 %v578_v42  ;;  %v680_v39 = vld [vmem:[%s4656_s1 + $0x978] sm:$0xff]  ;;  %v695_v41 = vld [vmem:[%s4656_s1 + $0x9f0] sm:$0xff] }
  0xa3   : > { %2638 = vmatpush3.msra.mxu1 %v610_v43  ;;  %2583 = vmatprep.subr.mxu0 %v593_v44  ;;  %v215_v42 = vld [vmem:[%s3238_s6 + $0x130] sm:$0xff]  ;;  %v217_v43 = vld [vmem:[%s3238_s6 + $0x140] sm:$0xff] }
  0xa4   : > { %2639 = vmatprep.subr.mxu1 %v625_v45  ;;  %1288 = vmatprep.mubr.f32.mxu0 %v286_v46  ;;  %v647_v44 = vld [vmem:[%s4656_s1 + $0x870] sm:$0xff]  ;;  %v214_v46 = vld [vmem:[%s3238_s6 + $0x128] sm:$0xff] }
  0xa5   : > { %1393 = vmatprep.mubr.f32.mxu1 %v288_v47  ;;  %2584 = vmatpush3.msra.mxu0 %v577_v48  ;;  %v679_v45 = vld [vmem:[%s4656_s1 + $0x970] sm:$0xff]  ;;  %v216_v47 = vld [vmem:[%s3238_s6 + $0x138] sm:$0xff]  ;;  %v662_v48 = vld [vmem:[%s4656_s1 + $0x8e8] sm:$0xff] }
  0xa6   : > { %2640 = vmatpush3.msra.mxu1 %v609_v49  ;;  %1289 = vmatmul.mubr.f32.gmra.mxu0 %v285_v50  ;;  %v694_v49 = vld [vmem:[%s4656_s1 + $0x9e8] sm:$0xff] }
  0xa7   : > { %1394 = vmatmul.mubr.f32.gmra.mxu1 %v287_v51  ;;  %2585 = vmatprep.subr.mxu0 %v592_v52  ;;  %v646_v50 = vld [vmem:[%s4656_s1 + $0x868] sm:$0xff]  ;;  %v661_v52 = vld [vmem:[%s4656_s1 + $0x8e0] sm:$0xff] }
  0xa8   : > { %2641 = vmatprep.subr.mxu1 %v624_v53  ;;  %2586 = vmatpush3.msra.mxu0 %v576_v54  ;;  %v678_v51 = vld [vmem:[%s4656_s1 + $0x968] sm:$0xff]  ;;  %v693_v53 = vld [vmem:[%s4656_s1 + $0x9e0] sm:$0xff]  ;;  %v240_v54 = vld [vmem:[%s3238_s6 + $0x1f8] sm:$0xff] }
  0xa9   : > { %2642 = vmatpush3.msra.mxu1 %v608_v55  ;;  %2587 = vmatprep.subr.mxu0 %v591_v56  ;;  %v242_v55 = vld [vmem:[%s3238_s6 + $0x208] sm:$0xff]  ;;  %v645_v56 = vld [vmem:[%s4656_s1 + $0x860] sm:$0xff] }
  0xaa   : > { %2643 = vmatprep.subr.mxu1 %v623_v57  ;;  %1293 = vmatprep.mubr.f32.mxu0 %v311_v58  ;;  %v677_v57 = vld [vmem:[%s4656_s1 + $0x960] sm:$0xff]  ;;  %v239_v58 = vld [vmem:[%s3238_s6 + $0x1f0] sm:$0xff] }
  0xab   : > { %1398 = vmatprep.mubr.f32.mxu1 %v313_v59  ;;  %2588 = vmatpush3.msra.mxu0 %v575_v60  ;;  %v241_v59 = vld [vmem:[%s3238_s6 + $0x200] sm:$0xff]  ;;  %v660_v60 = vld [vmem:[%s4656_s1 + $0x8d8] sm:$0xff] }
  0xac   : > { %2644 = vmatpush3.msra.mxu1 %v607_v61  ;;  %1294 = vmatmul.mubr.f32.gmra.mxu0 %v310_v62  ;;  %v692_v61 = vld [vmem:[%s4656_s1 + $0x9d8] sm:$0xff] }
  0xad   : > { %1399 = vmatmul.mubr.f32.gmra.mxu1 %v312_v63  ;;  %2589 = vmatprep.subr.mxu0 %v590_v0  ;;  %v644_v62 = vld [vmem:[%s4656_s1 + $0x858] sm:$0xff]  ;;  %v659_v0 = vld [vmem:[%s4656_s1 + $0x8d0] sm:$0xff] }
  0xae   : > { %2645 = vmatprep.subr.mxu1 %v622_v1  ;;  %2590 = vmatpush3.msra.mxu0 %v574_v2  ;;  %v676_v63 = vld [vmem:[%s4656_s1 + $0x958] sm:$0xff]  ;;  %v691_v1 = vld [vmem:[%s4656_s1 + $0x9d0] sm:$0xff]  ;;  %v265_v2 = vld [vmem:[%s3238_s6 + $0x2c0] sm:$0xff] }
  0xaf   : > { %2646 = vmatpush3.msra.mxu1 %v606_v3  ;;  %2591 = vmatprep.subr.mxu0 %v589_v4  ;;  %v267_v3 = vld [vmem:[%s3238_s6 + $0x2d0] sm:$0xff] }
  0xb0   : > { %2647 = vmatprep.subr.mxu1 %v621_v5  ;;  %1298 = vmatprep.mubr.f32.mxu0 %v336_v6  ;;  %v643_v4 = vld [vmem:[%s4656_s1 + $0x850] sm:$0xff]  ;;  %v264_v6 = vld [vmem:[%s3238_s6 + $0x2b8] sm:$0xff] }
  0xb1   : > { %1403 = vmatprep.mubr.f32.mxu1 %v338_v7  ;;  %2592 = vmatpush3.msra.mxu0 %v573_v8  ;;  %v675_v5 = vld [vmem:[%s4656_s1 + $0x950] sm:$0xff]  ;;  %v266_v7 = vld [vmem:[%s3238_s6 + $0x2c8] sm:$0xff] }
  0xb2   : > { %2648 = vmatpush3.msra.mxu1 %v605_v9  ;;  %1299 = vmatmul.mubr.f32.gmra.mxu0 %v335_v10  ;;  %v658_v8 = vld [vmem:[%s4656_s1 + $0x8c8] sm:$0xff] }
  0xb3   : > { %1404 = vmatmul.mubr.f32.gmra.mxu1 %v337_v11  ;;  %2593 = vmatprep.subr.mxu0 %v588_v12  ;;  %v690_v9 = vld [vmem:[%s4656_s1 + $0x9c8] sm:$0xff]  ;;  %v657_v12 = vld [vmem:[%s4656_s1 + $0x8c0] sm:$0xff] }
  0xb4   : > { %2649 = vmatprep.subr.mxu1 %v620_v13  ;;  %2594 = vmatpush3.msra.mxu0 %v572_v14  ;;  %v642_v10 = vld [vmem:[%s4656_s1 + $0x848] sm:$0xff]  ;;  %v689_v13 = vld [vmem:[%s4656_s1 + $0x9c0] sm:$0xff] }
  0xb5   : > { %2650 = vmatpush3.msra.mxu1 %v604_v15  ;;  %2595 = vmatprep.subr.mxu0 %v587_v16  ;;  %v674_v11 = vld [vmem:[%s4656_s1 + $0x948] sm:$0xff]  ;;  %v292_v15 = vld [vmem:[%s3238_s6 + $0x398] sm:$0xff]  ;;  %v641_v16 = vld [vmem:[%s4656_s1 + $0x840] sm:$0xff] }
  0xb6   : > { %2651 = vmatprep.subr.mxu1 %v619_v17  ;;  %1303 = vmatprep.mubr.f32.mxu0 %v361_v18  ;;  %v290_v14 = vld [vmem:[%s3238_s6 + $0x388] sm:$0xff]  ;;  %v673_v17 = vld [vmem:[%s4656_s1 + $0x940] sm:$0xff] }
  0xb7   : > { %1408 = vmatprep.mubr.f32.mxu1 %v363_v19  ;;  %2596 = vmatpush3.msra.mxu0 %v571_v20  ;;  %v289_v18 = vld [vmem:[%s3238_s6 + $0x380] sm:$0xff]  ;;  %v291_v19 = vld [vmem:[%s3238_s6 + $0x390] sm:$0xff]  ;;  %v656_v20 = vld [vmem:[%s4656_s1 + $0x8b8] sm:$0xff] }
  0xb8   : > { %2652 = vmatpush3.msra.mxu1 %v603_v21  ;;  %1304 = vmatmul.mubr.f32.gmra.mxu0 %v360_v22  ;;  %v688_v21 = vld [vmem:[%s4656_s1 + $0x9b8] sm:$0xff] }
  0xb9   : > { %1409 = vmatmul.mubr.f32.gmra.mxu1 %v362_v23  ;;  %2597 = vmatprep.subr.mxu0 %v586_v24  ;;  %v640_v22 = vld [vmem:[%s4656_s1 + $0x838] sm:$0xff]  ;;  %v655_v24 = vld [vmem:[%s4656_s1 + $0x8b0] sm:$0xff] }
  0xba   : > { %2653 = vmatprep.subr.mxu1 %v618_v25  ;;  %2598 = vmatpush3.msra.mxu0 %v570_v26  ;;  %v672_v23 = vld [vmem:[%s4656_s1 + $0x938] sm:$0xff]  ;;  %v687_v25 = vld [vmem:[%s4656_s1 + $0x9b0] sm:$0xff] }
  0xbb   : > { %2654 = vmatpush3.msra.mxu1 %v602_v27  ;;  %2599 = vmatprep.subr.mxu0 %v585_v28  ;;  %v315_v26 = vld [vmem:[%s3238_s6 + $0x450] sm:$0xff]  ;;  %v317_v27 = vld [vmem:[%s3238_s6 + $0x460] sm:$0xff] }
  0xbc   : > { %2655 = vmatprep.subr.mxu1 %v617_v29  ;;  %2600 = vmatpush3.msra.mxu0 %v569_v30  ;;  %v639_v28 = vld [vmem:[%s4656_s1 + $0x830] sm:$0xff]  ;;  %v314_v30 = vld [vmem:[%s3238_s6 + $0x448] sm:$0xff] }
  0xbd   : > { %1478 = vmatprep.mubr.f32.mxu0 %v190_v31  ;;  %2656 = vmatpush3.msra.mxu1 %v601_v32  ;;  %v671_v29 = vld [vmem:[%s4656_s1 + $0x930] sm:$0xff]  ;;  %v316_v31 = vld [vmem:[%s3238_s6 + $0x458] sm:$0xff]  ;;  %v654_v32 = vld [vmem:[%s4656_s1 + $0x8a8] sm:$0xff] }
  0xbe   : > { %1583 = vmatprep.mubr.f32.mxu1 %v192_v33  ;;  %1479 = vmatmul.mubr.f32.vlgmr.msra.gmra.mxu0 %v189_v34  ;;  %v686_v33 = vld [vmem:[%s4656_s1 + $0x9a8] sm:$0xff] }
  0xbf   : > { %1584 = vmatmul.mubr.f32.vlgmr.msra.gmra.mxu1 %v191_v35  ;;  %2681 = vmatprep.subr.mxu0 %v664_v36  ;;  %v638_v34 = vld [vmem:[%s4656_s1 + $0x828] sm:$0xff]  ;;  %v653_v36 = vld [vmem:[%s4656_s1 + $0x8a0] sm:$0xff] }
  0xc0   : > { %2737 = vmatprep.subr.mxu1 %v696_v37  ;;  %2682 = vmatpush3.msra.mxu0 %v648_v38  ;;  %v670_v35 = vld [vmem:[%s4656_s1 + $0x928] sm:$0xff]  ;;  %v685_v37 = vld [vmem:[%s4656_s1 + $0x9a0] sm:$0xff]  ;;  %v340_v38 = vld [vmem:[%s3238_s6 + $0x518] sm:$0xff] }
  0xc1   : > { %2738 = vmatpush3.msra.mxu1 %v680_v39  ;;  %2683 = vmatprep.subr.mxu0 %v663_v40  ;;  %v342_v39 = vld [vmem:[%s3238_s6 + $0x528] sm:$0xff]  ;;  %v637_v40 = vld [vmem:[%s4656_s1 + $0x820] sm:$0xff] }
  0xc2   : > { %2739 = vmatprep.subr.mxu1 %v695_v41  ;;  %1483 = vmatprep.mubr.f32.mxu0 %v215_v42  ;;  %v669_v41 = vld [vmem:[%s4656_s1 + $0x920] sm:$0xff]  ;;  %v339_v42 = vld [vmem:[%s3238_s6 + $0x510] sm:$0xff] }
  0xc3   : > { %1588 = vmatprep.mubr.f32.mxu1 %v217_v43  ;;  %2684 = vmatpush3.msra.mxu0 %v647_v44  ;;  %v341_v43 = vld [vmem:[%s3238_s6 + $0x520] sm:$0xff]  ;;  %v652_v44 = vld [vmem:[%s4656_s1 + $0x898] sm:$0xff] }
  0xc4   : > { %2740 = vmatpush3.msra.mxu1 %v679_v45  ;;  %1484 = vmatmul.mubr.f32.gmra.mxu0 %v214_v46  ;;  %v684_v45 = vld [vmem:[%s4656_s1 + $0x998] sm:$0xff] }
  0xc5   : > { %1589 = vmatmul.mubr.f32.gmra.mxu1 %v216_v47  ;;  %2685 = vmatprep.subr.mxu0 %v662_v48  ;;  %v636_v46 = vld [vmem:[%s4656_s1 + $0x818] sm:$0xff]  ;;  %v651_v48 = vld [vmem:[%s4656_s1 + $0x890] sm:$0xff] }
  0xc6   : > { %2741 = vmatprep.subr.mxu1 %v694_v49  ;;  %2686 = vmatpush3.msra.mxu0 %v646_v50  ;;  %v668_v47 = vld [vmem:[%s4656_s1 + $0x918] sm:$0xff]  ;;  %v683_v49 = vld [vmem:[%s4656_s1 + $0x990] sm:$0xff]  ;;  %v365_v50 = vld [vmem:[%s3238_s6 + $0x5e0] sm:$0xff] }
  0xc7   : > { %2742 = vmatpush3.msra.mxu1 %v678_v51  ;;  %2687 = vmatprep.subr.mxu0 %v661_v52  ;;  %v367_v51 = vld [vmem:[%s3238_s6 + $0x5f0] sm:$0xff] }
  0xc8   : > { %2743 = vmatprep.subr.mxu1 %v693_v53  ;;  %1488 = vmatprep.mubr.f32.mxu0 %v240_v54  ;;  %v635_v52 = vld [vmem:[%s4656_s1 + $0x810] sm:$0xff]  ;;  %v364_v54 = vld [vmem:[%s3238_s6 + $0x5d8] sm:$0xff] }
  0xc9   : > { %1593 = vmatprep.mubr.f32.mxu1 %v242_v55  ;;  %2688 = vmatpush3.msra.mxu0 %v645_v56  ;;  %v667_v53 = vld [vmem:[%s4656_s1 + $0x910] sm:$0xff]  ;;  %v366_v55 = vld [vmem:[%s3238_s6 + $0x5e8] sm:$0xff] }
  0xca   : > { %2744 = vmatpush3.msra.mxu1 %v677_v57  ;;  %1489 = vmatmul.mubr.f32.gmra.mxu0 %v239_v58  ;;  %v650_v56 = vld [vmem:[%s4656_s1 + $0x888] sm:$0xff] }
  0xcb   : > { %1594 = vmatmul.mubr.f32.gmra.mxu1 %v241_v59  ;;  %2689 = vmatprep.subr.mxu0 %v660_v60  ;;  %v682_v57 = vld [vmem:[%s4656_s1 + $0x988] sm:$0xff]  ;;  %v649_v60 = vld [vmem:[%s4656_s1 + $0x880] sm:$0xff] }
  0xcc   : > { %2745 = vmatprep.subr.mxu1 %v692_v61  ;;  %2690 = vmatpush3.msra.mxu0 %v644_v62  ;;  %v634_v58 = vld [vmem:[%s4656_s1 + $0x808] sm:$0xff]  ;;  %v681_v61 = vld [vmem:[%s4656_s1 + $0x980] sm:$0xff] }
  0xcd   : > { %2746 = vmatpush3.msra.mxu1 %v676_v63  ;;  %2691 = vmatprep.subr.mxu0 %v659_v0  ;;  %v666_v59 = vld [vmem:[%s4656_s1 + $0x908] sm:$0xff]  ;;  %v633_v62 = vld [vmem:[%s4656_s1 + $0x800] sm:$0xff] }
  0xce   : > { %2747 = vmatprep.subr.mxu1 %v691_v1  ;;  %1493 = vmatprep.mubr.f32.mxu0 %v265_v2  ;;  %v194_v63 = vld [vmem:[%s3238_s6 + $0x88] sm:$0xff]  ;;  %v665_v0 = vld [vmem:[%s4656_s1 + $0x900] sm:$0xff]  ;;  %v196_v1 = vld [vmem:[%s3238_s6 + $0x98] sm:$0xff] }
  0xcf   : > { %1598 = vmatprep.mubr.f32.mxu1 %v267_v3  ;;  %2692 = vmatpush3.msra.mxu0 %v643_v4  ;;  %v193_v2 = vld [vmem:[%s3238_s6 + $0x80] sm:$0xff]  ;;  %v195_v3 = vld [vmem:[%s3238_s6 + $0x90] sm:$0xff]  ;;  %v728_v4 = vld [vmem:[%s4656_s1 + $0xaf8] sm:$0xff] }
  0xd0   : > { %2748 = vmatpush3.msra.mxu1 %v675_v5  ;;  %1494 = vmatmul.mubr.f32.gmra.mxu0 %v264_v6  ;;  %v760_v5 = vld [vmem:[%s4656_s1 + $0xbf8] sm:$0xff] }
  0xd1   : > { %1599 = vmatmul.mubr.f32.gmra.mxu1 %v266_v7  ;;  %2693 = vmatprep.subr.mxu0 %v658_v8  ;;  %v712_v6 = vld [vmem:[%s4656_s1 + $0xa78] sm:$0xff]  ;;  %v727_v8 = vld [vmem:[%s4656_s1 + $0xaf0] sm:$0xff] }
  0xd2   : > { %2749 = vmatprep.subr.mxu1 %v690_v9  ;;  %2694 = vmatpush3.msra.mxu0 %v642_v10  ;;  %v744_v7 = vld [vmem:[%s4656_s1 + $0xb78] sm:$0xff]  ;;  %v759_v9 = vld [vmem:[%s4656_s1 + $0xbf0] sm:$0xff] }
  0xd3   : > { %2750 = vmatpush3.msra.mxu1 %v674_v11  ;;  %2695 = vmatprep.subr.mxu0 %v657_v12  ;;  %v219_v12 = vld [vmem:[%s3238_s6 + $0x150] sm:$0xff] }
  0xd4   : > { %2751 = vmatprep.subr.mxu1 %v689_v13  ;;  %1498 = vmatprep.mubr.f32.mxu0 %v290_v14  ;;  %v221_v13 = vld [vmem:[%s3238_s6 + $0x160] sm:$0xff]  ;;  %v711_v14 = vld [vmem:[%s4656_s1 + $0xa70] sm:$0xff] }
  0xd5   : > { %1603 = vmatprep.mubr.f32.mxu1 %v292_v15  ;;  %2696 = vmatpush3.msra.mxu0 %v641_v16  ;;  %v743_v15 = vld [vmem:[%s4656_s1 + $0xb70] sm:$0xff]  ;;  %v4187_v16 = vld [vmem:[%s4657_s2] ss:$0 sm:$0xff] }
  0xd6   : > { %2752 = vmatpush3.msra.mxu1 %v673_v17  ;;  %1499 = vmatmul.mubr.f32.gmra.mxu0 %v289_v18 }
  0xd7   : > { %1604 = vmatmul.mubr.f32.gmra.mxu1 %v291_v19  ;;  %2697 = vmatprep.subr.mxu0 %v656_v20  ;;  %v218_v19 = vld [vmem:[%s3238_s6 + $0x148] sm:$0xff]  ;;  %v220_v20 = vld [vmem:[%s3238_s6 + $0x158] sm:$0xff] }
  0xd8   : > { %2753 = vmatprep.subr.mxu1 %v688_v21  ;;  %2698 = vmatpush3.msra.mxu0 %v640_v22 }
  0xd9   : > { %2754 = vmatpush3.msra.mxu1 %v672_v23  ;;  %2699 = vmatprep.subr.mxu0 %v655_v24  ;;  %v726_v23 = vld [vmem:[%s4656_s1 + $0xae8] sm:$0xff] }
  0xda   : > { %2755 = vmatprep.subr.mxu1 %v687_v25  ;;  %1503 = vmatprep.mubr.f32.mxu0 %v315_v26  ;;  %v758_v24 = vld [vmem:[%s4656_s1 + $0xbe8] sm:$0xff] }
  0xdb   : > { %1608 = vmatprep.mubr.f32.mxu1 %v317_v27  ;;  %2700 = vmatpush3.msra.mxu0 %v639_v28  ;;  %v710_v25 = vld [vmem:[%s4656_s1 + $0xa68] sm:$0xff]  ;;  %v725_v28 = vld [vmem:[%s4656_s1 + $0xae0] sm:$0xff] }
  0xdc   : > { %2756 = vmatpush3.msra.mxu1 %v671_v29  ;;  %1504 = vmatmul.mubr.f32.gmra.mxu0 %v314_v30  ;;  %v742_v26 = vld [vmem:[%s4656_s1 + $0xb68] sm:$0xff]  ;;  %v757_v29 = vld [vmem:[%s4656_s1 + $0xbe0] sm:$0xff] }
  0xdd   : > { %1609 = vmatmul.mubr.f32.gmra.mxu1 %v316_v31  ;;  %2701 = vmatprep.subr.mxu0 %v654_v32  ;;  %v244_v32 = vld [vmem:[%s3238_s6 + $0x218] sm:$0xff] }
  0xde   : > { %2757 = vmatprep.subr.mxu1 %v686_v33  ;;  %2702 = vmatpush3.msra.mxu0 %v638_v34  ;;  %v246_v33 = vld [vmem:[%s3238_s6 + $0x228] sm:$0xff] }
  0xdf   : > { %2758 = vmatpush3.msra.mxu1 %v670_v35  ;;  %2703 = vmatprep.subr.mxu0 %v653_v36  ;;  %v709_v35 = vld [vmem:[%s4656_s1 + $0xa60] sm:$0xff] }
  0xe0   : > { %2759 = vmatprep.subr.mxu1 %v685_v37  ;;  %1508 = vmatprep.mubr.f32.mxu0 %v340_v38  ;;  %v741_v36 = vld [vmem:[%s4656_s1 + $0xb60] sm:$0xff] }
  0xe1   : > { %1613 = vmatprep.mubr.f32.mxu1 %v342_v39  ;;  %2704 = vmatpush3.msra.mxu0 %v637_v40  ;;  %v243_v39 = vld [vmem:[%s3238_s6 + $0x210] sm:$0xff]  ;;  %v245_v40 = vld [vmem:[%s3238_s6 + $0x220] sm:$0xff] }
  0xe2   : > { %2760 = vmatpush3.msra.mxu1 %v669_v41  ;;  %1509 = vmatmul.mubr.f32.gmra.mxu0 %v339_v42 }
  0xe3   : > { %1614 = vmatmul.mubr.f32.gmra.mxu1 %v341_v43  ;;  %2705 = vmatprep.subr.mxu0 %v652_v44  ;;  %v724_v43 = vld [vmem:[%s4656_s1 + $0xad8] sm:$0xff] }
  0xe4   : > { %2761 = vmatprep.subr.mxu1 %v684_v45  ;;  %2706 = vmatpush3.msra.mxu0 %v636_v46  ;;  %v756_v44 = vld [vmem:[%s4656_s1 + $0xbd8] sm:$0xff] }
  0xe5   : > { %2762 = vmatpush3.msra.mxu1 %v668_v47  ;;  %2707 = vmatprep.subr.mxu0 %v651_v48  ;;  %v708_v45 = vld [vmem:[%s4656_s1 + $0xa58] sm:$0xff]  ;;  %v723_v48 = vld [vmem:[%s4656_s1 + $0xad0] sm:$0xff] }
  0xe6   : > { %2763 = vmatprep.subr.mxu1 %v683_v49  ;;  %1513 = vmatprep.mubr.f32.mxu0 %v365_v50  ;;  %v740_v46 = vld [vmem:[%s4656_s1 + $0xb58] sm:$0xff]  ;;  %v755_v49 = vld [vmem:[%s4656_s1 + $0xbd0] sm:$0xff] }
  0xe7   : > { %1618 = vmatprep.mubr.f32.mxu1 %v367_v51  ;;  %2708 = vmatpush3.msra.mxu0 %v635_v52  ;;  %v269_v52 = vld [vmem:[%s3238_s6 + $0x2e0] sm:$0xff] }
  0xe8   : > { %2764 = vmatpush3.msra.mxu1 %v667_v53  ;;  %1514 = vmatmul.mubr.f32.gmra.mxu0 %v364_v54  ;;  %v271_v53 = vld [vmem:[%s3238_s6 + $0x2f0] sm:$0xff] }
  0xe9   : > { %1619 = vmatmul.mubr.f32.gmra.mxu1 %v366_v55  ;;  %2709 = vmatprep.subr.mxu0 %v650_v56  ;;  %v707_v55 = vld [vmem:[%s4656_s1 + $0xa50] sm:$0xff] }
  0xea   : > { %2765 = vmatprep.subr.mxu1 %v682_v57  ;;  %2710 = vmatpush3.msra.mxu0 %v634_v58  ;;  %v739_v56 = vld [vmem:[%s4656_s1 + $0xb50] sm:$0xff] }
  0xeb   : > { %2766 = vmatpush3.msra.mxu1 %v666_v59  ;;  %2711 = vmatprep.subr.mxu0 %v649_v60  ;;  %v268_v59 = vld [vmem:[%s3238_s6 + $0x2d8] sm:$0xff]  ;;  %v270_v60 = vld [vmem:[%s3238_s6 + $0x2e8] sm:$0xff] }
  0xec   : > { %2767 = vmatprep.subr.mxu1 %v681_v61  ;;  %2712 = vmatpush3.msra.mxu0 %v633_v62 }
  0xed   : > { %1688 = vmatprep.mubr.f32.mxu0 %v194_v63  ;;  %2768 = vmatpush3.msra.mxu1 %v665_v0  ;;  %v722_v63 = vld [vmem:[%s4656_s1 + $0xac8] sm:$0xff] }
  0xee   : > { %1793 = vmatprep.mubr.f32.mxu1 %v196_v1  ;;  %1689 = vmatmul.mubr.f32.vlgmr.msra.gmra.mxu0 %v193_v2  ;;  %v2265_v10 = vpop.f32.mrf.mxu0  ;;  %v754_v0 = vld [vmem:[%s4656_s1 + $0xbc8] sm:$0xff] }
  0xef   : > { %1794 = vmatmul.mubr.f32.vlgmr.msra.gmra.mxu1 %v195_v3  ;;  %v2321_v11 = vpop.f32.mrf.mxu1  ;;  %2793 = vmatprep.subr.mxu0 %v728_v4  ;;  %v706_v1 = vld [vmem:[%s4656_s1 + $0xa48] sm:$0xff]  ;;  %v721_v4 = vld [vmem:[%s4656_s1 + $0xac0] sm:$0xff] }
  0xf0   : > { %2849 = vmatprep.subr.mxu1 %v760_v5  ;;  %2794 = vmatpush3.msra.mxu0 %v712_v6  ;;  %v2266_v17 = vpop.f32.mrf.mxu0  ;;  %v738_v2 = vld [vmem:[%s4656_s1 + $0xb48] sm:$0xff]  ;;  %v753_v5 = vld [vmem:[%s4656_s1 + $0xbc0] sm:$0xff] }
  0xf1   : > { %2850 = vmatpush3.msra.mxu1 %v744_v7  ;;  %v2322_v18 = vpop.f32.mrf.mxu1  ;;  %2795 = vmatprep.subr.mxu0 %v727_v8  ;;  %v2267_v21 = vadd.f32 %v2266_v17, %v2265_v10  ;;  %v294_v8 = vld [vmem:[%s3238_s6 + $0x3a8] sm:$0xff]  ;;  %v295_v17 = vld [vmem:[%s3238_s6 + $0x3b0] sm:$0xff] }
  0xf2   : > { %2851 = vmatprep.subr.mxu1 %v759_v9  ;;  %v2323_v22 = vadd.f32 %v2322_v18, %v2321_v11  ;;  %1693 = vmatprep.mubr.f32.mxu0 %v219_v12  ;;  %v296_v9 = vld [vmem:[%s3238_s6 + $0x3b8] sm:$0xff]  ;;  %v705_v11 = vld [vmem:[%s4656_s1 + $0xa40] sm:$0xff] }
  0xf3   : > { %1798 = vmatprep.mubr.f32.mxu1 %v221_v13  ;;  %2796 = vmatpush3.msra.mxu0 %v711_v14  ;;  %v851_v27 = vadd.f32 %v2267_v21, %v4187_v16  ;;  %v737_v12 = vld [vmem:[%s4656_s1 + $0xb40] sm:$0xff]  ;;  %v752_v21 = vld [vmem:[%s4656_s1 + $0xbb8] sm:$0xff] }
  0xf4   : > { %2852 = vmatpush3.msra.mxu1 %v743_v15  ;;  %1694 = vmatmul.mubr.f32.gmra.mxu0 %v218_v19  ;;  %v2268_v30 = vpop.f32.mrf.mxu0  ;;  %v293_v15 = vld [vmem:[%s3238_s6 + $0x3a0] sm:$0xff] }
  0xf5   : > { %1799 = vmatmul.mubr.f32.gmra.mxu1 %v220_v20  ;;  %v2324_v31 = vpop.f32.mrf.mxu1  ;;  %2797 = vmatprep.subr.mxu0 %v726_v23  ;;  %v4212_v34 = vadd.f32 %v2323_v22, %v851_v27  ;;  %v720_v20 = vld [vmem:[%s4656_s1 + $0xab8] sm:$0xff] }
  0xf6   : > { %2853 = vmatprep.subr.mxu1 %v758_v24  ;;  %2798 = vmatpush3.msra.mxu0 %v710_v25  ;;  %v2269_v37 = vpop.f32.mrf.mxu0  ;;  %v704_v22 = vld [vmem:[%s4656_s1 + $0xa38] sm:$0xff]  ;;  %v719_v25 = vld [vmem:[%s4656_s1 + $0xab0] sm:$0xff] }
  0xf7   : > { %2854 = vmatpush3.msra.mxu1 %v742_v26  ;;  %v2325_v38 = vpop.f32.mrf.mxu1  ;;  %2799 = vmatprep.subr.mxu0 %v725_v28  ;;  %v2270_v41 = vadd.f32 %v2269_v37, %v2268_v30  ;;  %v736_v23 = vld [vmem:[%s4656_s1 + $0xb38] sm:$0xff]  ;;  %v751_v26 = vld [vmem:[%s4656_s1 + $0xbb0] sm:$0xff]  ;;  %v321_v30 = vld [vmem:[%s3238_s6 + $0x480] sm:$0xff] }
  0xf8   : > { %2855 = vmatprep.subr.mxu1 %v757_v29  ;;  %v2326_v42 = vadd.f32 %v2325_v38, %v2324_v31  ;;  %1698 = vmatprep.mubr.f32.mxu0 %v244_v32  ;;  %v319_v29 = vld [vmem:[%s3238_s6 + $0x470] sm:$0xff]  ;;  %v318_v37 = vld [vmem:[%s3238_s6 + $0x468] sm:$0xff]  ;;  %v320_v38 = vld [vmem:[%s3238_s6 + $0x478] sm:$0xff] }
  0xf9   : > { %1803 = vmatprep.mubr.f32.mxu1 %v246_v33  ;;  %2800 = vmatpush3.msra.mxu0 %v709_v35  ;;  %v856_v47 = vadd.f32 %v2270_v41, %v4187_v16  ;;  %v703_v32 = vld [vmem:[%s4656_s1 + $0xa30] sm:$0xff]  ;;  %v718_v41 = vld [vmem:[%s4656_s1 + $0xaa8] sm:$0xff] }
  0xfa   : > { %2856 = vmatpush3.msra.mxu1 %v741_v36  ;;  %1699 = vmatmul.mubr.f32.gmra.mxu0 %v243_v39  ;;  %v2271_v50 = vpop.f32.mrf.mxu0  ;;  %v735_v33 = vld [vmem:[%s4656_s1 + $0xb30] sm:$0xff] }
  0xfb   : > { %1804 = vmatmul.mubr.f32.gmra.mxu1 %v245_v40  ;;  %v2327_v51 = vpop.f32.mrf.mxu1  ;;  %2801 = vmatprep.subr.mxu0 %v724_v43  ;;  %v4243_v54 = vadd.f32 %v2326_v42, %v856_v47  ;;  %v750_v42 = vld [vmem:[%s4656_s1 + $0xba8] sm:$0xff]  ;;  %v749_v47 = vld [vmem:[%s4656_s1 + $0xba0] sm:$0xff] }
  0xfc   : > { %2857 = vmatprep.subr.mxu1 %v756_v44  ;;  %2802 = vmatpush3.msra.mxu0 %v708_v45  ;;  %v2272_v57 = vpop.f32.mrf.mxu0  ;;  %v702_v43 = vld [vmem:[%s4656_s1 + $0xa28] sm:$0xff] }
  0xfd   : > { %2858 = vmatpush3.msra.mxu1 %v740_v46  ;;  %v2328_v58 = vpop.f32.mrf.mxu1  ;;  %2803 = vmatprep.subr.mxu0 %v723_v48  ;;  %v2273_v61 = vadd.f32 %v2272_v57, %v2271_v50  ;;  %v734_v44 = vld [vmem:[%s4656_s1 + $0xb28] sm:$0xff]  ;;  %v717_v46 = vld [vmem:[%s4656_s1 + $0xaa0] sm:$0xff]  ;;  %v344_v50 = vld [vmem:[%s3238_s6 + $0x538] sm:$0xff] }
  0xfe   : > { %2859 = vmatprep.subr.mxu1 %v755_v49  ;;  %v2329_v62 = vadd.f32 %v2328_v58, %v2327_v51  ;;  %1703 = vmatprep.mubr.f32.mxu0 %v269_v52  ;;  %v346_v51 = vld [vmem:[%s3238_s6 + $0x548] sm:$0xff]  ;;  %v343_v58 = vld [vmem:[%s3238_s6 + $0x530] sm:$0xff] }
  0xff   : > { %1808 = vmatprep.mubr.f32.mxu1 %v271_v53  ;;  %2804 = vmatpush3.msra.mxu0 %v707_v55  ;;  %v861_v3 = vadd.f32 %v2273_v61, %v4187_v16  ;;  %v701_v53 = vld [vmem:[%s4656_s1 + $0xa20] sm:$0xff] }
 0x100   : > { %2860 = vmatpush3.msra.mxu1 %v739_v56  ;;  %1704 = vmatmul.mubr.f32.gmra.mxu0 %v268_v59  ;;  %v2274_v6 = vpop.f32.mrf.mxu0  ;;  %v733_v55 = vld [vmem:[%s4656_s1 + $0xb20] sm:$0xff] }
 0x101   : > { %1809 = vmatmul.mubr.f32.gmra.mxu1 %v270_v60  ;;  %v2330_v7 = vpop.f32.mrf.mxu1  ;;  %2805 = vmatprep.subr.mxu0 %v722_v63  ;;  %v4274_v10 = vadd.f32 %v2329_v62, %v861_v3  ;;  %v345_v59 = vld [vmem:[%s3238_s6 + $0x540] sm:$0xff]  ;;  %v716_v62 = vld [vmem:[%s4656_s1 + $0xa98] sm:$0xff]  ;;  %v715_v3 = vld [vmem:[%s4656_s1 + $0xa90] sm:$0xff] }
 0x102   : > { %2861 = vmatprep.subr.mxu1 %v754_v0  ;;  %2806 = vmatpush3.msra.mxu0 %v706_v1  ;;  %v2275_v13 = vpop.f32.mrf.mxu0  ;;  %v748_v63 = vld [vmem:[%s4656_s1 + $0xb98] sm:$0xff] }
 0x103   : > { %2862 = vmatpush3.msra.mxu1 %v738_v2  ;;  %v2331_v14 = vpop.f32.mrf.mxu1  ;;  %2807 = vmatprep.subr.mxu0 %v721_v4  ;;  %v2276_v18 = vadd.f32 %v2275_v13, %v2274_v6  ;;  %v700_v0 = vld [vmem:[%s4656_s1 + $0xa18] sm:$0xff]  ;;  %v747_v4 = vld [vmem:[%s4656_s1 + $0xb90] sm:$0xff] }
 0x104   : > { %2863 = vmatprep.subr.mxu1 %v753_v5  ;;  %v2332_v19 = vadd.f32 %v2331_v14, %v2330_v7  ;;  %1708 = vmatprep.mubr.f32.mxu0 %v294_v8  ;;  %v732_v1 = vld [vmem:[%s4656_s1 + $0xb18] sm:$0xff]  ;;  %v369_v7 = vld [vmem:[%s3238_s6 + $0x600] sm:$0xff]  ;;  %v371_v8 = vld [vmem:[%s3238_s6 + $0x610] sm:$0xff] }
 0x105   : > { %1813 = vmatprep.mubr.f32.mxu1 %v296_v9  ;;  %2808 = vmatpush3.msra.mxu0 %v705_v11  ;;  %v866_v24 = vadd.f32 %v2276_v18, %v4187_v16  ;;  %v699_v11 = vld [vmem:[%s4656_s1 + $0xa10] sm:$0xff] }
 0x106   : > { %2864 = vmatpush3.msra.mxu1 %v737_v12  ;;  %1709 = vmatmul.mubr.f32.gmra.mxu0 %v293_v15  ;;  %v2277_v27 = vpop.f32.mrf.mxu0  ;;  %v731_v12 = vld [vmem:[%s4656_s1 + $0xb10] sm:$0xff]  ;;  %v368_v15 = vld [vmem:[%s3238_s6 + $0x5f8] sm:$0xff] }
 0x107   : > { %1814 = vmatmul.mubr.f32.gmra.mxu1 %v295_v17  ;;  %v2333_v28 = vpop.f32.mrf.mxu1  ;;  %2809 = vmatprep.subr.mxu0 %v720_v20  ;;  %v4305_v31 = vadd.f32 %v2332_v19, %v866_v24  ;;  %v370_v17 = vld [vmem:[%s3238_s6 + $0x608] sm:$0xff] }
 0x108   : > { %2865 = vmatprep.subr.mxu1 %v752_v21  ;;  %2810 = vmatpush3.msra.mxu0 %v704_v22  ;;  %v2278_v35 = vpop.f32.mrf.mxu0  ;;  %v714_v20 = vld [vmem:[%s4656_s1 + $0xa88] sm:$0xff] }
 0x109   : > { %2866 = vmatpush3.msra.mxu1 %v736_v23  ;;  %v2334_v36 = vpop.f32.mrf.mxu1  ;;  %2811 = vmatprep.subr.mxu0 %v719_v25  ;;  %v2279_v39 = vadd.f32 %v2278_v35, %v2277_v27  ;;  %v746_v21 = vld [vmem:[%s4656_s1 + $0xb88] sm:$0xff]  ;;  %v713_v25 = vld [vmem:[%s4656_s1 + $0xa80] sm:$0xff]  ;;  %v200_v35 = vld [vmem:[%s3238_s6 + $0xb8] sm:$0xff] }
 0x10a   : > { %2867 = vmatprep.subr.mxu1 %v751_v26  ;;  %v2335_v40 = vadd.f32 %v2334_v36, %v2333_v28  ;;  %1713 = vmatprep.mubr.f32.mxu0 %v319_v29  ;;  %v698_v22 = vld [vmem:[%s4656_s1 + $0xa08] sm:$0xff]  ;;  %v745_v26 = vld [vmem:[%s4656_s1 + $0xb80] sm:$0xff] }
 0x10b   : > { %1818 = vmatprep.mubr.f32.mxu1 %v321_v30  ;;  %2812 = vmatpush3.msra.mxu0 %v703_v32  ;;  %v871_v45 = vadd.f32 %v2279_v39, %v4187_v16  ;;  %v730_v23 = vld [vmem:[%s4656_s1 + $0xb08] sm:$0xff]  ;;  %v697_v29 = vld [vmem:[%s4656_s1 + $0xa00] sm:$0xff]  ;;  %v199_v39 = vld [vmem:[%s3238_s6 + $0xb0] sm:$0xff] }
 0x10c   : > { %2868 = vmatpush3.msra.mxu1 %v735_v33  ;;  %1714 = vmatmul.mubr.f32.gmra.mxu0 %v318_v37  ;;  %v2280_v48 = vpop.f32.mrf.mxu0  ;;  %v198_v30 = vld [vmem:[%s3238_s6 + $0xa8] sm:$0xff]  ;;  %v729_v33 = vld [vmem:[%s4656_s1 + $0xb00] sm:$0xff] }
 0x10d   : > { %1819 = vmatmul.mubr.f32.gmra.mxu1 %v320_v38  ;;  %v2336_v49 = vpop.f32.mrf.mxu1  ;;  %2813 = vmatprep.subr.mxu0 %v718_v41  ;;  %v4336_v52 = vadd.f32 %v2335_v40, %v871_v45  ;;  %v197_v38 = vld [vmem:[%s3238_s6 + $0xa0] sm:$0xff] }
 0x10e   : > { %2869 = vmatprep.subr.mxu1 %v750_v42  ;;  %2814 = vmatpush3.msra.mxu0 %v702_v43  ;;  %v2281_v56 = vpop.f32.mrf.mxu0  ;;  %v776_v42 = vld [vmem:[%s4656_s1 + $0xc78] sm:$0xff] }
 0x10f   : > { %2870 = vmatpush3.msra.mxu1 %v734_v44  ;;  %v2337_v57 = vpop.f32.mrf.mxu1  ;;  %2815 = vmatprep.subr.mxu0 %v717_v46  ;;  %v2282_v60 = vadd.f32 %v2281_v56, %v2280_v48  ;;  %v775_v44 = vld [vmem:[%s4656_s1 + $0xc70] sm:$0xff]  ;;  %v225_v48 = vld [vmem:[%s3238_s6 + $0x180] sm:$0xff] }
 0x110   : > { %2871 = vmatprep.subr.mxu1 %v749_v47  ;;  %v2338_v61 = vadd.f32 %v2337_v57, %v2336_v49  ;;  %1718 = vmatprep.mubr.f32.mxu0 %v344_v50  ;;  %v223_v47 = vld [vmem:[%s3238_s6 + $0x170] sm:$0xff]  ;;  %v774_v57 = vld [vmem:[%s4656_s1 + $0xc68] sm:$0xff] }
 0x111   : > { %1823 = vmatprep.mubr.f32.mxu1 %v346_v51  ;;  %2816 = vmatpush3.msra.mxu0 %v701_v53  ;;  %v876_v2 = vadd.f32 %v2282_v60, %v4187_v16  ;;  %v222_v51 = vld [vmem:[%s3238_s6 + $0x168] sm:$0xff]  ;;  %v224_v53 = vld [vmem:[%s3238_s6 + $0x178] sm:$0xff] }
 0x112   : > { %2872 = vmatpush3.msra.mxu1 %v733_v55  ;;  %1719 = vmatmul.mubr.f32.gmra.mxu0 %v343_v58  ;;  %v2283_v5 = vpop.f32.mrf.mxu0 }
 0x113   : > { %1824 = vmatmul.mubr.f32.gmra.mxu1 %v345_v59  ;;  %v2339_v6 = vpop.f32.mrf.mxu1  ;;  %2817 = vmatprep.subr.mxu0 %v716_v62  ;;  %v4367_v9 = vadd.f32 %v2338_v61, %v876_v2  ;;  %v773_v59 = vld [vmem:[%s4656_s1 + $0xc60] sm:$0xff]  ;;  %v248_v62 = vld [vmem:[%s3238_s6 + $0x238] sm:$0xff]  ;;  %v247_v2 = vld [vmem:[%s3238_s6 + $0x230] sm:$0xff] }
 0x114   : > { %2873 = vmatprep.subr.mxu1 %v748_v63  ;;  %2818 = vmatpush3.msra.mxu0 %v700_v0  ;;  %v2284_v13 = vpop.f32.mrf.mxu0  ;;  %v250_v63 = vld [vmem:[%s3238_s6 + $0x248] sm:$0xff] }
 0x115   : > { %2874 = vmatpush3.msra.mxu1 %v732_v1  ;;  %v2340_v14 = vpop.f32.mrf.mxu1  ;;  %2819 = vmatprep.subr.mxu0 %v715_v3  ;;  %v2285_v18 = vadd.f32 %v2284_v13, %v2283_v5  ;;  %v249_v3 = vld [vmem:[%s3238_s6 + $0x240] sm:$0xff] }
 0x116   : > { %2875 = vmatprep.subr.mxu1 %v747_v4  ;;  %v2341_v19 = vadd.f32 %v2340_v14, %v2339_v6  ;;  %1723 = vmatprep.mubr.f32.mxu0 %v369_v7  ;;  %v772_v6 = vld [vmem:[%s4656_s1 + $0xc58] sm:$0xff]  ;;  %v273_v13 = vld [vmem:[%s3238_s6 + $0x300] sm:$0xff]  ;;  %v275_v14 = vld [vmem:[%s3238_s6 + $0x310] sm:$0xff] }
 0x117   : > { %1828 = vmatprep.mubr.f32.mxu1 %v371_v8  ;;  %2820 = vmatpush3.msra.mxu0 %v699_v11  ;;  %v881_v24 = vadd.f32 %v2285_v18, %v4187_v16  ;;  %v771_v8 = vld [vmem:[%s4656_s1 + $0xc50] sm:$0xff]  ;;  %v272_v18 = vld [vmem:[%s3238_s6 + $0x2f8] sm:$0xff] }
 0x118   : > { %2876 = vmatpush3.msra.mxu1 %v731_v12  ;;  %1724 = vmatmul.mubr.f32.gmra.mxu0 %v368_v15  ;;  %v2286_v27 = vpop.f32.mrf.mxu0 }
 0x119   : > { %1829 = vmatmul.mubr.f32.gmra.mxu1 %v370_v17  ;;  %v2342_v28 = vpop.f32.mrf.mxu1  ;;  %2821 = vmatprep.subr.mxu0 %v714_v20  ;;  %v4400_v32 = vadd.f32 %v2341_v19, %v881_v24  ;;  %v274_v19 = vld [vmem:[%s3238_s6 + $0x308] sm:$0xff]  ;;  %v769_v24 = vld [vmem:[%s4656_s1 + $0xc40] sm:$0xff] }
 0x11a   : > { %2877 = vmatprep.subr.mxu1 %v746_v21  ;;  %2822 = vmatpush3.msra.mxu0 %v698_v22  ;;  %v2287_v36 = vpop.f32.mrf.mxu0  ;;  %v770_v22 = vld [vmem:[%s4656_s1 + $0xc48] sm:$0xff] }
 0x11b   : > { %2878 = vmatpush3.msra.mxu1 %v730_v23  ;;  %v2343_v37 = vpop.f32.mrf.mxu1  ;;  %2823 = vmatprep.subr.mxu0 %v713_v25  ;;  %v2288_v40 = vadd.f32 %v2287_v36, %v2286_v27  ;;  %v298_v27 = vld [vmem:[%s3238_s6 + $0x3c8] sm:$0xff] }
 0x11c   : > { %2879 = vmatprep.subr.mxu1 %v745_v26  ;;  %v2344_v41 = vadd.f32 %v2343_v37, %v2342_v28  ;;  %2824 = vmatpush3.msra.mxu0 %v697_v29  ;;  %v300_v28 = vld [vmem:[%s3238_s6 + $0x3d8] sm:$0xff] }
 0x11d   : > { %1898 = vmatprep.mubr.f32.mxu0 %v198_v30  ;;  %2880 = vmatpush3.msra.mxu1 %v729_v33  ;;  %v886_v43 = vadd.f32 %v2288_v40, %v4187_v16  ;;  %v297_v33 = vld [vmem:[%s3238_s6 + $0x3c0] sm:$0xff]  ;;  %v767_v40 = vld [vmem:[%s4656_s1 + $0xc30] sm:$0xff] }
 0x11e   : > { %2003 = vmatprep.mubr.f32.mxu1 %v200_v35  ;;  %1899 = vmatmul.mubr.f32.vlgmr.msra.gmra.mxu0 %v197_v38  ;;  %v2377_v45 = vpop.f32.mrf.mxu0  ;;  %v299_v35 = vld [vmem:[%s3238_s6 + $0x3d0] sm:$0xff]  ;;  %v768_v38 = vld [vmem:[%s4656_s1 + $0xc38] sm:$0xff] }
 0x11f   : > { %2004 = vmatmul.mubr.f32.vlgmr.msra.gmra.mxu1 %v199_v39  ;;  %v2433_v46 = vpop.f32.mrf.mxu1  ;;  %2929 = vmatprep.subr.mxu0 %v776_v42  ;;  %v4417_v49 = vadd.f32 %v2344_v41, %v886_v43  ;;  %v323_v43 = vld [vmem:[%s3238_s6 + $0x490] sm:$0xff] }
 0x120   : > { %2973 = vmatprep.subr.mxu1 %v776_v42  ;;  %2930 = vmatpush3.msra.mxu0 %v776_v42  ;;  %v2378_v50 = vpop.f32.mrf.mxu0 }
 0x121   : > { %2989 = vmatpush3.msra.mxu1 %v776_v42  ;;  %v2434_v16 = vpop.f32.mrf.mxu1  ;;  %2931 = vmatprep.subr.mxu0 %v775_v44  ;;  %v2379_v55 = vadd.f32 %v2378_v50, %v2377_v45 }
 0x122   : > { %2974 = vmatprep.subr.mxu1 %v775_v44  ;;  %v2435_v56 = vadd.f32 %v2434_v16, %v2433_v46  ;;  %1903 = vmatprep.mubr.f32.mxu0 %v223_v47  ;;  %v322_v47 = vld [vmem:[%s3238_s6 + $0x488] sm:$0xff] }
 0x123   : > { %2008 = vmatprep.mubr.f32.mxu1 %v225_v48  ;;  %2932 = vmatpush3.msra.mxu0 %v775_v44  ;;  %v1061_v58 = vadd.f32 %v2379_v55, %v4212_v34  ;;  %v324_v48 = vld [vmem:[%s3238_s6 + $0x498] sm:$0xff]  ;;  %v765_v55 = vld [vmem:[%s4656_s1 + $0xc20] sm:$0xff] }
 0x124   : > { %2990 = vmatpush3.msra.mxu1 %v775_v44  ;;  %1904 = vmatmul.mubr.f32.gmra.mxu0 %v222_v51  ;;  %v2380_v60 = vpop.f32.mrf.mxu0  ;;  %v325_v44 = vld [vmem:[%s3238_s6 + $0x4a0] sm:$0xff]  ;;  %v766_v51 = vld [vmem:[%s4656_s1 + $0xc28] sm:$0xff] }
 0x125   : > { %2009 = vmatmul.mubr.f32.gmra.mxu1 %v224_v53  ;;  %v2436_v61 = vpop.f32.mrf.mxu1  ;;  %2933 = vmatprep.subr.mxu0 %v774_v57  ;;  %v4430_v0 = vadd.f32 %v2435_v56, %v1061_v58  ;;  %v348_v58 = vld [vmem:[%s3238_s6 + $0x558] sm:$0xff] }
 0x126   : > { %2975 = vmatprep.subr.mxu1 %v774_v57  ;;  %2934 = vmatpush3.msra.mxu0 %v774_v57  ;;  %v2381_v1 = vpop.f32.mrf.mxu0 }
 0x127   : > { %2991 = vmatpush3.msra.mxu1 %v774_v57  ;;  %v2437_v34 = vpop.f32.mrf.mxu1  ;;  %2935 = vmatprep.subr.mxu0 %v773_v59  ;;  %v2382_v4 = vadd.f32 %v2381_v1, %v2380_v60 }
 0x128   : > { %2976 = vmatprep.subr.mxu1 %v773_v59  ;;  %v2438_v5 = vadd.f32 %v2437_v34, %v2436_v61  ;;  %1908 = vmatprep.mubr.f32.mxu0 %v248_v62  ;;  %v347_v62 = vld [vmem:[%s3238_s6 + $0x550] sm:$0xff] }
 0x129   : > { %2013 = vmatprep.mubr.f32.mxu1 %v250_v63  ;;  %2936 = vmatpush3.msra.mxu0 %v773_v59  ;;  %v1066_v7 = vadd.f32 %v2382_v4, %v4243_v54  ;;  %v349_v63 = vld [vmem:[%s3238_s6 + $0x560] sm:$0xff]  ;;  %v763_v4 = vld [vmem:[%s4656_s1 + $0xc10] sm:$0xff] }
 0x12a   : > { %2992 = vmatpush3.msra.mxu1 %v773_v59  ;;  %1909 = vmatmul.mubr.f32.gmra.mxu0 %v247_v2  ;;  %v2383_v11 = vpop.f32.mrf.mxu0  ;;  %v350_v59 = vld [vmem:[%s3238_s6 + $0x568] sm:$0xff]  ;;  %v764_v2 = vld [vmem:[%s4656_s1 + $0xc18] sm:$0xff] }
 0x12b   : > { %2014 = vmatmul.mubr.f32.gmra.mxu1 %v249_v3  ;;  %v2439_v12 = vpop.f32.mrf.mxu1  ;;  %2937 = vmatprep.subr.mxu0 %v772_v6  ;;  %v4443_v15 = vadd.f32 %v2438_v5, %v1066_v7  ;;  %v373_v7 = vld [vmem:[%s3238_s6 + $0x620] sm:$0xff] }
 0x12c   : > { %2977 = vmatprep.subr.mxu1 %v772_v6  ;;  %2938 = vmatpush3.msra.mxu0 %v772_v6  ;;  %v2384_v17 = vpop.f32.mrf.mxu0 }
 0x12d   : > { %2993 = vmatpush3.msra.mxu1 %v772_v6  ;;  %v2440_v54 = vpop.f32.mrf.mxu1  ;;  %2939 = vmatprep.subr.mxu0 %v771_v8  ;;  %v2385_v20 = vadd.f32 %v2384_v17, %v2383_v11 }
 0x12e   : > { %2978 = vmatprep.subr.mxu1 %v771_v8  ;;  %v2441_v21 = vadd.f32 %v2440_v54, %v2439_v12  ;;  %1913 = vmatprep.mubr.f32.mxu0 %v273_v13  ;;  %v372_v13 = vld [vmem:[%s3238_s6 + $0x618] sm:$0xff] }
 0x12f   : > { %2018 = vmatprep.mubr.f32.mxu1 %v275_v14  ;;  %2940 = vmatpush3.msra.mxu0 %v771_v8  ;;  %v1071_v23 = vadd.f32 %v2385_v20, %v4274_v10  ;;  %v374_v14 = vld [vmem:[%s3238_s6 + $0x628] sm:$0xff]  ;;  %v761_v20 = vld [vmem:[%s4656_s1 + $0xc00] sm:$0xff] }
 0x130   : > { %2994 = vmatpush3.msra.mxu1 %v771_v8  ;;  %1914 = vmatmul.mubr.f32.gmra.mxu0 %v272_v18  ;;  %v2386_v25 = vpop.f32.mrf.mxu0  ;;  %v375_v8 = vld [vmem:[%s3238_s6 + $0x630] sm:$0xff]  ;;  %v762_v18 = vld [vmem:[%s4656_s1 + $0xc08] sm:$0xff] }
 0x131   : > { %2019 = vmatmul.mubr.f32.gmra.mxu1 %v274_v19  ;;  %v2442_v26 = vpop.f32.mrf.mxu1  ;;  %2941 = vmatprep.subr.mxu0 %v770_v22  ;;  %v4456_v29 = vadd.f32 %v2441_v21, %v1071_v23 }
 0x132   : > { %2979 = vmatprep.subr.mxu1 %v770_v22  ;;  %2942 = vmatpush3.msra.mxu0 %v770_v22  ;;  %v2387_v30 = vpop.f32.mrf.mxu0 }
 0x133   : > { %2995 = vmatpush3.msra.mxu1 %v770_v22  ;;  %v2443_v10 = vpop.f32.mrf.mxu1  ;;  %2943 = vmatprep.subr.mxu0 %v769_v24  ;;  %v2388_v36 = vadd.f32 %v2387_v30, %v2386_v25 }
 0x134   : > { %2980 = vmatprep.subr.mxu1 %v769_v24  ;;  %v2444_v37 = vadd.f32 %v2443_v10, %v2442_v26  ;;  %1918 = vmatprep.mubr.f32.mxu0 %v298_v27  ;;  %v226_v27 = vld [vmem:[%s3238_s6 + $0x188] sm:$0xff] }
 0x135   : > { %2023 = vmatprep.mubr.f32.mxu1 %v300_v28  ;;  %2944 = vmatpush3.msra.mxu0 %v769_v24  ;;  %v1076_v39 = vadd.f32 %v2388_v36, %v4305_v31  ;;  %v326_v28 = vld [vmem:[%s3238_s6 + $0x4a8] sm:$0xff] }
 0x136   : > { %2996 = vmatpush3.msra.mxu1 %v769_v24  ;;  %1919 = vmatmul.mubr.f32.gmra.mxu0 %v297_v33  ;;  %v2389_v41 = vpop.f32.mrf.mxu0  ;;  %v201_v24 = vld [vmem:[%s3238_s6 + $0xc0] sm:$0xff]  ;;  %v251_v33 = vld [vmem:[%s3238_s6 + $0x250] sm:$0xff] }
 0x137   : > { %2024 = vmatmul.mubr.f32.gmra.mxu1 %v299_v35  ;;  %v2445_v42 = vpop.f32.mrf.mxu1  ;;  %2945 = vmatprep.subr.mxu0 %v768_v38  ;;  %v4469_v45 = vadd.f32 %v2444_v37, %v1076_v39  ;;  %v351_v35 = vld [vmem:[%s3238_s6 + $0x570] sm:$0xff]  ;;  %v276_v39 = vld [vmem:[%s3238_s6 + $0x318] sm:$0xff] }
 0x138   : > { %2981 = vmatprep.subr.mxu1 %v768_v38  ;;  %2946 = vmatpush3.msra.mxu0 %v768_v38  ;;  %v2390_v46 = vpop.f32.mrf.mxu0 }
 0x139   : > { %2997 = vmatpush3.msra.mxu1 %v768_v38  ;;  %v2446_v31 = vpop.f32.mrf.mxu1  ;;  %2947 = vmatprep.subr.mxu0 %v767_v40  ;;  %v2391_v50 = vadd.f32 %v2390_v46, %v2389_v41 }
 0x13a   : > { %2982 = vmatprep.subr.mxu1 %v767_v40  ;;  %v2447_v16 = vadd.f32 %v2446_v31, %v2445_v42  ;;  %1923 = vmatprep.mubr.f32.mxu0 %v323_v43 }
 0x13b   : > { %2028 = vmatprep.mubr.f32.mxu1 %v325_v44  ;;  %2948 = vmatpush3.msra.mxu0 %v767_v40  ;;  %v1081_v53 = vadd.f32 %v2391_v50, %v4336_v52 }
 0x13c   : > { %2998 = vmatpush3.msra.mxu1 %v767_v40  ;;  %1924 = vmatmul.mubr.f32.gmra.mxu0 %v322_v47  ;;  %v2392_v56 = vpop.f32.mrf.mxu0  ;;  %v376_v40 = vld [vmem:[%s3238_s6 + $0x638] sm:$0xff] }
 0x13d   : > { %2029 = vmatmul.mubr.f32.gmra.mxu1 %v324_v48  ;;  %v2448_v57 = vpop.f32.mrf.mxu1  ;;  %2949 = vmatprep.subr.mxu0 %v766_v51  ;;  %v4482_v60 = vadd.f32 %v2447_v16, %v1081_v53 }
 0x13e   : > { %2983 = vmatprep.subr.mxu1 %v766_v51  ;;  %2950 = vmatpush3.msra.mxu0 %v766_v51  ;;  %v2393_v61 = vpop.f32.mrf.mxu0 }
 0x13f   : > { %2999 = vmatpush3.msra.mxu1 %v766_v51  ;;  %v2449_v52 = vpop.f32.mrf.mxu1  ;;  %2951 = vmatprep.subr.mxu0 %v765_v55  ;;  %v2394_v1 = vadd.f32 %v2393_v61, %v2392_v56 }
 0x140   : > { %2984 = vmatprep.subr.mxu1 %v765_v55  ;;  %v2450_v34 = vadd.f32 %v2449_v52, %v2448_v57  ;;  %1928 = vmatprep.mubr.f32.mxu0 %v348_v58 }
 0x141   : > { %2033 = vmatprep.mubr.f32.mxu1 %v350_v59  ;;  %2952 = vmatpush3.msra.mxu0 %v765_v55  ;;  %v1086_v3 = vadd.f32 %v2394_v1, %v4367_v9 }
 0x142   : > { %3000 = vmatpush3.msra.mxu1 %v765_v55  ;;  %1929 = vmatmul.mubr.f32.gmra.mxu0 %v347_v62  ;;  %v2395_v5 = vpop.f32.mrf.mxu0 }
 0x143   : > { %2034 = vmatmul.mubr.f32.gmra.mxu1 %v349_v63  ;;  %v2451_v6 = vpop.f32.mrf.mxu1  ;;  %2953 = vmatprep.subr.mxu0 %v764_v2  ;;  %v4495_v11 = vadd.f32 %v2450_v34, %v1086_v3 }
 0x144   : > { %2985 = vmatprep.subr.mxu1 %v764_v2  ;;  %2954 = vmatpush3.msra.mxu0 %v764_v2  ;;  %v2396_v12 = vpop.f32.mrf.mxu0 }
 0x145   : > { %3001 = vmatpush3.msra.mxu1 %v764_v2  ;;  %v2452_v9 = vpop.f32.mrf.mxu1  ;;  %2955 = vmatprep.subr.mxu0 %v763_v4  ;;  %v2397_v17 = vadd.f32 %v2396_v12, %v2395_v5 }
 0x146   : > { %2986 = vmatprep.subr.mxu1 %v763_v4  ;;  %v2453_v54 = vadd.f32 %v2452_v9, %v2451_v6  ;;  %1933 = vmatprep.mubr.f32.mxu0 %v373_v7 }
 0x147   : > { %2038 = vmatprep.mubr.f32.mxu1 %v375_v8  ;;  %2956 = vmatpush3.msra.mxu0 %v763_v4  ;;  %v1091_v19 = vadd.f32 %v2397_v17, %v4400_v32  ;;  %v301_v32 = vld [vmem:[%s3238_s6 + $0x3e0] sm:$0xff]  ;;  %s2229_s6 = sshll.u32 %s4690_s20, 3 }
 0x148   : > { %3002 = vmatpush3.msra.mxu1 %v763_v4  ;;  %1934 = vmatmul.mubr.f32.gmra.mxu0 %v372_v13  ;;  %v2398_v21 = vpop.f32.mrf.mxu0  ;;  %s4642_s25 = scalar_lea.vmem %s4658_s3, %s2229_s6 }
 0x149   : > { %2039 = vmatmul.mubr.f32.gmra.mxu1 %v374_v14  ;;  %v2454_v22 = vpop.f32.mrf.mxu1  ;;  %2957 = vmatprep.subr.mxu0 %v762_v18  ;;  %v4506_v23 = vadd.f32 %v2453_v54, %v1091_v19 }
 0x14a   : > { %2987 = vmatprep.subr.mxu1 %v762_v18  ;;  %2958 = vmatpush3.msra.mxu0 %v762_v18  ;;  %v2399_v25 = vpop.f32.mrf.mxu0 }
 0x14b   : > { %3003 = vmatpush3.msra.mxu1 %v762_v18  ;;  %v2455_v26 = vpop.f32.mrf.mxu1  ;;  %2959 = vmatprep.subr.mxu0 %v761_v20  ;;  %v2400_v30 = vadd.f32 %v2399_v25, %v2398_v21 }
 0x14c   : > { %2988 = vmatprep.subr.mxu1 %v761_v20  ;;  %v2456_v10 = vadd.f32 %v2455_v26, %v2454_v22  ;;  %2960 = vmatpush3.msra.mxu0 %v761_v20 }
 0x14d   : > { %3004 = vmatpush3.msra.mxu1 %v761_v20  ;;  %2961 = vmatprep.mubr.f32.mxu0 %v201_v24  ;;  %v1096_v36 = vadd.f32 %v2400_v30, %v4417_v49 }
 0x14e   : > { %2967 = vmatprep.mubr.f32.mxu1 %v301_v32  ;;  %2962 = vmatmul.mubr.f32.vlgmr.msra.gmra.mxu0 %v226_v27  ;;  %v2489_v37 = vpop.f32.mrf.mxu0 }
 0x14f   : > { %2968 = vmatmul.mubr.f32.vlgmr.msra.gmra.mxu1 %v326_v28  ;;  %v2545_v38 = vpop.f32.mrf.mxu1  ;;  %2964 = vmatprep.mubr.f32.mxu0 %v251_v33  ;;  %v4517_v41 = vadd.f32 %v2456_v10, %v1096_v36 }
 0x150   : > { %2970 = vmatprep.mubr.f32.mxu1 %v351_v35  ;;  %v2490_v42 = vpop.f32.mrf.mxu0 }
 0x151   : > { %v2546_v43 = vpop.f32.mrf.mxu1  ;;  %v2491_v44 = vadd.f32 %v2490_v42, %v2489_v37 }
 0x152   : > { %v2547_v46 = vadd.f32 %v2546_v43, %v2545_v38  ;;  %2965 = vmatmul.mubr.f32.gmra.mxu0 %v276_v39 }
 0x153   : > { %2971 = vmatmul.mubr.f32.gmra.mxu1 %v376_v40  ;;  %v1271_v31 = vadd.f32 %v2491_v44, %v4430_v0 }
 0x154   : > { %v2492_v47 = vpop.f32.mrf.mxu0 }
 0x155   : > { %v2548_v49 = vpop.f32.mrf.mxu1  ;;  %v1376_v48 = vadd.f32 %v2547_v46, %v1271_v31 }
 0x156   : > { %v2493_v50 = vpop.f32.mrf.mxu0 }
 0x157   : > { %v2549_v16 = vpop.f32.mrf.mxu1  ;;  %v2494_v51 = vadd.f32 %v2493_v50, %v2492_v47 }
 0x158   : > { %v2550_v53 = vadd.f32 %v2549_v16, %v2548_v49 }
 0x159   : > { %v1276_v55 = vadd.f32 %v2494_v51, %v4443_v15 }
 0x15a   : > { %v2495_v56 = vpop.f32.mrf.mxu0 }
 0x15b   : > { %v2551_v57 = vpop.f32.mrf.mxu1  ;;  %v1381_v58 = vadd.f32 %v2550_v53, %v1276_v55 }
 0x15c   : > { %v2496_v59 = vpop.f32.mrf.mxu0 }
 0x15d   : > { %v2552_v61 = vpop.f32.mrf.mxu1  ;;  %v2497_v52 = vadd.f32 %v2496_v59, %v2495_v56 }
 0x15e   : > { %v2553_v62 = vadd.f32 %v2552_v61, %v2551_v57 }
 0x15f   : > { %v1281_v63 = vadd.f32 %v2497_v52, %v4456_v29 }
 0x160   : > { %v2498_v1 = vpop.f32.mrf.mxu0 }
 0x161   : > { %v2554_v0 = vpop.f32.mrf.mxu1  ;;  %v1386_v34 = vadd.f32 %v2553_v62, %v1281_v63 }
 0x162   : > { %v2499_v2 = vpop.f32.mrf.mxu0 }
 0x163   : > { %v2555_v3 = vpop.f32.mrf.mxu1  ;;  %v2500_v4 = vadd.f32 %v2499_v2, %v2498_v1 }
 0x164   : > { %v2556_v5 = vadd.f32 %v2555_v3, %v2554_v0 }
 0x165   : > { %v1286_v6 = vadd.f32 %v2500_v4, %v4469_v45 }
 0x166   : > { %v2501_v7 = vpop.f32.mrf.mxu0 }
 0x167   : > { %v2557_v15 = vpop.f32.mrf.mxu1  ;;  %v1391_v8 = vadd.f32 %v2556_v5, %v1286_v6 }
 0x168   : > { %v2502_v12 = vpop.f32.mrf.mxu0 }
 0x169   : > { %v2558_v9 = vpop.f32.mrf.mxu1  ;;  %v2503_v13 = vadd.f32 %v2502_v12, %v2501_v7 }
 0x16a   : > { %v2559_v14 = vadd.f32 %v2558_v9, %v2557_v15 }
 0x16b   : > { %v1291_v17 = vadd.f32 %v2503_v13, %v4482_v60 }
 0x16c   : > { %v2504_v54 = vpop.f32.mrf.mxu0 }
 0x16d   : > { %v2560_v29 = vpop.f32.mrf.mxu1  ;;  %v1396_v18 = vadd.f32 %v2559_v14, %v1291_v17 }
 0x16e   : > { %v2505_v19 = vpop.f32.mrf.mxu0 }
 0x16f   : > { %v2561_v20 = vpop.f32.mrf.mxu1  ;;  %v2506_v21 = vadd.f32 %v2505_v19, %v2504_v54 }
 0x170   : > { %v2562_v22 = vadd.f32 %v2561_v20, %v2560_v29 }
 0x171   : > { %v1296_v24 = vadd.f32 %v2506_v21, %v4495_v11 }
 0x172   : > { %v2507_v32 = vpop.f32.mrf.mxu0 }
 0x173   : > { %v2563_v45 = vpop.f32.mrf.mxu1  ;;  %v1401_v25 = vadd.f32 %v2562_v22, %v1296_v24 }
 0x174   : > { %v2508_v26 = vpop.f32.mrf.mxu0 }
 0x175   : > { %v2564_v27 = vpop.f32.mrf.mxu1  ;;  %v2509_v28 = vadd.f32 %v2508_v26, %v2507_v32 }
 0x176   : > { %v2565_v30 = vadd.f32 %v2564_v27, %v2563_v45 }
 0x177   : > { %v1301_v10 = vadd.f32 %v2509_v28, %v4506_v23 }
 0x178   : > { %v2510_v33 = vpop.f32.mrf.mxu0 }
 0x179   : > { %v2566_v60 = vpop.f32.mrf.mxu1  ;;  %v1406_v35 = vadd.f32 %v2565_v30, %v1301_v10 }
 0x17a   : > { %v2511_v36 = vpop.f32.mrf.mxu0 }
 0x17b   : > { %v2567_v37 = vpop.f32.mrf.mxu1  ;;  %v2512_v38 = vadd.f32 %v2511_v36, %v2510_v33 }
 0x17c   : > { %v2568_v39 = vadd.f32 %v2567_v37, %v2566_v60 }
 0x17d   : > { %v1306_v40 = vadd.f32 %v2512_v38, %v4517_v41 }
 0x17e   : > { %v2601_v42 = vpop.f32.mrf.mxu0 }
 0x17f   : > { %v2657_v11 = vpop.f32.mrf.mxu1  ;;  %v4527_v43 = vadd.f32 %v2568_v39, %v1306_v40 }
 0x180   : > { %v2602_v44 = vpop.f32.mrf.mxu0 }
 0x181   : > { %v2658_v46 = vpop.f32.mrf.mxu1  ;;  %v2603_v31 = vadd.f32 %v2602_v44, %v2601_v42 }
 0x182   : > { %v2659_v47 = vadd.f32 %v2658_v46, %v2657_v11 }
 0x183   : > { %v1481_v49 = vadd.f32 %v2603_v31, %v1376_v48 }
 0x184   : > { %v2604_v50 = vpop.f32.mrf.mxu0 }
 0x185   : > { %v2660_v23 = vpop.f32.mrf.mxu1  ;;  %v4529_v16 = vadd.f32 %v2659_v47, %v1481_v49 }
 0x186   : > { %v2605_v51 = vpop.f32.mrf.mxu0 }
 0x187   : > { %v2661_v53 = vpop.f32.mrf.mxu1  ;;  %v2606_v55 = vadd.f32 %v2605_v51, %v2604_v50 }
 0x188   : > { %v2662_v56 = vadd.f32 %v2661_v53, %v2660_v23 }
 0x189   : > { %v1486_v57 = vadd.f32 %v2606_v55, %v1381_v58 }
 0x18a   : > { %v2607_v59 = vpop.f32.mrf.mxu0 }
 0x18b   : > { %v2663_v41 = vpop.f32.mrf.mxu1  ;;  %v4531_v61 = vadd.f32 %v2662_v56, %v1486_v57 }
 0x18c   : > { %v2608_v52 = vpop.f32.mrf.mxu0 }
 0x18d   : > { %v2664_v62 = vpop.f32.mrf.mxu1  ;;  %v2609_v63 = vadd.f32 %v2608_v52, %v2607_v59 }
 0x18e   : > { %v2665_v1 = vadd.f32 %v2664_v62, %v2663_v41 }
 0x18f   : > { %v1491_v0 = vadd.f32 %v2609_v63, %v1386_v34 }
 0x190   : > { %v2610_v2 = vpop.f32.mrf.mxu0 }
 0x191   : > { %v2666_v48 = vpop.f32.mrf.mxu1  ;;  %v4533_v3 = vadd.f32 %v2665_v1, %v1491_v0 }
 0x192   : > { %v2611_v4 = vpop.f32.mrf.mxu0 }
 0x193   : > { %v2667_v5 = vpop.f32.mrf.mxu1  ;;  %v2612_v6 = vadd.f32 %v2611_v4, %v2610_v2 }
 0x194   : > { %v2668_v7 = vadd.f32 %v2667_v5, %v2666_v48 }
 0x195   : > { %v1496_v15 = vadd.f32 %v2612_v6, %v1391_v8 }
 0x196   : > { %v2613_v12 = vpop.f32.mrf.mxu0 }
 0x197   : > { %v2669_v58 = vpop.f32.mrf.mxu1  ;;  %v4535_v9 = vadd.f32 %v2668_v7, %v1496_v15 }
 0x198   : > { %v2614_v13 = vpop.f32.mrf.mxu0 }
 0x199   : > { %v2670_v14 = vpop.f32.mrf.mxu1  ;;  %v2615_v17 = vadd.f32 %v2614_v13, %v2613_v12 }
 0x19a   : > { %v2671_v54 = vadd.f32 %v2670_v14, %v2669_v58 }
 0x19b   : > { %v1501_v29 = vadd.f32 %v2615_v17, %v1396_v18 }
 0x19c   : > { %v2616_v19 = vpop.f32.mrf.mxu0 }
 0x19d   : > { %v2672_v34 = vpop.f32.mrf.mxu1  ;;  %v4537_v20 = vadd.f32 %v2671_v54, %v1501_v29 }
 0x19e   : > { %v2617_v21 = vpop.f32.mrf.mxu0 }
 0x19f   : > { %v2673_v22 = vpop.f32.mrf.mxu1  ;;  %v2618_v24 = vadd.f32 %v2617_v21, %v2616_v19 }
 0x1a0   : > { %v2674_v45 = vadd.f32 %v2673_v22, %v2672_v34 }
 0x1a1   : > { %v1506_v32 = vadd.f32 %v2618_v24, %v1401_v25 }
 0x1a2   : > { %v2619_v26 = vpop.f32.mrf.mxu0 }
 0x1a3   : > { %v2675_v8 = vpop.f32.mrf.mxu1  ;;  %v4539_v27 = vadd.f32 %v2674_v45, %v1506_v32 }
 0x1a4   : > { %v2620_v28 = vpop.f32.mrf.mxu0 }
 0x1a5   : > { %v2676_v30 = vpop.f32.mrf.mxu1  ;;  %v2621_v10 = vadd.f32 %v2620_v28, %v2619_v26 }
 0x1a6   : > { %v2677_v33 = vadd.f32 %v2676_v30, %v2675_v8 }
 0x1a7   : > { %v1511_v60 = vadd.f32 %v2621_v10, %v1406_v35 }
 0x1a8   : > { %v2622_v36 = vpop.f32.mrf.mxu0 }
 0x1a9   : > { %v4541_v18 = vpop.f32.mrf.mxu1  ;;  %v4543_v37 = vadd.f32 %v2677_v33, %v1511_v60 }
 0x1aa   : > { %v2623_v38 = vpop.f32.mrf.mxu0 }
 0x1ab   : > { %v4545_v39 = vpop.f32.mrf.mxu1 }
 0x1ae   : > { %v2713_v40 = vpop.f32.mrf.mxu0 }
 0x1af   : > { %v4547_v25 = vpop.f32.mrf.mxu1 }
 0x1b0   : > { %v2714_v42 = vpop.f32.mrf.mxu0 }
 0x1b1   : > { %v4549_v11 = vpop.f32.mrf.mxu1 }
 0x1b4   : > { %v2716_v44 = vpop.f32.mrf.mxu0 }
 0x1b5   : > { %v4551_v46 = vpop.f32.mrf.mxu1 }
 0x1b6   : > { %v2717_v31 = vpop.f32.mrf.mxu0 }
 0x1b7   : > { %v4553_v47 = vpop.f32.mrf.mxu1 }
 0x1ba   : > { %v2719_v35 = vpop.f32.mrf.mxu0 }
 0x1bb   : > { %v4555_v49 = vpop.f32.mrf.mxu1 }
 0x1bc   : > { %v2720_v50 = vpop.f32.mrf.mxu0 }
 0x1bd   : > { %v4557_v23 = vpop.f32.mrf.mxu1 }
 0x1c0   : > { %v2722_v51 = vpop.f32.mrf.mxu0 }
 0x1c1   : > { %v4559_v53 = vpop.f32.mrf.mxu1 }
 0x1c2   : > { %v2723_v55 = vpop.f32.mrf.mxu0 }
 0x1c3   : > { %v4561_v56 = vpop.f32.mrf.mxu1 }
 0x1c6   : > { %v2725_v57 = vpop.f32.mrf.mxu0 }
 0x1c7   : > { %v4563_v59 = vpop.f32.mrf.mxu1 }
 0x1c8   : > { %v2726_v41 = vpop.f32.mrf.mxu0 }
 0x1c9   : > { %v4565_v52 = vpop.f32.mrf.mxu1 }
 0x1cc   : > { %v2728_v62 = vpop.f32.mrf.mxu0 }
 0x1cd   : > { %v2784_v63 = vpop.f32.mrf.mxu1 }
 0x1ce   : > { %v2729_v1 = vpop.f32.mrf.mxu0 }
 0x1cf   : > { %v2785_v0 = vpop.f32.mrf.mxu1 }
 0x1d2   : > { %v2731_v2 = vpop.f32.mrf.mxu0 }
 0x1d3   : > { %v4567_v48 = vpop.f32.mrf.mxu1 }
 0x1d4   : > { %4659 = vst [vmem:[#allocation2_spill] sm:$0xff] %v4567_v48  ;;  %v2732_v4 = vpop.f32.mrf.mxu0 }
 0x1d5   : > { %v4569_v5 = vpop.f32.mrf.mxu1 }
 0x1d6   : > { %4660 = vst [vmem:[#allocation3_spill] sm:$0xff] %v4569_v5  ;;  %v2727_v5 = vadd.f32 %v2726_v41, %v2725_v57  ;;  %v2786_v57 = vadd.f32 %v2785_v0, %v2784_v63 }
 0x1d8   : > { %v2734_v6 = vpop.f32.mrf.mxu0 }
 0x1d9   : > { %v4571_v7 = vpop.f32.mrf.mxu1 }
 0x1da   : > { %4661 = vst [vmem:[#allocation4_spill] sm:$0xff] %v4571_v7  ;;  %v2735_v15 = vpop.f32.mrf.mxu0  ;;  %v2724_v7 = vadd.f32 %v2723_v55, %v2722_v51  ;;  %v1711_v55 = vadd.f32 %v2727_v5, %v4537_v20 }
 0x1db   : > { %v4573_v12 = vpop.f32.mrf.mxu1  ;;  %v4674_v5 = vld [vmem:[#allocation2_spill] sm:$0xff] }
 0x1dc   : > { %4662 = vst [vmem:[#allocation5_spill] sm:$0xff] %v4573_v12 }
 0x1de   : > { %v2825_v58 = vpop.f32.mrf.mxu0 }
 0x1df   : > { %v4575_v13 = vpop.f32.mrf.mxu1 }
 0x1e0   : > { %4663 = vst [vmem:[#allocation6_spill] sm:$0xff] %v4575_v13  ;;  %v2826_v14 = vpop.f32.mrf.mxu0 }
 0x1e1   : > { %v4577_v17 = vpop.f32.mrf.mxu1 }
 0x1e2   : > { %4664 = vst [vmem:[#allocation7_spill] sm:$0xff] %v4577_v17  ;;  %v2624_v17 = vadd.f32 %v2623_v38, %v2622_v36 }
 0x1e4   : > { %v2828_v54 = vpop.f32.mrf.mxu0 }
 0x1e5   : > { %v4579_v29 = vpop.f32.mrf.mxu1 }
 0x1e6   : > { %4665 = vst [vmem:[#allocation8_spill] sm:$0xff] %v4579_v29  ;;  %v2829_v19 = vpop.f32.mrf.mxu0 }
 0x1e7   : > { %v4581_v34 = vpop.f32.mrf.mxu1 }
 0x1e8   : > { %4666 = vst [vmem:[#allocation9_spill] sm:$0xff] %v4581_v34  ;;  %v2718_v34 = vadd.f32 %v2717_v31, %v2716_v44  ;;  %v2774_v44 = vadd.f32 %v4553_v47, %v4551_v46  ;;  %v1706_v31 = vadd.f32 %v2724_v7, %v4535_v9  ;;  %v2827_v46 = vadd.f32 %v2826_v14, %v2825_v58 }
 0x1e9   : > { %v2783_v47 = vadd.f32 %v4565_v52, %v4563_v59 }
 0x1ea   : > { %v4583_v21 = vpop.f32.mrf.mxu0  ;;  %v1696_v36 = vadd.f32 %v2718_v34, %v4531_v61  ;;  %v2733_v61 = vadd.f32 %v2732_v4, %v2731_v2 }
 0x1eb   : > { %4667 = vst [vmem:[#allocation10_spill] sm:$0xff] %v4583_v21  ;;  %v4585_v22 = vpop.f32.mrf.mxu1  ;;  %v1816_v0 = vadd.f32 %v2783_v47, %v1711_v55 }
 0x1ec   : > { %4668 = vst [vmem:[#allocation11_spill] sm:$0xff] %v4585_v22  ;;  %v4587_v24 = vpop.f32.mrf.mxu0  ;;  %v2715_v22 = vadd.f32 %v2714_v42, %v2713_v40 }
 0x1ed   : > { %4669 = vst [vmem:[#allocation12_spill] sm:$0xff] %v4587_v24  ;;  %v4589_v32 = vpop.f32.mrf.mxu1  ;;  %v1516_v24 = vadd.f32 %v2624_v17, %v4527_v43  ;;  %v2771_v43 = vadd.f32 %v4549_v11, %v4547_v25  ;;  %v1801_v11 = vadd.f32 %v2774_v44, %v1696_v36  ;;  %v4678_v59 = vld [vmem:[#allocation8_spill] sm:$0xff] }
 0x1ee   : > { %4670 = vst [vmem:[#allocation13_spill] sm:$0xff] %v4589_v32  ;;  %v2721_v32 = vadd.f32 %v2720_v50, %v2719_v35  ;;  %v2830_v35 = vadd.f32 %v2829_v19, %v2828_v54 }
 0x1ef   : > { %v4679_v52 = vld [vmem:[#allocation9_spill] sm:$0xff] }
 0x1f0   : > { %v2834_v45 = vpop.f32.mrf.mxu0  ;;  %v1701_v38 = vadd.f32 %v2721_v32, %v4533_v3  ;;  %v1906_v2 = vadd.f32 %v2830_v35, %v1801_v11 }
 0x1f1   : > { %v4591_v26 = vpop.f32.mrf.mxu1 }
 0x1f2   : > { %4671 = vst [vmem:[#allocation14_spill] sm:$0xff] %v4591_v26  ;;  %v2835_v8 = vpop.f32.mrf.mxu0  ;;  %v2730_v26 = vadd.f32 %v2729_v1, %v2728_v62  ;;  %v1721_v1 = vadd.f32 %v2733_v61, %v4543_v37  ;;  %v4680_v14 = vld [vmem:[#allocation10_spill] sm:$0xff] }
 0x1f3   : > { %v4593_v28 = vpop.f32.mrf.mxu1  ;;  %v2836_v4 = vadd.f32 %v2835_v8, %v2834_v45  ;;  %v4683_v8 = vld [vmem:[#allocation7_spill] sm:$0xff] }
 0x1f4   : > { %4672 = vst [vmem:[#allocation15_spill] sm:$0xff] %v4593_v28  ;;  %v2680_v28 = vadd.f32 %v4545_v39, %v4541_v18  ;;  %v1716_v18 = vadd.f32 %v2730_v26, %v4539_v27  ;;  %v2736_v39 = vadd.f32 %v2735_v15, %v2734_v6  ;;  %v2780_v27 = vadd.f32 %v4561_v56, %v4559_v53  ;;  %v4675_v6 = vld [vmem:[#allocation3_spill] sm:$0xff]  ;;  %v4676_v15 = vld [vmem:[#allocation4_spill] sm:$0xff]  ;;  %v4677_v53 = vld [vmem:[#allocation5_spill] sm:$0xff] }
 0x1f5   : > { %v2789_v7 = vadd.f32 %v4675_v6, %v4674_v5  ;;  %v2792_v56 = vadd.f32 %v4677_v53, %v4676_v15  ;;  %v4681_v17 = vld [vmem:[#allocation12_spill] sm:$0xff]  ;;  %v4682_v26 = vld [vmem:[#allocation6_spill] sm:$0xff] }
 0x1f6   : > { %v2837_v30 = vpop.f32.mrf.mxu0  ;;  %v1621_v48 = vadd.f32 %v2680_v28, %v1516_v24  ;;  %v1811_v62 = vadd.f32 %v2780_v27, %v1706_v31  ;;  %v2833_v37 = vadd.f32 %v4681_v17, %v4680_v14  ;;  %v2883_v28 = vadd.f32 %v4683_v8, %v4682_v26 }
 0x1f7   : > { %v4595_v10 = vpop.f32.mrf.mxu1  ;;  %v1826_v45 = vadd.f32 %v2789_v7, %v1721_v1 }
 0x1f8   : > { %4673 = vst [vmem:[#allocation16_spill] sm:$0xff] %v4595_v10  ;;  %v2838_v33 = vpop.f32.mrf.mxu0  ;;  %v1691_v10 = vadd.f32 %v2715_v22, %v4529_v16  ;;  %v2777_v16 = vadd.f32 %v4557_v23, %v4555_v49  ;;  %v1821_v49 = vadd.f32 %v2786_v57, %v1716_v18  ;;  %v1726_v9 = vadd.f32 %v2736_v39, %v1621_v48  ;;  %v4687_v57 = vld [vmem:[#allocation11_spill] sm:$0xff] }
 0x1f9   : > { %v4597_v60 = vpop.f32.mrf.mxu1  ;;  %v2839_v23 = vadd.f32 %v2838_v33, %v2837_v30  ;;  %v2886_v48 = vadd.f32 %v4679_v52, %v4678_v59  ;;  %v1916_v30 = vadd.f32 %v2836_v4, %v1811_v62  ;;  %v4685_v18 = vld [vmem:[#allocation14_spill] sm:$0xff] }
 0x1fa   : > { %v1796_v51 = vadd.f32 %v2771_v43, %v1691_v10  ;;  %v1806_v41 = vadd.f32 %v2777_v16, %v1701_v38  ;;  %v1831_v34 = vadd.f32 %v2792_v56, %v1726_v9 }
 0x1fb   : > { %v1921_v22 = vadd.f32 %v2839_v23, %v1816_v0  ;;  %v2011_v10 = vadd.f32 %v2886_v48, %v1906_v2  ;;  %v4686_v39 = vld [vmem:[#allocation15_spill] sm:$0xff] }
 0x1fc   : > { %v2840_v13 = vpop.f32.mrf.mxu0  ;;  %v2892_v16 = vadd.f32 %v4686_v39, %v4685_v18 }
 0x1fd   : > { %v2896_v21 = vpop.f32.mrf.mxu1 }
 0x1fe   : > { %v2841_v29 = vpop.f32.mrf.mxu0 }
 0x1ff   : > { %v2897_v12 = vpop.f32.mrf.mxu1  ;;  %v2842_v25 = vadd.f32 %v2841_v29, %v2840_v13  ;;  %v1901_v13 = vadd.f32 %v2827_v46, %v1796_v51  ;;  %v4684_v33 = vld [vmem:[#allocation16_spill] sm:$0xff]  ;;  %v2021_v46 = vadd.f32 %v2892_v16, %v1916_v30 }
 0x200   : > { %v2898_v24 = vadd.f32 %v2897_v12, %v2896_v21  ;;  %v2895_v36 = vadd.f32 %v4597_v60, %v4684_v33 }
 0x201   : > { %v1926_v58 = vadd.f32 %v2842_v25, %v1821_v49  ;;  %v2006_v61 = vadd.f32 %v2883_v28, %v1901_v13  ;;  %v4688_v25 = vld [vmem:[#allocation13_spill] sm:$0xff] }
 0x202   : > { %v2843_v40 = vpop.f32.mrf.mxu0  ;;  %v2026_v51 = vadd.f32 %v2895_v36, %v1921_v22  ;;  %v2889_v11 = vadd.f32 %v4688_v25, %v4687_v57 }
 0x203   : > { %v4605_v42 = vpop.f32.mrf.mxu1  ;;  %v2031_v44 = vadd.f32 %v2898_v24, %v1926_v58 }
 0x204   : > { %v2844_v3 = vpop.f32.mrf.mxu0 }
 0x205   : > { %v2900_v50 = vpop.f32.mrf.mxu1  ;;  %v2845_v54 = vadd.f32 %v2844_v3, %v2843_v40  ;;  %v1911_v40 = vadd.f32 %v2833_v37, %v1806_v41 }
 0x206   : > { %v2901_v60 = vadd.f32 %v2900_v50, %v4605_v42 }
 0x207   : > { %v1931_v31 = vadd.f32 %v2845_v54, %v1826_v45  ;;  %v2016_v2 = vadd.f32 %v2889_v11, %v1911_v40 }
 0x208   : > { %v2846_v20 = vpop.f32.mrf.mxu0 }
 0x209   : > { %v2902_v63 = vpop.f32.mrf.mxu1  ;;  %v2036_v42 = vadd.f32 %v2901_v60, %v1931_v31 }
 0x20a   : > { %v2847_v29 = vpop.f32.mrf.mxu0 }
 0x20b   : > { %v2903_v19 = vpop.f32.mrf.mxu1  ;;  %v2848_v32 = vadd.f32 %v2847_v29, %v2846_v20 }
 0x20c   : > { %v2904_v43 = vadd.f32 %v2903_v19, %v2902_v63 }
 0x20d   : > { %v1936_v38 = vadd.f32 %v2848_v32, %v1831_v34 }
 0x20e   : > { %v2963_v12 = vpop.f32.mrf.mxu0 }
 0x20f   : > { %v2969_v21 = vpop.f32.mrf.mxu1  ;;  %v2116_v35 = vadd.f32 %v2963_v12, %v2011_v10  ;;  %v2041_v55 = vadd.f32 %v2904_v43, %v1936_v38 }
 0x210   : > { %v2136_v3 = vadd.f32 %v2969_v21, %v2031_v44  ;;  %v2110_v41 = vpop.f32.mrf.mxu0 }
 0x211   : > { %v2130_v27 = vpop.f32.mrf.mxu1  ;;  %v2150_v47 = vmax.f32 %v2116_v35, 0.0  ;;  %v2111_v9 = vadd.f32 %v2110_v41, %v2006_v61 }
 0x212   : > { %v2154_v49 = vmax.f32 %v2136_v3, 0.0  ;;  %v2131_v23 = vadd.f32 %v2130_v27, %v2026_v51  ;;  %v2966_v62 = vpop.f32.mrf.mxu0 }
 0x213   : > { %v2972_v1 = vpop.f32.mrf.mxu1  ;;  %2158 = vst [vmem:[%s4642_s25 + $0x8] sm:$0xff] %v2150_v47  ;;  %v2149_v50 = vmax.f32 %v2111_v9, 0.0  ;;  %v2126_v20 = vadd.f32 %v2966_v62, %v2021_v46 }
 0x214   : > { %2162 = vst [vmem:[%s4642_s25 + $0x28] sm:$0xff] %v2154_v49  ;;  %v2153_v4 = vmax.f32 %v2131_v23, 0.0  ;;  %v2146_v63 = vadd.f32 %v2972_v1, %v2041_v55  ;;  %v2120_v0 = vpop.f32.mrf.mxu0 }
 0x215   : > { %v2140_v5 = vpop.f32.mrf.mxu1  ;;  %2157 = vst [vmem:[%s4642_s25] sm:$0xff] %v2149_v50  ;;  %v2152_v6 = vmax.f32 %v2126_v20, 0.0  ;;  %v2121_v15 = vadd.f32 %v2120_v0, %v2016_v2 }
 0x216   : > { %2161 = vst [vmem:[%s4642_s25 + $0x20] sm:$0xff] %v2153_v4  ;;  %v2156_v7 = vmax.f32 %v2146_v63, 0.0  ;;  %v2141_v53 = vadd.f32 %v2140_v5, %v2036_v42 }
 0x217   : > { %2160 = vst [vmem:[%s4642_s25 + $0x18] sm:$0xff] %v2152_v6  ;;  %v2151_v56 = vmax.f32 %v2121_v15, 0.0 }
 0x218   : > { %2164 = vst [vmem:[%s4642_s25 + $0x38] sm:$0xff] %v2156_v7  ;;  %v2155_v58 = vmax.f32 %v2141_v53, 0.0 }
 0x219   : > { %2159 = vst [vmem:[%s4642_s25 + $0x10] sm:$0xff] %v2151_v56 }
 0x21a   : > { %2163 = vst [vmem:[%s4642_s25 + $0x30] sm:$0xff] %v2155_v58 }
 0x21b PF: > { %s13_s12 = sadd.s32 1, %s3020_s12  }
 0x21c   : > { %p10_p4 = scmp.ge.s32.totalorder %s13_s12, 4  }
 0x21e   :  { %12 = sbr.rel (!%p10_p4) target bundleno = 1 (0x1), region = 62 }

// kernel: visual_encoder_forward.14
= control target key start
LH: loop header
LB: loop body
LE: loop exit
PB: predicated region body
PF: predicated region fallthrough
CT: control target
= control target key end

     0   :  { %s1342_s12 = smov 0   ;;  %s1658_s0 = inlined_call_operand.vmem [shape: f32[2,128,128], index: 0, kind: input, shape index: {}]   ;;  %s1659_s1 = inlined_call_operand.vmem [shape: f32[640,128], index: 1, kind: input, shape index: {}]   ;;  %s1660_s2 = inlined_call_operand.vmem [shape: f32[1,128], index: 2, kind: input, shape index: {}]   ;;  %s1661_s3 = inlined_call_operand.vmem [shape: f32[2,64,128], index: 3, kind: output, shape index: {}]  }
   0x1 LB: > { %s920_s13 = sadd.s32 4294967295, %s1320_s12   ;;  %p924_p0 = scmp.ge.s32.totalorder %s1320_s12, 1  ;;  %s1320_s12 = sphi %s1342_s12, %s13_s12  }
   0x2   : > { %p137_p1 = scmp.lt.s32.totalorder %s1320_s12, 3 }
   0x4   : > { %p138_p2 = pnand %p924_p0, %p137_p1 }
   0x5   : > { %p161_p3 = scmp.lt.s32.totalorder (!%p138_p2), %s920_s13, 1 }
   0x6   : > { %141 = sbr.rel (%p138_p2) target bundleno = 332 (0x14c), region = 32 }
   0xb   : > { %v212_v0 = vld [vmem:[%s1659_s1 + $0xf8] sm:$0xff]  ;;  %v211_v2 = vld [vmem:[%s1659_s1 + $0xf0] sm:$0xff]  ;;  %v210_v4 = vld [vmem:[%s1659_s1 + $0xe8] sm:$0xff]  ;;  %s1663_s13 = smov (!%p161_p3, %s920_s13), 1 }
   0xc   : > { %v194_v1 = vld [vmem:[%s1659_s1 + $0x78] sm:$0xff]  ;;  %1054 = vmatprep.subr.mxu0 %v212_v0  ;;  %v193_v3 = vld [vmem:[%s1659_s1 + $0x70] sm:$0xff]  ;;  %v192_v5 = vld [vmem:[%s1659_s1 + $0x68] sm:$0xff]  ;;  %s932_s16 = sshll.u32 %s1663_s13, 7  ;;  %s933_s6 = sshll.u32 %s1663_s13, 6 }
   0xd   : > { %1098 = vmatprep.subr.mxu1 %v194_v1  ;;  %1055 = vmatpush3.msra.mxu0 %v212_v0  ;;  %v209_v6 = vld [vmem:[%s1659_s1 + $0xe0] sm:$0xff]  ;;  %v208_v8 = vld [vmem:[%s1659_s1 + $0xd8] sm:$0xff]  ;;  %v207_v10 = vld [vmem:[%s1659_s1 + $0xd0] sm:$0xff]  ;;  %s1450_s27 = scalar_lea.vmem %s1658_s0, %s932_s16  ;;  %s170_s9 = scalar_lea.vmem %s1661_s3, %s933_s6 }
   0xe   : > { %1099 = vmatpush3.msra.mxu1 %v194_v1  ;;  %1056 = vmatprep.subr.mxu0 %v211_v2  ;;  %v191_v7 = vld [vmem:[%s1659_s1 + $0x60] sm:$0xff]  ;;  %v190_v9 = vld [vmem:[%s1659_s1 + $0x58] sm:$0xff]  ;;  %v189_v11 = vld [vmem:[%s1659_s1 + $0x50] sm:$0xff] }
   0xf   : > { %1100 = vmatprep.subr.mxu1 %v193_v3  ;;  %1057 = vmatpush3.msra.mxu0 %v211_v2  ;;  %v206_v12 = vld [vmem:[%s1659_s1 + $0xc8] sm:$0xff]  ;;  %v205_v14 = vld [vmem:[%s1659_s1 + $0xc0] sm:$0xff]  ;;  %v204_v16 = vld [vmem:[%s1659_s1 + $0xb8] sm:$0xff] }
  0x10   : > { %1101 = vmatpush3.msra.mxu1 %v193_v3  ;;  %1058 = vmatprep.subr.mxu0 %v210_v4  ;;  %v188_v13 = vld [vmem:[%s1659_s1 + $0x48] sm:$0xff]  ;;  %v187_v15 = vld [vmem:[%s1659_s1 + $0x40] sm:$0xff]  ;;  %v186_v17 = vld [vmem:[%s1659_s1 + $0x38] sm:$0xff] }
  0x11   : > { %1102 = vmatprep.subr.mxu1 %v192_v5  ;;  %1059 = vmatpush3.msra.mxu0 %v210_v4  ;;  %v203_v18 = vld [vmem:[%s1659_s1 + $0xb0] sm:$0xff]  ;;  %v202_v20 = vld [vmem:[%s1659_s1 + $0xa8] sm:$0xff]  ;;  %v201_v22 = vld [vmem:[%s1659_s1 + $0xa0] sm:$0xff] }
  0x12   : > { %1103 = vmatpush3.msra.mxu1 %v192_v5  ;;  %1060 = vmatprep.subr.mxu0 %v209_v6  ;;  %v185_v19 = vld [vmem:[%s1659_s1 + $0x30] sm:$0xff]  ;;  %v184_v21 = vld [vmem:[%s1659_s1 + $0x28] sm:$0xff]  ;;  %v183_v23 = vld [vmem:[%s1659_s1 + $0x20] sm:$0xff] }
  0x13   : > { %1104 = vmatprep.subr.mxu1 %v191_v7  ;;  %1061 = vmatpush3.msra.mxu0 %v209_v6  ;;  %v200_v24 = vld [vmem:[%s1659_s1 + $0x98] sm:$0xff]  ;;  %v199_v26 = vld [vmem:[%s1659_s1 + $0x90] sm:$0xff]  ;;  %v198_v28 = vld [vmem:[%s1659_s1 + $0x88] sm:$0xff] }
  0x14   : > { %1105 = vmatpush3.msra.mxu1 %v191_v7  ;;  %1062 = vmatprep.subr.mxu0 %v208_v8  ;;  %v182_v25 = vld [vmem:[%s1659_s1 + $0x18] sm:$0xff]  ;;  %v181_v27 = vld [vmem:[%s1659_s1 + $0x10] sm:$0xff]  ;;  %v180_v29 = vld [vmem:[%s1659_s1 + $0x8] sm:$0xff] }
  0x15   : > { %1106 = vmatprep.subr.mxu1 %v190_v9  ;;  %1063 = vmatpush3.msra.mxu0 %v208_v8  ;;  %v197_v30 = vld [vmem:[%s1659_s1 + $0x80] sm:$0xff]  ;;  %v1459_v32 = vld [vmem:[%s1450_s27 + $0x10] sm:$0xff]  ;;  %v1463_v34 = vld [vmem:[%s1450_s27 + $0x18] sm:$0xff] }
  0x16   : > { %1107 = vmatpush3.msra.mxu1 %v190_v9  ;;  %1064 = vmatprep.subr.mxu0 %v207_v10  ;;  %v179_v31 = vld [vmem:[%s1659_s1] sm:$0xff]  ;;  %v172_v35 = vld [vmem:[%s1450_s27 + $0x8] sm:$0xff]  ;;  %v446_v36 = vld [vmem:[%s1659_s1 + $0x178] sm:$0xff] }
  0x17   : > { %1108 = vmatprep.subr.mxu1 %v189_v11  ;;  %1065 = vmatpush3.msra.mxu0 %v207_v10  ;;  %v171_v33 = vld [vmem:[%s1450_s27] sm:$0xff]  ;;  %v583_v37 = vld [vmem:[%s1659_s1 + $0x1f8] sm:$0xff]  ;;  %v445_v38 = vld [vmem:[%s1659_s1 + $0x170] sm:$0xff] }
  0x18   : > { %1109 = vmatpush3.msra.mxu1 %v189_v11  ;;  %1066 = vmatprep.subr.mxu0 %v206_v12  ;;  %v582_v39 = vld [vmem:[%s1659_s1 + $0x1f0] sm:$0xff]  ;;  %v444_v40 = vld [vmem:[%s1659_s1 + $0x168] sm:$0xff]  ;;  %v443_v42 = vld [vmem:[%s1659_s1 + $0x160] sm:$0xff] }
  0x19   : > { %1110 = vmatprep.subr.mxu1 %v188_v13  ;;  %1067 = vmatpush3.msra.mxu0 %v206_v12  ;;  %v581_v41 = vld [vmem:[%s1659_s1 + $0x1e8] sm:$0xff]  ;;  %v580_v43 = vld [vmem:[%s1659_s1 + $0x1e0] sm:$0xff]  ;;  %v442_v44 = vld [vmem:[%s1659_s1 + $0x158] sm:$0xff] }
  0x1a   : > { %1111 = vmatpush3.msra.mxu1 %v188_v13  ;;  %1068 = vmatprep.subr.mxu0 %v205_v14  ;;  %v579_v45 = vld [vmem:[%s1659_s1 + $0x1d8] sm:$0xff]  ;;  %v441_v46 = vld [vmem:[%s1659_s1 + $0x150] sm:$0xff]  ;;  %v440_v48 = vld [vmem:[%s1659_s1 + $0x148] sm:$0xff] }
  0x1b   : > { %1112 = vmatprep.subr.mxu1 %v187_v15  ;;  %1069 = vmatpush3.msra.mxu0 %v205_v14  ;;  %v578_v47 = vld [vmem:[%s1659_s1 + $0x1d0] sm:$0xff]  ;;  %v577_v49 = vld [vmem:[%s1659_s1 + $0x1c8] sm:$0xff]  ;;  %v439_v50 = vld [vmem:[%s1659_s1 + $0x140] sm:$0xff] }
  0x1c   : > { %1113 = vmatpush3.msra.mxu1 %v187_v15  ;;  %1070 = vmatprep.subr.mxu0 %v204_v16  ;;  %v576_v51 = vld [vmem:[%s1659_s1 + $0x1c0] sm:$0xff]  ;;  %v438_v52 = vld [vmem:[%s1659_s1 + $0x138] sm:$0xff]  ;;  %v437_v55 = vld [vmem:[%s1659_s1 + $0x130] sm:$0xff] }
  0x1d   : > { %1114 = vmatprep.subr.mxu1 %v186_v17  ;;  %1071 = vmatpush3.msra.mxu0 %v204_v16  ;;  %v575_v53 = vld [vmem:[%s1659_s1 + $0x1b8] sm:$0xff]  ;;  %v175_v54 = vld [vmem:[%s1450_s27 + $0x20] sm:$0xff]  ;;  %v574_v56 = vld [vmem:[%s1659_s1 + $0x1b0] sm:$0xff] }
  0x1e   : > { %1115 = vmatpush3.msra.mxu1 %v186_v17  ;;  %1072 = vmatprep.subr.mxu0 %v203_v18  ;;  %v176_v57 = vld [vmem:[%s1450_s27 + $0x28] sm:$0xff]  ;;  %v177_v60 = vld [vmem:[%s1450_s27 + $0x30] sm:$0xff]  ;;  %v435_v61 = vld [vmem:[%s1659_s1 + $0x120] sm:$0xff] }
  0x1f   : > { %1116 = vmatprep.subr.mxu1 %v185_v19  ;;  %1073 = vmatpush3.msra.mxu0 %v203_v18  ;;  %v436_v58 = vld [vmem:[%s1659_s1 + $0x128] sm:$0xff]  ;;  %v572_v62 = vld [vmem:[%s1659_s1 + $0x1a0] sm:$0xff]  ;;  %v178_v63 = vld [vmem:[%s1450_s27 + $0x38] sm:$0xff] }
  0x20   : > { %1117 = vmatpush3.msra.mxu1 %v185_v19  ;;  %1074 = vmatprep.subr.mxu0 %v202_v20  ;;  %v573_v59 = vld [vmem:[%s1659_s1 + $0x1a8] sm:$0xff]  ;;  %v434_v0 = vld [vmem:[%s1659_s1 + $0x118] sm:$0xff]  ;;  %v1553_v2 = vld [vmem:[%s1450_s27 + $0x40] sm:$0xff] }
  0x21   : > { %1118 = vmatprep.subr.mxu1 %v184_v21  ;;  %1075 = vmatpush3.msra.mxu0 %v202_v20  ;;  %v571_v1 = vld [vmem:[%s1659_s1 + $0x198] sm:$0xff]  ;;  %v433_v3 = vld [vmem:[%s1659_s1 + $0x110] sm:$0xff]  ;;  %v1562_v5 = vld [vmem:[%s1450_s27 + $0x48] sm:$0xff] }
  0x22   : > { %1119 = vmatpush3.msra.mxu1 %v184_v21  ;;  %1076 = vmatprep.subr.mxu0 %v201_v22  ;;  %v570_v4 = vld [vmem:[%s1659_s1 + $0x190] sm:$0xff]  ;;  %v432_v6 = vld [vmem:[%s1659_s1 + $0x108] sm:$0xff]  ;;  %v431_v8 = vld [vmem:[%s1659_s1 + $0x100] sm:$0xff] }
  0x23   : > { %1120 = vmatprep.subr.mxu1 %v183_v23  ;;  %1077 = vmatpush3.msra.mxu0 %v201_v22  ;;  %v569_v7 = vld [vmem:[%s1659_s1 + $0x188] sm:$0xff]  ;;  %v568_v9 = vld [vmem:[%s1659_s1 + $0x180] sm:$0xff]  ;;  %v720_v10 = vld [vmem:[%s1659_s1 + $0x278] sm:$0xff] }
  0x24   : > { %1121 = vmatpush3.msra.mxu1 %v183_v23  ;;  %1078 = vmatprep.subr.mxu0 %v200_v24  ;;  %v719_v11 = vld [vmem:[%s1659_s1 + $0x270] sm:$0xff]  ;;  %v718_v12 = vld [vmem:[%s1659_s1 + $0x268] sm:$0xff]  ;;  %v717_v13 = vld [vmem:[%s1659_s1 + $0x260] sm:$0xff] }
  0x25   : > { %1122 = vmatprep.subr.mxu1 %v182_v25  ;;  %1079 = vmatpush3.msra.mxu0 %v200_v24  ;;  %v716_v14 = vld [vmem:[%s1659_s1 + $0x258] sm:$0xff]  ;;  %v1597_v15 = vld [vmem:[%s1450_s27 + $0x50] sm:$0xff]  ;;  %v714_v18 = vld [vmem:[%s1659_s1 + $0x248] sm:$0xff] }
  0x26   : > { %1123 = vmatpush3.msra.mxu1 %v182_v25  ;;  %1080 = vmatprep.subr.mxu0 %v199_v26  ;;  %v715_v16 = vld [vmem:[%s1659_s1 + $0x250] sm:$0xff]  ;;  %v1604_v17 = vld [vmem:[%s1450_s27 + $0x58] sm:$0xff]  ;;  %v566_v19 = vld [vmem:[%s1450_s27 + $0x60] sm:$0xff] }
  0x27   : > { %1124 = vmatprep.subr.mxu1 %v181_v27  ;;  %1081 = vmatpush3.msra.mxu0 %v199_v26  ;;  %v713_v20 = vld [vmem:[%s1659_s1 + $0x240] sm:$0xff]  ;;  %v567_v21 = vld [vmem:[%s1450_s27 + $0x68] sm:$0xff]  ;;  %v712_v22 = vld [vmem:[%s1659_s1 + $0x238] sm:$0xff] }
  0x28   : > { %1125 = vmatpush3.msra.mxu1 %v181_v27  ;;  %1082 = vmatprep.subr.mxu0 %v198_v28  ;;  %v711_v23 = vld [vmem:[%s1659_s1 + $0x230] sm:$0xff]  ;;  %v710_v24 = vld [vmem:[%s1659_s1 + $0x228] sm:$0xff]  ;;  %v709_v25 = vld [vmem:[%s1659_s1 + $0x220] sm:$0xff] }
  0x29   : > { %1126 = vmatprep.subr.mxu1 %v180_v29  ;;  %1083 = vmatpush3.msra.mxu0 %v198_v28  ;;  %v708_v26 = vld [vmem:[%s1659_s1 + $0x218] sm:$0xff]  ;;  %v707_v27 = vld [vmem:[%s1659_s1 + $0x210] sm:$0xff]  ;;  %v706_v28 = vld [vmem:[%s1659_s1 + $0x208] sm:$0xff] }
  0x2a   : > { %1127 = vmatpush3.msra.mxu1 %v180_v29  ;;  %1084 = vmatprep.subr.mxu0 %v197_v30  ;;  %v705_v29 = vld [vmem:[%s1659_s1 + $0x200] sm:$0xff] }
  0x2b   : > { %1128 = vmatprep.subr.mxu1 %v179_v31  ;;  %1085 = vmatpush3.msra.mxu0 %v197_v30  ;;  %v703_v30 = vld [vmem:[%s1450_s27 + $0x70] sm:$0xff] }
  0x2c   : > { %1086 = vmatprep.mubr.f32.mxu0 %v1459_v32  ;;  %1129 = vmatpush3.msra.mxu1 %v179_v31  ;;  %v704_v31 = vld [vmem:[%s1450_s27 + $0x78] sm:$0xff] }
  0x2d   : > { %1130 = vmatprep.mubr.f32.mxu1 %v171_v33  ;;  %1087 = vmatmul.mubr.f32.vlgmr.msra.gmra.mxu0 %v1463_v34 }
  0x2e   : > { %1131 = vmatmul.mubr.f32.vlgmr.msra.gmra.mxu1 %v172_v35  ;;  %1142 = vmatprep.subr.mxu0 %v446_v36 }
  0x2f   : > { %1186 = vmatprep.subr.mxu1 %v583_v37  ;;  %1143 = vmatpush3.msra.mxu0 %v446_v36 }
  0x30   : > { %1187 = vmatpush3.msra.mxu1 %v583_v37  ;;  %1144 = vmatprep.subr.mxu0 %v445_v38 }
  0x31   : > { %1188 = vmatprep.subr.mxu1 %v582_v39  ;;  %1145 = vmatpush3.msra.mxu0 %v445_v38 }
  0x32   : > { %1189 = vmatpush3.msra.mxu1 %v582_v39  ;;  %1146 = vmatprep.subr.mxu0 %v444_v40 }
  0x33   : > { %1190 = vmatprep.subr.mxu1 %v581_v41  ;;  %1147 = vmatpush3.msra.mxu0 %v444_v40 }
  0x34   : > { %1191 = vmatpush3.msra.mxu1 %v581_v41  ;;  %1148 = vmatprep.subr.mxu0 %v443_v42 }
  0x35   : > { %1192 = vmatprep.subr.mxu1 %v580_v43  ;;  %1149 = vmatpush3.msra.mxu0 %v443_v42 }
  0x36   : > { %1193 = vmatpush3.msra.mxu1 %v580_v43  ;;  %1150 = vmatprep.subr.mxu0 %v442_v44 }
  0x37   : > { %1194 = vmatprep.subr.mxu1 %v579_v45  ;;  %1151 = vmatpush3.msra.mxu0 %v442_v44 }
  0x38   : > { %1195 = vmatpush3.msra.mxu1 %v579_v45  ;;  %1152 = vmatprep.subr.mxu0 %v441_v46 }
  0x39   : > { %1196 = vmatprep.subr.mxu1 %v578_v47  ;;  %1153 = vmatpush3.msra.mxu0 %v441_v46 }
  0x3a   : > { %1197 = vmatpush3.msra.mxu1 %v578_v47  ;;  %1154 = vmatprep.subr.mxu0 %v440_v48 }
  0x3b   : > { %1198 = vmatprep.subr.mxu1 %v577_v49  ;;  %1155 = vmatpush3.msra.mxu0 %v440_v48 }
  0x3c   : > { %1199 = vmatpush3.msra.mxu1 %v577_v49  ;;  %1156 = vmatprep.subr.mxu0 %v439_v50 }
  0x3d   : > { %1200 = vmatprep.subr.mxu1 %v576_v51  ;;  %1157 = vmatpush3.msra.mxu0 %v439_v50 }
  0x3e   : > { %1201 = vmatpush3.msra.mxu1 %v576_v51  ;;  %1158 = vmatprep.subr.mxu0 %v438_v52 }
  0x3f   : > { %1202 = vmatprep.subr.mxu1 %v575_v53  ;;  %1159 = vmatpush3.msra.mxu0 %v438_v52 }
  0x40   : > { %1203 = vmatpush3.msra.mxu1 %v575_v53  ;;  %1089 = vmatprep.mubr.f32.mxu0 %v175_v54 }
  0x41   : > { %1133 = vmatprep.mubr.f32.mxu1 %v1459_v32  ;;  %1160 = vmatprep.subr.mxu0 %v437_v55 }
  0x42   : > { %1204 = vmatprep.subr.mxu1 %v574_v56  ;;  %1090 = vmatmul.mubr.f32.gmra.mxu0 %v176_v57 }
  0x43   : > { %1134 = vmatmul.mubr.f32.gmra.mxu1 %v1463_v34  ;;  %1161 = vmatpush3.msra.mxu0 %v437_v55 }
  0x44   : > { %1205 = vmatpush3.msra.mxu1 %v574_v56  ;;  %1162 = vmatprep.subr.mxu0 %v436_v58 }
  0x45   : > { %1206 = vmatprep.subr.mxu1 %v573_v59  ;;  %1163 = vmatpush3.msra.mxu0 %v436_v58 }
  0x46   : > { %1207 = vmatpush3.msra.mxu1 %v573_v59  ;;  %1092 = vmatprep.mubr.f32.mxu0 %v177_v60 }
  0x47   : > { %1136 = vmatprep.mubr.f32.mxu1 %v175_v54  ;;  %1164 = vmatprep.subr.mxu0 %v435_v61 }
  0x48   : > { %1208 = vmatprep.subr.mxu1 %v572_v62  ;;  %1093 = vmatmul.mubr.f32.gmra.mxu0 %v178_v63 }
  0x49   : > { %1137 = vmatmul.mubr.f32.gmra.mxu1 %v176_v57  ;;  %1165 = vmatpush3.msra.mxu0 %v435_v61 }
  0x4a   : > { %1209 = vmatpush3.msra.mxu1 %v572_v62  ;;  %1166 = vmatprep.subr.mxu0 %v434_v0 }
  0x4b   : > { %1210 = vmatprep.subr.mxu1 %v571_v1  ;;  %1167 = vmatpush3.msra.mxu0 %v434_v0 }
  0x4c   : > { %1211 = vmatpush3.msra.mxu1 %v571_v1  ;;  %1095 = vmatprep.mubr.f32.mxu0 %v1553_v2 }
  0x4d   : > { %1139 = vmatprep.mubr.f32.mxu1 %v177_v60  ;;  %1168 = vmatprep.subr.mxu0 %v433_v3 }
  0x4e   : > { %1212 = vmatprep.subr.mxu1 %v570_v4  ;;  %1096 = vmatmul.mubr.f32.gmra.mxu0 %v1562_v5 }
  0x4f   : > { %1140 = vmatmul.mubr.f32.gmra.mxu1 %v178_v63  ;;  %1169 = vmatpush3.msra.mxu0 %v433_v3 }
  0x50   : > { %1213 = vmatpush3.msra.mxu1 %v570_v4  ;;  %1170 = vmatprep.subr.mxu0 %v432_v6 }
  0x51   : > { %1214 = vmatprep.subr.mxu1 %v569_v7  ;;  %1171 = vmatpush3.msra.mxu0 %v432_v6 }
  0x52   : > { %1215 = vmatpush3.msra.mxu1 %v569_v7  ;;  %1172 = vmatprep.subr.mxu0 %v431_v8 }
  0x53   : > { %1216 = vmatprep.subr.mxu1 %v568_v9  ;;  %1173 = vmatpush3.msra.mxu0 %v431_v8 }
  0x54   : > { %1174 = vmatprep.mubr.f32.mxu0 %v175_v54  ;;  %1217 = vmatpush3.msra.mxu1 %v568_v9 }
  0x55   : > { %1218 = vmatprep.mubr.f32.mxu1 %v177_v60  ;;  %1175 = vmatmul.mubr.f32.vlgmr.msra.gmra.mxu0 %v176_v57 }
  0x56   : > { %1219 = vmatmul.mubr.f32.vlgmr.msra.gmra.mxu1 %v178_v63  ;;  %1230 = vmatprep.subr.mxu0 %v720_v10 }
  0x57   : > { %1274 = vmatprep.subr.mxu1 %v720_v10  ;;  %1231 = vmatpush3.msra.mxu0 %v720_v10 }
  0x58   : > { %1290 = vmatpush3.msra.mxu1 %v720_v10  ;;  %1232 = vmatprep.subr.mxu0 %v719_v11 }
  0x59   : > { %1275 = vmatprep.subr.mxu1 %v719_v11  ;;  %1177 = vmatprep.mubr.f32.mxu0 %v177_v60 }
  0x5a   : > { %1233 = vmatpush3.msra.mxu0 %v719_v11  ;;  %1291 = vmatpush3.msra.mxu1 %v719_v11 }
  0x5b   : > { %1178 = vmatmul.mubr.f32.gmra.mxu0 %v178_v63  ;;  %1234 = vmatprep.subr.mxu0 %v718_v12 }
  0x5c   : > { %1276 = vmatprep.subr.mxu1 %v718_v12  ;;  %1221 = vmatprep.mubr.f32.mxu1 %v1553_v2 }
  0x5d   : > { %1235 = vmatpush3.msra.mxu0 %v718_v12  ;;  %1292 = vmatpush3.msra.mxu1 %v718_v12 }
  0x5e   : > { %1236 = vmatprep.subr.mxu0 %v717_v13  ;;  %1222 = vmatmul.mubr.f32.gmra.mxu1 %v1562_v5 }
  0x5f   : > { %1277 = vmatprep.subr.mxu1 %v717_v13  ;;  %1180 = vmatprep.mubr.f32.mxu0 %v1553_v2 }
  0x60   : > { %1237 = vmatpush3.msra.mxu0 %v717_v13  ;;  %1293 = vmatpush3.msra.mxu1 %v717_v13 }
  0x61   : > { %1181 = vmatmul.mubr.f32.gmra.mxu0 %v1562_v5  ;;  %1238 = vmatprep.subr.mxu0 %v716_v14 }
  0x62   : > { %1278 = vmatprep.subr.mxu1 %v716_v14  ;;  %1224 = vmatprep.mubr.f32.mxu1 %v1597_v15 }
  0x63   : > { %1239 = vmatpush3.msra.mxu0 %v716_v14  ;;  %1294 = vmatpush3.msra.mxu1 %v716_v14 }
  0x64   : > { %1240 = vmatprep.subr.mxu0 %v715_v16  ;;  %1225 = vmatmul.mubr.f32.gmra.mxu1 %v1604_v17 }
  0x65   : > { %1279 = vmatprep.subr.mxu1 %v715_v16  ;;  %1183 = vmatprep.mubr.f32.mxu0 %v1597_v15 }
  0x66   : > { %1241 = vmatpush3.msra.mxu0 %v715_v16  ;;  %1295 = vmatpush3.msra.mxu1 %v715_v16 }
  0x67   : > { %1184 = vmatmul.mubr.f32.gmra.mxu0 %v1604_v17  ;;  %1242 = vmatprep.subr.mxu0 %v714_v18 }
  0x68   : > { %1280 = vmatprep.subr.mxu1 %v714_v18  ;;  %1227 = vmatprep.mubr.f32.mxu1 %v566_v19 }
  0x69   : > { %1243 = vmatpush3.msra.mxu0 %v714_v18  ;;  %1296 = vmatpush3.msra.mxu1 %v714_v18 }
  0x6a   : > { %1244 = vmatprep.subr.mxu0 %v713_v20  ;;  %1228 = vmatmul.mubr.f32.gmra.mxu1 %v567_v21 }
  0x6b   : > { %1281 = vmatprep.subr.mxu1 %v713_v20  ;;  %1245 = vmatpush3.msra.mxu0 %v713_v20 }
  0x6c   : > { %1297 = vmatpush3.msra.mxu1 %v713_v20  ;;  %1246 = vmatprep.subr.mxu0 %v712_v22 }
  0x6d   : > { %1282 = vmatprep.subr.mxu1 %v712_v22  ;;  %1247 = vmatpush3.msra.mxu0 %v712_v22 }
  0x6e   : > { %1298 = vmatpush3.msra.mxu1 %v712_v22  ;;  %1248 = vmatprep.subr.mxu0 %v711_v23 }
  0x6f   : > { %1283 = vmatprep.subr.mxu1 %v711_v23  ;;  %1249 = vmatpush3.msra.mxu0 %v711_v23 }
  0x70   : > { %1299 = vmatpush3.msra.mxu1 %v711_v23  ;;  %1250 = vmatprep.subr.mxu0 %v710_v24 }
  0x71   : > { %1284 = vmatprep.subr.mxu1 %v710_v24  ;;  %1251 = vmatpush3.msra.mxu0 %v710_v24 }
  0x72   : > { %1300 = vmatpush3.msra.mxu1 %v710_v24  ;;  %1252 = vmatprep.subr.mxu0 %v709_v25 }
  0x73   : > { %1285 = vmatprep.subr.mxu1 %v709_v25  ;;  %1253 = vmatpush3.msra.mxu0 %v709_v25 }
  0x74   : > { %1301 = vmatpush3.msra.mxu1 %v709_v25  ;;  %1254 = vmatprep.subr.mxu0 %v708_v26 }
  0x75   : > { %1286 = vmatprep.subr.mxu1 %v708_v26  ;;  %1255 = vmatpush3.msra.mxu0 %v708_v26 }
  0x76   : > { %1302 = vmatpush3.msra.mxu1 %v708_v26  ;;  %1256 = vmatprep.subr.mxu0 %v707_v27 }
  0x77   : > { %1287 = vmatprep.subr.mxu1 %v707_v27  ;;  %1257 = vmatpush3.msra.mxu0 %v707_v27 }
  0x78   : > { %1303 = vmatpush3.msra.mxu1 %v707_v27  ;;  %1258 = vmatprep.subr.mxu0 %v706_v28 }
  0x79   : > { %1288 = vmatprep.subr.mxu1 %v706_v28  ;;  %1259 = vmatpush3.msra.mxu0 %v706_v28 }
  0x7a   : > { %1304 = vmatpush3.msra.mxu1 %v706_v28  ;;  %1260 = vmatprep.subr.mxu0 %v705_v29 }
  0x7b   : > { %1289 = vmatprep.subr.mxu1 %v705_v29  ;;  %1261 = vmatpush3.msra.mxu0 %v705_v29 }
  0x7c   : > { %1305 = vmatpush3.msra.mxu1 %v705_v29  ;;  %1262 = vmatprep.mubr.f32.mxu0 %v1553_v2 }
  0x7d   : > { %1268 = vmatprep.mubr.f32.mxu1 %v566_v19  ;;  %1263 = vmatmul.mubr.f32.vlgmr.msra.gmra.mxu0 %v1562_v5  ;;  %v929_v19 = vld [vmem:[%s1660_s2] ss:$0 sm:$0xff] }
  0x7e   : > { %1269 = vmatmul.mubr.f32.vlgmr.msra.gmra.mxu1 %v567_v21  ;;  %1265 = vmatprep.mubr.f32.mxu0 %v1597_v15 }
  0x7f   : > { %1271 = vmatprep.mubr.f32.mxu1 %v703_v30 }
  0x81   : > { %1266 = vmatmul.mubr.f32.gmra.mxu0 %v1604_v17 }
  0x82   : > { %1272 = vmatmul.mubr.f32.gmra.mxu1 %v704_v31 }
  0xed   : > { %v1088_v32 = vpop.f32.mrf.mxu0 }
  0xee   : > { %v1132_v33 = vpop.f32.mrf.mxu1 }
  0xef   : > { %v279_v34 = vpop.f32.mrf.mxu0  ;;  %v390_v60 = vadd.f32 %v1132_v33, %v1088_v32 }
  0xf0   : > { %v384_v36 = vpop.f32.mrf.mxu1 }
  0xf1   : > { %v385_v0 = vadd.f32 %v384_v36, %v279_v34 }
 0x102   : > { %v1091_v35 = vpop.f32.mrf.mxu0 }
 0x103   : > { %v1135_v37 = vpop.f32.mrf.mxu1 }
 0x104   : > { %v289_v38 = vpop.f32.mrf.mxu0  ;;  %v400_v7 = vadd.f32 %v1135_v37, %v1091_v35 }
 0x105   : > { %v394_v39 = vpop.f32.mrf.mxu1 }
 0x106   : > { %v395_v8 = vadd.f32 %v394_v39, %v289_v38 }
 0x108   : > { %v1094_v40 = vpop.f32.mrf.mxu0 }
 0x109   : > { %v1138_v41 = vpop.f32.mrf.mxu1 }
 0x10a   : > { %v299_v42 = vpop.f32.mrf.mxu0  ;;  %v410_v61 = vadd.f32 %v1138_v41, %v1094_v40 }
 0x10b   : > { %v404_v43 = vpop.f32.mrf.mxu1 }
 0x10c   : > { %v405_v1 = vadd.f32 %v404_v43, %v299_v42 }
 0x10e   : > { %v1097_v44 = vpop.f32.mrf.mxu0 }
 0x10f   : > { %v1141_v45 = vpop.f32.mrf.mxu1 }
 0x110   : > { %v309_v46 = vpop.f32.mrf.mxu0  ;;  %v420_v9 = vadd.f32 %v1141_v45, %v1097_v44 }
 0x111   : > { %v414_v47 = vpop.f32.mrf.mxu1 }
 0x112   : > { %v415_v10 = vadd.f32 %v414_v47, %v309_v46 }
 0x115   : > { %v1176_v48 = vpop.f32.mrf.mxu0 }
 0x116   : > { %v1220_v49 = vpop.f32.mrf.mxu1  ;;  %v553_v2 = vadd.f32 %v1176_v48, %v390_v60 }
 0x117   : > { %v513_v50 = vpop.f32.mrf.mxu0 }
 0x118   : > { %v650_v51 = vpop.f32.mrf.mxu1  ;;  %v552_v4 = vadd.f32 %v513_v50, %v385_v0  ;;  %v690_v12 = vadd.f32 %v1220_v49, %v553_v2 }
 0x11a   : > { %v689_v21 = vadd.f32 %v650_v51, %v552_v4 }
 0x11b   : > { %v1179_v52 = vpop.f32.mrf.mxu0 }
 0x11c   : > { %v555_v14 = vadd.f32 %v1179_v52, %v400_v7 }
 0x11d   : > { %v523_v54 = vpop.f32.mrf.mxu0 }
 0x11e   : > { %v1223_v53 = vpop.f32.mrf.mxu1  ;;  %v554_v15 = vadd.f32 %v523_v54, %v395_v8 }
 0x11f   : > { %v692_v31 = vadd.f32 %v1223_v53, %v555_v14 }
 0x120   : > { %v660_v55 = vpop.f32.mrf.mxu1 }
 0x121   : > { %v1182_v56 = vpop.f32.mrf.mxu0  ;;  %v691_v32 = vadd.f32 %v660_v55, %v554_v15 }
 0x122   : > { %v557_v3 = vadd.f32 %v1182_v56, %v410_v61 }
 0x123   : > { %v533_v58 = vpop.f32.mrf.mxu0 }
 0x124   : > { %v1226_v57 = vpop.f32.mrf.mxu1  ;;  %v556_v5 = vadd.f32 %v533_v58, %v405_v1 }
 0x125   : > { %v694_v13 = vadd.f32 %v1226_v57, %v557_v3 }
 0x126   : > { %v670_v59 = vpop.f32.mrf.mxu1 }
 0x127   : > { %v1185_v62 = vpop.f32.mrf.mxu0  ;;  %v693_v22 = vadd.f32 %v670_v59, %v556_v5 }
 0x128   : > { %v559_v16 = vadd.f32 %v1185_v62, %v420_v9 }
 0x129   : > { %v543_v6 = vpop.f32.mrf.mxu0 }
 0x12a   : > { %v1229_v63 = vpop.f32.mrf.mxu1  ;;  %v558_v17 = vadd.f32 %v543_v6, %v415_v10 }
 0x12b   : > { %v696_v33 = vadd.f32 %v1229_v63, %v559_v16 }
 0x12c   : > { %v680_v11 = vpop.f32.mrf.mxu1 }
 0x12d   : > { %v695_v34 = vadd.f32 %v680_v11, %v558_v17 }
 0x13d   : > { %v1264_v18 = vpop.f32.mrf.mxu0 }
 0x13e   : > { %v1270_v20 = vpop.f32.mrf.mxu1  ;;  %v827_v23 = vadd.f32 %v1264_v18, %v690_v12 }
 0x13f   : > { %v831_v24 = vadd.f32 %v1270_v20, %v694_v13  ;;  %v787_v25 = vpop.f32.mrf.mxu0 }
 0x140   : > { %v807_v26 = vpop.f32.mrf.mxu1  ;;  %v842_v27 = vadd.f32 %v929_v19, %v827_v23  ;;  %v826_v29 = vadd.f32 %v787_v25, %v689_v21 }
 0x141   : > { %v846_v28 = vadd.f32 %v929_v19, %v831_v24  ;;  %v830_v30 = vadd.f32 %v807_v26, %v693_v22  ;;  %v1267_v35 = vpop.f32.mrf.mxu0 }
 0x142   : > { %v1273_v36 = vpop.f32.mrf.mxu1  ;;  %v850_v37 = vmax.f32 %v842_v27, 0.0  ;;  %v841_v39 = vadd.f32 %v929_v19, %v826_v29  ;;  %v829_v41 = vadd.f32 %v1267_v35, %v692_v31 }
 0x143   : > { %v854_v38 = vmax.f32 %v846_v28, 0.0  ;;  %v845_v40 = vadd.f32 %v929_v19, %v830_v30  ;;  %v833_v42 = vadd.f32 %v1273_v36, %v696_v33  ;;  %v797_v43 = vpop.f32.mrf.mxu0 }
 0x144   : > { %v817_v44 = vpop.f32.mrf.mxu1  ;;  %858 = vst [vmem:[%s170_s9 + $0x8] sm:$0xff] %v850_v37  ;;  %v849_v45 = vmax.f32 %v841_v39, 0.0  ;;  %v828_v47 = vadd.f32 %v797_v43, %v691_v32  ;;  %v844_v49 = vadd.f32 %v929_v19, %v829_v41 }
 0x145   : > { %862 = vst [vmem:[%s170_s9 + $0x28] sm:$0xff] %v854_v38  ;;  %v853_v46 = vmax.f32 %v845_v40, 0.0  ;;  %v832_v48 = vadd.f32 %v817_v44, %v695_v34  ;;  %v848_v50 = vadd.f32 %v929_v19, %v833_v42 }
 0x146   : > { %857 = vst [vmem:[%s170_s9] sm:$0xff] %v849_v45  ;;  %v843_v51 = vadd.f32 %v929_v19, %v828_v47  ;;  %v852_v53 = vmax.f32 %v844_v49, 0.0 }
 0x147   : > { %861 = vst [vmem:[%s170_s9 + $0x20] sm:$0xff] %v853_v46  ;;  %v847_v52 = vadd.f32 %v929_v19, %v832_v48  ;;  %v856_v54 = vmax.f32 %v848_v50, 0.0 }
 0x148   : > { %v851_v55 = vmax.f32 %v843_v51, 0.0  ;;  %860 = vst [vmem:[%s170_s9 + $0x18] sm:$0xff] %v852_v53 }
 0x149   : > { %v855_v56 = vmax.f32 %v847_v52, 0.0  ;;  %864 = vst [vmem:[%s170_s9 + $0x38] sm:$0xff] %v856_v54 }
 0x14a   : > { %859 = vst [vmem:[%s170_s9 + $0x10] sm:$0xff] %v851_v55 }
 0x14b   : > { %863 = vst [vmem:[%s170_s9 + $0x30] sm:$0xff] %v855_v56 }
 0x14c PF: > { %s13_s12 = sadd.s32 1, %s1320_s12  }
 0x14d   : > { %p10_p4 = scmp.ge.s32.totalorder %s13_s12, 4  }
 0x14f   :  { %12 = sbr.rel (!%p10_p4) target bundleno = 1 (0x1), region = 62 }

// kernel: visual_encoder_forward.15
= control target key start
LH: loop header
LB: loop body
LE: loop exit
PB: predicated region body
PF: predicated region fallthrough
CT: control target
= control target key end

     0   :  { %s530_s12 = smov 0   ;;  %s607_s0 = inlined_call_operand.vmem [shape: f32[128,128], index: 0, kind: input, shape index: {}]   ;;  %s608_s1 = inlined_call_operand.vmem [shape: f32[128,128], index: 1, kind: input, shape index: {}]   ;;  %s609_s2 = inlined_call_operand.vmem [shape: f32[1,128], index: 2, kind: input, shape index: {}]   ;;  %s610_s3 = inlined_call_operand.vmem [shape: f32[128,128], index: 3, kind: output, shape index: {}]  }
   0x1 LB: > { %s382_s13 = sadd.s32 4294967295, %s508_s12   ;;  %p386_p0 = scmp.ge.s32.totalorder %s508_s12, 1  ;;  %s508_s12 = sphi %s530_s12, %s13_s12  }
   0x2   : > { %p138_p1 = scmp.lt.s32.totalorder %s508_s12, 3 }
   0x4   : > { %p139_p2 = pnand %p386_p0, %p138_p1 }
   0x5   : > { %s387_s30 = sshll.u32 (!%p139_p2), %s382_s13, 3 }
   0x6   : > { %142 = sbr.rel (%p139_p2) target bundleno = 249 (0xf9), region = 32  ;;  %p163_p3 = scmp.lt.s32.totalorder (!%p139_p2), %s387_s30, 15 }
   0xb   : > { %v197_v0 = vld [vmem:[%s608_s1 + $0x78] sm:$0xff]  ;;  %v196_v1 = vld [vmem:[%s608_s1 + $0x70] sm:$0xff]  ;;  %v195_v2 = vld [vmem:[%s608_s1 + $0x68] sm:$0xff]  ;;  %s612_s30 = smov (!%p163_p3, %s387_s30), 15 }
   0xc   : > { %418 = vmatprep.subr.mxu0 %v197_v0  ;;  %462 = vmatprep.subr.mxu1 %v197_v0  ;;  %v194_v3 = vld [vmem:[%s608_s1 + $0x60] sm:$0xff]  ;;  %v193_v4 = vld [vmem:[%s608_s1 + $0x58] sm:$0xff]  ;;  %v192_v5 = vld [vmem:[%s608_s1 + $0x50] sm:$0xff]  ;;  %s388_s17 = sshll.u32 %s612_s30, 3 }
   0xd   : > { %419 = vmatpush3.msra.mxu0 %v197_v0  ;;  %478 = vmatpush3.msra.mxu1 %v197_v0  ;;  %v191_v6 = vld [vmem:[%s608_s1 + $0x48] sm:$0xff]  ;;  %v190_v7 = vld [vmem:[%s608_s1 + $0x40] sm:$0xff]  ;;  %v189_v8 = vld [vmem:[%s608_s1 + $0x38] sm:$0xff]  ;;  %s166_s22 = scalar_lea.vmem %s607_s0, %s388_s17  ;;  %s172_s29 = scalar_lea.vmem %s610_s3, %s388_s17 }
   0xe   : > { %420 = vmatprep.subr.mxu0 %v196_v1  ;;  %463 = vmatprep.subr.mxu1 %v196_v1  ;;  %v188_v9 = vld [vmem:[%s608_s1 + $0x30] sm:$0xff]  ;;  %v187_v10 = vld [vmem:[%s608_s1 + $0x28] sm:$0xff]  ;;  %v186_v11 = vld [vmem:[%s608_s1 + $0x20] sm:$0xff] }
   0xf   : > { %421 = vmatpush3.msra.mxu0 %v196_v1  ;;  %479 = vmatpush3.msra.mxu1 %v196_v1  ;;  %v185_v12 = vld [vmem:[%s608_s1 + $0x18] sm:$0xff]  ;;  %v184_v13 = vld [vmem:[%s608_s1 + $0x10] sm:$0xff]  ;;  %v183_v14 = vld [vmem:[%s608_s1 + $0x8] sm:$0xff] }
  0x10   : > { %422 = vmatprep.subr.mxu0 %v195_v2  ;;  %464 = vmatprep.subr.mxu1 %v195_v2  ;;  %v182_v15 = vld [vmem:[%s608_s1] sm:$0xff]  ;;  %v175_v18 = vld [vmem:[%s166_s22 + $0x8] sm:$0xff]  ;;  %v176_v20 = vld [vmem:[%s166_s22 + $0x10] sm:$0xff] }
  0x11   : > { %423 = vmatpush3.msra.mxu0 %v195_v2  ;;  %480 = vmatpush3.msra.mxu1 %v195_v2  ;;  %v174_v16 = vld [vmem:[%s166_s22] sm:$0xff]  ;;  %v179_v19 = vld [vmem:[%s166_s22 + $0x28] sm:$0xff]  ;;  %v180_v21 = vld [vmem:[%s166_s22 + $0x30] sm:$0xff] }
  0x12   : > { %424 = vmatprep.subr.mxu0 %v194_v3  ;;  %465 = vmatprep.subr.mxu1 %v194_v3  ;;  %v178_v17 = vld [vmem:[%s166_s22 + $0x20] sm:$0xff]  ;;  %v177_v22 = vld [vmem:[%s166_s22 + $0x18] sm:$0xff] }
  0x13   : > { %425 = vmatpush3.msra.mxu0 %v194_v3  ;;  %481 = vmatpush3.msra.mxu1 %v194_v3  ;;  %v181_v23 = vld [vmem:[%s166_s22 + $0x38] sm:$0xff]  ;;  %v391_v24 = vld [vmem:[%s609_s2] ss:$0 sm:$0xff] }
  0x14   : > { %426 = vmatprep.subr.mxu0 %v193_v4  ;;  %466 = vmatprep.subr.mxu1 %v193_v4 }
  0x15   : > { %427 = vmatpush3.msra.mxu0 %v193_v4  ;;  %482 = vmatpush3.msra.mxu1 %v193_v4 }
  0x16   : > { %428 = vmatprep.subr.mxu0 %v192_v5  ;;  %467 = vmatprep.subr.mxu1 %v192_v5 }
  0x17   : > { %429 = vmatpush3.msra.mxu0 %v192_v5  ;;  %483 = vmatpush3.msra.mxu1 %v192_v5 }
  0x18   : > { %430 = vmatprep.subr.mxu0 %v191_v6  ;;  %468 = vmatprep.subr.mxu1 %v191_v6 }
  0x19   : > { %431 = vmatpush3.msra.mxu0 %v191_v6  ;;  %484 = vmatpush3.msra.mxu1 %v191_v6 }
  0x1a   : > { %432 = vmatprep.subr.mxu0 %v190_v7  ;;  %469 = vmatprep.subr.mxu1 %v190_v7 }
  0x1b   : > { %433 = vmatpush3.msra.mxu0 %v190_v7  ;;  %485 = vmatpush3.msra.mxu1 %v190_v7 }
  0x1c   : > { %434 = vmatprep.subr.mxu0 %v189_v8  ;;  %470 = vmatprep.subr.mxu1 %v189_v8 }
  0x1d   : > { %435 = vmatpush3.msra.mxu0 %v189_v8  ;;  %486 = vmatpush3.msra.mxu1 %v189_v8 }
  0x1e   : > { %436 = vmatprep.subr.mxu0 %v188_v9  ;;  %471 = vmatprep.subr.mxu1 %v188_v9 }
  0x1f   : > { %437 = vmatpush3.msra.mxu0 %v188_v9  ;;  %487 = vmatpush3.msra.mxu1 %v188_v9 }
  0x20   : > { %438 = vmatprep.subr.mxu0 %v187_v10  ;;  %472 = vmatprep.subr.mxu1 %v187_v10 }
  0x21   : > { %439 = vmatpush3.msra.mxu0 %v187_v10  ;;  %488 = vmatpush3.msra.mxu1 %v187_v10 }
  0x22   : > { %440 = vmatprep.subr.mxu0 %v186_v11  ;;  %473 = vmatprep.subr.mxu1 %v186_v11 }
  0x23   : > { %441 = vmatpush3.msra.mxu0 %v186_v11  ;;  %489 = vmatpush3.msra.mxu1 %v186_v11 }
  0x24   : > { %442 = vmatprep.subr.mxu0 %v185_v12  ;;  %474 = vmatprep.subr.mxu1 %v185_v12 }
  0x25   : > { %443 = vmatpush3.msra.mxu0 %v185_v12  ;;  %490 = vmatpush3.msra.mxu1 %v185_v12 }
  0x26   : > { %444 = vmatprep.subr.mxu0 %v184_v13  ;;  %475 = vmatprep.subr.mxu1 %v184_v13 }
  0x27   : > { %445 = vmatpush3.msra.mxu0 %v184_v13  ;;  %491 = vmatpush3.msra.mxu1 %v184_v13 }
  0x28   : > { %446 = vmatprep.subr.mxu0 %v183_v14  ;;  %476 = vmatprep.subr.mxu1 %v183_v14 }
  0x29   : > { %447 = vmatpush3.msra.mxu0 %v183_v14  ;;  %492 = vmatpush3.msra.mxu1 %v183_v14 }
  0x2a   : > { %448 = vmatprep.subr.mxu0 %v182_v15  ;;  %477 = vmatprep.subr.mxu1 %v182_v15 }
  0x2b   : > { %449 = vmatpush3.msra.mxu0 %v182_v15  ;;  %493 = vmatpush3.msra.mxu1 %v182_v15 }
  0x2c   : > { %450 = vmatprep.mubr.f32.mxu0 %v174_v16  ;;  %456 = vmatprep.mubr.f32.mxu1 %v178_v17 }
  0x2d   : > { %451 = vmatmul.mubr.f32.vlgmr.msra.gmra.mxu0 %v175_v18  ;;  %457 = vmatmul.mubr.f32.vlgmr.msra.gmra.mxu1 %v179_v19 }
  0x2e   : > { %453 = vmatprep.mubr.f32.mxu0 %v176_v20  ;;  %459 = vmatprep.mubr.f32.mxu1 %v180_v21 }
  0x31   : > { %454 = vmatmul.mubr.f32.gmra.mxu0 %v177_v22  ;;  %460 = vmatmul.mubr.f32.gmra.mxu1 %v181_v23 }
  0xed   : > { %v452_v25 = vpop.f32.mrf.mxu0  ;;  %v458_v26 = vpop.f32.mrf.mxu1 }
  0xee   : > { %v277_v27 = vadd.f32 %v452_v25, %v391_v24  ;;  %v297_v28 = vadd.f32 %v458_v26, %v391_v24 }
  0xef   : > { %v271_v29 = vpop.f32.mrf.mxu0  ;;  %v291_v30 = vpop.f32.mrf.mxu1 }
  0xf0   : > { %v311_v31 = vmax.f32 %v277_v27, 0.0  ;;  %v315_v32 = vmax.f32 %v297_v28, 0.0  ;;  %v272_v33 = vadd.f32 %v391_v24, %v271_v29  ;;  %v292_v34 = vadd.f32 %v391_v24, %v291_v30 }
  0xf1   : > { %v455_v35 = vpop.f32.mrf.mxu0  ;;  %v461_v36 = vpop.f32.mrf.mxu1 }
  0xf2   : > { %319 = vst [vmem:[%s172_s29 + $0x8] sm:$0xff] %v311_v31  ;;  %323 = vst [vmem:[%s172_s29 + $0x28] sm:$0xff] %v315_v32  ;;  %v310_v37 = vmax.f32 %v272_v33, 0.0  ;;  %v314_v38 = vmax.f32 %v292_v34, 0.0  ;;  %v287_v39 = vadd.f32 %v455_v35, %v391_v24  ;;  %v307_v40 = vadd.f32 %v461_v36, %v391_v24 }
  0xf3   : > { %v281_v41 = vpop.f32.mrf.mxu0  ;;  %v301_v42 = vpop.f32.mrf.mxu1 }
  0xf4   : > { %318 = vst [vmem:[%s172_s29] sm:$0xff] %v310_v37  ;;  %322 = vst [vmem:[%s172_s29 + $0x20] sm:$0xff] %v314_v38  ;;  %v313_v43 = vmax.f32 %v287_v39, 0.0  ;;  %v317_v44 = vmax.f32 %v307_v40, 0.0  ;;  %v282_v45 = vadd.f32 %v391_v24, %v281_v41  ;;  %v302_v46 = vadd.f32 %v391_v24, %v301_v42 }
  0xf6   : > { %321 = vst [vmem:[%s172_s29 + $0x18] sm:$0xff] %v313_v43  ;;  %325 = vst [vmem:[%s172_s29 + $0x38] sm:$0xff] %v317_v44  ;;  %v312_v47 = vmax.f32 %v282_v45, 0.0  ;;  %v316_v48 = vmax.f32 %v302_v46, 0.0 }
  0xf8   : > { %320 = vst [vmem:[%s172_s29 + $0x10] sm:$0xff] %v312_v47  ;;  %324 = vst [vmem:[%s172_s29 + $0x30] sm:$0xff] %v316_v48 }
  0xf9 PF: > { %s13_s12 = sadd.s32 1, %s508_s12  }
  0xfa   : > { %p10_p4 = scmp.ge.s32.totalorder %s13_s12, 4  }
  0xfc   :  { %12 = sbr.rel (!%p10_p4) target bundleno = 1 (0x1), region = 62 }

// kernel: visual_encoder_forward.16
= control target key start
LH: loop header
LB: loop body
LE: loop exit
PB: predicated region body
PF: predicated region fallthrough
CT: control target
= control target key end

     0   :  { %s2192_s12 = smov 0   ;;  %s4676_s0 = inlined_call_operand.vmem [shape: f32[32,3200], index: 0, kind: input, shape index: {}]   ;;  %s4677_s1 = inlined_call_operand.vmem [shape: f32[3200,256], index: 1, kind: input, shape index: {}]   ;;  %s4678_s2 = inlined_call_operand.vmem [shape: f32[1,256], index: 2, kind: input, shape index: {}]   ;;  %s4679_s3 = inlined_call_operand.vmem [shape: f32[32,256], index: 3, kind: output, shape index: {}]  }
   0x1 LB: > { %s2108_s13 = sadd.s32 4294967295, %s2169_s12   ;;  %p2112_p0 = scmp.ge.s32.totalorder %s2169_s12, 1  ;;  %s2169_s12 = sphi %s2192_s12, %s13_s12  }
   0x2   : > { %p139_p1 = scmp.lt.s32.totalorder %s2169_s12, 3 }
   0x4   : > { %p140_p2 = pnand %p2112_p0, %p139_p1 }
   0x5   : > { %s2478_s23 = sshll.u32 (!%p140_p2), %s2108_s13, 1 }
   0x6   : > { %143 = sbr.rel (%p140_p2) target bundleno = 654 (0x28e), region = 32  ;;  %p166_p3 = scmp.lt.s32.totalorder (!%p140_p2), %s2478_s23, 3 }
   0xb   : > { %v260_v0 = vld [vmem:[%s4677_s1 + $0xf8] sm:$0xff]  ;;  %v259_v2 = vld [vmem:[%s4677_s1 + $0xf0] sm:$0xff]  ;;  %v258_v4 = vld [vmem:[%s4677_s1 + $0xe8] sm:$0xff]  ;;  %s4681_s23 = smov (!%p166_p3, %s2478_s23), 3 }
   0xc   : > { %v324_v1 = vld [vmem:[%s4677_s1 + $0x2f8] sm:$0xff]  ;;  %1041 = vmatprep.subr.mxu0 %v260_v0  ;;  %v323_v3 = vld [vmem:[%s4677_s1 + $0x2f0] sm:$0xff]  ;;  %v322_v5 = vld [vmem:[%s4677_s1 + $0x2e8] sm:$0xff]  ;;  %s2153_s17 = smul.u32 200, %s4681_s23  ;;  %s2120_s26 = sshll.u32 %s4681_s23, 4 }
   0xd   : > { %1118 = vmatprep.subr.mxu1 %v324_v1  ;;  %1042 = vmatpush1.msra.mxu0 %v259_v2  ;;  %v257_v6 = vld [vmem:[%s4677_s1 + $0xe0] sm:$0xff]  ;;  %v256_v8 = vld [vmem:[%s4677_s1 + $0xd8] sm:$0xff]  ;;  %v255_v10 = vld [vmem:[%s4677_s1 + $0xd0] sm:$0xff]  ;;  %s177_s29 = scalar_lea.vmem %s4679_s3, %s2120_s26 }
   0xe   : > { %1119 = vmatpush1.msra.mxu1 %v323_v3  ;;  %v321_v7 = vld [vmem:[%s4677_s1 + $0x2e0] sm:$0xff]  ;;  %1043 = vmatprep.subr.mxu0 %v258_v4  ;;  %v320_v9 = vld [vmem:[%s4677_s1 + $0x2d8] sm:$0xff]  ;;  %v319_v11 = vld [vmem:[%s4677_s1 + $0x2d0] sm:$0xff]  ;;  %s2580_s9 = scalar_lea.vmem %s4676_s0, %s2153_s17 }
   0xf   : > { %1120 = vmatprep.subr.mxu1 %v322_v5  ;;  %1044 = vmatpush1.msra.mxu0 %v257_v6  ;;  %v254_v12 = vld [vmem:[%s4677_s1 + $0xc8] sm:$0xff]  ;;  %v253_v14 = vld [vmem:[%s4677_s1 + $0xc0] sm:$0xff]  ;;  %v252_v16 = vld [vmem:[%s4677_s1 + $0xb8] sm:$0xff] }
  0x10   : > { %1121 = vmatpush1.msra.mxu1 %v321_v7  ;;  %v318_v13 = vld [vmem:[%s4677_s1 + $0x2c8] sm:$0xff]  ;;  %1045 = vmatprep.subr.mxu0 %v256_v8  ;;  %v317_v15 = vld [vmem:[%s4677_s1 + $0x2c0] sm:$0xff]  ;;  %v316_v17 = vld [vmem:[%s4677_s1 + $0x2b8] sm:$0xff] }
  0x11   : > { %1122 = vmatprep.subr.mxu1 %v320_v9  ;;  %1046 = vmatpush1.msra.mxu0 %v255_v10  ;;  %v251_v18 = vld [vmem:[%s4677_s1 + $0xb0] sm:$0xff]  ;;  %v250_v20 = vld [vmem:[%s4677_s1 + $0xa8] sm:$0xff]  ;;  %v249_v22 = vld [vmem:[%s4677_s1 + $0xa0] sm:$0xff] }
  0x12   : > { %1123 = vmatpush1.msra.mxu1 %v319_v11  ;;  %1047 = vmatprep.subr.mxu0 %v254_v12  ;;  %v315_v19 = vld [vmem:[%s4677_s1 + $0x2b0] sm:$0xff]  ;;  %v314_v21 = vld [vmem:[%s4677_s1 + $0x2a8] sm:$0xff]  ;;  %v313_v23 = vld [vmem:[%s4677_s1 + $0x2a0] sm:$0xff] }
  0x13   : > { %1124 = vmatprep.subr.mxu1 %v318_v13  ;;  %1048 = vmatpush1.msra.mxu0 %v253_v14  ;;  %v248_v24 = vld [vmem:[%s4677_s1 + $0x98] sm:$0xff]  ;;  %v247_v26 = vld [vmem:[%s4677_s1 + $0x90] sm:$0xff]  ;;  %v246_v28 = vld [vmem:[%s4677_s1 + $0x88] sm:$0xff] }
  0x14   : > { %1125 = vmatpush1.msra.mxu1 %v317_v15  ;;  %1049 = vmatprep.subr.mxu0 %v252_v16  ;;  %v312_v25 = vld [vmem:[%s4677_s1 + $0x298] sm:$0xff]  ;;  %v311_v27 = vld [vmem:[%s4677_s1 + $0x290] sm:$0xff]  ;;  %v310_v29 = vld [vmem:[%s4677_s1 + $0x288] sm:$0xff] }
  0x15   : > { %1126 = vmatprep.subr.mxu1 %v316_v17  ;;  %1050 = vmatpush1.msra.mxu0 %v251_v18  ;;  %v245_v30 = vld [vmem:[%s4677_s1 + $0x80] sm:$0xff]  ;;  %v244_v32 = vld [vmem:[%s4677_s1 + $0x78] sm:$0xff]  ;;  %v243_v34 = vld [vmem:[%s4677_s1 + $0x70] sm:$0xff] }
  0x16   : > { %1127 = vmatpush1.msra.mxu1 %v315_v19  ;;  %1051 = vmatprep.subr.mxu0 %v250_v20  ;;  %v309_v31 = vld [vmem:[%s4677_s1 + $0x280] sm:$0xff]  ;;  %v308_v33 = vld [vmem:[%s4677_s1 + $0x278] sm:$0xff]  ;;  %v307_v35 = vld [vmem:[%s4677_s1 + $0x270] sm:$0xff] }
  0x17   : > { %1128 = vmatprep.subr.mxu1 %v314_v21  ;;  %1052 = vmatpush1.msra.mxu0 %v249_v22  ;;  %v242_v36 = vld [vmem:[%s4677_s1 + $0x68] sm:$0xff]  ;;  %v241_v38 = vld [vmem:[%s4677_s1 + $0x60] sm:$0xff]  ;;  %v240_v40 = vld [vmem:[%s4677_s1 + $0x58] sm:$0xff] }
  0x18   : > { %1129 = vmatpush1.msra.mxu1 %v313_v23  ;;  %1053 = vmatprep.subr.mxu0 %v248_v24  ;;  %v306_v37 = vld [vmem:[%s4677_s1 + $0x268] sm:$0xff]  ;;  %v305_v39 = vld [vmem:[%s4677_s1 + $0x260] sm:$0xff]  ;;  %v304_v41 = vld [vmem:[%s4677_s1 + $0x258] sm:$0xff] }
  0x19   : > { %1130 = vmatprep.subr.mxu1 %v312_v25  ;;  %1054 = vmatpush1.msra.mxu0 %v247_v26  ;;  %v239_v42 = vld [vmem:[%s4677_s1 + $0x50] sm:$0xff]  ;;  %v238_v44 = vld [vmem:[%s4677_s1 + $0x48] sm:$0xff]  ;;  %v237_v46 = vld [vmem:[%s4677_s1 + $0x40] sm:$0xff] }
  0x1a   : > { %1131 = vmatpush1.msra.mxu1 %v311_v27  ;;  %1055 = vmatprep.subr.mxu0 %v246_v28  ;;  %v303_v43 = vld [vmem:[%s4677_s1 + $0x250] sm:$0xff]  ;;  %v302_v45 = vld [vmem:[%s4677_s1 + $0x248] sm:$0xff]  ;;  %v301_v47 = vld [vmem:[%s4677_s1 + $0x240] sm:$0xff] }
  0x1b   : > { %1132 = vmatprep.subr.mxu1 %v310_v29  ;;  %1056 = vmatpush1.msra.mxu0 %v245_v30  ;;  %v236_v48 = vld [vmem:[%s4677_s1 + $0x38] sm:$0xff]  ;;  %v235_v50 = vld [vmem:[%s4677_s1 + $0x30] sm:$0xff]  ;;  %v234_v52 = vld [vmem:[%s4677_s1 + $0x28] sm:$0xff] }
  0x1c   : > { %1133 = vmatpush1.msra.mxu1 %v309_v31  ;;  %1057 = vmatprep.subr.mxu0 %v244_v32  ;;  %v300_v49 = vld [vmem:[%s4677_s1 + $0x238] sm:$0xff]  ;;  %v299_v51 = vld [vmem:[%s4677_s1 + $0x230] sm:$0xff]  ;;  %v298_v53 = vld [vmem:[%s4677_s1 + $0x228] sm:$0xff] }
  0x1d   : > { %1134 = vmatprep.subr.mxu1 %v308_v33  ;;  %1058 = vmatpush1.msra.mxu0 %v243_v34  ;;  %v233_v54 = vld [vmem:[%s4677_s1 + $0x20] sm:$0xff]  ;;  %v232_v56 = vld [vmem:[%s4677_s1 + $0x18] sm:$0xff]  ;;  %v231_v58 = vld [vmem:[%s4677_s1 + $0x10] sm:$0xff] }
  0x1e   : > { %1135 = vmatpush1.msra.mxu1 %v307_v35  ;;  %1059 = vmatprep.subr.mxu0 %v242_v36  ;;  %v297_v55 = vld [vmem:[%s4677_s1 + $0x220] sm:$0xff]  ;;  %v296_v57 = vld [vmem:[%s4677_s1 + $0x218] sm:$0xff]  ;;  %v295_v59 = vld [vmem:[%s4677_s1 + $0x210] sm:$0xff] }
  0x1f   : > { %1136 = vmatprep.subr.mxu1 %v306_v37  ;;  %1060 = vmatpush1.msra.mxu0 %v241_v38  ;;  %v230_v60 = vld [vmem:[%s4677_s1 + $0x8] sm:$0xff]  ;;  %v229_v62 = vld [vmem:[%s4677_s1] sm:$0xff]  ;;  %v292_v0 = vld [vmem:[%s4677_s1 + $0x1f8] sm:$0xff] }
  0x20   : > { %1137 = vmatpush1.msra.mxu1 %v305_v39  ;;  %1061 = vmatprep.subr.mxu0 %v240_v40  ;;  %v294_v61 = vld [vmem:[%s4677_s1 + $0x208] sm:$0xff]  ;;  %v293_v63 = vld [vmem:[%s4677_s1 + $0x200] sm:$0xff]  ;;  %v356_v1 = vld [vmem:[%s4677_s1 + $0x3f8] sm:$0xff] }
  0x21   : > { %1138 = vmatprep.subr.mxu1 %v304_v41  ;;  %1062 = vmatpush1.msra.mxu0 %v239_v42  ;;  %v291_v2 = vld [vmem:[%s4677_s1 + $0x1f0] sm:$0xff]  ;;  %v290_v4 = vld [vmem:[%s4677_s1 + $0x1e8] sm:$0xff]  ;;  %v289_v6 = vld [vmem:[%s4677_s1 + $0x1e0] sm:$0xff] }
  0x22   : > { %1139 = vmatpush1.msra.mxu1 %v303_v43  ;;  %1063 = vmatprep.subr.mxu0 %v238_v44  ;;  %v355_v3 = vld [vmem:[%s4677_s1 + $0x3f0] sm:$0xff]  ;;  %v354_v5 = vld [vmem:[%s4677_s1 + $0x3e8] sm:$0xff]  ;;  %v353_v7 = vld [vmem:[%s4677_s1 + $0x3e0] sm:$0xff] }
  0x23   : > { %1140 = vmatprep.subr.mxu1 %v302_v45  ;;  %1064 = vmatpush1.msra.mxu0 %v237_v46  ;;  %v288_v8 = vld [vmem:[%s4677_s1 + $0x1d8] sm:$0xff]  ;;  %v287_v10 = vld [vmem:[%s4677_s1 + $0x1d0] sm:$0xff]  ;;  %v286_v12 = vld [vmem:[%s4677_s1 + $0x1c8] sm:$0xff] }
  0x24   : > { %1141 = vmatpush1.msra.mxu1 %v301_v47  ;;  %1065 = vmatprep.subr.mxu0 %v236_v48  ;;  %v352_v9 = vld [vmem:[%s4677_s1 + $0x3d8] sm:$0xff]  ;;  %v351_v11 = vld [vmem:[%s4677_s1 + $0x3d0] sm:$0xff]  ;;  %v350_v13 = vld [vmem:[%s4677_s1 + $0x3c8] sm:$0xff] }
  0x25   : > { %1142 = vmatprep.subr.mxu1 %v300_v49  ;;  %1066 = vmatpush1.msra.mxu0 %v235_v50  ;;  %v285_v14 = vld [vmem:[%s4677_s1 + $0x1c0] sm:$0xff]  ;;  %v284_v16 = vld [vmem:[%s4677_s1 + $0x1b8] sm:$0xff]  ;;  %v283_v18 = vld [vmem:[%s4677_s1 + $0x1b0] sm:$0xff] }
  0x26   : > { %1143 = vmatpush1.msra.mxu1 %v299_v51  ;;  %1067 = vmatprep.subr.mxu0 %v234_v52  ;;  %v349_v15 = vld [vmem:[%s4677_s1 + $0x3c0] sm:$0xff]  ;;  %v348_v17 = vld [vmem:[%s4677_s1 + $0x3b8] sm:$0xff]  ;;  %v347_v19 = vld [vmem:[%s4677_s1 + $0x3b0] sm:$0xff] }
  0x27   : > { %1144 = vmatprep.subr.mxu1 %v298_v53  ;;  %1068 = vmatpush1.msra.mxu0 %v233_v54  ;;  %v282_v20 = vld [vmem:[%s4677_s1 + $0x1a8] sm:$0xff]  ;;  %v281_v22 = vld [vmem:[%s4677_s1 + $0x1a0] sm:$0xff]  ;;  %v280_v24 = vld [vmem:[%s4677_s1 + $0x198] sm:$0xff] }
  0x28   : > { %1145 = vmatpush1.msra.mxu1 %v297_v55  ;;  %1069 = vmatprep.subr.mxu0 %v232_v56  ;;  %v346_v21 = vld [vmem:[%s4677_s1 + $0x3a8] sm:$0xff]  ;;  %v345_v23 = vld [vmem:[%s4677_s1 + $0x3a0] sm:$0xff]  ;;  %v344_v25 = vld [vmem:[%s4677_s1 + $0x398] sm:$0xff] }
  0x29   : > { %1146 = vmatprep.subr.mxu1 %v296_v57  ;;  %1070 = vmatpush1.msra.mxu0 %v231_v58  ;;  %v279_v26 = vld [vmem:[%s4677_s1 + $0x190] sm:$0xff]  ;;  %v278_v28 = vld [vmem:[%s4677_s1 + $0x188] sm:$0xff]  ;;  %v277_v30 = vld [vmem:[%s4677_s1 + $0x180] sm:$0xff] }
  0x2a   : > { %1147 = vmatpush1.msra.mxu1 %v295_v59  ;;  %1071 = vmatprep.subr.mxu0 %v230_v60  ;;  %v343_v27 = vld [vmem:[%s4677_s1 + $0x390] sm:$0xff]  ;;  %v342_v29 = vld [vmem:[%s4677_s1 + $0x388] sm:$0xff]  ;;  %v341_v31 = vld [vmem:[%s4677_s1 + $0x380] sm:$0xff] }
  0x2b   : > { %1148 = vmatprep.subr.mxu1 %v294_v61  ;;  %1072 = vmatpush1.msra.mxu0 %v229_v62  ;;  %v276_v32 = vld [vmem:[%s4677_s1 + $0x178] sm:$0xff]  ;;  %v275_v34 = vld [vmem:[%s4677_s1 + $0x170] sm:$0xff]  ;;  %v274_v36 = vld [vmem:[%s4677_s1 + $0x168] sm:$0xff] }
  0x2c   : > { %1149 = vmatpush1.msra.mxu1 %v293_v63  ;;  %1073 = vmatprep.subr.mxu0 %v292_v0  ;;  %v340_v33 = vld [vmem:[%s4677_s1 + $0x378] sm:$0xff]  ;;  %v339_v35 = vld [vmem:[%s4677_s1 + $0x370] sm:$0xff]  ;;  %v338_v37 = vld [vmem:[%s4677_s1 + $0x368] sm:$0xff] }
  0x2d   : > { %1150 = vmatprep.subr.mxu1 %v356_v1  ;;  %1074 = vmatpush2.msra.mxu0 %v291_v2  ;;  %v273_v38 = vld [vmem:[%s4677_s1 + $0x160] sm:$0xff]  ;;  %v272_v40 = vld [vmem:[%s4677_s1 + $0x158] sm:$0xff]  ;;  %v271_v42 = vld [vmem:[%s4677_s1 + $0x150] sm:$0xff] }
  0x2e   : > { %1151 = vmatpush2.msra.mxu1 %v355_v3  ;;  %1075 = vmatprep.subr.mxu0 %v290_v4  ;;  %v337_v39 = vld [vmem:[%s4677_s1 + $0x360] sm:$0xff]  ;;  %v336_v41 = vld [vmem:[%s4677_s1 + $0x358] sm:$0xff]  ;;  %v335_v43 = vld [vmem:[%s4677_s1 + $0x350] sm:$0xff] }
  0x2f   : > { %1152 = vmatprep.subr.mxu1 %v354_v5  ;;  %1076 = vmatpush2.msra.mxu0 %v289_v6  ;;  %v270_v44 = vld [vmem:[%s4677_s1 + $0x148] sm:$0xff]  ;;  %v269_v46 = vld [vmem:[%s4677_s1 + $0x140] sm:$0xff]  ;;  %v268_v48 = vld [vmem:[%s4677_s1 + $0x138] sm:$0xff] }
  0x30   : > { %1153 = vmatpush2.msra.mxu1 %v353_v7  ;;  %1077 = vmatprep.subr.mxu0 %v288_v8  ;;  %v334_v45 = vld [vmem:[%s4677_s1 + $0x348] sm:$0xff]  ;;  %v333_v47 = vld [vmem:[%s4677_s1 + $0x340] sm:$0xff]  ;;  %v332_v49 = vld [vmem:[%s4677_s1 + $0x338] sm:$0xff] }
  0x31   : > { %1154 = vmatprep.subr.mxu1 %v352_v9  ;;  %1078 = vmatpush2.msra.mxu0 %v287_v10  ;;  %v267_v50 = vld [vmem:[%s4677_s1 + $0x130] sm:$0xff]  ;;  %v266_v52 = vld [vmem:[%s4677_s1 + $0x128] sm:$0xff]  ;;  %v265_v54 = vld [vmem:[%s4677_s1 + $0x120] sm:$0xff] }
  0x32   : > { %1155 = vmatpush2.msra.mxu1 %v351_v11  ;;  %1079 = vmatprep.subr.mxu0 %v286_v12  ;;  %v331_v51 = vld [vmem:[%s4677_s1 + $0x330] sm:$0xff]  ;;  %v330_v53 = vld [vmem:[%s4677_s1 + $0x328] sm:$0xff]  ;;  %v329_v55 = vld [vmem:[%s4677_s1 + $0x320] sm:$0xff] }
  0x33   : > { %1156 = vmatprep.subr.mxu1 %v350_v13  ;;  %1080 = vmatpush2.msra.mxu0 %v285_v14  ;;  %v264_v56 = vld [vmem:[%s4677_s1 + $0x118] sm:$0xff]  ;;  %v263_v58 = vld [vmem:[%s4677_s1 + $0x110] sm:$0xff]  ;;  %v262_v60 = vld [vmem:[%s4677_s1 + $0x108] sm:$0xff] }
  0x34   : > { %1157 = vmatpush2.msra.mxu1 %v349_v15  ;;  %1081 = vmatprep.subr.mxu0 %v284_v16  ;;  %v328_v57 = vld [vmem:[%s4677_s1 + $0x318] sm:$0xff]  ;;  %v327_v59 = vld [vmem:[%s4677_s1 + $0x310] sm:$0xff]  ;;  %v326_v61 = vld [vmem:[%s4677_s1 + $0x308] sm:$0xff] }
  0x35   : > { %1158 = vmatprep.subr.mxu1 %v348_v17  ;;  %1082 = vmatpush2.msra.mxu0 %v283_v18  ;;  %v261_v62 = vld [vmem:[%s4677_s1 + $0x100] sm:$0xff]  ;;  %v180_v63 = vld [vmem:[%s2580_s9 + $0x8] sm:$0xff]  ;;  %v182_v1 = vld [vmem:[%s2580_s9 + $0x18] sm:$0xff] }
  0x36   : > { %1159 = vmatpush2.msra.mxu1 %v347_v19  ;;  %1083 = vmatprep.subr.mxu0 %v282_v20  ;;  %v325_v0 = vld [vmem:[%s4677_s1 + $0x300] sm:$0xff]  ;;  %v181_v3 = vld [vmem:[%s2580_s9 + $0x10] sm:$0xff]  ;;  %v388_v4 = vld [vmem:[%s4677_s1 + $0x4f8] sm:$0xff] }
  0x37   : > { %1160 = vmatprep.subr.mxu1 %v346_v21  ;;  %1084 = vmatpush2.msra.mxu0 %v281_v22  ;;  %v179_v2 = vld [vmem:[%s2580_s9] sm:$0xff]  ;;  %v452_v5 = vld [vmem:[%s4677_s1 + $0x6f8] sm:$0xff]  ;;  %v387_v6 = vld [vmem:[%s4677_s1 + $0x4f0] sm:$0xff] }
  0x38   : > { %1161 = vmatpush2.msra.mxu1 %v345_v23  ;;  %1085 = vmatprep.subr.mxu0 %v280_v24  ;;  %v451_v7 = vld [vmem:[%s4677_s1 + $0x6f0] sm:$0xff]  ;;  %v386_v8 = vld [vmem:[%s4677_s1 + $0x4e8] sm:$0xff]  ;;  %v385_v10 = vld [vmem:[%s4677_s1 + $0x4e0] sm:$0xff] }
  0x39   : > { %1162 = vmatprep.subr.mxu1 %v344_v25  ;;  %1086 = vmatpush2.msra.mxu0 %v279_v26  ;;  %v450_v9 = vld [vmem:[%s4677_s1 + $0x6e8] sm:$0xff]  ;;  %v449_v11 = vld [vmem:[%s4677_s1 + $0x6e0] sm:$0xff]  ;;  %v384_v12 = vld [vmem:[%s4677_s1 + $0x4d8] sm:$0xff] }
  0x3a   : > { %1163 = vmatpush2.msra.mxu1 %v343_v27  ;;  %1087 = vmatprep.subr.mxu0 %v278_v28  ;;  %v448_v13 = vld [vmem:[%s4677_s1 + $0x6d8] sm:$0xff]  ;;  %v383_v14 = vld [vmem:[%s4677_s1 + $0x4d0] sm:$0xff]  ;;  %v382_v16 = vld [vmem:[%s4677_s1 + $0x4c8] sm:$0xff] }
  0x3b   : > { %1164 = vmatprep.subr.mxu1 %v342_v29  ;;  %1088 = vmatpush2.msra.mxu0 %v277_v30  ;;  %v447_v15 = vld [vmem:[%s4677_s1 + $0x6d0] sm:$0xff]  ;;  %v446_v17 = vld [vmem:[%s4677_s1 + $0x6c8] sm:$0xff]  ;;  %v381_v18 = vld [vmem:[%s4677_s1 + $0x4c0] sm:$0xff] }
  0x3c   : > { %1165 = vmatpush2.msra.mxu1 %v341_v31  ;;  %1089 = vmatprep.subr.mxu0 %v276_v32  ;;  %v445_v19 = vld [vmem:[%s4677_s1 + $0x6c0] sm:$0xff]  ;;  %v380_v20 = vld [vmem:[%s4677_s1 + $0x4b8] sm:$0xff]  ;;  %v379_v22 = vld [vmem:[%s4677_s1 + $0x4b0] sm:$0xff] }
  0x3d   : > { %1166 = vmatprep.subr.mxu1 %v340_v33  ;;  %1090 = vmatpush2.msra.mxu0 %v275_v34  ;;  %v444_v21 = vld [vmem:[%s4677_s1 + $0x6b8] sm:$0xff]  ;;  %v443_v23 = vld [vmem:[%s4677_s1 + $0x6b0] sm:$0xff]  ;;  %v378_v24 = vld [vmem:[%s4677_s1 + $0x4a8] sm:$0xff] }
  0x3e   : > { %1167 = vmatpush2.msra.mxu1 %v339_v35  ;;  %1091 = vmatprep.subr.mxu0 %v274_v36  ;;  %v442_v25 = vld [vmem:[%s4677_s1 + $0x6a8] sm:$0xff]  ;;  %v377_v26 = vld [vmem:[%s4677_s1 + $0x4a0] sm:$0xff]  ;;  %v376_v28 = vld [vmem:[%s4677_s1 + $0x498] sm:$0xff] }
  0x3f   : > { %1168 = vmatprep.subr.mxu1 %v338_v37  ;;  %1092 = vmatpush2.msra.mxu0 %v273_v38  ;;  %v441_v27 = vld [vmem:[%s4677_s1 + $0x6a0] sm:$0xff]  ;;  %v440_v29 = vld [vmem:[%s4677_s1 + $0x698] sm:$0xff]  ;;  %v375_v30 = vld [vmem:[%s4677_s1 + $0x490] sm:$0xff] }
  0x40   : > { %1169 = vmatpush2.msra.mxu1 %v337_v39  ;;  %1093 = vmatprep.subr.mxu0 %v272_v40  ;;  %v439_v31 = vld [vmem:[%s4677_s1 + $0x690] sm:$0xff]  ;;  %v374_v32 = vld [vmem:[%s4677_s1 + $0x488] sm:$0xff]  ;;  %v373_v34 = vld [vmem:[%s4677_s1 + $0x480] sm:$0xff] }
  0x41   : > { %1170 = vmatprep.subr.mxu1 %v336_v41  ;;  %1094 = vmatpush2.msra.mxu0 %v271_v42  ;;  %v438_v33 = vld [vmem:[%s4677_s1 + $0x688] sm:$0xff]  ;;  %v437_v35 = vld [vmem:[%s4677_s1 + $0x680] sm:$0xff]  ;;  %v372_v36 = vld [vmem:[%s4677_s1 + $0x478] sm:$0xff] }
  0x42   : > { %1171 = vmatpush2.msra.mxu1 %v335_v43  ;;  %1095 = vmatprep.subr.mxu0 %v270_v44  ;;  %v436_v37 = vld [vmem:[%s4677_s1 + $0x678] sm:$0xff]  ;;  %v371_v38 = vld [vmem:[%s4677_s1 + $0x470] sm:$0xff]  ;;  %v370_v40 = vld [vmem:[%s4677_s1 + $0x468] sm:$0xff] }
  0x43   : > { %1172 = vmatprep.subr.mxu1 %v334_v45  ;;  %1096 = vmatpush2.msra.mxu0 %v269_v46  ;;  %v435_v39 = vld [vmem:[%s4677_s1 + $0x670] sm:$0xff]  ;;  %v434_v41 = vld [vmem:[%s4677_s1 + $0x668] sm:$0xff]  ;;  %v369_v42 = vld [vmem:[%s4677_s1 + $0x460] sm:$0xff] }
  0x44   : > { %1173 = vmatpush2.msra.mxu1 %v333_v47  ;;  %1097 = vmatprep.subr.mxu0 %v268_v48  ;;  %v433_v43 = vld [vmem:[%s4677_s1 + $0x660] sm:$0xff]  ;;  %v368_v44 = vld [vmem:[%s4677_s1 + $0x458] sm:$0xff]  ;;  %v367_v46 = vld [vmem:[%s4677_s1 + $0x450] sm:$0xff] }
  0x45   : > { %1174 = vmatprep.subr.mxu1 %v332_v49  ;;  %1098 = vmatpush2.msra.mxu0 %v267_v50  ;;  %v432_v45 = vld [vmem:[%s4677_s1 + $0x658] sm:$0xff]  ;;  %v431_v47 = vld [vmem:[%s4677_s1 + $0x650] sm:$0xff]  ;;  %v366_v48 = vld [vmem:[%s4677_s1 + $0x448] sm:$0xff] }
  0x46   : > { %1175 = vmatpush2.msra.mxu1 %v331_v51  ;;  %1099 = vmatprep.subr.mxu0 %v266_v52  ;;  %v430_v49 = vld [vmem:[%s4677_s1 + $0x648] sm:$0xff]  ;;  %v365_v50 = vld [vmem:[%s4677_s1 + $0x440] sm:$0xff]  ;;  %v364_v52 = vld [vmem:[%s4677_s1 + $0x438] sm:$0xff] }
  0x47   : > { %1176 = vmatprep.subr.mxu1 %v330_v53  ;;  %1100 = vmatpush2.msra.mxu0 %v265_v54  ;;  %v429_v51 = vld [vmem:[%s4677_s1 + $0x640] sm:$0xff]  ;;  %v428_v53 = vld [vmem:[%s4677_s1 + $0x638] sm:$0xff]  ;;  %v363_v54 = vld [vmem:[%s4677_s1 + $0x430] sm:$0xff] }
  0x48   : > { %1177 = vmatpush2.msra.mxu1 %v329_v55  ;;  %1101 = vmatprep.subr.mxu0 %v264_v56  ;;  %v427_v55 = vld [vmem:[%s4677_s1 + $0x630] sm:$0xff]  ;;  %v362_v56 = vld [vmem:[%s4677_s1 + $0x428] sm:$0xff] }
  0x49   : > { %1178 = vmatprep.subr.mxu1 %v328_v57  ;;  %1102 = vmatpush2.msra.mxu0 %v263_v58  ;;  %v426_v57 = vld [vmem:[%s4677_s1 + $0x628] sm:$0xff]  ;;  %v361_v58 = vld [vmem:[%s4677_s1 + $0x420] sm:$0xff] }
  0x4a   : > { %1179 = vmatpush2.msra.mxu1 %v327_v59  ;;  %1103 = vmatprep.subr.mxu0 %v262_v60  ;;  %v425_v59 = vld [vmem:[%s4677_s1 + $0x620] sm:$0xff]  ;;  %v360_v60 = vld [vmem:[%s4677_s1 + $0x418] sm:$0xff] }
  0x4b   : > { %1180 = vmatprep.subr.mxu1 %v326_v61  ;;  %1104 = vmatpush2.msra.mxu0 %v261_v62  ;;  %v424_v61 = vld [vmem:[%s4677_s1 + $0x618] sm:$0xff]  ;;  %v359_v62 = vld [vmem:[%s4677_s1 + $0x410] sm:$0xff] }
  0x4c   : > { %1105 = vmatprep.mubr.f32.mxu0 %v180_v63  ;;  %1181 = vmatpush2.msra.mxu1 %v325_v0  ;;  %v423_v63 = vld [vmem:[%s4677_s1 + $0x610] sm:$0xff]  ;;  %v358_v0 = vld [vmem:[%s4677_s1 + $0x408] sm:$0xff] }
  0x4d   : > { %1182 = vmatprep.mubr.f32.mxu1 %v182_v1  ;;  %1106 = vmatmul.mubr.f32.vlgmr.msra.gmra.mxu0 %v179_v2  ;;  %v422_v1 = vld [vmem:[%s4677_s1 + $0x608] sm:$0xff]  ;;  %v357_v2 = vld [vmem:[%s4677_s1 + $0x400] sm:$0xff] }
  0x4e   : > { %1183 = vmatmul.mubr.f32.vlgmr.msra.gmra.mxu1 %v181_v3  ;;  %1195 = vmatprep.subr.mxu0 %v388_v4  ;;  %v421_v3 = vld [vmem:[%s4677_s1 + $0x600] sm:$0xff]  ;;  %v420_v4 = vld [vmem:[%s4677_s1 + $0x5f8] sm:$0xff] }
  0x4f   : > { %1272 = vmatprep.subr.mxu1 %v452_v5  ;;  %1196 = vmatpush1.msra.mxu0 %v387_v6  ;;  %v484_v5 = vld [vmem:[%s4677_s1 + $0x7f8] sm:$0xff]  ;;  %v419_v6 = vld [vmem:[%s4677_s1 + $0x5f0] sm:$0xff] }
  0x50   : > { %1273 = vmatpush1.msra.mxu1 %v451_v7  ;;  %1197 = vmatprep.subr.mxu0 %v386_v8  ;;  %v483_v7 = vld [vmem:[%s4677_s1 + $0x7f0] sm:$0xff]  ;;  %v418_v8 = vld [vmem:[%s4677_s1 + $0x5e8] sm:$0xff] }
  0x51   : > { %1274 = vmatprep.subr.mxu1 %v450_v9  ;;  %1198 = vmatpush1.msra.mxu0 %v385_v10  ;;  %v482_v9 = vld [vmem:[%s4677_s1 + $0x7e8] sm:$0xff]  ;;  %v417_v10 = vld [vmem:[%s4677_s1 + $0x5e0] sm:$0xff] }
  0x52   : > { %1275 = vmatpush1.msra.mxu1 %v449_v11  ;;  %1199 = vmatprep.subr.mxu0 %v384_v12  ;;  %v481_v11 = vld [vmem:[%s4677_s1 + $0x7e0] sm:$0xff]  ;;  %v416_v12 = vld [vmem:[%s4677_s1 + $0x5d8] sm:$0xff] }
  0x53   : > { %1276 = vmatprep.subr.mxu1 %v448_v13  ;;  %1200 = vmatpush1.msra.mxu0 %v383_v14  ;;  %v480_v13 = vld [vmem:[%s4677_s1 + $0x7d8] sm:$0xff]  ;;  %v415_v14 = vld [vmem:[%s4677_s1 + $0x5d0] sm:$0xff] }
  0x54   : > { %1277 = vmatpush1.msra.mxu1 %v447_v15  ;;  %1201 = vmatprep.subr.mxu0 %v382_v16  ;;  %v479_v15 = vld [vmem:[%s4677_s1 + $0x7d0] sm:$0xff]  ;;  %v414_v16 = vld [vmem:[%s4677_s1 + $0x5c8] sm:$0xff] }
  0x55   : > { %1278 = vmatprep.subr.mxu1 %v446_v17  ;;  %1202 = vmatpush1.msra.mxu0 %v381_v18  ;;  %v478_v17 = vld [vmem:[%s4677_s1 + $0x7c8] sm:$0xff]  ;;  %v413_v18 = vld [vmem:[%s4677_s1 + $0x5c0] sm:$0xff] }
  0x56   : > { %1279 = vmatpush1.msra.mxu1 %v445_v19  ;;  %1203 = vmatprep.subr.mxu0 %v380_v20  ;;  %v477_v19 = vld [vmem:[%s4677_s1 + $0x7c0] sm:$0xff]  ;;  %v412_v20 = vld [vmem:[%s4677_s1 + $0x5b8] sm:$0xff] }
  0x57   : > { %1280 = vmatprep.subr.mxu1 %v444_v21  ;;  %1204 = vmatpush1.msra.mxu0 %v379_v22  ;;  %v476_v21 = vld [vmem:[%s4677_s1 + $0x7b8] sm:$0xff]  ;;  %v411_v22 = vld [vmem:[%s4677_s1 + $0x5b0] sm:$0xff] }
  0x58   : > { %1281 = vmatpush1.msra.mxu1 %v443_v23  ;;  %1205 = vmatprep.subr.mxu0 %v378_v24  ;;  %v475_v23 = vld [vmem:[%s4677_s1 + $0x7b0] sm:$0xff]  ;;  %v410_v24 = vld [vmem:[%s4677_s1 + $0x5a8] sm:$0xff] }
  0x59   : > { %1282 = vmatprep.subr.mxu1 %v442_v25  ;;  %1206 = vmatpush1.msra.mxu0 %v377_v26  ;;  %v474_v25 = vld [vmem:[%s4677_s1 + $0x7a8] sm:$0xff]  ;;  %v409_v26 = vld [vmem:[%s4677_s1 + $0x5a0] sm:$0xff] }
  0x5a   : > { %1283 = vmatpush1.msra.mxu1 %v441_v27  ;;  %1207 = vmatprep.subr.mxu0 %v376_v28  ;;  %v473_v27 = vld [vmem:[%s4677_s1 + $0x7a0] sm:$0xff]  ;;  %v408_v28 = vld [vmem:[%s4677_s1 + $0x598] sm:$0xff] }
  0x5b   : > { %1284 = vmatprep.subr.mxu1 %v440_v29  ;;  %1208 = vmatpush1.msra.mxu0 %v375_v30  ;;  %v472_v29 = vld [vmem:[%s4677_s1 + $0x798] sm:$0xff]  ;;  %v407_v30 = vld [vmem:[%s4677_s1 + $0x590] sm:$0xff] }
  0x5c   : > { %1285 = vmatpush1.msra.mxu1 %v439_v31  ;;  %1209 = vmatprep.subr.mxu0 %v374_v32  ;;  %v471_v31 = vld [vmem:[%s4677_s1 + $0x790] sm:$0xff]  ;;  %v406_v32 = vld [vmem:[%s4677_s1 + $0x588] sm:$0xff] }
  0x5d   : > { %1286 = vmatprep.subr.mxu1 %v438_v33  ;;  %1210 = vmatpush1.msra.mxu0 %v373_v34  ;;  %v470_v33 = vld [vmem:[%s4677_s1 + $0x788] sm:$0xff]  ;;  %v405_v34 = vld [vmem:[%s4677_s1 + $0x580] sm:$0xff] }
  0x5e   : > { %1287 = vmatpush1.msra.mxu1 %v437_v35  ;;  %1211 = vmatprep.subr.mxu0 %v372_v36  ;;  %v469_v35 = vld [vmem:[%s4677_s1 + $0x780] sm:$0xff]  ;;  %v404_v36 = vld [vmem:[%s4677_s1 + $0x578] sm:$0xff] }
  0x5f   : > { %1288 = vmatprep.subr.mxu1 %v436_v37  ;;  %1212 = vmatpush1.msra.mxu0 %v371_v38  ;;  %v468_v37 = vld [vmem:[%s4677_s1 + $0x778] sm:$0xff]  ;;  %v403_v38 = vld [vmem:[%s4677_s1 + $0x570] sm:$0xff] }
  0x60   : > { %1289 = vmatpush1.msra.mxu1 %v435_v39  ;;  %1213 = vmatprep.subr.mxu0 %v370_v40  ;;  %v467_v39 = vld [vmem:[%s4677_s1 + $0x770] sm:$0xff]  ;;  %v402_v40 = vld [vmem:[%s4677_s1 + $0x568] sm:$0xff] }
  0x61   : > { %1290 = vmatprep.subr.mxu1 %v434_v41  ;;  %1214 = vmatpush1.msra.mxu0 %v369_v42  ;;  %v466_v41 = vld [vmem:[%s4677_s1 + $0x768] sm:$0xff]  ;;  %v401_v42 = vld [vmem:[%s4677_s1 + $0x560] sm:$0xff] }
  0x62   : > { %1291 = vmatpush1.msra.mxu1 %v433_v43  ;;  %1215 = vmatprep.subr.mxu0 %v368_v44  ;;  %v465_v43 = vld [vmem:[%s4677_s1 + $0x760] sm:$0xff]  ;;  %v400_v44 = vld [vmem:[%s4677_s1 + $0x558] sm:$0xff] }
  0x63   : > { %1292 = vmatprep.subr.mxu1 %v432_v45  ;;  %1216 = vmatpush1.msra.mxu0 %v367_v46  ;;  %v464_v45 = vld [vmem:[%s4677_s1 + $0x758] sm:$0xff]  ;;  %v399_v46 = vld [vmem:[%s4677_s1 + $0x550] sm:$0xff] }
  0x64   : > { %1293 = vmatpush1.msra.mxu1 %v431_v47  ;;  %1217 = vmatprep.subr.mxu0 %v366_v48  ;;  %v463_v47 = vld [vmem:[%s4677_s1 + $0x750] sm:$0xff]  ;;  %v398_v48 = vld [vmem:[%s4677_s1 + $0x548] sm:$0xff] }
  0x65   : > { %1294 = vmatprep.subr.mxu1 %v430_v49  ;;  %1218 = vmatpush1.msra.mxu0 %v365_v50  ;;  %v462_v49 = vld [vmem:[%s4677_s1 + $0x748] sm:$0xff]  ;;  %v397_v50 = vld [vmem:[%s4677_s1 + $0x540] sm:$0xff] }
  0x66   : > { %1295 = vmatpush1.msra.mxu1 %v429_v51  ;;  %1219 = vmatprep.subr.mxu0 %v364_v52  ;;  %v461_v51 = vld [vmem:[%s4677_s1 + $0x740] sm:$0xff]  ;;  %v396_v52 = vld [vmem:[%s4677_s1 + $0x538] sm:$0xff] }
  0x67   : > { %1296 = vmatprep.subr.mxu1 %v428_v53  ;;  %1220 = vmatpush1.msra.mxu0 %v363_v54  ;;  %v460_v53 = vld [vmem:[%s4677_s1 + $0x738] sm:$0xff]  ;;  %v205_v54 = vld [vmem:[%s2580_s9 + $0xd0] sm:$0xff] }
  0x68   : > { %1297 = vmatpush1.msra.mxu1 %v427_v55  ;;  %1221 = vmatprep.subr.mxu0 %v362_v56  ;;  %v395_v55 = vld [vmem:[%s4677_s1 + $0x530] sm:$0xff] }
  0x69   : > { %1298 = vmatprep.subr.mxu1 %v426_v57  ;;  %1222 = vmatpush1.msra.mxu0 %v361_v58  ;;  %v459_v56 = vld [vmem:[%s4677_s1 + $0x730] sm:$0xff]  ;;  %v204_v57 = vld [vmem:[%s2580_s9 + $0xc8] sm:$0xff] }
  0x6a   : > { %1299 = vmatpush1.msra.mxu1 %v425_v59  ;;  %1223 = vmatprep.subr.mxu0 %v360_v60  ;;  %v394_v58 = vld [vmem:[%s4677_s1 + $0x528] sm:$0xff]  ;;  %v207_v60 = vld [vmem:[%s2580_s9 + $0xe0] sm:$0xff] }
  0x6b   : > { %1300 = vmatprep.subr.mxu1 %v424_v61  ;;  %1224 = vmatpush1.msra.mxu0 %v359_v62  ;;  %v458_v59 = vld [vmem:[%s4677_s1 + $0x728] sm:$0xff]  ;;  %v393_v61 = vld [vmem:[%s4677_s1 + $0x520] sm:$0xff] }
  0x6c   : > { %1301 = vmatpush1.msra.mxu1 %v423_v63  ;;  %1225 = vmatprep.subr.mxu0 %v358_v0  ;;  %v457_v62 = vld [vmem:[%s4677_s1 + $0x720] sm:$0xff]  ;;  %v392_v63 = vld [vmem:[%s4677_s1 + $0x518] sm:$0xff] }
  0x6d   : > { %1302 = vmatprep.subr.mxu1 %v422_v1  ;;  %1226 = vmatpush1.msra.mxu0 %v357_v2  ;;  %v206_v0 = vld [vmem:[%s2580_s9 + $0xd8] sm:$0xff]  ;;  %v391_v2 = vld [vmem:[%s4677_s1 + $0x510] sm:$0xff] }
  0x6e   : > { %1303 = vmatpush1.msra.mxu1 %v421_v3  ;;  %1227 = vmatprep.subr.mxu0 %v420_v4  ;;  %v456_v1 = vld [vmem:[%s4677_s1 + $0x718] sm:$0xff]  ;;  %v455_v3 = vld [vmem:[%s4677_s1 + $0x710] sm:$0xff]  ;;  %v390_v4 = vld [vmem:[%s4677_s1 + $0x508] sm:$0xff] }
  0x6f   : > { %1304 = vmatprep.subr.mxu1 %v484_v5  ;;  %1228 = vmatpush2.msra.mxu0 %v419_v6  ;;  %v454_v5 = vld [vmem:[%s4677_s1 + $0x708] sm:$0xff]  ;;  %v389_v6 = vld [vmem:[%s4677_s1 + $0x500] sm:$0xff] }
  0x70   : > { %1305 = vmatpush2.msra.mxu1 %v483_v7  ;;  %1229 = vmatprep.subr.mxu0 %v418_v8  ;;  %v184_v7 = vld [vmem:[%s2580_s9 + $0x28] sm:$0xff]  ;;  %v453_v8 = vld [vmem:[%s4677_s1 + $0x700] sm:$0xff] }
  0x71   : > { %1306 = vmatprep.subr.mxu1 %v482_v9  ;;  %1230 = vmatpush2.msra.mxu0 %v417_v10  ;;  %v186_v9 = vld [vmem:[%s2580_s9 + $0x38] sm:$0xff]  ;;  %v183_v10 = vld [vmem:[%s2580_s9 + $0x20] sm:$0xff] }
  0x72   : > { %1307 = vmatpush2.msra.mxu1 %v481_v11  ;;  %1231 = vmatprep.subr.mxu0 %v416_v12  ;;  %v185_v11 = vld [vmem:[%s2580_s9 + $0x30] sm:$0xff]  ;;  %v516_v12 = vld [vmem:[%s4677_s1 + $0x8f8] sm:$0xff] }
  0x73   : > { %1308 = vmatprep.subr.mxu1 %v480_v13  ;;  %1232 = vmatpush2.msra.mxu0 %v415_v14  ;;  %v580_v13 = vld [vmem:[%s4677_s1 + $0xaf8] sm:$0xff]  ;;  %v515_v14 = vld [vmem:[%s4677_s1 + $0x8f0] sm:$0xff] }
  0x74   : > { %1309 = vmatpush2.msra.mxu1 %v479_v15  ;;  %1233 = vmatprep.subr.mxu0 %v414_v16  ;;  %v579_v15 = vld [vmem:[%s4677_s1 + $0xaf0] sm:$0xff]  ;;  %v514_v16 = vld [vmem:[%s4677_s1 + $0x8e8] sm:$0xff] }
  0x75   : > { %1310 = vmatprep.subr.mxu1 %v478_v17  ;;  %1234 = vmatpush2.msra.mxu0 %v413_v18  ;;  %v578_v17 = vld [vmem:[%s4677_s1 + $0xae8] sm:$0xff]  ;;  %v209_v18 = vld [vmem:[%s2580_s9 + $0xf0] sm:$0xff] }
  0x76   : > { %1311 = vmatpush2.msra.mxu1 %v477_v19  ;;  %1235 = vmatprep.subr.mxu0 %v412_v20  ;;  %v513_v19 = vld [vmem:[%s4677_s1 + $0x8e0] sm:$0xff] }
  0x77   : > { %1312 = vmatprep.subr.mxu1 %v476_v21  ;;  %1236 = vmatpush2.msra.mxu0 %v411_v22  ;;  %v577_v20 = vld [vmem:[%s4677_s1 + $0xae0] sm:$0xff]  ;;  %v208_v21 = vld [vmem:[%s2580_s9 + $0xe8] sm:$0xff]  ;;  %v512_v22 = vld [vmem:[%s4677_s1 + $0x8d8] sm:$0xff] }
  0x78   : > { %1313 = vmatpush2.msra.mxu1 %v475_v23  ;;  %1237 = vmatprep.subr.mxu0 %v410_v24  ;;  %v576_v23 = vld [vmem:[%s4677_s1 + $0xad8] sm:$0xff]  ;;  %v211_v24 = vld [vmem:[%s2580_s9 + $0x100] sm:$0xff] }
  0x79   : > { %1314 = vmatprep.subr.mxu1 %v474_v25  ;;  %1238 = vmatpush2.msra.mxu0 %v409_v26  ;;  %v511_v25 = vld [vmem:[%s4677_s1 + $0x8d0] sm:$0xff] }
  0x7a   : > { %1315 = vmatpush2.msra.mxu1 %v473_v27  ;;  %1239 = vmatprep.subr.mxu0 %v408_v28  ;;  %v575_v26 = vld [vmem:[%s4677_s1 + $0xad0] sm:$0xff]  ;;  %v510_v27 = vld [vmem:[%s4677_s1 + $0x8c8] sm:$0xff]  ;;  %v210_v28 = vld [vmem:[%s2580_s9 + $0xf8] sm:$0xff] }
  0x7b   : > { %1316 = vmatprep.subr.mxu1 %v472_v29  ;;  %1240 = vmatpush2.msra.mxu0 %v407_v30  ;;  %v574_v29 = vld [vmem:[%s4677_s1 + $0xac8] sm:$0xff]  ;;  %v509_v30 = vld [vmem:[%s4677_s1 + $0x8c0] sm:$0xff] }
  0x7c   : > { %1317 = vmatpush2.msra.mxu1 %v471_v31  ;;  %1241 = vmatprep.subr.mxu0 %v406_v32  ;;  %v573_v31 = vld [vmem:[%s4677_s1 + $0xac0] sm:$0xff]  ;;  %v508_v32 = vld [vmem:[%s4677_s1 + $0x8b8] sm:$0xff] }
  0x7d   : > { %1318 = vmatprep.subr.mxu1 %v470_v33  ;;  %1242 = vmatpush2.msra.mxu0 %v405_v34  ;;  %v572_v33 = vld [vmem:[%s4677_s1 + $0xab8] sm:$0xff]  ;;  %v507_v34 = vld [vmem:[%s4677_s1 + $0x8b0] sm:$0xff] }
  0x7e   : > { %1319 = vmatpush2.msra.mxu1 %v469_v35  ;;  %1243 = vmatprep.subr.mxu0 %v404_v36  ;;  %v571_v35 = vld [vmem:[%s4677_s1 + $0xab0] sm:$0xff]  ;;  %v506_v36 = vld [vmem:[%s4677_s1 + $0x8a8] sm:$0xff] }
  0x7f   : > { %1320 = vmatprep.subr.mxu1 %v468_v37  ;;  %1244 = vmatpush2.msra.mxu0 %v403_v38  ;;  %v570_v37 = vld [vmem:[%s4677_s1 + $0xaa8] sm:$0xff]  ;;  %v505_v38 = vld [vmem:[%s4677_s1 + $0x8a0] sm:$0xff] }
  0x80   : > { %1321 = vmatpush2.msra.mxu1 %v467_v39  ;;  %1245 = vmatprep.subr.mxu0 %v402_v40  ;;  %v569_v39 = vld [vmem:[%s4677_s1 + $0xaa0] sm:$0xff]  ;;  %v504_v40 = vld [vmem:[%s4677_s1 + $0x898] sm:$0xff] }
  0x81   : > { %1322 = vmatprep.subr.mxu1 %v466_v41  ;;  %1246 = vmatpush2.msra.mxu0 %v401_v42  ;;  %v568_v41 = vld [vmem:[%s4677_s1 + $0xa98] sm:$0xff]  ;;  %v503_v42 = vld [vmem:[%s4677_s1 + $0x890] sm:$0xff] }
  0x82   : > { %1323 = vmatpush2.msra.mxu1 %v465_v43  ;;  %1247 = vmatprep.subr.mxu0 %v400_v44  ;;  %v567_v43 = vld [vmem:[%s4677_s1 + $0xa90] sm:$0xff]  ;;  %v502_v44 = vld [vmem:[%s4677_s1 + $0x888] sm:$0xff] }
  0x83   : > { %1324 = vmatprep.subr.mxu1 %v464_v45  ;;  %1248 = vmatpush2.msra.mxu0 %v399_v46  ;;  %v566_v45 = vld [vmem:[%s4677_s1 + $0xa88] sm:$0xff]  ;;  %v501_v46 = vld [vmem:[%s4677_s1 + $0x880] sm:$0xff] }
  0x84   : > { %1325 = vmatpush2.msra.mxu1 %v463_v47  ;;  %1249 = vmatprep.subr.mxu0 %v398_v48  ;;  %v565_v47 = vld [vmem:[%s4677_s1 + $0xa80] sm:$0xff]  ;;  %v500_v48 = vld [vmem:[%s4677_s1 + $0x878] sm:$0xff] }
  0x85   : > { %1326 = vmatprep.subr.mxu1 %v462_v49  ;;  %1250 = vmatpush2.msra.mxu0 %v397_v50  ;;  %v564_v49 = vld [vmem:[%s4677_s1 + $0xa78] sm:$0xff]  ;;  %v499_v50 = vld [vmem:[%s4677_s1 + $0x870] sm:$0xff] }
  0x86   : > { %1327 = vmatpush2.msra.mxu1 %v461_v51  ;;  %1251 = vmatprep.subr.mxu0 %v396_v52  ;;  %v563_v51 = vld [vmem:[%s4677_s1 + $0xa70] sm:$0xff]  ;;  %v498_v52 = vld [vmem:[%s4677_s1 + $0x868] sm:$0xff] }
  0x87   : > { %1328 = vmatprep.subr.mxu1 %v460_v53  ;;  %1111 = vmatprep.mubr.f32.mxu0 %v205_v54  ;;  %v562_v53 = vld [vmem:[%s4677_s1 + $0xa68] sm:$0xff]  ;;  %v497_v54 = vld [vmem:[%s4677_s1 + $0x860] sm:$0xff] }
  0x88   : > { %1252 = vmatpush2.msra.mxu0 %v395_v55  ;;  %1329 = vmatpush2.msra.mxu1 %v459_v56  ;;  %v561_v55 = vld [vmem:[%s4677_s1 + $0xa60] sm:$0xff]  ;;  %v496_v56 = vld [vmem:[%s4677_s1 + $0x858] sm:$0xff] }
  0x89   : > { %1112 = vmatmul.mubr.f32.gmra.mxu0 %v204_v57  ;;  %1253 = vmatprep.subr.mxu0 %v394_v58  ;;  %v560_v57 = vld [vmem:[%s4677_s1 + $0xa58] sm:$0xff]  ;;  %v495_v58 = vld [vmem:[%s4677_s1 + $0x850] sm:$0xff] }
  0x8a   : > { %1330 = vmatprep.subr.mxu1 %v458_v59  ;;  %1188 = vmatprep.mubr.f32.mxu1 %v207_v60  ;;  %v559_v59 = vld [vmem:[%s4677_s1 + $0xa50] sm:$0xff]  ;;  %v494_v60 = vld [vmem:[%s4677_s1 + $0x848] sm:$0xff] }
  0x8b   : > { %1254 = vmatpush2.msra.mxu0 %v393_v61  ;;  %1331 = vmatpush2.msra.mxu1 %v457_v62  ;;  %v558_v61 = vld [vmem:[%s4677_s1 + $0xa48] sm:$0xff]  ;;  %v493_v62 = vld [vmem:[%s4677_s1 + $0x840] sm:$0xff] }
  0x8c   : > { %1255 = vmatprep.subr.mxu0 %v392_v63  ;;  %1189 = vmatmul.mubr.f32.gmra.mxu1 %v206_v0  ;;  %v557_v63 = vld [vmem:[%s4677_s1 + $0xa40] sm:$0xff]  ;;  %v492_v0 = vld [vmem:[%s4677_s1 + $0x838] sm:$0xff] }
  0x8d   : > { %1332 = vmatprep.subr.mxu1 %v456_v1  ;;  %1256 = vmatpush2.msra.mxu0 %v391_v2  ;;  %v556_v1 = vld [vmem:[%s4677_s1 + $0xa38] sm:$0xff]  ;;  %v491_v2 = vld [vmem:[%s4677_s1 + $0x830] sm:$0xff] }
  0x8e   : > { %1333 = vmatpush2.msra.mxu1 %v455_v3  ;;  %1257 = vmatprep.subr.mxu0 %v390_v4  ;;  %v555_v3 = vld [vmem:[%s4677_s1 + $0xa30] sm:$0xff]  ;;  %v490_v4 = vld [vmem:[%s4677_s1 + $0x828] sm:$0xff] }
  0x8f   : > { %1334 = vmatprep.subr.mxu1 %v454_v5  ;;  %1258 = vmatpush2.msra.mxu0 %v389_v6  ;;  %v554_v5 = vld [vmem:[%s4677_s1 + $0xa28] sm:$0xff]  ;;  %v489_v6 = vld [vmem:[%s4677_s1 + $0x820] sm:$0xff] }
  0x90   : > { %1259 = vmatprep.mubr.f32.mxu0 %v184_v7  ;;  %1335 = vmatpush2.msra.mxu1 %v453_v8  ;;  %v553_v7 = vld [vmem:[%s4677_s1 + $0xa20] sm:$0xff]  ;;  %v488_v8 = vld [vmem:[%s4677_s1 + $0x818] sm:$0xff] }
  0x91   : > { %1336 = vmatprep.mubr.f32.mxu1 %v186_v9  ;;  %1260 = vmatmul.mubr.f32.vlgmr.msra.gmra.mxu0 %v183_v10  ;;  %v552_v9 = vld [vmem:[%s4677_s1 + $0xa18] sm:$0xff]  ;;  %v487_v10 = vld [vmem:[%s4677_s1 + $0x810] sm:$0xff] }
  0x92   : > { %1337 = vmatmul.mubr.f32.vlgmr.msra.gmra.mxu1 %v185_v11  ;;  %1349 = vmatprep.subr.mxu0 %v516_v12  ;;  %v551_v11 = vld [vmem:[%s4677_s1 + $0xa10] sm:$0xff]  ;;  %v486_v12 = vld [vmem:[%s4677_s1 + $0x808] sm:$0xff] }
  0x93   : > { %1426 = vmatprep.subr.mxu1 %v580_v13  ;;  %1350 = vmatpush1.msra.mxu0 %v515_v14  ;;  %v550_v13 = vld [vmem:[%s4677_s1 + $0xa08] sm:$0xff]  ;;  %v485_v14 = vld [vmem:[%s4677_s1 + $0x800] sm:$0xff] }
  0x94   : > { %1427 = vmatpush1.msra.mxu1 %v579_v15  ;;  %1351 = vmatprep.subr.mxu0 %v514_v16  ;;  %v549_v15 = vld [vmem:[%s4677_s1 + $0xa00] sm:$0xff]  ;;  %v548_v16 = vld [vmem:[%s4677_s1 + $0x9f8] sm:$0xff] }
  0x95   : > { %1428 = vmatprep.subr.mxu1 %v578_v17  ;;  %1265 = vmatprep.mubr.f32.mxu0 %v209_v18  ;;  %v612_v17 = vld [vmem:[%s4677_s1 + $0xbf8] sm:$0xff]  ;;  %v547_v18 = vld [vmem:[%s4677_s1 + $0x9f0] sm:$0xff] }
  0x96   : > { %1352 = vmatpush1.msra.mxu0 %v513_v19  ;;  %1429 = vmatpush1.msra.mxu1 %v577_v20  ;;  %v611_v19 = vld [vmem:[%s4677_s1 + $0xbf0] sm:$0xff]  ;;  %v546_v20 = vld [vmem:[%s4677_s1 + $0x9e8] sm:$0xff] }
  0x97   : > { %1266 = vmatmul.mubr.f32.gmra.mxu0 %v208_v21  ;;  %1353 = vmatprep.subr.mxu0 %v512_v22  ;;  %v610_v21 = vld [vmem:[%s4677_s1 + $0xbe8] sm:$0xff]  ;;  %v545_v22 = vld [vmem:[%s4677_s1 + $0x9e0] sm:$0xff] }
  0x98   : > { %1430 = vmatprep.subr.mxu1 %v576_v23  ;;  %1342 = vmatprep.mubr.f32.mxu1 %v211_v24  ;;  %v609_v23 = vld [vmem:[%s4677_s1 + $0xbe0] sm:$0xff]  ;;  %v544_v24 = vld [vmem:[%s4677_s1 + $0x9d8] sm:$0xff] }
  0x99   : > { %1354 = vmatpush1.msra.mxu0 %v511_v25  ;;  %1431 = vmatpush1.msra.mxu1 %v575_v26  ;;  %v608_v25 = vld [vmem:[%s4677_s1 + $0xbd8] sm:$0xff]  ;;  %v543_v26 = vld [vmem:[%s4677_s1 + $0x9d0] sm:$0xff] }
  0x9a   : > { %1355 = vmatprep.subr.mxu0 %v510_v27  ;;  %1343 = vmatmul.mubr.f32.gmra.mxu1 %v210_v28  ;;  %v607_v27 = vld [vmem:[%s4677_s1 + $0xbd0] sm:$0xff]  ;;  %v542_v28 = vld [vmem:[%s4677_s1 + $0x9c8] sm:$0xff] }
  0x9b   : > { %1432 = vmatprep.subr.mxu1 %v574_v29  ;;  %1356 = vmatpush1.msra.mxu0 %v509_v30  ;;  %v606_v29 = vld [vmem:[%s4677_s1 + $0xbc8] sm:$0xff]  ;;  %v541_v30 = vld [vmem:[%s4677_s1 + $0x9c0] sm:$0xff] }
  0x9c   : > { %1433 = vmatpush1.msra.mxu1 %v573_v31  ;;  %1357 = vmatprep.subr.mxu0 %v508_v32  ;;  %v605_v31 = vld [vmem:[%s4677_s1 + $0xbc0] sm:$0xff]  ;;  %v540_v32 = vld [vmem:[%s4677_s1 + $0x9b8] sm:$0xff] }
  0x9d   : > { %1434 = vmatprep.subr.mxu1 %v572_v33  ;;  %1358 = vmatpush1.msra.mxu0 %v507_v34  ;;  %v604_v33 = vld [vmem:[%s4677_s1 + $0xbb8] sm:$0xff]  ;;  %v539_v34 = vld [vmem:[%s4677_s1 + $0x9b0] sm:$0xff] }
  0x9e   : > { %1435 = vmatpush1.msra.mxu1 %v571_v35  ;;  %1359 = vmatprep.subr.mxu0 %v506_v36  ;;  %v603_v35 = vld [vmem:[%s4677_s1 + $0xbb0] sm:$0xff]  ;;  %v538_v36 = vld [vmem:[%s4677_s1 + $0x9a8] sm:$0xff] }
  0x9f   : > { %1436 = vmatprep.subr.mxu1 %v570_v37  ;;  %1360 = vmatpush1.msra.mxu0 %v505_v38  ;;  %v602_v37 = vld [vmem:[%s4677_s1 + $0xba8] sm:$0xff]  ;;  %v537_v38 = vld [vmem:[%s4677_s1 + $0x9a0] sm:$0xff] }
  0xa0   : > { %1437 = vmatpush1.msra.mxu1 %v569_v39  ;;  %1361 = vmatprep.subr.mxu0 %v504_v40  ;;  %v601_v39 = vld [vmem:[%s4677_s1 + $0xba0] sm:$0xff]  ;;  %v536_v40 = vld [vmem:[%s4677_s1 + $0x998] sm:$0xff] }
  0xa1   : > { %1438 = vmatprep.subr.mxu1 %v568_v41  ;;  %1362 = vmatpush1.msra.mxu0 %v503_v42  ;;  %v600_v41 = vld [vmem:[%s4677_s1 + $0xb98] sm:$0xff]  ;;  %v535_v42 = vld [vmem:[%s4677_s1 + $0x990] sm:$0xff] }
  0xa2   : > { %1439 = vmatpush1.msra.mxu1 %v567_v43  ;;  %1363 = vmatprep.subr.mxu0 %v502_v44  ;;  %v599_v43 = vld [vmem:[%s4677_s1 + $0xb90] sm:$0xff]  ;;  %v534_v44 = vld [vmem:[%s4677_s1 + $0x988] sm:$0xff] }
  0xa3   : > { %1440 = vmatprep.subr.mxu1 %v566_v45  ;;  %1364 = vmatpush1.msra.mxu0 %v501_v46  ;;  %v598_v45 = vld [vmem:[%s4677_s1 + $0xb88] sm:$0xff]  ;;  %v533_v46 = vld [vmem:[%s4677_s1 + $0x980] sm:$0xff] }
  0xa4   : > { %1441 = vmatpush1.msra.mxu1 %v565_v47  ;;  %1365 = vmatprep.subr.mxu0 %v500_v48  ;;  %v597_v47 = vld [vmem:[%s4677_s1 + $0xb80] sm:$0xff]  ;;  %v532_v48 = vld [vmem:[%s4677_s1 + $0x978] sm:$0xff] }
  0xa5   : > { %1442 = vmatprep.subr.mxu1 %v564_v49  ;;  %1366 = vmatpush1.msra.mxu0 %v499_v50  ;;  %v596_v49 = vld [vmem:[%s4677_s1 + $0xb78] sm:$0xff]  ;;  %v531_v50 = vld [vmem:[%s4677_s1 + $0x970] sm:$0xff] }
  0xa6   : > { %1443 = vmatpush1.msra.mxu1 %v563_v51  ;;  %1367 = vmatprep.subr.mxu0 %v498_v52  ;;  %v595_v51 = vld [vmem:[%s4677_s1 + $0xb70] sm:$0xff]  ;;  %v530_v52 = vld [vmem:[%s4677_s1 + $0x968] sm:$0xff] }
  0xa7   : > { %1444 = vmatprep.subr.mxu1 %v562_v53  ;;  %1368 = vmatpush1.msra.mxu0 %v497_v54  ;;  %v594_v53 = vld [vmem:[%s4677_s1 + $0xb68] sm:$0xff]  ;;  %v529_v54 = vld [vmem:[%s4677_s1 + $0x960] sm:$0xff] }
  0xa8   : > { %1445 = vmatpush1.msra.mxu1 %v561_v55  ;;  %1369 = vmatprep.subr.mxu0 %v496_v56  ;;  %v593_v55 = vld [vmem:[%s4677_s1 + $0xb60] sm:$0xff]  ;;  %v528_v56 = vld [vmem:[%s4677_s1 + $0x958] sm:$0xff] }
  0xa9   : > { %1446 = vmatprep.subr.mxu1 %v560_v57  ;;  %1370 = vmatpush1.msra.mxu0 %v495_v58  ;;  %v592_v57 = vld [vmem:[%s4677_s1 + $0xb58] sm:$0xff]  ;;  %v527_v58 = vld [vmem:[%s4677_s1 + $0x950] sm:$0xff] }
  0xaa   : > { %1447 = vmatpush1.msra.mxu1 %v559_v59  ;;  %1371 = vmatprep.subr.mxu0 %v494_v60  ;;  %v591_v59 = vld [vmem:[%s4677_s1 + $0xb50] sm:$0xff]  ;;  %v526_v60 = vld [vmem:[%s4677_s1 + $0x948] sm:$0xff] }
  0xab   : > { %1448 = vmatprep.subr.mxu1 %v558_v61  ;;  %1372 = vmatpush1.msra.mxu0 %v493_v62  ;;  %v590_v61 = vld [vmem:[%s4677_s1 + $0xb48] sm:$0xff]  ;;  %v525_v62 = vld [vmem:[%s4677_s1 + $0x940] sm:$0xff] }
  0xac   : > { %1449 = vmatpush1.msra.mxu1 %v557_v63  ;;  %1373 = vmatprep.subr.mxu0 %v492_v0  ;;  %v589_v63 = vld [vmem:[%s4677_s1 + $0xb40] sm:$0xff]  ;;  %v524_v0 = vld [vmem:[%s4677_s1 + $0x938] sm:$0xff] }
  0xad   : > { %1450 = vmatprep.subr.mxu1 %v556_v1  ;;  %1374 = vmatpush1.msra.mxu0 %v491_v2  ;;  %v588_v1 = vld [vmem:[%s4677_s1 + $0xb38] sm:$0xff]  ;;  %v523_v2 = vld [vmem:[%s4677_s1 + $0x930] sm:$0xff] }
  0xae   : > { %1451 = vmatpush1.msra.mxu1 %v555_v3  ;;  %1375 = vmatprep.subr.mxu0 %v490_v4  ;;  %v587_v3 = vld [vmem:[%s4677_s1 + $0xb30] sm:$0xff]  ;;  %v522_v4 = vld [vmem:[%s4677_s1 + $0x928] sm:$0xff] }
  0xaf   : > { %1452 = vmatprep.subr.mxu1 %v554_v5  ;;  %1376 = vmatpush1.msra.mxu0 %v489_v6  ;;  %v586_v5 = vld [vmem:[%s4677_s1 + $0xb28] sm:$0xff]  ;;  %v521_v6 = vld [vmem:[%s4677_s1 + $0x920] sm:$0xff] }
  0xb0   : > { %1453 = vmatpush1.msra.mxu1 %v553_v7  ;;  %1377 = vmatprep.subr.mxu0 %v488_v8  ;;  %v585_v7 = vld [vmem:[%s4677_s1 + $0xb20] sm:$0xff]  ;;  %v520_v8 = vld [vmem:[%s4677_s1 + $0x918] sm:$0xff] }
  0xb1   : > { %1454 = vmatprep.subr.mxu1 %v552_v9  ;;  %1378 = vmatpush1.msra.mxu0 %v487_v10  ;;  %v584_v9 = vld [vmem:[%s4677_s1 + $0xb18] sm:$0xff]  ;;  %v519_v10 = vld [vmem:[%s4677_s1 + $0x910] sm:$0xff] }
  0xb2   : > { %1455 = vmatpush1.msra.mxu1 %v551_v11  ;;  %1379 = vmatprep.subr.mxu0 %v486_v12  ;;  %v583_v11 = vld [vmem:[%s4677_s1 + $0xb10] sm:$0xff]  ;;  %v518_v12 = vld [vmem:[%s4677_s1 + $0x908] sm:$0xff] }
  0xb3   : > { %1456 = vmatprep.subr.mxu1 %v550_v13  ;;  %1380 = vmatpush1.msra.mxu0 %v485_v14  ;;  %v582_v13 = vld [vmem:[%s4677_s1 + $0xb08] sm:$0xff]  ;;  %v517_v14 = vld [vmem:[%s4677_s1 + $0x900] sm:$0xff] }
  0xb4   : > { %1457 = vmatpush1.msra.mxu1 %v549_v15  ;;  %1381 = vmatprep.subr.mxu0 %v548_v16  ;;  %v188_v15 = vld [vmem:[%s2580_s9 + $0x48] sm:$0xff]  ;;  %v581_v16 = vld [vmem:[%s4677_s1 + $0xb00] sm:$0xff] }
  0xb5   : > { %1458 = vmatprep.subr.mxu1 %v612_v17  ;;  %1382 = vmatpush2.msra.mxu0 %v547_v18  ;;  %v190_v17 = vld [vmem:[%s2580_s9 + $0x58] sm:$0xff]  ;;  %v187_v18 = vld [vmem:[%s2580_s9 + $0x40] sm:$0xff] }
  0xb6   : > { %1459 = vmatpush2.msra.mxu1 %v611_v19  ;;  %1383 = vmatprep.subr.mxu0 %v546_v20  ;;  %v189_v19 = vld [vmem:[%s2580_s9 + $0x50] sm:$0xff]  ;;  %v644_v20 = vld [vmem:[%s4677_s1 + $0xcf8] sm:$0xff] }
  0xb7   : > { %1460 = vmatprep.subr.mxu1 %v610_v21  ;;  %1384 = vmatpush2.msra.mxu0 %v545_v22  ;;  %v708_v21 = vld [vmem:[%s4677_s1 + $0xef8] sm:$0xff]  ;;  %v643_v22 = vld [vmem:[%s4677_s1 + $0xcf0] sm:$0xff] }
  0xb8   : > { %1461 = vmatpush2.msra.mxu1 %v609_v23  ;;  %1385 = vmatprep.subr.mxu0 %v544_v24  ;;  %v707_v23 = vld [vmem:[%s4677_s1 + $0xef0] sm:$0xff]  ;;  %v642_v24 = vld [vmem:[%s4677_s1 + $0xce8] sm:$0xff] }
  0xb9   : > { %1462 = vmatprep.subr.mxu1 %v608_v25  ;;  %1386 = vmatpush2.msra.mxu0 %v543_v26  ;;  %v706_v25 = vld [vmem:[%s4677_s1 + $0xee8] sm:$0xff]  ;;  %v213_v26 = vld [vmem:[%s2580_s9 + $0x110] sm:$0xff] }
  0xba   : > { %1463 = vmatpush2.msra.mxu1 %v607_v27  ;;  %1387 = vmatprep.subr.mxu0 %v542_v28  ;;  %v641_v27 = vld [vmem:[%s4677_s1 + $0xce0] sm:$0xff] }
  0xbb   : > { %1464 = vmatprep.subr.mxu1 %v606_v29  ;;  %1388 = vmatpush2.msra.mxu0 %v541_v30  ;;  %v705_v28 = vld [vmem:[%s4677_s1 + $0xee0] sm:$0xff]  ;;  %v212_v29 = vld [vmem:[%s2580_s9 + $0x108] sm:$0xff]  ;;  %v640_v30 = vld [vmem:[%s4677_s1 + $0xcd8] sm:$0xff] }
  0xbc   : > { %1465 = vmatpush2.msra.mxu1 %v605_v31  ;;  %1389 = vmatprep.subr.mxu0 %v540_v32  ;;  %v704_v31 = vld [vmem:[%s4677_s1 + $0xed8] sm:$0xff]  ;;  %v215_v32 = vld [vmem:[%s2580_s9 + $0x120] sm:$0xff] }
  0xbd   : > { %1466 = vmatprep.subr.mxu1 %v604_v33  ;;  %1390 = vmatpush2.msra.mxu0 %v539_v34  ;;  %v639_v33 = vld [vmem:[%s4677_s1 + $0xcd0] sm:$0xff] }
  0xbe   : > { %1467 = vmatpush2.msra.mxu1 %v603_v35  ;;  %1391 = vmatprep.subr.mxu0 %v538_v36  ;;  %v703_v34 = vld [vmem:[%s4677_s1 + $0xed0] sm:$0xff]  ;;  %v638_v35 = vld [vmem:[%s4677_s1 + $0xcc8] sm:$0xff]  ;;  %v214_v36 = vld [vmem:[%s2580_s9 + $0x118] sm:$0xff] }
  0xbf   : > { %1468 = vmatprep.subr.mxu1 %v602_v37  ;;  %1392 = vmatpush2.msra.mxu0 %v537_v38  ;;  %v702_v37 = vld [vmem:[%s4677_s1 + $0xec8] sm:$0xff]  ;;  %v637_v38 = vld [vmem:[%s4677_s1 + $0xcc0] sm:$0xff] }
  0xc0   : > { %1469 = vmatpush2.msra.mxu1 %v601_v39  ;;  %1393 = vmatprep.subr.mxu0 %v536_v40  ;;  %v701_v39 = vld [vmem:[%s4677_s1 + $0xec0] sm:$0xff]  ;;  %v636_v40 = vld [vmem:[%s4677_s1 + $0xcb8] sm:$0xff] }
  0xc1   : > { %1470 = vmatprep.subr.mxu1 %v600_v41  ;;  %1394 = vmatpush2.msra.mxu0 %v535_v42  ;;  %v700_v41 = vld [vmem:[%s4677_s1 + $0xeb8] sm:$0xff]  ;;  %v635_v42 = vld [vmem:[%s4677_s1 + $0xcb0] sm:$0xff] }
  0xc2   : > { %1471 = vmatpush2.msra.mxu1 %v599_v43  ;;  %1395 = vmatprep.subr.mxu0 %v534_v44  ;;  %v699_v43 = vld [vmem:[%s4677_s1 + $0xeb0] sm:$0xff]  ;;  %v634_v44 = vld [vmem:[%s4677_s1 + $0xca8] sm:$0xff] }
  0xc3   : > { %1472 = vmatprep.subr.mxu1 %v598_v45  ;;  %1396 = vmatpush2.msra.mxu0 %v533_v46  ;;  %v698_v45 = vld [vmem:[%s4677_s1 + $0xea8] sm:$0xff]  ;;  %v633_v46 = vld [vmem:[%s4677_s1 + $0xca0] sm:$0xff] }
  0xc4   : > { %1473 = vmatpush2.msra.mxu1 %v597_v47  ;;  %1397 = vmatprep.subr.mxu0 %v532_v48  ;;  %v697_v47 = vld [vmem:[%s4677_s1 + $0xea0] sm:$0xff]  ;;  %v632_v48 = vld [vmem:[%s4677_s1 + $0xc98] sm:$0xff] }
  0xc5   : > { %1474 = vmatprep.subr.mxu1 %v596_v49  ;;  %1398 = vmatpush2.msra.mxu0 %v531_v50  ;;  %v696_v49 = vld [vmem:[%s4677_s1 + $0xe98] sm:$0xff]  ;;  %v631_v50 = vld [vmem:[%s4677_s1 + $0xc90] sm:$0xff] }
  0xc6   : > { %1475 = vmatpush2.msra.mxu1 %v595_v51  ;;  %1399 = vmatprep.subr.mxu0 %v530_v52  ;;  %v695_v51 = vld [vmem:[%s4677_s1 + $0xe90] sm:$0xff]  ;;  %v630_v52 = vld [vmem:[%s4677_s1 + $0xc88] sm:$0xff] }
  0xc7   : > { %1476 = vmatprep.subr.mxu1 %v594_v53  ;;  %1400 = vmatpush2.msra.mxu0 %v529_v54  ;;  %v694_v53 = vld [vmem:[%s4677_s1 + $0xe88] sm:$0xff]  ;;  %v629_v54 = vld [vmem:[%s4677_s1 + $0xc80] sm:$0xff] }
  0xc8   : > { %1477 = vmatpush2.msra.mxu1 %v593_v55  ;;  %1401 = vmatprep.subr.mxu0 %v528_v56  ;;  %v693_v55 = vld [vmem:[%s4677_s1 + $0xe80] sm:$0xff]  ;;  %v628_v56 = vld [vmem:[%s4677_s1 + $0xc78] sm:$0xff] }
  0xc9   : > { %1478 = vmatprep.subr.mxu1 %v592_v57  ;;  %1402 = vmatpush2.msra.mxu0 %v527_v58  ;;  %v692_v57 = vld [vmem:[%s4677_s1 + $0xe78] sm:$0xff]  ;;  %v627_v58 = vld [vmem:[%s4677_s1 + $0xc70] sm:$0xff] }
  0xca   : > { %1479 = vmatpush2.msra.mxu1 %v591_v59  ;;  %1403 = vmatprep.subr.mxu0 %v526_v60  ;;  %v691_v59 = vld [vmem:[%s4677_s1 + $0xe70] sm:$0xff]  ;;  %v626_v60 = vld [vmem:[%s4677_s1 + $0xc68] sm:$0xff] }
  0xcb   : > { %1480 = vmatprep.subr.mxu1 %v590_v61  ;;  %1404 = vmatpush2.msra.mxu0 %v525_v62  ;;  %v690_v61 = vld [vmem:[%s4677_s1 + $0xe68] sm:$0xff]  ;;  %v625_v62 = vld [vmem:[%s4677_s1 + $0xc60] sm:$0xff] }
  0xcc   : > { %1481 = vmatpush2.msra.mxu1 %v589_v63  ;;  %1405 = vmatprep.subr.mxu0 %v524_v0  ;;  %v689_v63 = vld [vmem:[%s4677_s1 + $0xe60] sm:$0xff]  ;;  %v624_v0 = vld [vmem:[%s4677_s1 + $0xc58] sm:$0xff] }
  0xcd   : > { %1482 = vmatprep.subr.mxu1 %v588_v1  ;;  %1406 = vmatpush2.msra.mxu0 %v523_v2  ;;  %v688_v1 = vld [vmem:[%s4677_s1 + $0xe58] sm:$0xff]  ;;  %v623_v2 = vld [vmem:[%s4677_s1 + $0xc50] sm:$0xff] }
  0xce   : > { %1483 = vmatpush2.msra.mxu1 %v587_v3  ;;  %1407 = vmatprep.subr.mxu0 %v522_v4  ;;  %v687_v3 = vld [vmem:[%s4677_s1 + $0xe50] sm:$0xff]  ;;  %v622_v4 = vld [vmem:[%s4677_s1 + $0xc48] sm:$0xff] }
  0xcf   : > { %1484 = vmatprep.subr.mxu1 %v586_v5  ;;  %1408 = vmatpush2.msra.mxu0 %v521_v6  ;;  %v686_v5 = vld [vmem:[%s4677_s1 + $0xe48] sm:$0xff]  ;;  %v621_v6 = vld [vmem:[%s4677_s1 + $0xc40] sm:$0xff] }
  0xd0   : > { %1485 = vmatpush2.msra.mxu1 %v585_v7  ;;  %1409 = vmatprep.subr.mxu0 %v520_v8  ;;  %v685_v7 = vld [vmem:[%s4677_s1 + $0xe40] sm:$0xff]  ;;  %v620_v8 = vld [vmem:[%s4677_s1 + $0xc38] sm:$0xff] }
  0xd1   : > { %1486 = vmatprep.subr.mxu1 %v584_v9  ;;  %1410 = vmatpush2.msra.mxu0 %v519_v10  ;;  %v684_v9 = vld [vmem:[%s4677_s1 + $0xe38] sm:$0xff]  ;;  %v619_v10 = vld [vmem:[%s4677_s1 + $0xc30] sm:$0xff] }
  0xd2   : > { %1487 = vmatpush2.msra.mxu1 %v583_v11  ;;  %1411 = vmatprep.subr.mxu0 %v518_v12  ;;  %v683_v11 = vld [vmem:[%s4677_s1 + $0xe30] sm:$0xff]  ;;  %v618_v12 = vld [vmem:[%s4677_s1 + $0xc28] sm:$0xff] }
  0xd3   : > { %1488 = vmatprep.subr.mxu1 %v582_v13  ;;  %1412 = vmatpush2.msra.mxu0 %v517_v14  ;;  %v682_v13 = vld [vmem:[%s4677_s1 + $0xe28] sm:$0xff]  ;;  %v617_v14 = vld [vmem:[%s4677_s1 + $0xc20] sm:$0xff] }
  0xd4   : > { %1413 = vmatprep.mubr.f32.mxu0 %v188_v15  ;;  %1489 = vmatpush2.msra.mxu1 %v581_v16  ;;  %v681_v15 = vld [vmem:[%s4677_s1 + $0xe20] sm:$0xff]  ;;  %v616_v16 = vld [vmem:[%s4677_s1 + $0xc18] sm:$0xff] }
  0xd5   : > { %1490 = vmatprep.mubr.f32.mxu1 %v190_v17  ;;  %1414 = vmatmul.mubr.f32.vlgmr.msra.gmra.mxu0 %v187_v18  ;;  %v680_v17 = vld [vmem:[%s4677_s1 + $0xe18] sm:$0xff]  ;;  %v615_v18 = vld [vmem:[%s4677_s1 + $0xc10] sm:$0xff] }
  0xd6   : > { %1491 = vmatmul.mubr.f32.vlgmr.msra.gmra.mxu1 %v189_v19  ;;  %1503 = vmatprep.subr.mxu0 %v644_v20  ;;  %v679_v19 = vld [vmem:[%s4677_s1 + $0xe10] sm:$0xff]  ;;  %v614_v20 = vld [vmem:[%s4677_s1 + $0xc08] sm:$0xff] }
  0xd7   : > { %1580 = vmatprep.subr.mxu1 %v708_v21  ;;  %1504 = vmatpush1.msra.mxu0 %v643_v22  ;;  %v678_v21 = vld [vmem:[%s4677_s1 + $0xe08] sm:$0xff]  ;;  %v613_v22 = vld [vmem:[%s4677_s1 + $0xc00] sm:$0xff] }
  0xd8   : > { %1581 = vmatpush1.msra.mxu1 %v707_v23  ;;  %1505 = vmatprep.subr.mxu0 %v642_v24  ;;  %v677_v23 = vld [vmem:[%s4677_s1 + $0xe00] sm:$0xff]  ;;  %v676_v24 = vld [vmem:[%s4677_s1 + $0xdf8] sm:$0xff] }
  0xd9   : > { %1582 = vmatprep.subr.mxu1 %v706_v25  ;;  %1419 = vmatprep.mubr.f32.mxu0 %v213_v26  ;;  %v740_v25 = vld [vmem:[%s4677_s1 + $0xff8] sm:$0xff]  ;;  %v675_v26 = vld [vmem:[%s4677_s1 + $0xdf0] sm:$0xff] }
  0xda   : > { %1506 = vmatpush1.msra.mxu0 %v641_v27  ;;  %1583 = vmatpush1.msra.mxu1 %v705_v28  ;;  %v739_v27 = vld [vmem:[%s4677_s1 + $0xff0] sm:$0xff]  ;;  %v674_v28 = vld [vmem:[%s4677_s1 + $0xde8] sm:$0xff] }
  0xdb   : > { %1420 = vmatmul.mubr.f32.gmra.mxu0 %v212_v29  ;;  %1507 = vmatprep.subr.mxu0 %v640_v30  ;;  %v738_v29 = vld [vmem:[%s4677_s1 + $0xfe8] sm:$0xff]  ;;  %v673_v30 = vld [vmem:[%s4677_s1 + $0xde0] sm:$0xff] }
  0xdc   : > { %1584 = vmatprep.subr.mxu1 %v704_v31  ;;  %1496 = vmatprep.mubr.f32.mxu1 %v215_v32  ;;  %v737_v31 = vld [vmem:[%s4677_s1 + $0xfe0] sm:$0xff]  ;;  %v672_v32 = vld [vmem:[%s4677_s1 + $0xdd8] sm:$0xff] }
  0xdd   : > { %1508 = vmatpush1.msra.mxu0 %v639_v33  ;;  %1585 = vmatpush1.msra.mxu1 %v703_v34  ;;  %v736_v33 = vld [vmem:[%s4677_s1 + $0xfd8] sm:$0xff]  ;;  %v671_v34 = vld [vmem:[%s4677_s1 + $0xdd0] sm:$0xff] }
  0xde   : > { %1509 = vmatprep.subr.mxu0 %v638_v35  ;;  %1497 = vmatmul.mubr.f32.gmra.mxu1 %v214_v36  ;;  %v735_v35 = vld [vmem:[%s4677_s1 + $0xfd0] sm:$0xff]  ;;  %v670_v36 = vld [vmem:[%s4677_s1 + $0xdc8] sm:$0xff] }
  0xdf   : > { %1586 = vmatprep.subr.mxu1 %v702_v37  ;;  %1510 = vmatpush1.msra.mxu0 %v637_v38  ;;  %v734_v37 = vld [vmem:[%s4677_s1 + $0xfc8] sm:$0xff]  ;;  %v669_v38 = vld [vmem:[%s4677_s1 + $0xdc0] sm:$0xff] }
  0xe0   : > { %1587 = vmatpush1.msra.mxu1 %v701_v39  ;;  %1511 = vmatprep.subr.mxu0 %v636_v40  ;;  %v733_v39 = vld [vmem:[%s4677_s1 + $0xfc0] sm:$0xff]  ;;  %v668_v40 = vld [vmem:[%s4677_s1 + $0xdb8] sm:$0xff] }
  0xe1   : > { %1588 = vmatprep.subr.mxu1 %v700_v41  ;;  %1512 = vmatpush1.msra.mxu0 %v635_v42  ;;  %v732_v41 = vld [vmem:[%s4677_s1 + $0xfb8] sm:$0xff]  ;;  %v667_v42 = vld [vmem:[%s4677_s1 + $0xdb0] sm:$0xff] }
  0xe2   : > { %1589 = vmatpush1.msra.mxu1 %v699_v43  ;;  %1513 = vmatprep.subr.mxu0 %v634_v44  ;;  %v731_v43 = vld [vmem:[%s4677_s1 + $0xfb0] sm:$0xff]  ;;  %v666_v44 = vld [vmem:[%s4677_s1 + $0xda8] sm:$0xff] }
  0xe3   : > { %1590 = vmatprep.subr.mxu1 %v698_v45  ;;  %1514 = vmatpush1.msra.mxu0 %v633_v46  ;;  %v730_v45 = vld [vmem:[%s4677_s1 + $0xfa8] sm:$0xff]  ;;  %v665_v46 = vld [vmem:[%s4677_s1 + $0xda0] sm:$0xff] }
  0xe4   : > { %1591 = vmatpush1.msra.mxu1 %v697_v47  ;;  %1515 = vmatprep.subr.mxu0 %v632_v48  ;;  %v729_v47 = vld [vmem:[%s4677_s1 + $0xfa0] sm:$0xff]  ;;  %v664_v48 = vld [vmem:[%s4677_s1 + $0xd98] sm:$0xff] }
  0xe5   : > { %1592 = vmatprep.subr.mxu1 %v696_v49  ;;  %1516 = vmatpush1.msra.mxu0 %v631_v50  ;;  %v728_v49 = vld [vmem:[%s4677_s1 + $0xf98] sm:$0xff]  ;;  %v663_v50 = vld [vmem:[%s4677_s1 + $0xd90] sm:$0xff] }
  0xe6   : > { %1593 = vmatpush1.msra.mxu1 %v695_v51  ;;  %1517 = vmatprep.subr.mxu0 %v630_v52  ;;  %v727_v51 = vld [vmem:[%s4677_s1 + $0xf90] sm:$0xff]  ;;  %v662_v52 = vld [vmem:[%s4677_s1 + $0xd88] sm:$0xff] }
  0xe7   : > { %1594 = vmatprep.subr.mxu1 %v694_v53  ;;  %1518 = vmatpush1.msra.mxu0 %v629_v54  ;;  %v726_v53 = vld [vmem:[%s4677_s1 + $0xf88] sm:$0xff]  ;;  %v661_v54 = vld [vmem:[%s4677_s1 + $0xd80] sm:$0xff] }
  0xe8   : > { %1595 = vmatpush1.msra.mxu1 %v693_v55  ;;  %1519 = vmatprep.subr.mxu0 %v628_v56  ;;  %v725_v55 = vld [vmem:[%s4677_s1 + $0xf80] sm:$0xff]  ;;  %v660_v56 = vld [vmem:[%s4677_s1 + $0xd78] sm:$0xff] }
  0xe9   : > { %1596 = vmatprep.subr.mxu1 %v692_v57  ;;  %1520 = vmatpush1.msra.mxu0 %v627_v58  ;;  %v724_v57 = vld [vmem:[%s4677_s1 + $0xf78] sm:$0xff]  ;;  %v659_v58 = vld [vmem:[%s4677_s1 + $0xd70] sm:$0xff] }
  0xea   : > { %1597 = vmatpush1.msra.mxu1 %v691_v59  ;;  %1521 = vmatprep.subr.mxu0 %v626_v60  ;;  %v723_v59 = vld [vmem:[%s4677_s1 + $0xf70] sm:$0xff]  ;;  %v658_v60 = vld [vmem:[%s4677_s1 + $0xd68] sm:$0xff] }
  0xeb   : > { %1598 = vmatprep.subr.mxu1 %v690_v61  ;;  %1522 = vmatpush1.msra.mxu0 %v625_v62  ;;  %v722_v61 = vld [vmem:[%s4677_s1 + $0xf68] sm:$0xff]  ;;  %v657_v62 = vld [vmem:[%s4677_s1 + $0xd60] sm:$0xff] }
  0xec   : > { %1599 = vmatpush1.msra.mxu1 %v689_v63  ;;  %1523 = vmatprep.subr.mxu0 %v624_v0  ;;  %v721_v63 = vld [vmem:[%s4677_s1 + $0xf60] sm:$0xff]  ;;  %v656_v0 = vld [vmem:[%s4677_s1 + $0xd58] sm:$0xff] }
  0xed   : > { %1600 = vmatprep.subr.mxu1 %v688_v1  ;;  %1524 = vmatpush1.msra.mxu0 %v623_v2  ;;  %v720_v1 = vld [vmem:[%s4677_s1 + $0xf58] sm:$0xff]  ;;  %v655_v2 = vld [vmem:[%s4677_s1 + $0xd50] sm:$0xff] }
  0xee   : > { %1601 = vmatpush1.msra.mxu1 %v687_v3  ;;  %1525 = vmatprep.subr.mxu0 %v622_v4  ;;  %v719_v3 = vld [vmem:[%s4677_s1 + $0xf50] sm:$0xff]  ;;  %v654_v4 = vld [vmem:[%s4677_s1 + $0xd48] sm:$0xff] }
  0xef   : > { %1602 = vmatprep.subr.mxu1 %v686_v5  ;;  %1526 = vmatpush1.msra.mxu0 %v621_v6  ;;  %v718_v5 = vld [vmem:[%s4677_s1 + $0xf48] sm:$0xff]  ;;  %v653_v6 = vld [vmem:[%s4677_s1 + $0xd40] sm:$0xff] }
  0xf0   : > { %1603 = vmatpush1.msra.mxu1 %v685_v7  ;;  %1527 = vmatprep.subr.mxu0 %v620_v8  ;;  %v717_v7 = vld [vmem:[%s4677_s1 + $0xf40] sm:$0xff]  ;;  %v652_v8 = vld [vmem:[%s4677_s1 + $0xd38] sm:$0xff] }
  0xf1   : > { %1604 = vmatprep.subr.mxu1 %v684_v9  ;;  %1528 = vmatpush1.msra.mxu0 %v619_v10  ;;  %v716_v9 = vld [vmem:[%s4677_s1 + $0xf38] sm:$0xff]  ;;  %v651_v10 = vld [vmem:[%s4677_s1 + $0xd30] sm:$0xff] }
  0xf2   : > { %1605 = vmatpush1.msra.mxu1 %v683_v11  ;;  %1529 = vmatprep.subr.mxu0 %v618_v12  ;;  %v715_v11 = vld [vmem:[%s4677_s1 + $0xf30] sm:$0xff]  ;;  %v650_v12 = vld [vmem:[%s4677_s1 + $0xd28] sm:$0xff] }
  0xf3   : > { %1606 = vmatprep.subr.mxu1 %v682_v13  ;;  %1530 = vmatpush1.msra.mxu0 %v617_v14  ;;  %v714_v13 = vld [vmem:[%s4677_s1 + $0xf28] sm:$0xff]  ;;  %v649_v14 = vld [vmem:[%s4677_s1 + $0xd20] sm:$0xff] }
  0xf4   : > { %1607 = vmatpush1.msra.mxu1 %v681_v15  ;;  %1531 = vmatprep.subr.mxu0 %v616_v16  ;;  %v713_v15 = vld [vmem:[%s4677_s1 + $0xf20] sm:$0xff]  ;;  %v648_v16 = vld [vmem:[%s4677_s1 + $0xd18] sm:$0xff] }
  0xf5   : > { %1608 = vmatprep.subr.mxu1 %v680_v17  ;;  %1532 = vmatpush1.msra.mxu0 %v615_v18  ;;  %v712_v17 = vld [vmem:[%s4677_s1 + $0xf18] sm:$0xff]  ;;  %v647_v18 = vld [vmem:[%s4677_s1 + $0xd10] sm:$0xff] }
  0xf6   : > { %1609 = vmatpush1.msra.mxu1 %v679_v19  ;;  %1533 = vmatprep.subr.mxu0 %v614_v20  ;;  %v711_v19 = vld [vmem:[%s4677_s1 + $0xf10] sm:$0xff]  ;;  %v646_v20 = vld [vmem:[%s4677_s1 + $0xd08] sm:$0xff] }
  0xf7   : > { %1610 = vmatprep.subr.mxu1 %v678_v21  ;;  %1534 = vmatpush1.msra.mxu0 %v613_v22  ;;  %v710_v21 = vld [vmem:[%s4677_s1 + $0xf08] sm:$0xff]  ;;  %v645_v22 = vld [vmem:[%s4677_s1 + $0xd00] sm:$0xff] }
  0xf8   : > { %1611 = vmatpush1.msra.mxu1 %v677_v23  ;;  %1535 = vmatprep.subr.mxu0 %v676_v24  ;;  %v192_v23 = vld [vmem:[%s2580_s9 + $0x68] sm:$0xff]  ;;  %v709_v24 = vld [vmem:[%s4677_s1 + $0xf00] sm:$0xff] }
  0xf9   : > { %1612 = vmatprep.subr.mxu1 %v740_v25  ;;  %1536 = vmatpush2.msra.mxu0 %v675_v26  ;;  %v194_v25 = vld [vmem:[%s2580_s9 + $0x78] sm:$0xff]  ;;  %v191_v26 = vld [vmem:[%s2580_s9 + $0x60] sm:$0xff] }
  0xfa   : > { %1613 = vmatpush2.msra.mxu1 %v739_v27  ;;  %1537 = vmatprep.subr.mxu0 %v674_v28  ;;  %v193_v27 = vld [vmem:[%s2580_s9 + $0x70] sm:$0xff]  ;;  %v772_v28 = vld [vmem:[%s4677_s1 + $0x10f8] sm:$0xff] }
  0xfb   : > { %1614 = vmatprep.subr.mxu1 %v738_v29  ;;  %1538 = vmatpush2.msra.mxu0 %v673_v30  ;;  %v836_v29 = vld [vmem:[%s4677_s1 + $0x12f8] sm:$0xff]  ;;  %v771_v30 = vld [vmem:[%s4677_s1 + $0x10f0] sm:$0xff] }
  0xfc   : > { %1615 = vmatpush2.msra.mxu1 %v737_v31  ;;  %1539 = vmatprep.subr.mxu0 %v672_v32  ;;  %v835_v31 = vld [vmem:[%s4677_s1 + $0x12f0] sm:$0xff]  ;;  %v770_v32 = vld [vmem:[%s4677_s1 + $0x10e8] sm:$0xff] }
  0xfd   : > { %1616 = vmatprep.subr.mxu1 %v736_v33  ;;  %1540 = vmatpush2.msra.mxu0 %v671_v34  ;;  %v834_v33 = vld [vmem:[%s4677_s1 + $0x12e8] sm:$0xff]  ;;  %v217_v34 = vld [vmem:[%s2580_s9 + $0x130] sm:$0xff] }
  0xfe   : > { %1617 = vmatpush2.msra.mxu1 %v735_v35  ;;  %1541 = vmatprep.subr.mxu0 %v670_v36  ;;  %v769_v35 = vld [vmem:[%s4677_s1 + $0x10e0] sm:$0xff] }
  0xff   : > { %1618 = vmatprep.subr.mxu1 %v734_v37  ;;  %1542 = vmatpush2.msra.mxu0 %v669_v38  ;;  %v833_v36 = vld [vmem:[%s4677_s1 + $0x12e0] sm:$0xff]  ;;  %v216_v37 = vld [vmem:[%s2580_s9 + $0x128] sm:$0xff]  ;;  %v768_v38 = vld [vmem:[%s4677_s1 + $0x10d8] sm:$0xff] }
 0x100   : > { %1619 = vmatpush2.msra.mxu1 %v733_v39  ;;  %1543 = vmatprep.subr.mxu0 %v668_v40  ;;  %v832_v39 = vld [vmem:[%s4677_s1 + $0x12d8] sm:$0xff]  ;;  %v219_v40 = vld [vmem:[%s2580_s9 + $0x140] sm:$0xff] }
 0x101   : > { %1620 = vmatprep.subr.mxu1 %v732_v41  ;;  %1544 = vmatpush2.msra.mxu0 %v667_v42  ;;  %v767_v41 = vld [vmem:[%s4677_s1 + $0x10d0] sm:$0xff] }
 0x102   : > { %1621 = vmatpush2.msra.mxu1 %v731_v43  ;;  %1545 = vmatprep.subr.mxu0 %v666_v44  ;;  %v831_v42 = vld [vmem:[%s4677_s1 + $0x12d0] sm:$0xff]  ;;  %v766_v43 = vld [vmem:[%s4677_s1 + $0x10c8] sm:$0xff]  ;;  %v218_v44 = vld [vmem:[%s2580_s9 + $0x138] sm:$0xff] }
 0x103   : > { %1622 = vmatprep.subr.mxu1 %v730_v45  ;;  %1546 = vmatpush2.msra.mxu0 %v665_v46  ;;  %v830_v45 = vld [vmem:[%s4677_s1 + $0x12c8] sm:$0xff]  ;;  %v765_v46 = vld [vmem:[%s4677_s1 + $0x10c0] sm:$0xff] }
 0x104   : > { %1623 = vmatpush2.msra.mxu1 %v729_v47  ;;  %1547 = vmatprep.subr.mxu0 %v664_v48  ;;  %v829_v47 = vld [vmem:[%s4677_s1 + $0x12c0] sm:$0xff]  ;;  %v764_v48 = vld [vmem:[%s4677_s1 + $0x10b8] sm:$0xff] }
 0x105   : > { %1624 = vmatprep.subr.mxu1 %v728_v49  ;;  %1548 = vmatpush2.msra.mxu0 %v663_v50  ;;  %v828_v49 = vld [vmem:[%s4677_s1 + $0x12b8] sm:$0xff]  ;;  %v763_v50 = vld [vmem:[%s4677_s1 + $0x10b0] sm:$0xff] }
 0x106   : > { %1625 = vmatpush2.msra.mxu1 %v727_v51  ;;  %1549 = vmatprep.subr.mxu0 %v662_v52  ;;  %v827_v51 = vld [vmem:[%s4677_s1 + $0x12b0] sm:$0xff]  ;;  %v762_v52 = vld [vmem:[%s4677_s1 + $0x10a8] sm:$0xff] }
 0x107   : > { %1626 = vmatprep.subr.mxu1 %v726_v53  ;;  %1550 = vmatpush2.msra.mxu0 %v661_v54  ;;  %v826_v53 = vld [vmem:[%s4677_s1 + $0x12a8] sm:$0xff]  ;;  %v761_v54 = vld [vmem:[%s4677_s1 + $0x10a0] sm:$0xff] }
 0x108   : > { %1627 = vmatpush2.msra.mxu1 %v725_v55  ;;  %1551 = vmatprep.subr.mxu0 %v660_v56  ;;  %v825_v55 = vld [vmem:[%s4677_s1 + $0x12a0] sm:$0xff]  ;;  %v760_v56 = vld [vmem:[%s4677_s1 + $0x1098] sm:$0xff] }
 0x109   : > { %1628 = vmatprep.subr.mxu1 %v724_v57  ;;  %1552 = vmatpush2.msra.mxu0 %v659_v58  ;;  %v824_v57 = vld [vmem:[%s4677_s1 + $0x1298] sm:$0xff]  ;;  %v759_v58 = vld [vmem:[%s4677_s1 + $0x1090] sm:$0xff] }
 0x10a   : > { %1629 = vmatpush2.msra.mxu1 %v723_v59  ;;  %1553 = vmatprep.subr.mxu0 %v658_v60  ;;  %v823_v59 = vld [vmem:[%s4677_s1 + $0x1290] sm:$0xff]  ;;  %v758_v60 = vld [vmem:[%s4677_s1 + $0x1088] sm:$0xff] }
 0x10b   : > { %1630 = vmatprep.subr.mxu1 %v722_v61  ;;  %1554 = vmatpush2.msra.mxu0 %v657_v62  ;;  %v822_v61 = vld [vmem:[%s4677_s1 + $0x1288] sm:$0xff]  ;;  %v757_v62 = vld [vmem:[%s4677_s1 + $0x1080] sm:$0xff] }
 0x10c   : > { %1631 = vmatpush2.msra.mxu1 %v721_v63  ;;  %1555 = vmatprep.subr.mxu0 %v656_v0  ;;  %v821_v63 = vld [vmem:[%s4677_s1 + $0x1280] sm:$0xff]  ;;  %v756_v0 = vld [vmem:[%s4677_s1 + $0x1078] sm:$0xff] }
 0x10d   : > { %1632 = vmatprep.subr.mxu1 %v720_v1  ;;  %1556 = vmatpush2.msra.mxu0 %v655_v2  ;;  %v820_v1 = vld [vmem:[%s4677_s1 + $0x1278] sm:$0xff]  ;;  %v755_v2 = vld [vmem:[%s4677_s1 + $0x1070] sm:$0xff] }
 0x10e   : > { %1633 = vmatpush2.msra.mxu1 %v719_v3  ;;  %1557 = vmatprep.subr.mxu0 %v654_v4  ;;  %v819_v3 = vld [vmem:[%s4677_s1 + $0x1270] sm:$0xff]  ;;  %v754_v4 = vld [vmem:[%s4677_s1 + $0x1068] sm:$0xff] }
 0x10f   : > { %1634 = vmatprep.subr.mxu1 %v718_v5  ;;  %1558 = vmatpush2.msra.mxu0 %v653_v6  ;;  %v818_v5 = vld [vmem:[%s4677_s1 + $0x1268] sm:$0xff]  ;;  %v753_v6 = vld [vmem:[%s4677_s1 + $0x1060] sm:$0xff] }
 0x110   : > { %1635 = vmatpush2.msra.mxu1 %v717_v7  ;;  %1559 = vmatprep.subr.mxu0 %v652_v8  ;;  %v817_v7 = vld [vmem:[%s4677_s1 + $0x1260] sm:$0xff]  ;;  %v752_v8 = vld [vmem:[%s4677_s1 + $0x1058] sm:$0xff] }
 0x111   : > { %1636 = vmatprep.subr.mxu1 %v716_v9  ;;  %1560 = vmatpush2.msra.mxu0 %v651_v10  ;;  %v816_v9 = vld [vmem:[%s4677_s1 + $0x1258] sm:$0xff]  ;;  %v751_v10 = vld [vmem:[%s4677_s1 + $0x1050] sm:$0xff] }
 0x112   : > { %1637 = vmatpush2.msra.mxu1 %v715_v11  ;;  %1561 = vmatprep.subr.mxu0 %v650_v12  ;;  %v815_v11 = vld [vmem:[%s4677_s1 + $0x1250] sm:$0xff]  ;;  %v750_v12 = vld [vmem:[%s4677_s1 + $0x1048] sm:$0xff] }
 0x113   : > { %1638 = vmatprep.subr.mxu1 %v714_v13  ;;  %1562 = vmatpush2.msra.mxu0 %v649_v14  ;;  %v814_v13 = vld [vmem:[%s4677_s1 + $0x1248] sm:$0xff]  ;;  %v749_v14 = vld [vmem:[%s4677_s1 + $0x1040] sm:$0xff] }
 0x114   : > { %1639 = vmatpush2.msra.mxu1 %v713_v15  ;;  %1563 = vmatprep.subr.mxu0 %v648_v16  ;;  %v813_v15 = vld [vmem:[%s4677_s1 + $0x1240] sm:$0xff]  ;;  %v748_v16 = vld [vmem:[%s4677_s1 + $0x1038] sm:$0xff] }
 0x115   : > { %1640 = vmatprep.subr.mxu1 %v712_v17  ;;  %1564 = vmatpush2.msra.mxu0 %v647_v18  ;;  %v812_v17 = vld [vmem:[%s4677_s1 + $0x1238] sm:$0xff]  ;;  %v747_v18 = vld [vmem:[%s4677_s1 + $0x1030] sm:$0xff] }
 0x116   : > { %1641 = vmatpush2.msra.mxu1 %v711_v19  ;;  %1565 = vmatprep.subr.mxu0 %v646_v20  ;;  %v811_v19 = vld [vmem:[%s4677_s1 + $0x1230] sm:$0xff]  ;;  %v746_v20 = vld [vmem:[%s4677_s1 + $0x1028] sm:$0xff] }
 0x117   : > { %1642 = vmatprep.subr.mxu1 %v710_v21  ;;  %1566 = vmatpush2.msra.mxu0 %v645_v22  ;;  %v810_v21 = vld [vmem:[%s4677_s1 + $0x1228] sm:$0xff]  ;;  %v745_v22 = vld [vmem:[%s4677_s1 + $0x1020] sm:$0xff] }
 0x118   : > { %1567 = vmatprep.mubr.f32.mxu0 %v192_v23  ;;  %1643 = vmatpush2.msra.mxu1 %v709_v24  ;;  %v809_v23 = vld [vmem:[%s4677_s1 + $0x1220] sm:$0xff]  ;;  %v744_v24 = vld [vmem:[%s4677_s1 + $0x1018] sm:$0xff] }
 0x119   : > { %1644 = vmatprep.mubr.f32.mxu1 %v194_v25  ;;  %1568 = vmatmul.mubr.f32.vlgmr.msra.gmra.mxu0 %v191_v26  ;;  %v808_v25 = vld [vmem:[%s4677_s1 + $0x1218] sm:$0xff]  ;;  %v743_v26 = vld [vmem:[%s4677_s1 + $0x1010] sm:$0xff] }
 0x11a   : > { %1645 = vmatmul.mubr.f32.vlgmr.msra.gmra.mxu1 %v193_v27  ;;  %1657 = vmatprep.subr.mxu0 %v772_v28  ;;  %v807_v27 = vld [vmem:[%s4677_s1 + $0x1210] sm:$0xff]  ;;  %v742_v28 = vld [vmem:[%s4677_s1 + $0x1008] sm:$0xff] }
 0x11b   : > { %1734 = vmatprep.subr.mxu1 %v836_v29  ;;  %1658 = vmatpush1.msra.mxu0 %v771_v30  ;;  %v806_v29 = vld [vmem:[%s4677_s1 + $0x1208] sm:$0xff]  ;;  %v741_v30 = vld [vmem:[%s4677_s1 + $0x1000] sm:$0xff] }
 0x11c   : > { %1735 = vmatpush1.msra.mxu1 %v835_v31  ;;  %1659 = vmatprep.subr.mxu0 %v770_v32  ;;  %v805_v31 = vld [vmem:[%s4677_s1 + $0x1200] sm:$0xff]  ;;  %v804_v32 = vld [vmem:[%s4677_s1 + $0x11f8] sm:$0xff] }
 0x11d   : > { %1736 = vmatprep.subr.mxu1 %v834_v33  ;;  %1573 = vmatprep.mubr.f32.mxu0 %v217_v34  ;;  %v868_v33 = vld [vmem:[%s4677_s1 + $0x13f8] sm:$0xff]  ;;  %v803_v34 = vld [vmem:[%s4677_s1 + $0x11f0] sm:$0xff] }
 0x11e   : > { %1660 = vmatpush1.msra.mxu0 %v769_v35  ;;  %1737 = vmatpush1.msra.mxu1 %v833_v36  ;;  %v867_v35 = vld [vmem:[%s4677_s1 + $0x13f0] sm:$0xff]  ;;  %v802_v36 = vld [vmem:[%s4677_s1 + $0x11e8] sm:$0xff] }
 0x11f   : > { %1574 = vmatmul.mubr.f32.gmra.mxu0 %v216_v37  ;;  %1661 = vmatprep.subr.mxu0 %v768_v38  ;;  %v866_v37 = vld [vmem:[%s4677_s1 + $0x13e8] sm:$0xff]  ;;  %v801_v38 = vld [vmem:[%s4677_s1 + $0x11e0] sm:$0xff] }
 0x120   : > { %1738 = vmatprep.subr.mxu1 %v832_v39  ;;  %1650 = vmatprep.mubr.f32.mxu1 %v219_v40  ;;  %v865_v39 = vld [vmem:[%s4677_s1 + $0x13e0] sm:$0xff]  ;;  %v800_v40 = vld [vmem:[%s4677_s1 + $0x11d8] sm:$0xff] }
 0x121   : > { %1662 = vmatpush1.msra.mxu0 %v767_v41  ;;  %1739 = vmatpush1.msra.mxu1 %v831_v42  ;;  %v864_v41 = vld [vmem:[%s4677_s1 + $0x13d8] sm:$0xff]  ;;  %v799_v42 = vld [vmem:[%s4677_s1 + $0x11d0] sm:$0xff] }
 0x122   : > { %1663 = vmatprep.subr.mxu0 %v766_v43  ;;  %1651 = vmatmul.mubr.f32.gmra.mxu1 %v218_v44  ;;  %v863_v43 = vld [vmem:[%s4677_s1 + $0x13d0] sm:$0xff]  ;;  %v798_v44 = vld [vmem:[%s4677_s1 + $0x11c8] sm:$0xff] }
 0x123   : > { %1740 = vmatprep.subr.mxu1 %v830_v45  ;;  %1664 = vmatpush1.msra.mxu0 %v765_v46  ;;  %v862_v45 = vld [vmem:[%s4677_s1 + $0x13c8] sm:$0xff]  ;;  %v797_v46 = vld [vmem:[%s4677_s1 + $0x11c0] sm:$0xff] }
 0x124   : > { %1741 = vmatpush1.msra.mxu1 %v829_v47  ;;  %1665 = vmatprep.subr.mxu0 %v764_v48  ;;  %v861_v47 = vld [vmem:[%s4677_s1 + $0x13c0] sm:$0xff]  ;;  %v796_v48 = vld [vmem:[%s4677_s1 + $0x11b8] sm:$0xff] }
 0x125   : > { %1742 = vmatprep.subr.mxu1 %v828_v49  ;;  %1666 = vmatpush1.msra.mxu0 %v763_v50  ;;  %v860_v49 = vld [vmem:[%s4677_s1 + $0x13b8] sm:$0xff]  ;;  %v795_v50 = vld [vmem:[%s4677_s1 + $0x11b0] sm:$0xff] }
 0x126   : > { %1743 = vmatpush1.msra.mxu1 %v827_v51  ;;  %1667 = vmatprep.subr.mxu0 %v762_v52  ;;  %v859_v51 = vld [vmem:[%s4677_s1 + $0x13b0] sm:$0xff]  ;;  %v794_v52 = vld [vmem:[%s4677_s1 + $0x11a8] sm:$0xff] }
 0x127   : > { %1744 = vmatprep.subr.mxu1 %v826_v53  ;;  %1668 = vmatpush1.msra.mxu0 %v761_v54  ;;  %v858_v53 = vld [vmem:[%s4677_s1 + $0x13a8] sm:$0xff]  ;;  %v793_v54 = vld [vmem:[%s4677_s1 + $0x11a0] sm:$0xff] }
 0x128   : > { %1745 = vmatpush1.msra.mxu1 %v825_v55  ;;  %1669 = vmatprep.subr.mxu0 %v760_v56  ;;  %v857_v55 = vld [vmem:[%s4677_s1 + $0x13a0] sm:$0xff]  ;;  %v792_v56 = vld [vmem:[%s4677_s1 + $0x1198] sm:$0xff] }
 0x129   : > { %1746 = vmatprep.subr.mxu1 %v824_v57  ;;  %1670 = vmatpush1.msra.mxu0 %v759_v58  ;;  %v856_v57 = vld [vmem:[%s4677_s1 + $0x1398] sm:$0xff]  ;;  %v791_v58 = vld [vmem:[%s4677_s1 + $0x1190] sm:$0xff] }
 0x12a   : > { %1747 = vmatpush1.msra.mxu1 %v823_v59  ;;  %1671 = vmatprep.subr.mxu0 %v758_v60  ;;  %v855_v59 = vld [vmem:[%s4677_s1 + $0x1390] sm:$0xff]  ;;  %v790_v60 = vld [vmem:[%s4677_s1 + $0x1188] sm:$0xff] }
 0x12b   : > { %1748 = vmatprep.subr.mxu1 %v822_v61  ;;  %1672 = vmatpush1.msra.mxu0 %v757_v62  ;;  %v854_v61 = vld [vmem:[%s4677_s1 + $0x1388] sm:$0xff]  ;;  %v789_v62 = vld [vmem:[%s4677_s1 + $0x1180] sm:$0xff] }
 0x12c   : > { %1749 = vmatpush1.msra.mxu1 %v821_v63  ;;  %1673 = vmatprep.subr.mxu0 %v756_v0  ;;  %v853_v63 = vld [vmem:[%s4677_s1 + $0x1380] sm:$0xff]  ;;  %v788_v0 = vld [vmem:[%s4677_s1 + $0x1178] sm:$0xff] }
 0x12d   : > { %1750 = vmatprep.subr.mxu1 %v820_v1  ;;  %1674 = vmatpush1.msra.mxu0 %v755_v2  ;;  %v852_v1 = vld [vmem:[%s4677_s1 + $0x1378] sm:$0xff]  ;;  %v787_v2 = vld [vmem:[%s4677_s1 + $0x1170] sm:$0xff] }
 0x12e   : > { %1751 = vmatpush1.msra.mxu1 %v819_v3  ;;  %1675 = vmatprep.subr.mxu0 %v754_v4  ;;  %v851_v3 = vld [vmem:[%s4677_s1 + $0x1370] sm:$0xff]  ;;  %v786_v4 = vld [vmem:[%s4677_s1 + $0x1168] sm:$0xff] }
 0x12f   : > { %1752 = vmatprep.subr.mxu1 %v818_v5  ;;  %1676 = vmatpush1.msra.mxu0 %v753_v6  ;;  %v850_v5 = vld [vmem:[%s4677_s1 + $0x1368] sm:$0xff]  ;;  %v785_v6 = vld [vmem:[%s4677_s1 + $0x1160] sm:$0xff] }
 0x130   : > { %1753 = vmatpush1.msra.mxu1 %v817_v7  ;;  %1677 = vmatprep.subr.mxu0 %v752_v8  ;;  %v849_v7 = vld [vmem:[%s4677_s1 + $0x1360] sm:$0xff]  ;;  %v784_v8 = vld [vmem:[%s4677_s1 + $0x1158] sm:$0xff] }
 0x131   : > { %1754 = vmatprep.subr.mxu1 %v816_v9  ;;  %1678 = vmatpush1.msra.mxu0 %v751_v10  ;;  %v848_v9 = vld [vmem:[%s4677_s1 + $0x1358] sm:$0xff]  ;;  %v783_v10 = vld [vmem:[%s4677_s1 + $0x1150] sm:$0xff] }
 0x132   : > { %1755 = vmatpush1.msra.mxu1 %v815_v11  ;;  %1679 = vmatprep.subr.mxu0 %v750_v12  ;;  %v847_v11 = vld [vmem:[%s4677_s1 + $0x1350] sm:$0xff]  ;;  %v782_v12 = vld [vmem:[%s4677_s1 + $0x1148] sm:$0xff] }
 0x133   : > { %1756 = vmatprep.subr.mxu1 %v814_v13  ;;  %1680 = vmatpush1.msra.mxu0 %v749_v14  ;;  %v846_v13 = vld [vmem:[%s4677_s1 + $0x1348] sm:$0xff]  ;;  %v781_v14 = vld [vmem:[%s4677_s1 + $0x1140] sm:$0xff] }
 0x134   : > { %1757 = vmatpush1.msra.mxu1 %v813_v15  ;;  %1681 = vmatprep.subr.mxu0 %v748_v16  ;;  %v845_v15 = vld [vmem:[%s4677_s1 + $0x1340] sm:$0xff]  ;;  %v780_v16 = vld [vmem:[%s4677_s1 + $0x1138] sm:$0xff] }
 0x135   : > { %1758 = vmatprep.subr.mxu1 %v812_v17  ;;  %1682 = vmatpush1.msra.mxu0 %v747_v18  ;;  %v844_v17 = vld [vmem:[%s4677_s1 + $0x1338] sm:$0xff]  ;;  %v779_v18 = vld [vmem:[%s4677_s1 + $0x1130] sm:$0xff] }
 0x136   : > { %1759 = vmatpush1.msra.mxu1 %v811_v19  ;;  %1683 = vmatprep.subr.mxu0 %v746_v20  ;;  %v843_v19 = vld [vmem:[%s4677_s1 + $0x1330] sm:$0xff]  ;;  %v778_v20 = vld [vmem:[%s4677_s1 + $0x1128] sm:$0xff] }
 0x137   : > { %1760 = vmatprep.subr.mxu1 %v810_v21  ;;  %1684 = vmatpush1.msra.mxu0 %v745_v22  ;;  %v842_v21 = vld [vmem:[%s4677_s1 + $0x1328] sm:$0xff]  ;;  %v777_v22 = vld [vmem:[%s4677_s1 + $0x1120] sm:$0xff] }
 0x138   : > { %1761 = vmatpush1.msra.mxu1 %v809_v23  ;;  %1685 = vmatprep.subr.mxu0 %v744_v24  ;;  %v841_v23 = vld [vmem:[%s4677_s1 + $0x1320] sm:$0xff]  ;;  %v776_v24 = vld [vmem:[%s4677_s1 + $0x1118] sm:$0xff] }
 0x139   : > { %1762 = vmatprep.subr.mxu1 %v808_v25  ;;  %1686 = vmatpush1.msra.mxu0 %v743_v26  ;;  %v840_v25 = vld [vmem:[%s4677_s1 + $0x1318] sm:$0xff]  ;;  %v775_v26 = vld [vmem:[%s4677_s1 + $0x1110] sm:$0xff] }
 0x13a   : > { %1763 = vmatpush1.msra.mxu1 %v807_v27  ;;  %1687 = vmatprep.subr.mxu0 %v742_v28  ;;  %v839_v27 = vld [vmem:[%s4677_s1 + $0x1310] sm:$0xff]  ;;  %v774_v28 = vld [vmem:[%s4677_s1 + $0x1108] sm:$0xff] }
 0x13b   : > { %1764 = vmatprep.subr.mxu1 %v806_v29  ;;  %1688 = vmatpush1.msra.mxu0 %v741_v30  ;;  %v838_v29 = vld [vmem:[%s4677_s1 + $0x1308] sm:$0xff]  ;;  %v773_v30 = vld [vmem:[%s4677_s1 + $0x1100] sm:$0xff] }
 0x13c   : > { %1765 = vmatpush1.msra.mxu1 %v805_v31  ;;  %1689 = vmatprep.subr.mxu0 %v804_v32  ;;  %v196_v31 = vld [vmem:[%s2580_s9 + $0x88] sm:$0xff]  ;;  %v837_v32 = vld [vmem:[%s4677_s1 + $0x1300] sm:$0xff] }
 0x13d   : > { %1766 = vmatprep.subr.mxu1 %v868_v33  ;;  %1690 = vmatpush2.msra.mxu0 %v803_v34  ;;  %v198_v33 = vld [vmem:[%s2580_s9 + $0x98] sm:$0xff]  ;;  %v195_v34 = vld [vmem:[%s2580_s9 + $0x80] sm:$0xff] }
 0x13e   : > { %1767 = vmatpush2.msra.mxu1 %v867_v35  ;;  %1691 = vmatprep.subr.mxu0 %v802_v36  ;;  %v197_v35 = vld [vmem:[%s2580_s9 + $0x90] sm:$0xff]  ;;  %v900_v36 = vld [vmem:[%s4677_s1 + $0x14f8] sm:$0xff] }
 0x13f   : > { %1768 = vmatprep.subr.mxu1 %v866_v37  ;;  %1692 = vmatpush2.msra.mxu0 %v801_v38  ;;  %v964_v37 = vld [vmem:[%s4677_s1 + $0x16f8] sm:$0xff]  ;;  %v899_v38 = vld [vmem:[%s4677_s1 + $0x14f0] sm:$0xff] }
 0x140   : > { %1769 = vmatpush2.msra.mxu1 %v865_v39  ;;  %1693 = vmatprep.subr.mxu0 %v800_v40  ;;  %v963_v39 = vld [vmem:[%s4677_s1 + $0x16f0] sm:$0xff]  ;;  %v898_v40 = vld [vmem:[%s4677_s1 + $0x14e8] sm:$0xff] }
 0x141   : > { %1770 = vmatprep.subr.mxu1 %v864_v41  ;;  %1694 = vmatpush2.msra.mxu0 %v799_v42  ;;  %v962_v41 = vld [vmem:[%s4677_s1 + $0x16e8] sm:$0xff]  ;;  %v221_v42 = vld [vmem:[%s2580_s9 + $0x150] sm:$0xff] }
 0x142   : > { %1771 = vmatpush2.msra.mxu1 %v863_v43  ;;  %1695 = vmatprep.subr.mxu0 %v798_v44  ;;  %v897_v43 = vld [vmem:[%s4677_s1 + $0x14e0] sm:$0xff] }
 0x143   : > { %1772 = vmatprep.subr.mxu1 %v862_v45  ;;  %1696 = vmatpush2.msra.mxu0 %v797_v46  ;;  %v961_v44 = vld [vmem:[%s4677_s1 + $0x16e0] sm:$0xff]  ;;  %v220_v45 = vld [vmem:[%s2580_s9 + $0x148] sm:$0xff]  ;;  %v896_v46 = vld [vmem:[%s4677_s1 + $0x14d8] sm:$0xff] }
 0x144   : > { %1773 = vmatpush2.msra.mxu1 %v861_v47  ;;  %1697 = vmatprep.subr.mxu0 %v796_v48  ;;  %v960_v47 = vld [vmem:[%s4677_s1 + $0x16d8] sm:$0xff]  ;;  %v223_v48 = vld [vmem:[%s2580_s9 + $0x160] sm:$0xff] }
 0x145   : > { %1774 = vmatprep.subr.mxu1 %v860_v49  ;;  %1698 = vmatpush2.msra.mxu0 %v795_v50  ;;  %v895_v49 = vld [vmem:[%s4677_s1 + $0x14d0] sm:$0xff] }
 0x146   : > { %1775 = vmatpush2.msra.mxu1 %v859_v51  ;;  %1699 = vmatprep.subr.mxu0 %v794_v52  ;;  %v959_v50 = vld [vmem:[%s4677_s1 + $0x16d0] sm:$0xff]  ;;  %v894_v51 = vld [vmem:[%s4677_s1 + $0x14c8] sm:$0xff]  ;;  %v222_v52 = vld [vmem:[%s2580_s9 + $0x158] sm:$0xff] }
 0x147   : > { %1776 = vmatprep.subr.mxu1 %v858_v53  ;;  %1700 = vmatpush2.msra.mxu0 %v793_v54  ;;  %v958_v53 = vld [vmem:[%s4677_s1 + $0x16c8] sm:$0xff]  ;;  %v893_v54 = vld [vmem:[%s4677_s1 + $0x14c0] sm:$0xff] }
 0x148   : > { %1777 = vmatpush2.msra.mxu1 %v857_v55  ;;  %1701 = vmatprep.subr.mxu0 %v792_v56  ;;  %v957_v55 = vld [vmem:[%s4677_s1 + $0x16c0] sm:$0xff]  ;;  %v892_v56 = vld [vmem:[%s4677_s1 + $0x14b8] sm:$0xff] }
 0x149   : > { %1778 = vmatprep.subr.mxu1 %v856_v57  ;;  %1702 = vmatpush2.msra.mxu0 %v791_v58  ;;  %v956_v57 = vld [vmem:[%s4677_s1 + $0x16b8] sm:$0xff]  ;;  %v891_v58 = vld [vmem:[%s4677_s1 + $0x14b0] sm:$0xff] }
 0x14a   : > { %1779 = vmatpush2.msra.mxu1 %v855_v59  ;;  %1703 = vmatprep.subr.mxu0 %v790_v60  ;;  %v955_v59 = vld [vmem:[%s4677_s1 + $0x16b0] sm:$0xff]  ;;  %v890_v60 = vld [vmem:[%s4677_s1 + $0x14a8] sm:$0xff] }
 0x14b   : > { %1780 = vmatprep.subr.mxu1 %v854_v61  ;;  %1704 = vmatpush2.msra.mxu0 %v789_v62  ;;  %v954_v61 = vld [vmem:[%s4677_s1 + $0x16a8] sm:$0xff]  ;;  %v889_v62 = vld [vmem:[%s4677_s1 + $0x14a0] sm:$0xff] }
 0x14c   : > { %1781 = vmatpush2.msra.mxu1 %v853_v63  ;;  %1705 = vmatprep.subr.mxu0 %v788_v0  ;;  %v953_v63 = vld [vmem:[%s4677_s1 + $0x16a0] sm:$0xff]  ;;  %v888_v0 = vld [vmem:[%s4677_s1 + $0x1498] sm:$0xff] }
 0x14d   : > { %1782 = vmatprep.subr.mxu1 %v852_v1  ;;  %1706 = vmatpush2.msra.mxu0 %v787_v2  ;;  %v952_v1 = vld [vmem:[%s4677_s1 + $0x1698] sm:$0xff]  ;;  %v887_v2 = vld [vmem:[%s4677_s1 + $0x1490] sm:$0xff] }
 0x14e   : > { %1783 = vmatpush2.msra.mxu1 %v851_v3  ;;  %1707 = vmatprep.subr.mxu0 %v786_v4  ;;  %v951_v3 = vld [vmem:[%s4677_s1 + $0x1690] sm:$0xff]  ;;  %v886_v4 = vld [vmem:[%s4677_s1 + $0x1488] sm:$0xff] }
 0x14f   : > { %1784 = vmatprep.subr.mxu1 %v850_v5  ;;  %1708 = vmatpush2.msra.mxu0 %v785_v6  ;;  %v950_v5 = vld [vmem:[%s4677_s1 + $0x1688] sm:$0xff]  ;;  %v885_v6 = vld [vmem:[%s4677_s1 + $0x1480] sm:$0xff] }
 0x150   : > { %1785 = vmatpush2.msra.mxu1 %v849_v7  ;;  %1709 = vmatprep.subr.mxu0 %v784_v8  ;;  %v949_v7 = vld [vmem:[%s4677_s1 + $0x1680] sm:$0xff]  ;;  %v884_v8 = vld [vmem:[%s4677_s1 + $0x1478] sm:$0xff] }
 0x151   : > { %1786 = vmatprep.subr.mxu1 %v848_v9  ;;  %1710 = vmatpush2.msra.mxu0 %v783_v10  ;;  %v948_v9 = vld [vmem:[%s4677_s1 + $0x1678] sm:$0xff]  ;;  %v883_v10 = vld [vmem:[%s4677_s1 + $0x1470] sm:$0xff] }
 0x152   : > { %1787 = vmatpush2.msra.mxu1 %v847_v11  ;;  %1711 = vmatprep.subr.mxu0 %v782_v12  ;;  %v947_v11 = vld [vmem:[%s4677_s1 + $0x1670] sm:$0xff]  ;;  %v882_v12 = vld [vmem:[%s4677_s1 + $0x1468] sm:$0xff] }
 0x153   : > { %1788 = vmatprep.subr.mxu1 %v846_v13  ;;  %1712 = vmatpush2.msra.mxu0 %v781_v14  ;;  %v946_v13 = vld [vmem:[%s4677_s1 + $0x1668] sm:$0xff]  ;;  %v881_v14 = vld [vmem:[%s4677_s1 + $0x1460] sm:$0xff] }
 0x154   : > { %1789 = vmatpush2.msra.mxu1 %v845_v15  ;;  %1713 = vmatprep.subr.mxu0 %v780_v16  ;;  %v945_v15 = vld [vmem:[%s4677_s1 + $0x1660] sm:$0xff]  ;;  %v880_v16 = vld [vmem:[%s4677_s1 + $0x1458] sm:$0xff] }
 0x155   : > { %1790 = vmatprep.subr.mxu1 %v844_v17  ;;  %1714 = vmatpush2.msra.mxu0 %v779_v18  ;;  %v944_v17 = vld [vmem:[%s4677_s1 + $0x1658] sm:$0xff]  ;;  %v879_v18 = vld [vmem:[%s4677_s1 + $0x1450] sm:$0xff] }
 0x156   : > { %1791 = vmatpush2.msra.mxu1 %v843_v19  ;;  %1715 = vmatprep.subr.mxu0 %v778_v20  ;;  %v943_v19 = vld [vmem:[%s4677_s1 + $0x1650] sm:$0xff]  ;;  %v878_v20 = vld [vmem:[%s4677_s1 + $0x1448] sm:$0xff] }
 0x157   : > { %1792 = vmatprep.subr.mxu1 %v842_v21  ;;  %1716 = vmatpush2.msra.mxu0 %v777_v22  ;;  %v942_v21 = vld [vmem:[%s4677_s1 + $0x1648] sm:$0xff]  ;;  %v877_v22 = vld [vmem:[%s4677_s1 + $0x1440] sm:$0xff] }
 0x158   : > { %1793 = vmatpush2.msra.mxu1 %v841_v23  ;;  %1717 = vmatprep.subr.mxu0 %v776_v24  ;;  %v941_v23 = vld [vmem:[%s4677_s1 + $0x1640] sm:$0xff]  ;;  %v876_v24 = vld [vmem:[%s4677_s1 + $0x1438] sm:$0xff] }
 0x159   : > { %1794 = vmatprep.subr.mxu1 %v840_v25  ;;  %1718 = vmatpush2.msra.mxu0 %v775_v26  ;;  %v940_v25 = vld [vmem:[%s4677_s1 + $0x1638] sm:$0xff]  ;;  %v875_v26 = vld [vmem:[%s4677_s1 + $0x1430] sm:$0xff] }
 0x15a   : > { %1795 = vmatpush2.msra.mxu1 %v839_v27  ;;  %1719 = vmatprep.subr.mxu0 %v774_v28  ;;  %v939_v27 = vld [vmem:[%s4677_s1 + $0x1630] sm:$0xff]  ;;  %v874_v28 = vld [vmem:[%s4677_s1 + $0x1428] sm:$0xff] }
 0x15b   : > { %1796 = vmatprep.subr.mxu1 %v838_v29  ;;  %1720 = vmatpush2.msra.mxu0 %v773_v30  ;;  %v938_v29 = vld [vmem:[%s4677_s1 + $0x1628] sm:$0xff]  ;;  %v873_v30 = vld [vmem:[%s4677_s1 + $0x1420] sm:$0xff] }
 0x15c   : > { %1721 = vmatprep.mubr.f32.mxu0 %v196_v31  ;;  %1797 = vmatpush2.msra.mxu1 %v837_v32  ;;  %v937_v31 = vld [vmem:[%s4677_s1 + $0x1620] sm:$0xff]  ;;  %v872_v32 = vld [vmem:[%s4677_s1 + $0x1418] sm:$0xff] }
 0x15d   : > { %1798 = vmatprep.mubr.f32.mxu1 %v198_v33  ;;  %1722 = vmatmul.mubr.f32.vlgmr.msra.gmra.mxu0 %v195_v34  ;;  %v936_v33 = vld [vmem:[%s4677_s1 + $0x1618] sm:$0xff]  ;;  %v871_v34 = vld [vmem:[%s4677_s1 + $0x1410] sm:$0xff] }
 0x15e   : > { %1799 = vmatmul.mubr.f32.vlgmr.msra.gmra.mxu1 %v197_v35  ;;  %1811 = vmatprep.subr.mxu0 %v900_v36  ;;  %v935_v35 = vld [vmem:[%s4677_s1 + $0x1610] sm:$0xff]  ;;  %v870_v36 = vld [vmem:[%s4677_s1 + $0x1408] sm:$0xff] }
 0x15f   : > { %1888 = vmatprep.subr.mxu1 %v964_v37  ;;  %1812 = vmatpush1.msra.mxu0 %v899_v38  ;;  %v934_v37 = vld [vmem:[%s4677_s1 + $0x1608] sm:$0xff]  ;;  %v869_v38 = vld [vmem:[%s4677_s1 + $0x1400] sm:$0xff] }
 0x160   : > { %1889 = vmatpush1.msra.mxu1 %v963_v39  ;;  %1813 = vmatprep.subr.mxu0 %v898_v40  ;;  %v933_v39 = vld [vmem:[%s4677_s1 + $0x1600] sm:$0xff]  ;;  %v932_v40 = vld [vmem:[%s4677_s1 + $0x15f8] sm:$0xff] }
 0x161   : > { %1890 = vmatprep.subr.mxu1 %v962_v41  ;;  %1727 = vmatprep.mubr.f32.mxu0 %v221_v42  ;;  %v996_v41 = vld [vmem:[%s4677_s1 + $0x17f8] sm:$0xff]  ;;  %v931_v42 = vld [vmem:[%s4677_s1 + $0x15f0] sm:$0xff] }
 0x162   : > { %1814 = vmatpush1.msra.mxu0 %v897_v43  ;;  %1891 = vmatpush1.msra.mxu1 %v961_v44  ;;  %v995_v43 = vld [vmem:[%s4677_s1 + $0x17f0] sm:$0xff]  ;;  %v930_v44 = vld [vmem:[%s4677_s1 + $0x15e8] sm:$0xff] }
 0x163   : > { %1728 = vmatmul.mubr.f32.gmra.mxu0 %v220_v45  ;;  %1815 = vmatprep.subr.mxu0 %v896_v46  ;;  %v994_v45 = vld [vmem:[%s4677_s1 + $0x17e8] sm:$0xff]  ;;  %v929_v46 = vld [vmem:[%s4677_s1 + $0x15e0] sm:$0xff] }
 0x164   : > { %1892 = vmatprep.subr.mxu1 %v960_v47  ;;  %1804 = vmatprep.mubr.f32.mxu1 %v223_v48  ;;  %v993_v47 = vld [vmem:[%s4677_s1 + $0x17e0] sm:$0xff]  ;;  %v928_v48 = vld [vmem:[%s4677_s1 + $0x15d8] sm:$0xff] }
 0x165   : > { %1816 = vmatpush1.msra.mxu0 %v895_v49  ;;  %1893 = vmatpush1.msra.mxu1 %v959_v50  ;;  %v992_v49 = vld [vmem:[%s4677_s1 + $0x17d8] sm:$0xff]  ;;  %v927_v50 = vld [vmem:[%s4677_s1 + $0x15d0] sm:$0xff] }
 0x166   : > { %1817 = vmatprep.subr.mxu0 %v894_v51  ;;  %1805 = vmatmul.mubr.f32.gmra.mxu1 %v222_v52  ;;  %v991_v51 = vld [vmem:[%s4677_s1 + $0x17d0] sm:$0xff]  ;;  %v926_v52 = vld [vmem:[%s4677_s1 + $0x15c8] sm:$0xff] }
 0x167   : > { %1894 = vmatprep.subr.mxu1 %v958_v53  ;;  %1818 = vmatpush1.msra.mxu0 %v893_v54  ;;  %v990_v53 = vld [vmem:[%s4677_s1 + $0x17c8] sm:$0xff]  ;;  %v925_v54 = vld [vmem:[%s4677_s1 + $0x15c0] sm:$0xff] }
 0x168   : > { %1895 = vmatpush1.msra.mxu1 %v957_v55  ;;  %1819 = vmatprep.subr.mxu0 %v892_v56  ;;  %v989_v55 = vld [vmem:[%s4677_s1 + $0x17c0] sm:$0xff]  ;;  %v924_v56 = vld [vmem:[%s4677_s1 + $0x15b8] sm:$0xff] }
 0x169   : > { %1896 = vmatprep.subr.mxu1 %v956_v57  ;;  %1820 = vmatpush1.msra.mxu0 %v891_v58  ;;  %v988_v57 = vld [vmem:[%s4677_s1 + $0x17b8] sm:$0xff]  ;;  %v923_v58 = vld [vmem:[%s4677_s1 + $0x15b0] sm:$0xff] }
 0x16a   : > { %1897 = vmatpush1.msra.mxu1 %v955_v59  ;;  %1821 = vmatprep.subr.mxu0 %v890_v60  ;;  %v987_v59 = vld [vmem:[%s4677_s1 + $0x17b0] sm:$0xff]  ;;  %v922_v60 = vld [vmem:[%s4677_s1 + $0x15a8] sm:$0xff] }
 0x16b   : > { %1898 = vmatprep.subr.mxu1 %v954_v61  ;;  %1822 = vmatpush1.msra.mxu0 %v889_v62  ;;  %v986_v61 = vld [vmem:[%s4677_s1 + $0x17a8] sm:$0xff]  ;;  %v921_v62 = vld [vmem:[%s4677_s1 + $0x15a0] sm:$0xff] }
 0x16c   : > { %1899 = vmatpush1.msra.mxu1 %v953_v63  ;;  %1823 = vmatprep.subr.mxu0 %v888_v0  ;;  %v985_v63 = vld [vmem:[%s4677_s1 + $0x17a0] sm:$0xff]  ;;  %v920_v0 = vld [vmem:[%s4677_s1 + $0x1598] sm:$0xff] }
 0x16d   : > { %1900 = vmatprep.subr.mxu1 %v952_v1  ;;  %1824 = vmatpush1.msra.mxu0 %v887_v2  ;;  %v984_v1 = vld [vmem:[%s4677_s1 + $0x1798] sm:$0xff]  ;;  %v919_v2 = vld [vmem:[%s4677_s1 + $0x1590] sm:$0xff] }
 0x16e   : > { %1901 = vmatpush1.msra.mxu1 %v951_v3  ;;  %1825 = vmatprep.subr.mxu0 %v886_v4  ;;  %v983_v3 = vld [vmem:[%s4677_s1 + $0x1790] sm:$0xff]  ;;  %v918_v4 = vld [vmem:[%s4677_s1 + $0x1588] sm:$0xff] }
 0x16f   : > { %1902 = vmatprep.subr.mxu1 %v950_v5  ;;  %1826 = vmatpush1.msra.mxu0 %v885_v6  ;;  %v982_v5 = vld [vmem:[%s4677_s1 + $0x1788] sm:$0xff]  ;;  %v917_v6 = vld [vmem:[%s4677_s1 + $0x1580] sm:$0xff] }
 0x170   : > { %1903 = vmatpush1.msra.mxu1 %v949_v7  ;;  %1827 = vmatprep.subr.mxu0 %v884_v8  ;;  %v981_v7 = vld [vmem:[%s4677_s1 + $0x1780] sm:$0xff]  ;;  %v916_v8 = vld [vmem:[%s4677_s1 + $0x1578] sm:$0xff] }
 0x171   : > { %1904 = vmatprep.subr.mxu1 %v948_v9  ;;  %1828 = vmatpush1.msra.mxu0 %v883_v10  ;;  %v980_v9 = vld [vmem:[%s4677_s1 + $0x1778] sm:$0xff]  ;;  %v915_v10 = vld [vmem:[%s4677_s1 + $0x1570] sm:$0xff] }
 0x172   : > { %1905 = vmatpush1.msra.mxu1 %v947_v11  ;;  %1829 = vmatprep.subr.mxu0 %v882_v12  ;;  %v979_v11 = vld [vmem:[%s4677_s1 + $0x1770] sm:$0xff]  ;;  %v914_v12 = vld [vmem:[%s4677_s1 + $0x1568] sm:$0xff] }
 0x173   : > { %1906 = vmatprep.subr.mxu1 %v946_v13  ;;  %1830 = vmatpush1.msra.mxu0 %v881_v14  ;;  %v978_v13 = vld [vmem:[%s4677_s1 + $0x1768] sm:$0xff]  ;;  %v913_v14 = vld [vmem:[%s4677_s1 + $0x1560] sm:$0xff] }
 0x174   : > { %1907 = vmatpush1.msra.mxu1 %v945_v15  ;;  %1831 = vmatprep.subr.mxu0 %v880_v16  ;;  %v977_v15 = vld [vmem:[%s4677_s1 + $0x1760] sm:$0xff]  ;;  %v912_v16 = vld [vmem:[%s4677_s1 + $0x1558] sm:$0xff] }
 0x175   : > { %1908 = vmatprep.subr.mxu1 %v944_v17  ;;  %1832 = vmatpush1.msra.mxu0 %v879_v18  ;;  %v976_v17 = vld [vmem:[%s4677_s1 + $0x1758] sm:$0xff]  ;;  %v911_v18 = vld [vmem:[%s4677_s1 + $0x1550] sm:$0xff] }
 0x176   : > { %1909 = vmatpush1.msra.mxu1 %v943_v19  ;;  %1833 = vmatprep.subr.mxu0 %v878_v20  ;;  %v975_v19 = vld [vmem:[%s4677_s1 + $0x1750] sm:$0xff]  ;;  %v910_v20 = vld [vmem:[%s4677_s1 + $0x1548] sm:$0xff] }
 0x177   : > { %1910 = vmatprep.subr.mxu1 %v942_v21  ;;  %1834 = vmatpush1.msra.mxu0 %v877_v22  ;;  %v974_v21 = vld [vmem:[%s4677_s1 + $0x1748] sm:$0xff]  ;;  %v909_v22 = vld [vmem:[%s4677_s1 + $0x1540] sm:$0xff] }
 0x178   : > { %1911 = vmatpush1.msra.mxu1 %v941_v23  ;;  %1835 = vmatprep.subr.mxu0 %v876_v24  ;;  %v973_v23 = vld [vmem:[%s4677_s1 + $0x1740] sm:$0xff]  ;;  %v908_v24 = vld [vmem:[%s4677_s1 + $0x1538] sm:$0xff] }
 0x179   : > { %1912 = vmatprep.subr.mxu1 %v940_v25  ;;  %1836 = vmatpush1.msra.mxu0 %v875_v26  ;;  %v972_v25 = vld [vmem:[%s4677_s1 + $0x1738] sm:$0xff]  ;;  %v907_v26 = vld [vmem:[%s4677_s1 + $0x1530] sm:$0xff] }
 0x17a   : > { %1913 = vmatpush1.msra.mxu1 %v939_v27  ;;  %1837 = vmatprep.subr.mxu0 %v874_v28  ;;  %v971_v27 = vld [vmem:[%s4677_s1 + $0x1730] sm:$0xff]  ;;  %v906_v28 = vld [vmem:[%s4677_s1 + $0x1528] sm:$0xff] }
 0x17b   : > { %1914 = vmatprep.subr.mxu1 %v938_v29  ;;  %1838 = vmatpush1.msra.mxu0 %v873_v30  ;;  %v970_v29 = vld [vmem:[%s4677_s1 + $0x1728] sm:$0xff]  ;;  %v905_v30 = vld [vmem:[%s4677_s1 + $0x1520] sm:$0xff] }
 0x17c   : > { %1915 = vmatpush1.msra.mxu1 %v937_v31  ;;  %1839 = vmatprep.subr.mxu0 %v872_v32  ;;  %v969_v31 = vld [vmem:[%s4677_s1 + $0x1720] sm:$0xff]  ;;  %v904_v32 = vld [vmem:[%s4677_s1 + $0x1518] sm:$0xff] }
 0x17d   : > { %1916 = vmatprep.subr.mxu1 %v936_v33  ;;  %1840 = vmatpush1.msra.mxu0 %v871_v34  ;;  %v968_v33 = vld [vmem:[%s4677_s1 + $0x1718] sm:$0xff]  ;;  %v903_v34 = vld [vmem:[%s4677_s1 + $0x1510] sm:$0xff] }
 0x17e   : > { %1917 = vmatpush1.msra.mxu1 %v935_v35  ;;  %1841 = vmatprep.subr.mxu0 %v870_v36  ;;  %v967_v35 = vld [vmem:[%s4677_s1 + $0x1710] sm:$0xff]  ;;  %v902_v36 = vld [vmem:[%s4677_s1 + $0x1508] sm:$0xff] }
 0x17f   : > { %1918 = vmatprep.subr.mxu1 %v934_v37  ;;  %1842 = vmatpush1.msra.mxu0 %v869_v38  ;;  %v966_v37 = vld [vmem:[%s4677_s1 + $0x1708] sm:$0xff]  ;;  %v901_v38 = vld [vmem:[%s4677_s1 + $0x1500] sm:$0xff] }
 0x180   : > { %1919 = vmatpush1.msra.mxu1 %v933_v39  ;;  %1843 = vmatprep.subr.mxu0 %v932_v40  ;;  %v200_v39 = vld [vmem:[%s2580_s9 + $0xa8] sm:$0xff]  ;;  %v965_v40 = vld [vmem:[%s4677_s1 + $0x1700] sm:$0xff] }
 0x181   : > { %1920 = vmatprep.subr.mxu1 %v996_v41  ;;  %1844 = vmatpush2.msra.mxu0 %v931_v42  ;;  %v202_v41 = vld [vmem:[%s2580_s9 + $0xb8] sm:$0xff]  ;;  %v199_v42 = vld [vmem:[%s2580_s9 + $0xa0] sm:$0xff] }
 0x182   : > { %1921 = vmatpush2.msra.mxu1 %v995_v43  ;;  %1845 = vmatprep.subr.mxu0 %v930_v44  ;;  %v201_v43 = vld [vmem:[%s2580_s9 + $0xb0] sm:$0xff]  ;;  %v1028_v44 = vld [vmem:[%s4677_s1 + $0x18f8] sm:$0xff] }
 0x183   : > { %1922 = vmatprep.subr.mxu1 %v994_v45  ;;  %1846 = vmatpush2.msra.mxu0 %v929_v46  ;;  %v1027_v45 = vld [vmem:[%s4677_s1 + $0x18f0] sm:$0xff]  ;;  %v1026_v46 = vld [vmem:[%s4677_s1 + $0x18e8] sm:$0xff] }
 0x184   : > { %1923 = vmatpush2.msra.mxu1 %v993_v47  ;;  %1847 = vmatprep.subr.mxu0 %v928_v48  ;;  %v225_v47 = vld [vmem:[%s2580_s9 + $0x170] sm:$0xff]  ;;  %v1025_v48 = vld [vmem:[%s4677_s1 + $0x18e0] sm:$0xff] }
 0x185   : > { %1924 = vmatprep.subr.mxu1 %v992_v49  ;;  %1848 = vmatpush2.msra.mxu0 %v927_v50  ;;  %v224_v49 = vld [vmem:[%s2580_s9 + $0x168] sm:$0xff]  ;;  %v1024_v50 = vld [vmem:[%s4677_s1 + $0x18d8] sm:$0xff] }
 0x186   : > { %1925 = vmatpush2.msra.mxu1 %v991_v51  ;;  %1849 = vmatprep.subr.mxu0 %v926_v52  ;;  %v227_v51 = vld [vmem:[%s2580_s9 + $0x180] sm:$0xff]  ;;  %v1023_v52 = vld [vmem:[%s4677_s1 + $0x18d0] sm:$0xff] }
 0x187   : > { %1926 = vmatprep.subr.mxu1 %v990_v53  ;;  %1850 = vmatpush2.msra.mxu0 %v925_v54  ;;  %v1022_v53 = vld [vmem:[%s4677_s1 + $0x18c8] sm:$0xff]  ;;  %v226_v54 = vld [vmem:[%s2580_s9 + $0x178] sm:$0xff] }
 0x188   : > { %1927 = vmatpush2.msra.mxu1 %v989_v55  ;;  %1851 = vmatprep.subr.mxu0 %v924_v56  ;;  %v1021_v55 = vld [vmem:[%s4677_s1 + $0x18c0] sm:$0xff]  ;;  %v1020_v56 = vld [vmem:[%s4677_s1 + $0x18b8] sm:$0xff] }
 0x189   : > { %1928 = vmatprep.subr.mxu1 %v988_v57  ;;  %1852 = vmatpush2.msra.mxu0 %v923_v58  ;;  %v1019_v57 = vld [vmem:[%s4677_s1 + $0x18b0] sm:$0xff]  ;;  %v1018_v58 = vld [vmem:[%s4677_s1 + $0x18a8] sm:$0xff] }
 0x18a   : > { %1929 = vmatpush2.msra.mxu1 %v987_v59  ;;  %1853 = vmatprep.subr.mxu0 %v922_v60  ;;  %v1017_v59 = vld [vmem:[%s4677_s1 + $0x18a0] sm:$0xff]  ;;  %v1016_v60 = vld [vmem:[%s4677_s1 + $0x1898] sm:$0xff] }
 0x18b   : > { %1930 = vmatprep.subr.mxu1 %v986_v61  ;;  %1854 = vmatpush2.msra.mxu0 %v921_v62  ;;  %v1015_v61 = vld [vmem:[%s4677_s1 + $0x1890] sm:$0xff]  ;;  %v1014_v62 = vld [vmem:[%s4677_s1 + $0x1888] sm:$0xff] }
 0x18c   : > { %1931 = vmatpush2.msra.mxu1 %v985_v63  ;;  %1855 = vmatprep.subr.mxu0 %v920_v0  ;;  %v1013_v63 = vld [vmem:[%s4677_s1 + $0x1880] sm:$0xff]  ;;  %v1012_v0 = vld [vmem:[%s4677_s1 + $0x1878] sm:$0xff] }
 0x18d   : > { %1932 = vmatprep.subr.mxu1 %v984_v1  ;;  %1856 = vmatpush2.msra.mxu0 %v919_v2  ;;  %v1011_v1 = vld [vmem:[%s4677_s1 + $0x1870] sm:$0xff]  ;;  %v1010_v2 = vld [vmem:[%s4677_s1 + $0x1868] sm:$0xff] }
 0x18e   : > { %1933 = vmatpush2.msra.mxu1 %v983_v3  ;;  %1857 = vmatprep.subr.mxu0 %v918_v4  ;;  %v1009_v3 = vld [vmem:[%s4677_s1 + $0x1860] sm:$0xff]  ;;  %v1008_v4 = vld [vmem:[%s4677_s1 + $0x1858] sm:$0xff] }
 0x18f   : > { %1934 = vmatprep.subr.mxu1 %v982_v5  ;;  %1858 = vmatpush2.msra.mxu0 %v917_v6  ;;  %v1007_v5 = vld [vmem:[%s4677_s1 + $0x1850] sm:$0xff]  ;;  %v1006_v6 = vld [vmem:[%s4677_s1 + $0x1848] sm:$0xff] }
 0x190   : > { %1935 = vmatpush2.msra.mxu1 %v981_v7  ;;  %1859 = vmatprep.subr.mxu0 %v916_v8  ;;  %v1005_v7 = vld [vmem:[%s4677_s1 + $0x1840] sm:$0xff]  ;;  %v1004_v8 = vld [vmem:[%s4677_s1 + $0x1838] sm:$0xff] }
 0x191   : > { %1936 = vmatprep.subr.mxu1 %v980_v9  ;;  %1860 = vmatpush2.msra.mxu0 %v915_v10  ;;  %v1003_v9 = vld [vmem:[%s4677_s1 + $0x1830] sm:$0xff]  ;;  %v1002_v10 = vld [vmem:[%s4677_s1 + $0x1828] sm:$0xff] }
 0x192   : > { %1937 = vmatpush2.msra.mxu1 %v979_v11  ;;  %1861 = vmatprep.subr.mxu0 %v914_v12  ;;  %v1001_v11 = vld [vmem:[%s4677_s1 + $0x1820] sm:$0xff]  ;;  %v1000_v12 = vld [vmem:[%s4677_s1 + $0x1818] sm:$0xff] }
 0x193   : > { %1938 = vmatprep.subr.mxu1 %v978_v13  ;;  %1862 = vmatpush2.msra.mxu0 %v913_v14  ;;  %v999_v13 = vld [vmem:[%s4677_s1 + $0x1810] sm:$0xff]  ;;  %v998_v14 = vld [vmem:[%s4677_s1 + $0x1808] sm:$0xff] }
 0x194   : > { %1939 = vmatpush2.msra.mxu1 %v977_v15  ;;  %1863 = vmatprep.subr.mxu0 %v912_v16  ;;  %v997_v15 = vld [vmem:[%s4677_s1 + $0x1800] sm:$0xff] }
 0x195   : > { %1940 = vmatprep.subr.mxu1 %v976_v17  ;;  %1864 = vmatpush2.msra.mxu0 %v911_v18  ;;  %v203_v16 = vld [vmem:[%s2580_s9 + $0xc0] sm:$0xff]  ;;  %v228_v17 = vld [vmem:[%s2580_s9 + $0x188] sm:$0xff]  ;;  %v2171_v18 = vmov 0.0  }
 0x196   : > { %1941 = vmatpush2.msra.mxu1 %v975_v19  ;;  %1865 = vmatprep.subr.mxu0 %v910_v20  ;;  %v1107_v19 = vpop.f32.mrf.mxu0 }
 0x197   : > { %1942 = vmatprep.subr.mxu1 %v974_v21  ;;  %1866 = vmatpush2.msra.mxu0 %v909_v22 }
 0x198   : > { %1943 = vmatpush2.msra.mxu1 %v973_v23  ;;  %1867 = vmatprep.subr.mxu0 %v908_v24  ;;  %v1109_v20 = vpop.f32.mrf.mxu0  ;;  %v1184_v23 = vpop.f32.mrf.mxu1 }
 0x199   : > { %1944 = vmatprep.subr.mxu1 %v972_v25  ;;  %1868 = vmatpush2.msra.mxu0 %v907_v26 }
 0x19a   : > { %1945 = vmatpush2.msra.mxu1 %v971_v27  ;;  %1869 = vmatprep.subr.mxu0 %v906_v28  ;;  %v1113_v21 = vpop.f32.mrf.mxu0  ;;  %v1186_v25 = vpop.f32.mrf.mxu1 }
 0x19b   : > { %1946 = vmatprep.subr.mxu1 %v970_v29  ;;  %1870 = vmatpush2.msra.mxu0 %v905_v30 }
 0x19c   : > { %1947 = vmatpush2.msra.mxu1 %v969_v31  ;;  %1871 = vmatprep.subr.mxu0 %v904_v32  ;;  %v1115_v22 = vpop.f32.mrf.mxu0  ;;  %v1190_v27 = vpop.f32.mrf.mxu1 }
 0x19d   : > { %1948 = vmatprep.subr.mxu1 %v968_v33  ;;  %1872 = vmatpush2.msra.mxu0 %v903_v34 }
 0x19e   : > { %1949 = vmatpush2.msra.mxu1 %v967_v35  ;;  %1873 = vmatprep.subr.mxu0 %v902_v36  ;;  %v1261_v24 = vpop.f32.mrf.mxu0  ;;  %v1192_v29 = vpop.f32.mrf.mxu1 }
 0x19f   : > { %1950 = vmatprep.subr.mxu1 %v966_v37  ;;  %1874 = vmatpush2.msra.mxu0 %v901_v38  ;;  %v1031_v37 = vlaneseq }
 0x1a0   : > { %1875 = vmatprep.mubr.f32.mxu0 %v200_v39  ;;  %1951 = vmatpush2.msra.mxu1 %v965_v40  ;;  %v1263_v26 = vpop.f32.mrf.mxu0  ;;  %v1338_v31 = vpop.f32.mrf.mxu1 }
 0x1a1   : > { %1952 = vmatprep.mubr.f32.mxu1 %v202_v41  ;;  %1876 = vmatmul.mubr.f32.vlgmr.msra.gmra.mxu0 %v199_v42  ;;  %v1032_v41 = vshrl.u32 %v1031_v37, 7 }
 0x1a2   : > { %1953 = vmatmul.mubr.f32.vlgmr.msra.gmra.mxu1 %v201_v43  ;;  %1965 = vmatprep.subr.mxu0 %v1028_v44  ;;  %v1267_v28 = vpop.f32.mrf.mxu0  ;;  %v1340_v33 = vpop.f32.mrf.mxu1 }
 0x1a3   : > { %2121 = vmatprep.subr.mxu1 %v1028_v44  ;;  %1966 = vmatpush1.msra.mxu0 %v1027_v45  ;;  %v1033_v44 = vsub.s32 0, %v1032_v41 }
 0x1a4   : > { %2137 = vmatpush1.msra.mxu1 %v1027_v45  ;;  %1967 = vmatprep.subr.mxu0 %v1026_v46  ;;  %v1269_v30 = vpop.f32.mrf.mxu0  ;;  %v1344_v35 = vpop.f32.mrf.mxu1  ;;  %v1029_v45 = vld [vmem:[%s4678_s2] sm:$0x3] }
 0x1a5   : > { %2122 = vmatprep.subr.mxu1 %v1026_v46  ;;  %1881 = vmatprep.mubr.f32.mxu0 %v225_v47 }
 0x1a6   : > { %1968 = vmatpush1.msra.mxu0 %v1025_v48  ;;  %2138 = vmatpush1.msra.mxu1 %v1025_v48  ;;  %v1415_v32 = vpop.f32.mrf.mxu0  ;;  %v1346_v38 = vpop.f32.mrf.mxu1  ;;  %v1037_v48 = vsub.s32 1, %v1032_v41 }
 0x1a7   : > { %1882 = vmatmul.mubr.f32.gmra.mxu0 %v224_v49  ;;  %1969 = vmatprep.subr.mxu0 %v1024_v50  ;;  %v1034_v49 = vrot.slane %v1029_v45, %v1033_v44 }
 0x1a8   : > { %2123 = vmatprep.subr.mxu1 %v1024_v50  ;;  %1958 = vmatprep.mubr.f32.mxu1 %v227_v51  ;;  %v1417_v34 = vpop.f32.mrf.mxu0  ;;  %v1492_v39 = vpop.f32.mrf.mxu1 }
 0x1a9   : > { %1970 = vmatpush1.msra.mxu0 %v1023_v52  ;;  %2139 = vmatpush1.msra.mxu1 %v1023_v52  ;;  %v1038_v52 = vrot.slane %v1029_v45, %v1037_v48 }
 0x1aa   : > { %1971 = vmatprep.subr.mxu0 %v1022_v53  ;;  %1959 = vmatmul.mubr.f32.gmra.mxu1 %v226_v54  ;;  %v1421_v36 = vpop.f32.mrf.mxu0  ;;  %v1494_v43 = vpop.f32.mrf.mxu1  ;;  %v1108_v54 = vadd.f32 %v1107_v19, %v1034_v49 }
 0x1ab   : > { %2124 = vmatprep.subr.mxu1 %v1022_v53  ;;  %1972 = vmatpush1.msra.mxu0 %v1021_v55 }
 0x1ac   : > { %2140 = vmatpush1.msra.mxu1 %v1021_v55  ;;  %1973 = vmatprep.subr.mxu0 %v1020_v56  ;;  %v1423_v40 = vpop.f32.mrf.mxu0  ;;  %v1498_v46 = vpop.f32.mrf.mxu1  ;;  %v1114_v55 = vadd.f32 %v1113_v21, %v1034_v49 }
 0x1ad   : > { %2125 = vmatprep.subr.mxu1 %v1020_v56  ;;  %1974 = vmatpush1.msra.mxu0 %v1019_v57 }
 0x1ae   : > { %2141 = vmatpush1.msra.mxu1 %v1019_v57  ;;  %1975 = vmatprep.subr.mxu0 %v1018_v58  ;;  %v1500_v50 = vpop.f32.mrf.mxu1  ;;  %v1110_v57 = vadd.f32 %v1109_v20, %v1038_v52 }
 0x1af   : > { %2126 = vmatprep.subr.mxu1 %v1018_v58  ;;  %1976 = vmatpush1.msra.mxu0 %v1017_v59  ;;  %v1116_v58 = vadd.f32 %v1115_v22, %v1038_v52 }
 0x1b0   : > { %2142 = vmatpush1.msra.mxu1 %v1017_v59  ;;  %1977 = vmatprep.subr.mxu0 %v1016_v60 }
 0x1b1   : > { %2127 = vmatprep.subr.mxu1 %v1016_v60  ;;  %1978 = vmatpush1.msra.mxu0 %v1015_v61 }
 0x1b2   : > { %2143 = vmatpush1.msra.mxu1 %v1015_v61  ;;  %1979 = vmatprep.subr.mxu0 %v1014_v62  ;;  %v1185_v61 = vadd.f32 %v1184_v23, %v1108_v54 }
 0x1b3   : > { %2128 = vmatprep.subr.mxu1 %v1014_v62  ;;  %1980 = vmatpush1.msra.mxu0 %v1013_v63  ;;  %v1191_v62 = vadd.f32 %v1190_v27, %v1114_v55 }
 0x1b4   : > { %2144 = vmatpush1.msra.mxu1 %v1013_v63  ;;  %1981 = vmatprep.subr.mxu0 %v1012_v0 }
 0x1b5   : > { %2129 = vmatprep.subr.mxu1 %v1012_v0  ;;  %1982 = vmatpush1.msra.mxu0 %v1011_v1  ;;  %v1187_v0 = vadd.f32 %v1186_v25, %v1110_v57 }
 0x1b6   : > { %2145 = vmatpush1.msra.mxu1 %v1011_v1  ;;  %1983 = vmatprep.subr.mxu0 %v1010_v2  ;;  %v1193_v1 = vadd.f32 %v1192_v29, %v1116_v58 }
 0x1b7   : > { %2130 = vmatprep.subr.mxu1 %v1010_v2  ;;  %1984 = vmatpush1.msra.mxu0 %v1009_v3  ;;  %v1262_v2 = vadd.f32 %v1261_v24, %v1185_v61 }
 0x1b8   : > { %2146 = vmatpush1.msra.mxu1 %v1009_v3  ;;  %1985 = vmatprep.subr.mxu0 %v1008_v4  ;;  %v1268_v3 = vadd.f32 %v1267_v28, %v1191_v62 }
 0x1b9   : > { %2131 = vmatprep.subr.mxu1 %v1008_v4  ;;  %1986 = vmatpush1.msra.mxu0 %v1007_v5 }
 0x1ba   : > { %2147 = vmatpush1.msra.mxu1 %v1007_v5  ;;  %1987 = vmatprep.subr.mxu0 %v1006_v6  ;;  %v1264_v5 = vadd.f32 %v1263_v26, %v1187_v0 }
 0x1bb   : > { %2132 = vmatprep.subr.mxu1 %v1006_v6  ;;  %1988 = vmatpush1.msra.mxu0 %v1005_v7  ;;  %v1270_v6 = vadd.f32 %v1269_v30, %v1193_v1 }
 0x1bc   : > { %2148 = vmatpush1.msra.mxu1 %v1005_v7  ;;  %1989 = vmatprep.subr.mxu0 %v1004_v8 }
 0x1bd   : > { %2133 = vmatprep.subr.mxu1 %v1004_v8  ;;  %1990 = vmatpush1.msra.mxu0 %v1003_v9  ;;  %v1339_v8 = vadd.f32 %v1338_v31, %v1262_v2 }
 0x1be   : > { %2149 = vmatpush1.msra.mxu1 %v1003_v9  ;;  %1991 = vmatprep.subr.mxu0 %v1002_v10  ;;  %v1345_v9 = vadd.f32 %v1344_v35, %v1268_v3 }
 0x1bf   : > { %2134 = vmatprep.subr.mxu1 %v1002_v10  ;;  %1992 = vmatpush1.msra.mxu0 %v1001_v11 }
 0x1c0   : > { %2150 = vmatpush1.msra.mxu1 %v1001_v11  ;;  %1993 = vmatprep.subr.mxu0 %v1000_v12 }
 0x1c1   : > { %2135 = vmatprep.subr.mxu1 %v1000_v12  ;;  %1994 = vmatpush1.msra.mxu0 %v999_v13  ;;  %v1341_v12 = vadd.f32 %v1340_v33, %v1264_v5 }
 0x1c2   : > { %2151 = vmatpush1.msra.mxu1 %v999_v13  ;;  %1995 = vmatprep.subr.mxu0 %v998_v14  ;;  %v1347_v13 = vadd.f32 %v1346_v38, %v1270_v6 }
 0x1c3   : > { %2136 = vmatprep.subr.mxu1 %v998_v14  ;;  %1996 = vmatpush1.msra.mxu0 %v997_v15  ;;  %v1416_v14 = vadd.f32 %v1415_v32, %v1339_v8 }
 0x1c4   : > { %2152 = vmatpush1.msra.mxu1 %v997_v15  ;;  %2029 = vmatprep.mubr.f32.mxu0 %v2171_v18  ;;  %v1422_v15 = vadd.f32 %v1421_v36, %v1345_v9 }
 0x1c5   : > { %2035 = vmatprep.mubr.f32.mxu1 %v2171_v18  ;;  %2030 = vmatmul.mubr.f32.vlgmr.msra.gmra.mxu0 %v203_v16  ;;  %v1418_v16 = vadd.f32 %v1417_v34, %v1341_v12  ;;  %v1493_v20 = vadd.f32 %v1492_v39, %v1416_v14 }
 0x1c6   : > { %2036 = vmatmul.mubr.f32.vlgmr.msra.gmra.mxu1 %v228_v17  ;;  %v1424_v17 = vadd.f32 %v1423_v40, %v1347_v13  ;;  %v1499_v21 = vadd.f32 %v1498_v46, %v1422_v15 }
 0x1c7   : > { %v1495_v24 = vadd.f32 %v1494_v43, %v1418_v16 }
 0x1c8   : > { %v1501_v25 = vadd.f32 %v1500_v50, %v1424_v17 }
 0x1d9   : > { %v1569_v42 = vpop.f32.mrf.mxu0 }
 0x1da   : > { %v1646_v53 = vpop.f32.mrf.mxu1  ;;  %v1570_v26 = vadd.f32 %v1569_v42, %v1493_v20 }
 0x1db   : > { %v1571_v47 = vpop.f32.mrf.mxu0 }
 0x1dc   : > { %v1648_v59 = vpop.f32.mrf.mxu1  ;;  %v1572_v28 = vadd.f32 %v1571_v47, %v1495_v24  ;;  %v1647_v33 = vadd.f32 %v1646_v53, %v1570_v26 }
 0x1de   : > { %v1649_v36 = vadd.f32 %v1648_v59, %v1572_v28 }
 0x1df   : > { %v1575_v51 = vpop.f32.mrf.mxu0 }
 0x1e0   : > { %v1576_v27 = vadd.f32 %v1575_v51, %v1499_v21 }
 0x1e1   : > { %v1577_v56 = vpop.f32.mrf.mxu0 }
 0x1e2   : > { %v1652_v63 = vpop.f32.mrf.mxu1  ;;  %v1578_v29 = vadd.f32 %v1577_v56, %v1501_v25 }
 0x1e3   : > { %v1653_v35 = vadd.f32 %v1652_v63, %v1576_v27 }
 0x1e4   : > { %v1654_v7 = vpop.f32.mrf.mxu1 }
 0x1e5   : > { %v1655_v34 = vadd.f32 %v1654_v7, %v1578_v29 }
 0x21d   : > { %v1723_v60 = vpop.f32.mrf.mxu0 }
 0x21e   : > { %v1800_v10 = vpop.f32.mrf.mxu1  ;;  %v1724_v37 = vadd.f32 %v1723_v60, %v1647_v33 }
 0x21f   : > { %v1725_v4 = vpop.f32.mrf.mxu0 }
 0x220   : > { %v1802_v18 = vpop.f32.mrf.mxu1  ;;  %v1726_v39 = vadd.f32 %v1725_v4, %v1649_v36  ;;  %v1801_v43 = vadd.f32 %v1800_v10, %v1724_v37 }
 0x222   : > { %v1803_v47 = vadd.f32 %v1802_v18, %v1726_v39 }
 0x223   : > { %v1729_v11 = vpop.f32.mrf.mxu0 }
 0x224   : > { %v1730_v38 = vadd.f32 %v1729_v11, %v1653_v35 }
 0x225   : > { %v1731_v19 = vpop.f32.mrf.mxu0 }
 0x226   : > { %v1806_v22 = vpop.f32.mrf.mxu1  ;;  %v1732_v41 = vadd.f32 %v1731_v19, %v1655_v34 }
 0x227   : > { %v1807_v45 = vadd.f32 %v1806_v22, %v1730_v38 }
 0x228   : > { %v1808_v30 = vpop.f32.mrf.mxu1 }
 0x229   : > { %v1809_v48 = vadd.f32 %v1808_v30, %v1732_v41 }
 0x261   : > { %v1877_v23 = vpop.f32.mrf.mxu0 }
 0x262   : > { %v1954_v32 = vpop.f32.mrf.mxu1  ;;  %v1878_v49 = vadd.f32 %v1877_v23, %v1801_v43 }
 0x263   : > { %v1879_v31 = vpop.f32.mrf.mxu0 }
 0x264   : > { %v1956_v44 = vpop.f32.mrf.mxu1  ;;  %v1880_v51 = vadd.f32 %v1879_v31, %v1803_v47  ;;  %v1955_v54 = vadd.f32 %v1954_v32, %v1878_v49 }
 0x266   : > { %v1957_v58 = vadd.f32 %v1956_v44, %v1880_v51 }
 0x267   : > { %v1883_v40 = vpop.f32.mrf.mxu0 }
 0x268   : > { %v1884_v50 = vadd.f32 %v1883_v40, %v1807_v45 }
 0x269   : > { %v1885_v42 = vpop.f32.mrf.mxu0 }
 0x26a   : > { %v1960_v46 = vpop.f32.mrf.mxu1  ;;  %v1886_v52 = vadd.f32 %v1885_v42, %v1809_v48 }
 0x26b   : > { %v1961_v55 = vadd.f32 %v1960_v46, %v1884_v50 }
 0x26c   : > { %v1962_v53 = vpop.f32.mrf.mxu1 }
 0x26d   : > { %v1963_v59 = vadd.f32 %v1962_v53, %v1886_v52 }
 0x285   : > { %v2031_v56 = vpop.f32.mrf.mxu0 }
 0x286   : > { %v2037_v57 = vpop.f32.mrf.mxu1  ;;  %v2032_v60 = vadd.f32 %v2031_v56, %v1955_v54 }
 0x287   : > { %v2038_v61 = vadd.f32 %v2037_v57, %v1961_v55  ;;  %v2033_v62 = vpop.f32.mrf.mxu0 }
 0x288   : > { %v2039_v63 = vpop.f32.mrf.mxu1  ;;  %v2042_v0 = vmax.f32 %v2032_v60, 0.0  ;;  %v2034_v2 = vadd.f32 %v2033_v62, %v1957_v58 }
 0x289   : > { %v2044_v1 = vmax.f32 %v2038_v61, 0.0  ;;  %v2040_v3 = vadd.f32 %v2039_v63, %v1963_v59 }
 0x28a   : > { %2046 = vst [vmem:[%s177_s29] sm:$0xff] %v2042_v0  ;;  %v2043_v4 = vmax.f32 %v2034_v2, 0.0 }
 0x28b   : > { %v2045_v5 = vmax.f32 %v2040_v3, 0.0  ;;  %2048 = vst [vmem:[%s177_s29 + $0x10] sm:$0xff] %v2044_v1 }
 0x28c   : > { %2047 = vst [vmem:[%s177_s29 + $0x8] sm:$0xff] %v2043_v4 }
 0x28d   : > { %2049 = vst [vmem:[%s177_s29 + $0x18] sm:$0xff] %v2045_v5 }
 0x28e PF: > { %s13_s12 = sadd.s32 1, %s2169_s12  }
 0x28f   : > { %p10_p4 = scmp.ge.s32.totalorder %s13_s12, 4  }
 0x291   :  { %12 = sbr.rel (!%p10_p4) target bundleno = 1 (0x1), region = 62 }

// kernel: visual_encoder_forward.17
= control target key start
LH: loop header
LB: loop body
LE: loop exit
PB: predicated region body
PF: predicated region fallthrough
CT: control target
= control target key end

     0   :  { %s1139_s12 = smov 0   ;;  %s2187_s0 = inlined_call_operand.vmem [shape: f32[2,32,256], index: 0, kind: input, shape index: {}]   ;;  %s2188_s1 = inlined_call_operand.vmem [shape: f32[1280,256], index: 1, kind: input, shape index: {}]   ;;  %s2189_s2 = inlined_call_operand.vmem [shape: f32[1,256], index: 2, kind: input, shape index: {}]   ;;  %s2190_s3 = inlined_call_operand.vmem [shape: f32[2,16,256], index: 3, kind: output, shape index: {}]  }
   0x1 LB: > { %s1026_s13 = sadd.s32 4294967295, %s1117_s12   ;;  %p1030_p0 = scmp.ge.s32.totalorder %s1117_s12, 1  ;;  %s1117_s12 = sphi %s1139_s12, %s13_s12  }
   0x2   : > { %p137_p1 = scmp.lt.s32.totalorder %s1117_s12, 3 }
   0x4   : > { %p138_p2 = pnand %p1030_p0, %p137_p1 }
   0x5   : > { %p1407_p3 = scmp.lt.s32.totalorder (!%p138_p2), %s1026_s13, 1 }
   0x6   : > { %141 = sbr.rel (%p138_p2) target bundleno = 416 (0x1a0), region = 32 }
   0xb   : > { %v274_v0 = vld [vmem:[%s2188_s1 + $0x2f8] sm:$0xff]  ;;  %v273_v2 = vld [vmem:[%s2188_s1 + $0x2f0] sm:$0xff]  ;;  %v272_v4 = vld [vmem:[%s2188_s1 + $0x2e8] sm:$0xff]  ;;  %s2193_s13 = smov (!%p1407_p3, %s1026_s13), 1  ;;  %vm313_vm0 = vcmask 1043456  }
   0xc   : > { %v206_v1 = vld [vmem:[%s2188_s1 + $0xf8] sm:$0xff]  ;;  %328 = vmatprep.subr.mxu0 %v274_v0  ;;  %v205_v3 = vld [vmem:[%s2188_s1 + $0xf0] sm:$0xff]  ;;  %v204_v5 = vld [vmem:[%s2188_s1 + $0xe8] sm:$0xff]  ;;  %s1037_s19 = sshll.u32 %s2193_s13, 6  ;;  %s1038_s27 = sshll.u32 %s2193_s13, 5 }
   0xd   : > { %405 = vmatprep.subr.mxu1 %v206_v1  ;;  %329 = vmatpush1.msra.mxu0 %v273_v2  ;;  %v271_v6 = vld [vmem:[%s2188_s1 + $0x2e0] sm:$0xff]  ;;  %v270_v8 = vld [vmem:[%s2188_s1 + $0x2d8] sm:$0xff]  ;;  %v269_v10 = vld [vmem:[%s2188_s1 + $0x2d0] sm:$0xff]  ;;  %s1487_s7 = scalar_lea.vmem %s2187_s0, %s1037_s19  ;;  %s170_s30 = scalar_lea.vmem %s2190_s3, %s1038_s27 }
   0xe   : > { %406 = vmatpush1.msra.mxu1 %v205_v3  ;;  %v203_v7 = vld [vmem:[%s2188_s1 + $0xe0] sm:$0xff]  ;;  %330 = vmatprep.subr.mxu0 %v272_v4  ;;  %v202_v9 = vld [vmem:[%s2188_s1 + $0xd8] sm:$0xff]  ;;  %v201_v11 = vld [vmem:[%s2188_s1 + $0xd0] sm:$0xff] }
   0xf   : > { %407 = vmatprep.subr.mxu1 %v204_v5  ;;  %331 = vmatpush1.msra.mxu0 %v271_v6  ;;  %v268_v12 = vld [vmem:[%s2188_s1 + $0x2c8] sm:$0xff]  ;;  %v267_v14 = vld [vmem:[%s2188_s1 + $0x2c0] sm:$0xff]  ;;  %v266_v16 = vld [vmem:[%s2188_s1 + $0x2b8] sm:$0xff] }
  0x10   : > { %408 = vmatpush1.msra.mxu1 %v203_v7  ;;  %v200_v13 = vld [vmem:[%s2188_s1 + $0xc8] sm:$0xff]  ;;  %332 = vmatprep.subr.mxu0 %v270_v8  ;;  %v199_v15 = vld [vmem:[%s2188_s1 + $0xc0] sm:$0xff]  ;;  %v198_v17 = vld [vmem:[%s2188_s1 + $0xb8] sm:$0xff] }
  0x11   : > { %409 = vmatprep.subr.mxu1 %v202_v9  ;;  %333 = vmatpush1.msra.mxu0 %v269_v10  ;;  %v265_v18 = vld [vmem:[%s2188_s1 + $0x2b0] sm:$0xff]  ;;  %v264_v20 = vld [vmem:[%s2188_s1 + $0x2a8] sm:$0xff]  ;;  %v263_v22 = vld [vmem:[%s2188_s1 + $0x2a0] sm:$0xff] }
  0x12   : > { %410 = vmatpush1.msra.mxu1 %v201_v11  ;;  %334 = vmatprep.subr.mxu0 %v268_v12  ;;  %v197_v19 = vld [vmem:[%s2188_s1 + $0xb0] sm:$0xff]  ;;  %v196_v21 = vld [vmem:[%s2188_s1 + $0xa8] sm:$0xff]  ;;  %v195_v23 = vld [vmem:[%s2188_s1 + $0xa0] sm:$0xff] }
  0x13   : > { %411 = vmatprep.subr.mxu1 %v200_v13  ;;  %335 = vmatpush1.msra.mxu0 %v267_v14  ;;  %v262_v24 = vld [vmem:[%s2188_s1 + $0x298] sm:$0xff]  ;;  %v261_v26 = vld [vmem:[%s2188_s1 + $0x290] sm:$0xff]  ;;  %v260_v28 = vld [vmem:[%s2188_s1 + $0x288] sm:$0xff] }
  0x14   : > { %412 = vmatpush1.msra.mxu1 %v199_v15  ;;  %336 = vmatprep.subr.mxu0 %v266_v16  ;;  %v194_v25 = vld [vmem:[%s2188_s1 + $0x98] sm:$0xff]  ;;  %v193_v27 = vld [vmem:[%s2188_s1 + $0x90] sm:$0xff]  ;;  %v192_v29 = vld [vmem:[%s2188_s1 + $0x88] sm:$0xff] }
  0x15   : > { %413 = vmatprep.subr.mxu1 %v198_v17  ;;  %337 = vmatpush1.msra.mxu0 %v265_v18  ;;  %v259_v30 = vld [vmem:[%s2188_s1 + $0x280] sm:$0xff]  ;;  %v258_v32 = vld [vmem:[%s2188_s1 + $0x278] sm:$0xff]  ;;  %v257_v34 = vld [vmem:[%s2188_s1 + $0x270] sm:$0xff] }
  0x16   : > { %414 = vmatpush1.msra.mxu1 %v197_v19  ;;  %338 = vmatprep.subr.mxu0 %v264_v20  ;;  %v191_v31 = vld [vmem:[%s2188_s1 + $0x80] sm:$0xff]  ;;  %v190_v33 = vld [vmem:[%s2188_s1 + $0x78] sm:$0xff]  ;;  %v189_v35 = vld [vmem:[%s2188_s1 + $0x70] sm:$0xff] }
  0x17   : > { %415 = vmatprep.subr.mxu1 %v196_v21  ;;  %339 = vmatpush1.msra.mxu0 %v263_v22  ;;  %v256_v36 = vld [vmem:[%s2188_s1 + $0x268] sm:$0xff]  ;;  %v255_v38 = vld [vmem:[%s2188_s1 + $0x260] sm:$0xff]  ;;  %v254_v40 = vld [vmem:[%s2188_s1 + $0x258] sm:$0xff] }
  0x18   : > { %416 = vmatpush1.msra.mxu1 %v195_v23  ;;  %340 = vmatprep.subr.mxu0 %v262_v24  ;;  %v188_v37 = vld [vmem:[%s2188_s1 + $0x68] sm:$0xff]  ;;  %v187_v39 = vld [vmem:[%s2188_s1 + $0x60] sm:$0xff]  ;;  %v186_v41 = vld [vmem:[%s2188_s1 + $0x58] sm:$0xff] }
  0x19   : > { %417 = vmatprep.subr.mxu1 %v194_v25  ;;  %341 = vmatpush1.msra.mxu0 %v261_v26  ;;  %v253_v42 = vld [vmem:[%s2188_s1 + $0x250] sm:$0xff]  ;;  %v252_v44 = vld [vmem:[%s2188_s1 + $0x248] sm:$0xff]  ;;  %v251_v46 = vld [vmem:[%s2188_s1 + $0x240] sm:$0xff] }
  0x1a   : > { %418 = vmatpush1.msra.mxu1 %v193_v27  ;;  %342 = vmatprep.subr.mxu0 %v260_v28  ;;  %v185_v43 = vld [vmem:[%s2188_s1 + $0x50] sm:$0xff]  ;;  %v184_v45 = vld [vmem:[%s2188_s1 + $0x48] sm:$0xff]  ;;  %v183_v47 = vld [vmem:[%s2188_s1 + $0x40] sm:$0xff] }
  0x1b   : > { %419 = vmatprep.subr.mxu1 %v192_v29  ;;  %343 = vmatpush1.msra.mxu0 %v259_v30  ;;  %v250_v48 = vld [vmem:[%s2188_s1 + $0x238] sm:$0xff]  ;;  %v249_v50 = vld [vmem:[%s2188_s1 + $0x230] sm:$0xff]  ;;  %v248_v52 = vld [vmem:[%s2188_s1 + $0x228] sm:$0xff] }
  0x1c   : > { %420 = vmatpush1.msra.mxu1 %v191_v31  ;;  %344 = vmatprep.subr.mxu0 %v258_v32  ;;  %v182_v49 = vld [vmem:[%s2188_s1 + $0x38] sm:$0xff]  ;;  %v181_v51 = vld [vmem:[%s2188_s1 + $0x30] sm:$0xff]  ;;  %v180_v53 = vld [vmem:[%s2188_s1 + $0x28] sm:$0xff] }
  0x1d   : > { %421 = vmatprep.subr.mxu1 %v190_v33  ;;  %345 = vmatpush1.msra.mxu0 %v257_v34  ;;  %v247_v54 = vld [vmem:[%s2188_s1 + $0x220] sm:$0xff]  ;;  %v246_v56 = vld [vmem:[%s2188_s1 + $0x218] sm:$0xff]  ;;  %v245_v58 = vld [vmem:[%s2188_s1 + $0x210] sm:$0xff] }
  0x1e   : > { %422 = vmatpush1.msra.mxu1 %v189_v35  ;;  %346 = vmatprep.subr.mxu0 %v256_v36  ;;  %v179_v55 = vld [vmem:[%s2188_s1 + $0x20] sm:$0xff]  ;;  %v178_v57 = vld [vmem:[%s2188_s1 + $0x18] sm:$0xff]  ;;  %v177_v59 = vld [vmem:[%s2188_s1 + $0x10] sm:$0xff] }
  0x1f   : > { %423 = vmatprep.subr.mxu1 %v188_v37  ;;  %347 = vmatpush1.msra.mxu0 %v255_v38  ;;  %v244_v60 = vld [vmem:[%s2188_s1 + $0x208] sm:$0xff]  ;;  %v243_v62 = vld [vmem:[%s2188_s1 + $0x200] sm:$0xff]  ;;  %v306_v0 = vld [vmem:[%s2188_s1 + $0x3f8] sm:$0xff] }
  0x20   : > { %424 = vmatpush1.msra.mxu1 %v187_v39  ;;  %348 = vmatprep.subr.mxu0 %v254_v40  ;;  %v176_v61 = vld [vmem:[%s2188_s1 + $0x8] sm:$0xff]  ;;  %v175_v63 = vld [vmem:[%s2188_s1] sm:$0xff]  ;;  %v238_v1 = vld [vmem:[%s2188_s1 + $0x1f8] sm:$0xff] }
  0x21   : > { %425 = vmatprep.subr.mxu1 %v186_v41  ;;  %349 = vmatpush1.msra.mxu0 %v253_v42  ;;  %v305_v2 = vld [vmem:[%s2188_s1 + $0x3f0] sm:$0xff]  ;;  %v304_v4 = vld [vmem:[%s2188_s1 + $0x3e8] sm:$0xff]  ;;  %v303_v6 = vld [vmem:[%s2188_s1 + $0x3e0] sm:$0xff] }
  0x22   : > { %426 = vmatpush1.msra.mxu1 %v185_v43  ;;  %350 = vmatprep.subr.mxu0 %v252_v44  ;;  %v237_v3 = vld [vmem:[%s2188_s1 + $0x1f0] sm:$0xff]  ;;  %v236_v5 = vld [vmem:[%s2188_s1 + $0x1e8] sm:$0xff]  ;;  %v235_v7 = vld [vmem:[%s2188_s1 + $0x1e0] sm:$0xff] }
  0x23   : > { %427 = vmatprep.subr.mxu1 %v184_v45  ;;  %351 = vmatpush1.msra.mxu0 %v251_v46  ;;  %v302_v8 = vld [vmem:[%s2188_s1 + $0x3d8] sm:$0xff]  ;;  %v301_v10 = vld [vmem:[%s2188_s1 + $0x3d0] sm:$0xff]  ;;  %v300_v12 = vld [vmem:[%s2188_s1 + $0x3c8] sm:$0xff] }
  0x24   : > { %428 = vmatpush1.msra.mxu1 %v183_v47  ;;  %352 = vmatprep.subr.mxu0 %v250_v48  ;;  %v234_v9 = vld [vmem:[%s2188_s1 + $0x1d8] sm:$0xff]  ;;  %v233_v11 = vld [vmem:[%s2188_s1 + $0x1d0] sm:$0xff]  ;;  %v232_v13 = vld [vmem:[%s2188_s1 + $0x1c8] sm:$0xff] }
  0x25   : > { %429 = vmatprep.subr.mxu1 %v182_v49  ;;  %353 = vmatpush1.msra.mxu0 %v249_v50  ;;  %v299_v14 = vld [vmem:[%s2188_s1 + $0x3c0] sm:$0xff]  ;;  %v298_v16 = vld [vmem:[%s2188_s1 + $0x3b8] sm:$0xff]  ;;  %v297_v18 = vld [vmem:[%s2188_s1 + $0x3b0] sm:$0xff] }
  0x26   : > { %430 = vmatpush1.msra.mxu1 %v181_v51  ;;  %354 = vmatprep.subr.mxu0 %v248_v52  ;;  %v231_v15 = vld [vmem:[%s2188_s1 + $0x1c0] sm:$0xff]  ;;  %v230_v17 = vld [vmem:[%s2188_s1 + $0x1b8] sm:$0xff]  ;;  %v229_v19 = vld [vmem:[%s2188_s1 + $0x1b0] sm:$0xff] }
  0x27   : > { %431 = vmatprep.subr.mxu1 %v180_v53  ;;  %355 = vmatpush1.msra.mxu0 %v247_v54  ;;  %v296_v20 = vld [vmem:[%s2188_s1 + $0x3a8] sm:$0xff]  ;;  %v295_v22 = vld [vmem:[%s2188_s1 + $0x3a0] sm:$0xff]  ;;  %v294_v24 = vld [vmem:[%s2188_s1 + $0x398] sm:$0xff] }
  0x28   : > { %432 = vmatpush1.msra.mxu1 %v179_v55  ;;  %356 = vmatprep.subr.mxu0 %v246_v56  ;;  %v228_v21 = vld [vmem:[%s2188_s1 + $0x1a8] sm:$0xff]  ;;  %v227_v23 = vld [vmem:[%s2188_s1 + $0x1a0] sm:$0xff]  ;;  %v226_v25 = vld [vmem:[%s2188_s1 + $0x198] sm:$0xff] }
  0x29   : > { %433 = vmatprep.subr.mxu1 %v178_v57  ;;  %357 = vmatpush1.msra.mxu0 %v245_v58  ;;  %v293_v26 = vld [vmem:[%s2188_s1 + $0x390] sm:$0xff]  ;;  %v292_v28 = vld [vmem:[%s2188_s1 + $0x388] sm:$0xff]  ;;  %v291_v30 = vld [vmem:[%s2188_s1 + $0x380] sm:$0xff] }
  0x2a   : > { %434 = vmatpush1.msra.mxu1 %v177_v59  ;;  %358 = vmatprep.subr.mxu0 %v244_v60  ;;  %v225_v27 = vld [vmem:[%s2188_s1 + $0x190] sm:$0xff]  ;;  %v224_v29 = vld [vmem:[%s2188_s1 + $0x188] sm:$0xff]  ;;  %v223_v31 = vld [vmem:[%s2188_s1 + $0x180] sm:$0xff] }
  0x2b   : > { %435 = vmatprep.subr.mxu1 %v176_v61  ;;  %359 = vmatpush1.msra.mxu0 %v243_v62  ;;  %v290_v32 = vld [vmem:[%s2188_s1 + $0x378] sm:$0xff]  ;;  %v289_v34 = vld [vmem:[%s2188_s1 + $0x370] sm:$0xff]  ;;  %v288_v36 = vld [vmem:[%s2188_s1 + $0x368] sm:$0xff] }
  0x2c   : > { %436 = vmatpush1.msra.mxu1 %v175_v63  ;;  %360 = vmatprep.subr.mxu0 %v306_v0  ;;  %v222_v33 = vld [vmem:[%s2188_s1 + $0x178] sm:$0xff]  ;;  %v221_v35 = vld [vmem:[%s2188_s1 + $0x170] sm:$0xff]  ;;  %v220_v37 = vld [vmem:[%s2188_s1 + $0x168] sm:$0xff] }
  0x2d   : > { %437 = vmatprep.subr.mxu1 %v238_v1  ;;  %361 = vmatpush2.msra.mxu0 %v305_v2  ;;  %v287_v38 = vld [vmem:[%s2188_s1 + $0x360] sm:$0xff]  ;;  %v286_v40 = vld [vmem:[%s2188_s1 + $0x358] sm:$0xff]  ;;  %v285_v42 = vld [vmem:[%s2188_s1 + $0x350] sm:$0xff] }
  0x2e   : > { %438 = vmatpush2.msra.mxu1 %v237_v3  ;;  %362 = vmatprep.subr.mxu0 %v304_v4  ;;  %v219_v39 = vld [vmem:[%s2188_s1 + $0x160] sm:$0xff]  ;;  %v218_v41 = vld [vmem:[%s2188_s1 + $0x158] sm:$0xff]  ;;  %v217_v43 = vld [vmem:[%s2188_s1 + $0x150] sm:$0xff] }
  0x2f   : > { %439 = vmatprep.subr.mxu1 %v236_v5  ;;  %363 = vmatpush2.msra.mxu0 %v303_v6  ;;  %v284_v44 = vld [vmem:[%s2188_s1 + $0x348] sm:$0xff]  ;;  %v283_v46 = vld [vmem:[%s2188_s1 + $0x340] sm:$0xff]  ;;  %v282_v48 = vld [vmem:[%s2188_s1 + $0x338] sm:$0xff] }
  0x30   : > { %440 = vmatpush2.msra.mxu1 %v235_v7  ;;  %364 = vmatprep.subr.mxu0 %v302_v8  ;;  %v216_v45 = vld [vmem:[%s2188_s1 + $0x148] sm:$0xff]  ;;  %v215_v47 = vld [vmem:[%s2188_s1 + $0x140] sm:$0xff]  ;;  %v214_v49 = vld [vmem:[%s2188_s1 + $0x138] sm:$0xff] }
  0x31   : > { %441 = vmatprep.subr.mxu1 %v234_v9  ;;  %365 = vmatpush2.msra.mxu0 %v301_v10  ;;  %v1508_v50 = vld [vmem:[%s1487_s7 + $0x18] sm:$0xff]  ;;  %v240_v51 = vld [vmem:[%s1487_s7 + $0x8] sm:$0xf0]  ;;  %v281_v52 = vld [vmem:[%s2188_s1 + $0x330] sm:$0xff] }
  0x32   : > { %442 = vmatpush2.msra.mxu1 %v233_v11  ;;  %366 = vmatprep.subr.mxu0 %v300_v12  ;;  %v213_v53 = vld [vmem:[%s2188_s1 + $0x130] sm:$0xff]  ;;  %v280_v54 = vld [vmem:[%s2188_s1 + $0x328] sm:$0xff]  ;;  %v239_v57 = vld [vmem:[%s1487_s7] sm:$0xf0]  ;;  %v317_v60 = vrot.slane %v240_v51, 4  ;;  %v318_v61 = vrot.slane %v1508_v50, 4 }
  0x33   : > { %443 = vmatprep.subr.mxu1 %v232_v13  ;;  %367 = vmatpush2.msra.mxu0 %v299_v14  ;;  %v212_v55 = vld [vmem:[%s2188_s1 + $0x128] sm:$0xff]  ;;  %v1524_v56 = vld [vmem:[%s1487_s7 + $0x10] sm:$0xff]  ;;  %v279_v58 = vld [vmem:[%s2188_s1 + $0x320] sm:$0xff]  ;;  %v314_v2 = vrot.slane %v239_v57, 4 }
  0x34   : > { %444 = vmatpush2.msra.mxu1 %v231_v15  ;;  %368 = vmatprep.subr.mxu0 %v298_v16  ;;  %v211_v59 = vld [vmem:[%s2188_s1 + $0x120] sm:$0xff]  ;;  %v278_v62 = vld [vmem:[%s2188_s1 + $0x318] sm:$0xff]  ;;  %v277_v0 = vld [vmem:[%s2188_s1 + $0x310] sm:$0xff]  ;;  %v315_v3 = vrot.slane %v1524_v56, 4  ;;  %v319_v7 = vsel %vm313_vm0, %v317_v60, %v318_v61 }
  0x35   : > { %445 = vmatprep.subr.mxu1 %v230_v17  ;;  %369 = vmatpush2.msra.mxu0 %v297_v18  ;;  %v210_v63 = vld [vmem:[%s2188_s1 + $0x118] sm:$0xff]  ;;  %v209_v1 = vld [vmem:[%s2188_s1 + $0x110] sm:$0xff]  ;;  %v276_v4 = vld [vmem:[%s2188_s1 + $0x308] sm:$0xff] }
  0x36   : > { %446 = vmatpush2.msra.mxu1 %v229_v19  ;;  %370 = vmatprep.subr.mxu0 %v296_v20  ;;  %v208_v5 = vld [vmem:[%s2188_s1 + $0x108] sm:$0xff]  ;;  %v275_v6 = vld [vmem:[%s2188_s1 + $0x300] sm:$0xff]  ;;  %v316_v10 = vsel %vm313_vm0, %v314_v2, %v315_v3  ;;  %v515_v12 = vld [vmem:[%s2188_s1 + $0x4f8] sm:$0xff] }
  0x37   : > { %447 = vmatprep.subr.mxu1 %v228_v21  ;;  %371 = vmatpush2.msra.mxu0 %v295_v22  ;;  %v207_v8 = vld [vmem:[%s2188_s1 + $0x100] sm:$0xff]  ;;  %v172_v9 = vld [vmem:[%s1487_s7 + $0x8] sm:$0xff]  ;;  %v666_v13 = vld [vmem:[%s2188_s1 + $0x6f8] sm:$0xff] }
  0x38   : > { %448 = vmatpush2.msra.mxu1 %v227_v23  ;;  %372 = vmatprep.subr.mxu0 %v294_v24  ;;  %v171_v11 = vld [vmem:[%s1487_s7] sm:$0xff]  ;;  %v514_v14 = vld [vmem:[%s2188_s1 + $0x4f0] sm:$0xff]  ;;  %v513_v16 = vld [vmem:[%s2188_s1 + $0x4e8] sm:$0xff] }
  0x39   : > { %449 = vmatprep.subr.mxu1 %v226_v25  ;;  %373 = vmatpush2.msra.mxu0 %v293_v26  ;;  %v665_v15 = vld [vmem:[%s2188_s1 + $0x6f0] sm:$0xff]  ;;  %v664_v17 = vld [vmem:[%s2188_s1 + $0x6e8] sm:$0xff]  ;;  %v512_v18 = vld [vmem:[%s2188_s1 + $0x4e0] sm:$0xff] }
  0x3a   : > { %450 = vmatpush2.msra.mxu1 %v225_v27  ;;  %374 = vmatprep.subr.mxu0 %v292_v28  ;;  %v663_v19 = vld [vmem:[%s2188_s1 + $0x6e0] sm:$0xff]  ;;  %v511_v20 = vld [vmem:[%s2188_s1 + $0x4d8] sm:$0xff]  ;;  %v510_v22 = vld [vmem:[%s2188_s1 + $0x4d0] sm:$0xff] }
  0x3b   : > { %451 = vmatprep.subr.mxu1 %v224_v29  ;;  %375 = vmatpush2.msra.mxu0 %v291_v30  ;;  %v662_v21 = vld [vmem:[%s2188_s1 + $0x6d8] sm:$0xff]  ;;  %v661_v23 = vld [vmem:[%s2188_s1 + $0x6d0] sm:$0xff]  ;;  %v509_v24 = vld [vmem:[%s2188_s1 + $0x4c8] sm:$0xff] }
  0x3c   : > { %452 = vmatpush2.msra.mxu1 %v223_v31  ;;  %376 = vmatprep.subr.mxu0 %v290_v32  ;;  %v660_v25 = vld [vmem:[%s2188_s1 + $0x6c8] sm:$0xff]  ;;  %v508_v26 = vld [vmem:[%s2188_s1 + $0x4c0] sm:$0xff]  ;;  %v507_v28 = vld [vmem:[%s2188_s1 + $0x4b8] sm:$0xff] }
  0x3d   : > { %453 = vmatprep.subr.mxu1 %v222_v33  ;;  %377 = vmatpush2.msra.mxu0 %v289_v34  ;;  %v659_v27 = vld [vmem:[%s2188_s1 + $0x6c0] sm:$0xff]  ;;  %v658_v29 = vld [vmem:[%s2188_s1 + $0x6b8] sm:$0xff]  ;;  %v506_v30 = vld [vmem:[%s2188_s1 + $0x4b0] sm:$0xff] }
  0x3e   : > { %454 = vmatpush2.msra.mxu1 %v221_v35  ;;  %378 = vmatprep.subr.mxu0 %v288_v36  ;;  %v657_v31 = vld [vmem:[%s2188_s1 + $0x6b0] sm:$0xff]  ;;  %v505_v32 = vld [vmem:[%s2188_s1 + $0x4a8] sm:$0xff]  ;;  %v504_v34 = vld [vmem:[%s2188_s1 + $0x4a0] sm:$0xff] }
  0x3f   : > { %455 = vmatprep.subr.mxu1 %v220_v37  ;;  %379 = vmatpush2.msra.mxu0 %v287_v38  ;;  %v656_v33 = vld [vmem:[%s2188_s1 + $0x6a8] sm:$0xff]  ;;  %v655_v35 = vld [vmem:[%s2188_s1 + $0x6a0] sm:$0xff]  ;;  %v503_v36 = vld [vmem:[%s2188_s1 + $0x498] sm:$0xff] }
  0x40   : > { %456 = vmatpush2.msra.mxu1 %v219_v39  ;;  %380 = vmatprep.subr.mxu0 %v286_v40  ;;  %v654_v37 = vld [vmem:[%s2188_s1 + $0x698] sm:$0xff]  ;;  %v502_v38 = vld [vmem:[%s2188_s1 + $0x490] sm:$0xff]  ;;  %v501_v40 = vld [vmem:[%s2188_s1 + $0x488] sm:$0xff] }
  0x41   : > { %457 = vmatprep.subr.mxu1 %v218_v41  ;;  %381 = vmatpush2.msra.mxu0 %v285_v42  ;;  %v653_v39 = vld [vmem:[%s2188_s1 + $0x690] sm:$0xff]  ;;  %v652_v41 = vld [vmem:[%s2188_s1 + $0x688] sm:$0xff]  ;;  %v500_v42 = vld [vmem:[%s2188_s1 + $0x480] sm:$0xff] }
  0x42   : > { %458 = vmatpush2.msra.mxu1 %v217_v43  ;;  %382 = vmatprep.subr.mxu0 %v284_v44  ;;  %v651_v43 = vld [vmem:[%s2188_s1 + $0x680] sm:$0xff]  ;;  %v499_v44 = vld [vmem:[%s2188_s1 + $0x478] sm:$0xff]  ;;  %v645_v57 = vld [vmem:[%s2188_s1 + $0x650] sm:$0xff] }
  0x43   : > { %459 = vmatprep.subr.mxu1 %v216_v45  ;;  %383 = vmatpush2.msra.mxu0 %v283_v46  ;;  %v650_v45 = vld [vmem:[%s2188_s1 + $0x678] sm:$0xff]  ;;  %v498_v46 = vld [vmem:[%s2188_s1 + $0x470] sm:$0xff]  ;;  %v496_v51 = vld [vmem:[%s2188_s1 + $0x460] sm:$0xff] }
  0x44   : > { %460 = vmatpush2.msra.mxu1 %v215_v47  ;;  %384 = vmatprep.subr.mxu0 %v282_v48  ;;  %v649_v47 = vld [vmem:[%s2188_s1 + $0x670] sm:$0xff]  ;;  %v497_v48 = vld [vmem:[%s2188_s1 + $0x468] sm:$0xff]  ;;  %v492_v60 = vld [vmem:[%s2188_s1 + $0x440] sm:$0xff] }
  0x45   : > { %461 = vmatprep.subr.mxu1 %v214_v49  ;;  %385 = vmatpush2.msra.mxu0 %v281_v52  ;;  %v648_v49 = vld [vmem:[%s2188_s1 + $0x668] sm:$0xff]  ;;  %v647_v52 = vld [vmem:[%s2188_s1 + $0x660] sm:$0xff]  ;;  %v641_v2 = vld [vmem:[%s2188_s1 + $0x630] sm:$0xff] }
  0x46   : > { %462 = vmatpush2.msra.mxu1 %v213_v53  ;;  %386 = vmatprep.subr.mxu0 %v280_v54  ;;  %v495_v53 = vld [vmem:[%s2188_s1 + $0x458] sm:$0xff] }
  0x47   : > { %463 = vmatprep.subr.mxu1 %v212_v55  ;;  %387 = vmatpush2.msra.mxu0 %v279_v58  ;;  %v646_v54 = vld [vmem:[%s2188_s1 + $0x658] sm:$0xff]  ;;  %v494_v55 = vld [vmem:[%s2188_s1 + $0x450] sm:$0xff]  ;;  %v493_v58 = vld [vmem:[%s2188_s1 + $0x448] sm:$0xff] }
  0x48   : > { %464 = vmatpush2.msra.mxu1 %v211_v59  ;;  %388 = vmatprep.subr.mxu0 %v278_v62  ;;  %v644_v59 = vld [vmem:[%s2188_s1 + $0x648] sm:$0xff]  ;;  %v643_v62 = vld [vmem:[%s2188_s1 + $0x640] sm:$0xff] }
  0x49   : > { %465 = vmatprep.subr.mxu1 %v210_v63  ;;  %389 = vmatpush2.msra.mxu0 %v277_v0  ;;  %v491_v63 = vld [vmem:[%s2188_s1 + $0x438] sm:$0xff] }
  0x4a   : > { %466 = vmatpush2.msra.mxu1 %v209_v1  ;;  %390 = vmatprep.subr.mxu0 %v276_v4  ;;  %v642_v0 = vld [vmem:[%s2188_s1 + $0x638] sm:$0xff]  ;;  %v490_v1 = vld [vmem:[%s2188_s1 + $0x430] sm:$0xff]  ;;  %v489_v4 = vld [vmem:[%s2188_s1 + $0x428] sm:$0xff] }
  0x4b   : > { %467 = vmatprep.subr.mxu1 %v208_v5  ;;  %391 = vmatpush2.msra.mxu0 %v275_v6  ;;  %v640_v5 = vld [vmem:[%s2188_s1 + $0x628] sm:$0xff]  ;;  %v488_v6 = vld [vmem:[%s2188_s1 + $0x420] sm:$0xff] }
  0x4c   : > { %392 = vmatprep.mubr.f32.mxu0 %v319_v7  ;;  %468 = vmatpush2.msra.mxu1 %v207_v8  ;;  %v639_v7 = vld [vmem:[%s2188_s1 + $0x620] sm:$0xff]  ;;  %v487_v8 = vld [vmem:[%s2188_s1 + $0x418] sm:$0xff] }
  0x4d   : > { %469 = vmatprep.mubr.f32.mxu1 %v172_v9  ;;  %393 = vmatmul.mubr.f32.vlgmr.msra.gmra.mxu0 %v316_v10  ;;  %v638_v9 = vld [vmem:[%s2188_s1 + $0x618] sm:$0xff]  ;;  %v486_v10 = vld [vmem:[%s2188_s1 + $0x410] sm:$0xff] }
  0x4e   : > { %470 = vmatmul.mubr.f32.vlgmr.msra.gmra.mxu1 %v171_v11  ;;  %548 = vmatprep.subr.mxu0 %v515_v12  ;;  %v637_v11 = vld [vmem:[%s2188_s1 + $0x610] sm:$0xff]  ;;  %v485_v12 = vld [vmem:[%s2188_s1 + $0x408] sm:$0xff] }
  0x4f   : > { %719 = vmatprep.subr.mxu1 %v666_v13  ;;  %549 = vmatpush1.msra.mxu0 %v514_v14  ;;  %v636_v13 = vld [vmem:[%s2188_s1 + $0x608] sm:$0xff]  ;;  %v484_v14 = vld [vmem:[%s2188_s1 + $0x400] sm:$0xff] }
  0x50   : > { %720 = vmatpush1.msra.mxu1 %v665_v15  ;;  %550 = vmatprep.subr.mxu0 %v513_v16  ;;  %v635_v15 = vld [vmem:[%s2188_s1 + $0x600] sm:$0xff]  ;;  %v547_v16 = vld [vmem:[%s2188_s1 + $0x5f8] sm:$0xff] }
  0x51   : > { %721 = vmatprep.subr.mxu1 %v664_v17  ;;  %551 = vmatpush1.msra.mxu0 %v512_v18  ;;  %v698_v17 = vld [vmem:[%s2188_s1 + $0x7f8] sm:$0xff]  ;;  %v546_v18 = vld [vmem:[%s2188_s1 + $0x5f0] sm:$0xff] }
  0x52   : > { %722 = vmatpush1.msra.mxu1 %v663_v19  ;;  %552 = vmatprep.subr.mxu0 %v511_v20  ;;  %v697_v19 = vld [vmem:[%s2188_s1 + $0x7f0] sm:$0xff]  ;;  %v545_v20 = vld [vmem:[%s2188_s1 + $0x5e8] sm:$0xff] }
  0x53   : > { %723 = vmatprep.subr.mxu1 %v662_v21  ;;  %553 = vmatpush1.msra.mxu0 %v510_v22  ;;  %v696_v21 = vld [vmem:[%s2188_s1 + $0x7e8] sm:$0xff]  ;;  %v544_v22 = vld [vmem:[%s2188_s1 + $0x5e0] sm:$0xff] }
  0x54   : > { %724 = vmatpush1.msra.mxu1 %v661_v23  ;;  %554 = vmatprep.subr.mxu0 %v509_v24  ;;  %v695_v23 = vld [vmem:[%s2188_s1 + $0x7e0] sm:$0xff]  ;;  %v543_v24 = vld [vmem:[%s2188_s1 + $0x5d8] sm:$0xff] }
  0x55   : > { %725 = vmatprep.subr.mxu1 %v660_v25  ;;  %555 = vmatpush1.msra.mxu0 %v508_v26  ;;  %v694_v25 = vld [vmem:[%s2188_s1 + $0x7d8] sm:$0xff]  ;;  %v542_v26 = vld [vmem:[%s2188_s1 + $0x5d0] sm:$0xff] }
  0x56   : > { %726 = vmatpush1.msra.mxu1 %v659_v27  ;;  %556 = vmatprep.subr.mxu0 %v507_v28  ;;  %v693_v27 = vld [vmem:[%s2188_s1 + $0x7d0] sm:$0xff]  ;;  %v541_v28 = vld [vmem:[%s2188_s1 + $0x5c8] sm:$0xff] }
  0x57   : > { %727 = vmatprep.subr.mxu1 %v658_v29  ;;  %557 = vmatpush1.msra.mxu0 %v506_v30  ;;  %v692_v29 = vld [vmem:[%s2188_s1 + $0x7c8] sm:$0xff]  ;;  %v540_v30 = vld [vmem:[%s2188_s1 + $0x5c0] sm:$0xff] }
  0x58   : > { %728 = vmatpush1.msra.mxu1 %v657_v31  ;;  %558 = vmatprep.subr.mxu0 %v505_v32  ;;  %v691_v31 = vld [vmem:[%s2188_s1 + $0x7c0] sm:$0xff]  ;;  %v539_v32 = vld [vmem:[%s2188_s1 + $0x5b8] sm:$0xff] }
  0x59   : > { %729 = vmatprep.subr.mxu1 %v656_v33  ;;  %559 = vmatpush1.msra.mxu0 %v504_v34  ;;  %v690_v33 = vld [vmem:[%s2188_s1 + $0x7b8] sm:$0xff]  ;;  %v538_v34 = vld [vmem:[%s2188_s1 + $0x5b0] sm:$0xff] }
  0x5a   : > { %730 = vmatpush1.msra.mxu1 %v655_v35  ;;  %560 = vmatprep.subr.mxu0 %v503_v36  ;;  %v689_v35 = vld [vmem:[%s2188_s1 + $0x7b0] sm:$0xff]  ;;  %v537_v36 = vld [vmem:[%s2188_s1 + $0x5a8] sm:$0xff] }
  0x5b   : > { %731 = vmatprep.subr.mxu1 %v654_v37  ;;  %561 = vmatpush1.msra.mxu0 %v502_v38  ;;  %v688_v37 = vld [vmem:[%s2188_s1 + $0x7a8] sm:$0xff]  ;;  %v536_v38 = vld [vmem:[%s2188_s1 + $0x5a0] sm:$0xff] }
  0x5c   : > { %732 = vmatpush1.msra.mxu1 %v653_v39  ;;  %562 = vmatprep.subr.mxu0 %v501_v40  ;;  %v687_v39 = vld [vmem:[%s2188_s1 + $0x7a0] sm:$0xff]  ;;  %v535_v40 = vld [vmem:[%s2188_s1 + $0x598] sm:$0xff] }
  0x5d   : > { %733 = vmatprep.subr.mxu1 %v652_v41  ;;  %563 = vmatpush1.msra.mxu0 %v500_v42  ;;  %v686_v41 = vld [vmem:[%s2188_s1 + $0x798] sm:$0xff]  ;;  %v534_v42 = vld [vmem:[%s2188_s1 + $0x590] sm:$0xff] }
  0x5e   : > { %734 = vmatpush1.msra.mxu1 %v651_v43  ;;  %564 = vmatprep.subr.mxu0 %v499_v44  ;;  %v685_v43 = vld [vmem:[%s2188_s1 + $0x790] sm:$0xff]  ;;  %v533_v44 = vld [vmem:[%s2188_s1 + $0x588] sm:$0xff] }
  0x5f   : > { %735 = vmatprep.subr.mxu1 %v650_v45  ;;  %565 = vmatpush1.msra.mxu0 %v498_v46  ;;  %v684_v45 = vld [vmem:[%s2188_s1 + $0x788] sm:$0xff]  ;;  %v532_v46 = vld [vmem:[%s2188_s1 + $0x580] sm:$0xff] }
  0x60   : > { %736 = vmatpush1.msra.mxu1 %v649_v47  ;;  %566 = vmatprep.subr.mxu0 %v497_v48  ;;  %v683_v47 = vld [vmem:[%s2188_s1 + $0x780] sm:$0xff]  ;;  %v531_v48 = vld [vmem:[%s2188_s1 + $0x578] sm:$0xff] }
  0x61   : > { %737 = vmatprep.subr.mxu1 %v648_v49  ;;  %567 = vmatpush1.msra.mxu0 %v496_v51  ;;  %v682_v49 = vld [vmem:[%s2188_s1 + $0x778] sm:$0xff]  ;;  %v530_v51 = vld [vmem:[%s2188_s1 + $0x570] sm:$0xff] }
  0x62   : > { %738 = vmatpush1.msra.mxu1 %v647_v52  ;;  %568 = vmatprep.subr.mxu0 %v495_v53  ;;  %v681_v52 = vld [vmem:[%s2188_s1 + $0x770] sm:$0xff]  ;;  %v529_v53 = vld [vmem:[%s2188_s1 + $0x568] sm:$0xff] }
  0x63   : > { %739 = vmatprep.subr.mxu1 %v646_v54  ;;  %569 = vmatpush1.msra.mxu0 %v494_v55  ;;  %v680_v54 = vld [vmem:[%s2188_s1 + $0x768] sm:$0xff]  ;;  %v528_v55 = vld [vmem:[%s2188_s1 + $0x560] sm:$0xff] }
  0x64   : > { %740 = vmatpush1.msra.mxu1 %v645_v57  ;;  %570 = vmatprep.subr.mxu0 %v493_v58  ;;  %v679_v57 = vld [vmem:[%s2188_s1 + $0x760] sm:$0xff]  ;;  %v242_v58 = vld [vmem:[%s1487_s7 + $0x28] sm:$0xf] }
  0x65   : > { %741 = vmatprep.subr.mxu1 %v644_v59  ;;  %571 = vmatpush1.msra.mxu0 %v492_v60  ;;  %v527_v59 = vld [vmem:[%s2188_s1 + $0x558] sm:$0xff] }
  0x66   : > { %742 = vmatpush1.msra.mxu1 %v643_v62  ;;  %572 = vmatprep.subr.mxu0 %v491_v63  ;;  %v678_v60 = vld [vmem:[%s2188_s1 + $0x758] sm:$0xff]  ;;  %v526_v62 = vld [vmem:[%s2188_s1 + $0x550] sm:$0xff] }
  0x67   : > { %743 = vmatprep.subr.mxu1 %v642_v0  ;;  %573 = vmatpush1.msra.mxu0 %v490_v1  ;;  %v677_v63 = vld [vmem:[%s2188_s1 + $0x750] sm:$0xff]  ;;  %v241_v0 = vld [vmem:[%s1487_s7 + $0x20] sm:$0xf]  ;;  %v525_v1 = vld [vmem:[%s2188_s1 + $0x548] sm:$0xff] }
  0x68   : > { %744 = vmatpush1.msra.mxu1 %v641_v2  ;;  %574 = vmatprep.subr.mxu0 %v489_v4  ;;  %v676_v2 = vld [vmem:[%s2188_s1 + $0x748] sm:$0xff]  ;;  %v322_v4 = vrot.slane %v242_v58, 4 }
  0x69   : > { %745 = vmatprep.subr.mxu1 %v640_v5  ;;  %575 = vmatpush1.msra.mxu0 %v488_v6  ;;  %v524_v5 = vld [vmem:[%s2188_s1 + $0x540] sm:$0xff]  ;;  %v815_v58 = vld [vmem:[%s2188_s1 + $0x868] sm:$0xff] }
  0x6a   : > { %746 = vmatpush1.msra.mxu1 %v639_v7  ;;  %576 = vmatprep.subr.mxu0 %v487_v8  ;;  %v675_v6 = vld [vmem:[%s2188_s1 + $0x740] sm:$0xff]  ;;  %v523_v7 = vld [vmem:[%s2188_s1 + $0x538] sm:$0xff] }
  0x6b   : > { %747 = vmatprep.subr.mxu1 %v638_v9  ;;  %577 = vmatpush1.msra.mxu0 %v486_v10  ;;  %v674_v8 = vld [vmem:[%s2188_s1 + $0x738] sm:$0xff]  ;;  %v320_v9 = vrot.slane %v241_v0, 4  ;;  %v522_v10 = vld [vmem:[%s2188_s1 + $0x530] sm:$0xff]  ;;  %v810_v0 = vld [vmem:[%s2188_s1 + $0x840] sm:$0xff] }
  0x6c   : > { %748 = vmatpush1.msra.mxu1 %v637_v11  ;;  %578 = vmatprep.subr.mxu0 %v485_v12  ;;  %v673_v11 = vld [vmem:[%s2188_s1 + $0x730] sm:$0xff]  ;;  %v323_v12 = vsel %vm313_vm0, %v318_v61, %v322_v4  ;;  %v807_v4 = vld [vmem:[%s2188_s1 + $0x828] sm:$0xff] }
  0x6d   : > { %749 = vmatprep.subr.mxu1 %v636_v13  ;;  %579 = vmatpush1.msra.mxu0 %v484_v14  ;;  %v521_v13 = vld [vmem:[%s2188_s1 + $0x528] sm:$0xff]  ;;  %v629_v61 = vld [vmem:[%s1487_s7 + $0x10] sm:$0xf0] }
  0x6e   : > { %750 = vmatpush1.msra.mxu1 %v635_v15  ;;  %580 = vmatprep.subr.mxu0 %v547_v16  ;;  %v672_v14 = vld [vmem:[%s2188_s1 + $0x728] sm:$0xff]  ;;  %v630_v15 = vld [vmem:[%s1487_s7 + $0x18] sm:$0xf0] }
  0x6f   : > { %751 = vmatprep.subr.mxu1 %v698_v17  ;;  %581 = vmatpush2.msra.mxu0 %v546_v18  ;;  %v1928_v16 = vld [vmem:[%s1487_s7 + $0x28] sm:$0xff]  ;;  %v321_v17 = vsel %vm313_vm0, %v315_v3, %v320_v9  ;;  %v1935_v18 = vld [vmem:[%s1487_s7 + $0x20] sm:$0xff]  ;;  %v519_v3 = vld [vmem:[%s2188_s1 + $0x518] sm:$0xff] }
  0x70   : > { %752 = vmatpush2.msra.mxu1 %v697_v19  ;;  %582 = vmatprep.subr.mxu0 %v545_v20  ;;  %v520_v19 = vld [vmem:[%s2188_s1 + $0x520] sm:$0xff] }
  0x71   : > { %753 = vmatprep.subr.mxu1 %v696_v21  ;;  %583 = vmatpush2.msra.mxu0 %v544_v22  ;;  %v671_v20 = vld [vmem:[%s2188_s1 + $0x720] sm:$0xff]  ;;  %v670_v21 = vld [vmem:[%s2188_s1 + $0x718] sm:$0xff]  ;;  %v708_v22 = vrot.slane %v630_v15, 4  ;;  %v860_v15 = vld [vmem:[%s2188_s1 + $0x9d0] sm:$0xff] }
  0x72   : > { %754 = vmatpush2.msra.mxu1 %v695_v23  ;;  %584 = vmatprep.subr.mxu0 %v543_v24  ;;  %v709_v23 = vrot.slane %v1928_v16, 4  ;;  %v518_v24 = vld [vmem:[%s2188_s1 + $0x510] sm:$0xff]  ;;  %v802_v9 = vld [vmem:[%s2188_s1 + $0x800] sm:$0xff] }
  0x73   : > { %755 = vmatprep.subr.mxu1 %v694_v25  ;;  %585 = vmatpush2.msra.mxu0 %v542_v26  ;;  %v669_v25 = vld [vmem:[%s2188_s1 + $0x710] sm:$0xff]  ;;  %v705_v26 = vrot.slane %v629_v61, 4  ;;  %v858_v61 = vld [vmem:[%s2188_s1 + $0x9c0] sm:$0xff] }
  0x74   : > { %756 = vmatpush2.msra.mxu1 %v693_v27  ;;  %586 = vmatprep.subr.mxu0 %v541_v28  ;;  %v706_v27 = vrot.slane %v1935_v18, 4  ;;  %v517_v28 = vld [vmem:[%s2188_s1 + $0x508] sm:$0xff] }
  0x75   : > { %757 = vmatprep.subr.mxu1 %v692_v29  ;;  %587 = vmatpush2.msra.mxu0 %v540_v30  ;;  %v668_v29 = vld [vmem:[%s2188_s1 + $0x708] sm:$0xff]  ;;  %v516_v30 = vld [vmem:[%s2188_s1 + $0x500] sm:$0xff] }
  0x76   : > { %758 = vmatpush2.msra.mxu1 %v691_v31  ;;  %588 = vmatprep.subr.mxu0 %v539_v32  ;;  %v667_v31 = vld [vmem:[%s2188_s1 + $0x700] sm:$0xff]  ;;  %v710_v32 = vsel %vm313_vm0, %v708_v22, %v709_v23  ;;  %v853_v22 = vld [vmem:[%s2188_s1 + $0x998] sm:$0xff] }
  0x77   : > { %759 = vmatprep.subr.mxu1 %v690_v33  ;;  %589 = vmatpush2.msra.mxu0 %v538_v34  ;;  %v707_v33 = vsel %vm313_vm0, %v705_v26, %v706_v27  ;;  %v634_v34 = vld [vmem:[%s1487_s7 + $0x38] sm:$0xf] }
  0x78   : > { %760 = vmatpush2.msra.mxu1 %v689_v35  ;;  %590 = vmatprep.subr.mxu0 %v537_v36  ;;  %v833_v35 = vld [vmem:[%s2188_s1 + $0x8f8] sm:$0xff]  ;;  %v832_v36 = vld [vmem:[%s2188_s1 + $0x8f0] sm:$0xff] }
  0x79   : > { %761 = vmatprep.subr.mxu1 %v688_v37  ;;  %591 = vmatpush2.msra.mxu0 %v536_v38  ;;  %v633_v37 = vld [vmem:[%s1487_s7 + $0x30] sm:$0xf]  ;;  %v831_v38 = vld [vmem:[%s2188_s1 + $0x8e8] sm:$0xff]  ;;  %v849_v26 = vld [vmem:[%s2188_s1 + $0x978] sm:$0xff] }
  0x7a   : > { %762 = vmatpush2.msra.mxu1 %v687_v39  ;;  %592 = vmatprep.subr.mxu0 %v535_v40  ;;  %v713_v39 = vrot.slane %v634_v34, 4  ;;  %v711_v40 = vrot.slane %v633_v37, 4  ;;  %v841_v34 = vld [vmem:[%s2188_s1 + $0x938] sm:$0xff]  ;;  %v838_v37 = vld [vmem:[%s2188_s1 + $0x920] sm:$0xff] }
  0x7b   : > { %763 = vmatprep.subr.mxu1 %v686_v41  ;;  %593 = vmatpush2.msra.mxu0 %v534_v42  ;;  %v828_v42 = vld [vmem:[%s2188_s1 + $0x8d0] sm:$0xff] }
  0x7c   : > { %764 = vmatpush2.msra.mxu1 %v685_v43  ;;  %594 = vmatprep.subr.mxu0 %v533_v44  ;;  %v714_v41 = vsel %vm313_vm0, %v709_v23, %v713_v39  ;;  %v827_v43 = vld [vmem:[%s2188_s1 + $0x8c8] sm:$0xff]  ;;  %v712_v44 = vsel %vm313_vm0, %v706_v27, %v711_v40  ;;  %v852_v23 = vld [vmem:[%s2188_s1 + $0x990] sm:$0xff]  ;;  %v834_v40 = vld [vmem:[%s2188_s1 + $0x900] sm:$0xff] }
  0x7d   : > { %765 = vmatprep.subr.mxu1 %v684_v45  ;;  %595 = vmatpush2.msra.mxu0 %v532_v46  ;;  %v826_v45 = vld [vmem:[%s2188_s1 + $0x8c0] sm:$0xff]  ;;  %v825_v46 = vld [vmem:[%s2188_s1 + $0x8b8] sm:$0xff]  ;;  %v848_v27 = vld [vmem:[%s2188_s1 + $0x970] sm:$0xff] }
  0x7e   : > { %766 = vmatpush2.msra.mxu1 %v683_v47  ;;  %596 = vmatprep.subr.mxu0 %v531_v48  ;;  %v824_v47 = vld [vmem:[%s2188_s1 + $0x8b0] sm:$0xff]  ;;  %v823_v48 = vld [vmem:[%s2188_s1 + $0x8a8] sm:$0xff] }
  0x7f   : > { %767 = vmatprep.subr.mxu1 %v682_v49  ;;  %597 = vmatpush2.msra.mxu0 %v530_v51  ;;  %v822_v49 = vld [vmem:[%s2188_s1 + $0x8a0] sm:$0xff]  ;;  %v821_v51 = vld [vmem:[%s2188_s1 + $0x898] sm:$0xff]  ;;  %v836_v39 = vld [vmem:[%s2188_s1 + $0x910] sm:$0xff] }
  0x80   : > { %768 = vmatpush2.msra.mxu1 %v681_v52  ;;  %598 = vmatprep.subr.mxu0 %v529_v53  ;;  %v820_v52 = vld [vmem:[%s2188_s1 + $0x890] sm:$0xff]  ;;  %v819_v53 = vld [vmem:[%s2188_s1 + $0x888] sm:$0xff] }
  0x81   : > { %769 = vmatprep.subr.mxu1 %v680_v54  ;;  %599 = vmatpush2.msra.mxu0 %v528_v55  ;;  %v818_v54 = vld [vmem:[%s2188_s1 + $0x880] sm:$0xff]  ;;  %v817_v55 = vld [vmem:[%s2188_s1 + $0x878] sm:$0xff] }
  0x82   : > { %770 = vmatpush2.msra.mxu1 %v679_v57  ;;  %600 = vmatprep.subr.mxu0 %v527_v59  ;;  %v816_v57 = vld [vmem:[%s2188_s1 + $0x870] sm:$0xff]  ;;  %v814_v59 = vld [vmem:[%s2188_s1 + $0x860] sm:$0xff] }
  0x83   : > { %771 = vmatprep.subr.mxu1 %v678_v60  ;;  %601 = vmatpush2.msra.mxu0 %v526_v62  ;;  %v813_v60 = vld [vmem:[%s2188_s1 + $0x858] sm:$0xff]  ;;  %v812_v62 = vld [vmem:[%s2188_s1 + $0x850] sm:$0xff] }
  0x84   : > { %772 = vmatpush2.msra.mxu1 %v677_v63  ;;  %602 = vmatprep.subr.mxu0 %v525_v1  ;;  %v811_v63 = vld [vmem:[%s2188_s1 + $0x848] sm:$0xff]  ;;  %v809_v1 = vld [vmem:[%s2188_s1 + $0x838] sm:$0xff] }
  0x85   : > { %773 = vmatprep.subr.mxu1 %v676_v2  ;;  %603 = vmatpush2.msra.mxu0 %v524_v5  ;;  %v808_v2 = vld [vmem:[%s2188_s1 + $0x830] sm:$0xff]  ;;  %v806_v5 = vld [vmem:[%s2188_s1 + $0x820] sm:$0xff] }
  0x86   : > { %774 = vmatpush2.msra.mxu1 %v675_v6  ;;  %604 = vmatprep.subr.mxu0 %v523_v7  ;;  %v805_v6 = vld [vmem:[%s2188_s1 + $0x818] sm:$0xff]  ;;  %v804_v7 = vld [vmem:[%s2188_s1 + $0x810] sm:$0xff] }
  0x87   : > { %775 = vmatprep.subr.mxu1 %v674_v8  ;;  %605 = vmatpush2.msra.mxu0 %v522_v10  ;;  %v803_v8 = vld [vmem:[%s2188_s1 + $0x808] sm:$0xff]  ;;  %v865_v10 = vld [vmem:[%s2188_s1 + $0x9f8] sm:$0xff] }
  0x88   : > { %776 = vmatpush2.msra.mxu1 %v673_v11  ;;  %398 = vmatprep.mubr.f32.mxu0 %v323_v12  ;;  %v864_v11 = vld [vmem:[%s2188_s1 + $0x9f0] sm:$0xff]  ;;  %v863_v12 = vld [vmem:[%s2188_s1 + $0x9e8] sm:$0xff] }
  0x89   : > { %475 = vmatprep.mubr.f32.mxu1 %v1508_v50  ;;  %606 = vmatprep.subr.mxu0 %v521_v13  ;;  %v862_v13 = vld [vmem:[%s2188_s1 + $0x9e0] sm:$0xff] }
  0x8a   : > { %777 = vmatprep.subr.mxu1 %v672_v14  ;;  %399 = vmatmul.mubr.f32.gmra.mxu0 %v321_v17  ;;  %v861_v14 = vld [vmem:[%s2188_s1 + $0x9d8] sm:$0xff]  ;;  %v859_v17 = vld [vmem:[%s2188_s1 + $0x9c8] sm:$0xff] }
  0x8b   : > { %476 = vmatmul.mubr.f32.gmra.mxu1 %v1524_v56  ;;  %607 = vmatpush2.msra.mxu0 %v520_v19  ;;  %v857_v19 = vld [vmem:[%s2188_s1 + $0x9b8] sm:$0xff] }
  0x8c   : > { %778 = vmatpush2.msra.mxu1 %v671_v20  ;;  %608 = vmatprep.subr.mxu0 %v519_v3  ;;  %v856_v20 = vld [vmem:[%s2188_s1 + $0x9b0] sm:$0xff]  ;;  %v855_v3 = vld [vmem:[%s2188_s1 + $0x9a8] sm:$0xff] }
  0x8d   : > { %779 = vmatprep.subr.mxu1 %v670_v21  ;;  %609 = vmatpush2.msra.mxu0 %v518_v24  ;;  %v854_v21 = vld [vmem:[%s2188_s1 + $0x9a0] sm:$0xff]  ;;  %v851_v24 = vld [vmem:[%s2188_s1 + $0x988] sm:$0xff] }
  0x8e   : > { %780 = vmatpush2.msra.mxu1 %v669_v25  ;;  %610 = vmatprep.subr.mxu0 %v517_v28  ;;  %v850_v25 = vld [vmem:[%s2188_s1 + $0x980] sm:$0xff]  ;;  %v847_v28 = vld [vmem:[%s2188_s1 + $0x968] sm:$0xff] }
  0x8f   : > { %781 = vmatprep.subr.mxu1 %v668_v29  ;;  %611 = vmatpush2.msra.mxu0 %v516_v30  ;;  %v846_v29 = vld [vmem:[%s2188_s1 + $0x960] sm:$0xff]  ;;  %v845_v30 = vld [vmem:[%s2188_s1 + $0x958] sm:$0xff] }
  0x90   : > { %612 = vmatprep.mubr.f32.mxu0 %v1508_v50  ;;  %782 = vmatpush2.msra.mxu1 %v667_v31  ;;  %v830_v50 = vld [vmem:[%s2188_s1 + $0x8e0] sm:$0xff]  ;;  %v844_v31 = vld [vmem:[%s2188_s1 + $0x950] sm:$0xff] }
  0x91   : > { %783 = vmatprep.mubr.f32.mxu1 %v710_v32  ;;  %613 = vmatmul.mubr.f32.vlgmr.msra.gmra.mxu0 %v1524_v56  ;;  %v829_v56 = vld [vmem:[%s2188_s1 + $0x8d8] sm:$0xff]  ;;  %v843_v32 = vld [vmem:[%s2188_s1 + $0x948] sm:$0xff] }
  0x92   : > { %784 = vmatmul.mubr.f32.vlgmr.msra.gmra.mxu1 %v707_v33  ;;  %866 = vmatprep.subr.mxu0 %v833_v35  ;;  %v842_v33 = vld [vmem:[%s2188_s1 + $0x940] sm:$0xff] }
  0x93   : > { %1039 = vmatprep.subr.mxu1 %v833_v35  ;;  %867 = vmatpush1.msra.mxu0 %v832_v36  ;;  %v840_v35 = vld [vmem:[%s2188_s1 + $0x930] sm:$0xff] }
  0x94   : > { %1071 = vmatpush1.msra.mxu1 %v832_v36  ;;  %868 = vmatprep.subr.mxu0 %v831_v38  ;;  %v839_v36 = vld [vmem:[%s2188_s1 + $0x928] sm:$0xff] }
  0x95   : > { %1040 = vmatprep.subr.mxu1 %v831_v38  ;;  %618 = vmatprep.mubr.f32.mxu0 %v1928_v16  ;;  %v837_v38 = vld [vmem:[%s2188_s1 + $0x918] sm:$0xff] }
  0x96   : > { %869 = vmatpush1.msra.mxu0 %v830_v50  ;;  %1072 = vmatpush1.msra.mxu1 %v830_v50  ;;  %v835_v50 = vld [vmem:[%s2188_s1 + $0x908] sm:$0xff] }
  0x97   : > { %619 = vmatmul.mubr.f32.gmra.mxu0 %v1935_v18  ;;  %870 = vmatprep.subr.mxu0 %v829_v56 }
  0x98   : > { %1041 = vmatprep.subr.mxu1 %v829_v56  ;;  %789 = vmatprep.mubr.f32.mxu1 %v714_v41  ;;  %v801_v56 = vld [vmem:[%s1487_s7 + $0x38] sm:$0xff]  ;;  %v800_v41 = vld [vmem:[%s1487_s7 + $0x30] sm:$0xff] }
  0x99   : > { %871 = vmatpush1.msra.mxu0 %v828_v42  ;;  %1073 = vmatpush1.msra.mxu1 %v828_v42 }
  0x9a   : > { %872 = vmatprep.subr.mxu0 %v827_v43  ;;  %790 = vmatmul.mubr.f32.gmra.mxu1 %v712_v44 }
  0x9b   : > { %1042 = vmatprep.subr.mxu1 %v827_v43  ;;  %873 = vmatpush1.msra.mxu0 %v826_v45 }
  0x9c   : > { %1074 = vmatpush1.msra.mxu1 %v826_v45  ;;  %874 = vmatprep.subr.mxu0 %v825_v46 }
  0x9d   : > { %1043 = vmatprep.subr.mxu1 %v825_v46  ;;  %875 = vmatpush1.msra.mxu0 %v824_v47 }
  0x9e   : > { %1075 = vmatpush1.msra.mxu1 %v824_v47  ;;  %876 = vmatprep.subr.mxu0 %v823_v48 }
  0x9f   : > { %1044 = vmatprep.subr.mxu1 %v823_v48  ;;  %877 = vmatpush1.msra.mxu0 %v822_v49 }
  0xa0   : > { %1076 = vmatpush1.msra.mxu1 %v822_v49  ;;  %878 = vmatprep.subr.mxu0 %v821_v51 }
  0xa1   : > { %1045 = vmatprep.subr.mxu1 %v821_v51  ;;  %879 = vmatpush1.msra.mxu0 %v820_v52 }
  0xa2   : > { %1077 = vmatpush1.msra.mxu1 %v820_v52  ;;  %880 = vmatprep.subr.mxu0 %v819_v53 }
  0xa3   : > { %1046 = vmatprep.subr.mxu1 %v819_v53  ;;  %881 = vmatpush1.msra.mxu0 %v818_v54  ;;  %v949_v53 = vlaneseq }
  0xa4   : > { %1078 = vmatpush1.msra.mxu1 %v818_v54  ;;  %882 = vmatprep.subr.mxu0 %v817_v55 }
  0xa5   : > { %1047 = vmatprep.subr.mxu1 %v817_v55  ;;  %883 = vmatpush1.msra.mxu0 %v816_v57 }
  0xa6   : > { %1079 = vmatpush1.msra.mxu1 %v816_v57  ;;  %884 = vmatprep.subr.mxu0 %v815_v58  ;;  %v950_v57 = vshrl.u32 %v949_v53, 7 }
  0xa7   : > { %1048 = vmatprep.subr.mxu1 %v815_v58  ;;  %885 = vmatpush1.msra.mxu0 %v814_v59 }
  0xa8   : > { %1080 = vmatpush1.msra.mxu1 %v814_v59  ;;  %886 = vmatprep.subr.mxu0 %v813_v60 }
  0xa9   : > { %1049 = vmatprep.subr.mxu1 %v813_v60  ;;  %887 = vmatpush1.msra.mxu0 %v812_v62 }
  0xaa   : > { %1081 = vmatpush1.msra.mxu1 %v812_v62  ;;  %888 = vmatprep.subr.mxu0 %v811_v63 }
  0xab   : > { %1050 = vmatprep.subr.mxu1 %v811_v63  ;;  %889 = vmatpush1.msra.mxu0 %v810_v0 }
  0xac   : > { %1082 = vmatpush1.msra.mxu1 %v810_v0  ;;  %890 = vmatprep.subr.mxu0 %v809_v1 }
  0xad   : > { %1051 = vmatprep.subr.mxu1 %v809_v1  ;;  %891 = vmatpush1.msra.mxu0 %v808_v2 }
  0xae   : > { %1083 = vmatpush1.msra.mxu1 %v808_v2  ;;  %892 = vmatprep.subr.mxu0 %v807_v4  ;;  %v951_v2 = vsub.s32 0, %v950_v57 }
  0xaf   : > { %1052 = vmatprep.subr.mxu1 %v807_v4  ;;  %893 = vmatpush1.msra.mxu0 %v806_v5  ;;  %v947_v4 = vld [vmem:[%s2189_s2] sm:$0x3] }
  0xb0   : > { %1084 = vmatpush1.msra.mxu1 %v806_v5  ;;  %894 = vmatprep.subr.mxu0 %v805_v6  ;;  %v955_v5 = vsub.s32 1, %v950_v57 }
  0xb1   : > { %1053 = vmatprep.subr.mxu1 %v805_v6  ;;  %895 = vmatpush1.msra.mxu0 %v804_v7 }
  0xb2   : > { %1085 = vmatpush1.msra.mxu1 %v804_v7  ;;  %896 = vmatprep.subr.mxu0 %v803_v8 }
  0xb3   : > { %1054 = vmatprep.subr.mxu1 %v803_v8  ;;  %897 = vmatpush1.msra.mxu0 %v802_v9 }
  0xb4   : > { %1086 = vmatpush1.msra.mxu1 %v802_v9  ;;  %898 = vmatprep.subr.mxu0 %v865_v10 }
  0xb5   : > { %1055 = vmatprep.subr.mxu1 %v865_v10  ;;  %899 = vmatpush2.msra.mxu0 %v864_v11 }
  0xb6   : > { %1087 = vmatpush2.msra.mxu1 %v864_v11  ;;  %900 = vmatprep.subr.mxu0 %v863_v12  ;;  %v952_v11 = vrot.slane %v947_v4, %v951_v2 }
  0xb7   : > { %1056 = vmatprep.subr.mxu1 %v863_v12  ;;  %901 = vmatpush2.msra.mxu0 %v862_v13 }
  0xb8   : > { %1088 = vmatpush2.msra.mxu1 %v862_v13  ;;  %902 = vmatprep.subr.mxu0 %v861_v14 }
  0xb9   : > { %1057 = vmatprep.subr.mxu1 %v861_v14  ;;  %903 = vmatpush2.msra.mxu0 %v860_v15  ;;  %v956_v14 = vrot.slane %v947_v4, %v955_v5 }
  0xba   : > { %1089 = vmatpush2.msra.mxu1 %v860_v15  ;;  %904 = vmatprep.subr.mxu0 %v859_v17 }
  0xbb   : > { %1058 = vmatprep.subr.mxu1 %v859_v17  ;;  %905 = vmatpush2.msra.mxu0 %v858_v61 }
  0xbc   : > { %1090 = vmatpush2.msra.mxu1 %v858_v61  ;;  %906 = vmatprep.subr.mxu0 %v857_v19 }
  0xbd   : > { %1059 = vmatprep.subr.mxu1 %v857_v19  ;;  %907 = vmatpush2.msra.mxu0 %v856_v20 }
  0xbe   : > { %1091 = vmatpush2.msra.mxu1 %v856_v20  ;;  %908 = vmatprep.subr.mxu0 %v855_v3 }
  0xbf   : > { %1060 = vmatprep.subr.mxu1 %v855_v3  ;;  %909 = vmatpush2.msra.mxu0 %v854_v21 }
  0xc0   : > { %1092 = vmatpush2.msra.mxu1 %v854_v21  ;;  %910 = vmatprep.subr.mxu0 %v853_v22 }
  0xc1   : > { %1061 = vmatprep.subr.mxu1 %v853_v22  ;;  %911 = vmatpush2.msra.mxu0 %v852_v23 }
  0xc2   : > { %1093 = vmatpush2.msra.mxu1 %v852_v23  ;;  %912 = vmatprep.subr.mxu0 %v851_v24 }
  0xc3   : > { %1062 = vmatprep.subr.mxu1 %v851_v24  ;;  %913 = vmatpush2.msra.mxu0 %v850_v25 }
  0xc4   : > { %1094 = vmatpush2.msra.mxu1 %v850_v25  ;;  %914 = vmatprep.subr.mxu0 %v849_v26 }
  0xc5   : > { %1063 = vmatprep.subr.mxu1 %v849_v26  ;;  %915 = vmatpush2.msra.mxu0 %v848_v27 }
  0xc6   : > { %1095 = vmatpush2.msra.mxu1 %v848_v27  ;;  %916 = vmatprep.subr.mxu0 %v847_v28 }
  0xc7   : > { %1064 = vmatprep.subr.mxu1 %v847_v28  ;;  %917 = vmatpush2.msra.mxu0 %v846_v29 }
  0xc8   : > { %1096 = vmatpush2.msra.mxu1 %v846_v29  ;;  %918 = vmatprep.subr.mxu0 %v845_v30 }
  0xc9   : > { %1065 = vmatprep.subr.mxu1 %v845_v30  ;;  %919 = vmatpush2.msra.mxu0 %v844_v31 }
  0xca   : > { %1097 = vmatpush2.msra.mxu1 %v844_v31  ;;  %920 = vmatprep.subr.mxu0 %v843_v32 }
  0xcb   : > { %1066 = vmatprep.subr.mxu1 %v843_v32  ;;  %921 = vmatpush2.msra.mxu0 %v842_v33 }
  0xcc   : > { %1098 = vmatpush2.msra.mxu1 %v842_v33  ;;  %922 = vmatprep.subr.mxu0 %v841_v34 }
  0xcd   : > { %1067 = vmatprep.subr.mxu1 %v841_v34  ;;  %923 = vmatpush2.msra.mxu0 %v840_v35 }
  0xce   : > { %1099 = vmatpush2.msra.mxu1 %v840_v35  ;;  %924 = vmatprep.subr.mxu0 %v839_v36 }
  0xcf   : > { %1068 = vmatprep.subr.mxu1 %v839_v36  ;;  %925 = vmatpush2.msra.mxu0 %v838_v37 }
  0xd0   : > { %1100 = vmatpush2.msra.mxu1 %v838_v37  ;;  %926 = vmatprep.subr.mxu0 %v837_v38 }
  0xd1   : > { %1069 = vmatprep.subr.mxu1 %v837_v38  ;;  %927 = vmatpush2.msra.mxu0 %v836_v39 }
  0xd2   : > { %1101 = vmatpush2.msra.mxu1 %v836_v39  ;;  %928 = vmatprep.subr.mxu0 %v835_v50 }
  0xd3   : > { %1070 = vmatprep.subr.mxu1 %v835_v50  ;;  %929 = vmatpush2.msra.mxu0 %v834_v40 }
  0xd4   : > { %1102 = vmatpush2.msra.mxu1 %v834_v40  ;;  %930 = vmatprep.mubr.f32.mxu0 %v1928_v16 }
  0xd5   : > { %936 = vmatprep.mubr.f32.mxu1 %v801_v56  ;;  %931 = vmatmul.mubr.f32.vlgmr.msra.gmra.mxu0 %v1935_v18 }
  0xd6   : > { %937 = vmatmul.mubr.f32.vlgmr.msra.gmra.mxu1 %v800_v41 }
 0x10d   : > { %v394_v42 = vpop.f32.mrf.mxu0 }
 0x10e   : > { %v471_v44 = vpop.f32.mrf.mxu1 }
 0x10f   : > { %v396_v43 = vpop.f32.mrf.mxu0  ;;  %v472_v16 = vadd.f32 %v471_v44, %v394_v42 }
 0x110   : > { %v473_v46 = vpop.f32.mrf.mxu1 }
 0x111   : > { %v474_v60 = vadd.f32 %v473_v46, %v396_v43 }
 0x14a   : > { %v400_v45 = vpop.f32.mrf.mxu0 }
 0x14b   : > { %v477_v48 = vpop.f32.mrf.mxu1 }
 0x14c   : > { %v402_v47 = vpop.f32.mrf.mxu0  ;;  %v478_v59 = vadd.f32 %v477_v48, %v400_v45 }
 0x14d   : > { %v479_v51 = vpop.f32.mrf.mxu1 }
 0x14e   : > { %v480_v63 = vadd.f32 %v479_v51, %v402_v47 }
 0x151   : > { %v614_v49 = vpop.f32.mrf.mxu0 }
 0x152   : > { %v785_v54 = vpop.f32.mrf.mxu1  ;;  %v625_v0 = vadd.f32 %v614_v49, %v472_v16 }
 0x153   : > { %v616_v52 = vpop.f32.mrf.mxu0 }
 0x154   : > { %v787_v58 = vpop.f32.mrf.mxu1  ;;  %v626_v6 = vadd.f32 %v616_v52, %v474_v60  ;;  %v796_v9 = vadd.f32 %v785_v54, %v625_v0 }
 0x156   : > { %v797_v15 = vadd.f32 %v787_v58, %v626_v6 }
 0x157   : > { %v620_v55 = vpop.f32.mrf.mxu0 }
 0x158   : > { %v627_v1 = vadd.f32 %v620_v55, %v478_v59 }
 0x159   : > { %v622_v18 = vpop.f32.mrf.mxu0 }
 0x15a   : > { %v791_v62 = vpop.f32.mrf.mxu1  ;;  %v628_v7 = vadd.f32 %v622_v18, %v480_v63 }
 0x15b   : > { %v798_v10 = vadd.f32 %v791_v62, %v627_v1 }
 0x15c   : > { %v793_v8 = vpop.f32.mrf.mxu1 }
 0x15d   : > { %v799_v17 = vadd.f32 %v793_v8, %v628_v7 }
 0x195   : > { %v932_v12 = vpop.f32.mrf.mxu0 }
 0x196   : > { %v938_v13 = vpop.f32.mrf.mxu1  ;;  %v943_v61 = vadd.f32 %v932_v12, %v796_v9 }
 0x197   : > { %v945_v19 = vadd.f32 %v938_v13, %v798_v10  ;;  %v934_v20 = vpop.f32.mrf.mxu0 }
 0x198   : > { %v940_v3 = vpop.f32.mrf.mxu1  ;;  %v959_v21 = vadd.f32 %v952_v11, %v943_v61  ;;  %v944_v23 = vadd.f32 %v934_v20, %v797_v15 }
 0x199   : > { %v961_v22 = vadd.f32 %v952_v11, %v945_v19  ;;  %v946_v24 = vadd.f32 %v940_v3, %v799_v17 }
 0x19a   : > { %v963_v25 = vmax.f32 %v959_v21, 0.0  ;;  %v960_v27 = vadd.f32 %v956_v14, %v944_v23 }
 0x19b   : > { %v965_v26 = vmax.f32 %v961_v22, 0.0  ;;  %v962_v28 = vadd.f32 %v956_v14, %v946_v24 }
 0x19c   : > { %967 = vst [vmem:[%s170_s30] sm:$0xff] %v963_v25  ;;  %v964_v29 = vmax.f32 %v960_v27, 0.0 }
 0x19d   : > { %969 = vst [vmem:[%s170_s30 + $0x10] sm:$0xff] %v965_v26  ;;  %v966_v30 = vmax.f32 %v962_v28, 0.0 }
 0x19e   : > { %968 = vst [vmem:[%s170_s30 + $0x8] sm:$0xff] %v964_v29 }
 0x19f   : > { %970 = vst [vmem:[%s170_s30 + $0x18] sm:$0xff] %v966_v30 }
 0x1a0 PF: > { %s13_s12 = sadd.s32 1, %s1117_s12  }
 0x1a1   : > { %p10_p4 = scmp.ge.s32.totalorder %s13_s12, 4  }
 0x1a3   :  { %12 = sbr.rel (!%p10_p4) target bundleno = 1 (0x1), region = 62 }

// kernel: visual_encoder_forward.19
= control target key start
LH: loop header
LB: loop body
LE: loop exit
PB: predicated region body
PF: predicated region fallthrough
CT: control target
= control target key end

     0   :  { %vm17_vm0 = vcmask 1043456   ;;  %s174_s0 = inlined_call_operand.vmem [shape: f32[8,4,128], index: 0, kind: input, shape index: {}]   ;;  %s175_s1 = inlined_call_operand.hbm [shape: f32[8,128], index: 1, kind: output, shape index: {}]  }
   0x1   :  { %v9_v0 = vld [vmem:[%s174_s0] sm:$0xf]  ;;  %v10_v1 = vld [vmem:[%s174_s0 + $0x4] sm:$0xf]  ;;  %v11_v2 = vld [vmem:[%s174_s0 + $0x8] sm:$0xf] }
   0x2   :  { %v12_v3 = vld [vmem:[%s174_s0 + $0xc] sm:$0xf]  ;;  %v13_v4 = vld [vmem:[%s174_s0 + $0x10] sm:$0xf]  ;;  %v14_v5 = vld [vmem:[%s174_s0 + $0x14] sm:$0xf] }
   0x3   :  { %v15_v6 = vld [vmem:[%s174_s0 + $0x18] sm:$0xf]  ;;  %v16_v7 = vld [vmem:[%s174_s0 + $0x1c] sm:$0xf]  ;;  %v18_v8 = vsel %vm17_vm0, %v9_v0, -inf  ;;  %v25_v9 = vsel %vm17_vm0, %v10_v1, -inf }
   0x4   :  { %v32_v10 = vsel %vm17_vm0, %v11_v2, -inf  ;;  %v39_v11 = vsel %vm17_vm0, %v12_v3, -inf }
   0x5   :  { %6 = vsyncpa [#allocation3], 0  ;;  %v19_v12 = vrot.slane %v18_v8, 4  ;;  %v26_v13 = vrot.slane %v25_v9, 4  ;;  %v33_v14 = vrot.slane %v32_v10, 4  ;;  %v40_v15 = vrot.slane %v39_v11, 4 }
   0x6   :  { %v46_v16 = vsel %vm17_vm0, %v13_v4, -inf  ;;  %v53_v17 = vsel %vm17_vm0, %v14_v5, -inf  ;;  %v60_v18 = vsel %vm17_vm0, %v15_v6, -inf  ;;  %v67_v19 = vsel %vm17_vm0, %v16_v7, -inf  ;;  %s135_s0 = smov [#allocation2]  }
   0x7   :  { %vm82_vm1 = vcmask 1041409   ;;  %v20_v20 = vmax.f32 %v18_v8, %v19_v12  ;;  %v27_v21 = vmax.f32 %v25_v9, %v26_v13  ;;  %v34_v22 = vmax.f32 %v32_v10, %v33_v14  ;;  %s104_s22 = sshll.u32 %s135_s0, 4  ;;  %s105_s22 = int_to_ptr.vmem [resolvable:$true] %s104_s22 }
   0x8   :  { %v41_v23 = vmax.f32 %v39_v11, %v40_v15  ;;  %v47_v24 = vrot.slane %v46_v16, 4  ;;  %v54_v25 = vrot.slane %v53_v17, 4  ;;  %v61_v26 = vrot.slane %v60_v18, 4  ;;  %s113_s23 = scalar_lea.vmem %s105_s22, 128  ;;  %p118_p1 = scmp.lt.s32.totalorder %s105_s22, %s105_s22 }
   0x9   :  { %v68_v27 = vrot.slane %v67_v19, 4  ;;  %v21_v28 = vrot.slane %v20_v20, 2  ;;  %v28_v29 = vrot.slane %v27_v21, 2  ;;  %v35_v30 = vrot.slane %v34_v22, 2  ;;  %p114_p0 = scmp.ne.s32.totalorder %s105_s22, %s113_s23  ;;  %p119_p2 = scmp.lt.s32.totalorder %s113_s23, %s113_s23 }
   0xa   :  { %v42_v31 = vrot.slane %v41_v23, 2  ;;  %v48_v32 = vmax.f32 %v46_v16, %v47_v24  ;;  %v55_v33 = vmax.f32 %v53_v17, %v54_v25  ;;  %v62_v34 = vmax.f32 %v60_v18, %v61_v26 }
   0xb   :  { %v69_v35 = vmax.f32 %v67_v19, %v68_v27  ;;  %v22_v36 = vmax.f32 %v20_v20, %v21_v28  ;;  %v29_v37 = vmax.f32 %v27_v21, %v28_v29  ;;  %v36_v38 = vmax.f32 %v34_v22, %v35_v30  ;;  %p120_p3 = por %p119_p2, %p118_p1 }
   0xc   :  { %v43_v39 = vmax.f32 %v41_v23, %v42_v31  ;;  %v49_v40 = vrot.slane %v48_v32, 2  ;;  %v56_v41 = vrot.slane %v55_v33, 2  ;;  %v63_v42 = vrot.slane %v62_v34, 2 }
   0xd   :  { %v70_v43 = vrot.slane %v69_v35, 2  ;;  %v23_v44 = vrot.slane %v22_v36, 1  ;;  %v30_v45 = vrot.slane %v29_v37, 1  ;;  %v37_v46 = vrot.slane %v36_v38, 1  ;;  %p121_p4 = pnand %p120_p3, %p114_p0 }
   0xe   :  { %v44_v47 = vrot.slane %v43_v39, 1  ;;  %v50_v48 = vmax.f32 %v48_v32, %v49_v40  ;;  %v57_v49 = vmax.f32 %v55_v33, %v56_v41  ;;  %v64_v50 = vmax.f32 %v62_v34, %v63_v42 }
   0xf   :  { %v71_v51 = vmax.f32 %v69_v35, %v70_v43  ;;  %v24_v52 = vmax.f32 %v22_v36, %v23_v44  ;;  %v31_v53 = vmax.f32 %v29_v37, %v30_v45  ;;  %v38_v54 = vmax.f32 %v36_v38, %v37_v46 }
  0x10   :  { %v45_v55 = vmax.f32 %v43_v39, %v44_v47  ;;  %v51_v56 = vrot.slane %v50_v48, 1  ;;  %v58_v57 = vrot.slane %v57_v49, 1  ;;  %v65_v58 = vrot.slane %v64_v50, 1 }
  0x11   :  { %v72_v59 = vrot.slane %v71_v51, 1  ;;  %v83_v60 = vsel %vm82_vm1, %v31_v53, %v24_v52  ;;  %vm84_vm2 = vcmask 1042434   ;;  %vm86_vm3 = vcmask 1043459  }
  0x12   :  { %v52_v61 = vmax.f32 %v50_v48, %v51_v56  ;;  %v59_v62 = vmax.f32 %v57_v49, %v58_v57  ;;  %vm88_vm4 = vcmask 1044484   ;;  %v66_v63 = vmax.f32 %v64_v50, %v65_v58 }
  0x13   :  { %v85_v0 = vsel %vm84_vm2, %v38_v54, %v83_v60  ;;  %vm90_vm5 = vcmask 1045509   ;;  %v73_v1 = vmax.f32 %v71_v51, %v72_v59  ;;  %vm92_vm6 = vcmask 1046534  }
  0x14   :  { %v87_v2 = vsel %vm86_vm3, %v45_v55, %v85_v0  ;;  %vm94_vm7 = vcmask 1047559  }
  0x15   :  { %v89_v3 = vsel %vm88_vm4, %v52_v61, %v87_v2 }
  0x16   :  { %v91_v4 = vsel %vm90_vm5, %v59_v62, %v89_v3 }
  0x17   :  { %v93_v5 = vsel %vm92_vm6, %v66_v63, %v91_v4 }
  0x18   :  { %v95_v6 = vsel %vm94_vm7, %v73_v1, %v93_v5 }
  0x19   :  { %97 = vst [vmem:[#allocation2] sm:$0xff] %v95_v6 }
  0x1a   :  { %124 = shalt.err (!%p121_p4)
}
  0x1b   :  { %107 = dma.vmem_to_hbm [thread:$0]  %s105_s22, 128, %s175_s1, [#allocation3]  }
  0x1c   :  { %133 = dma.done.wait [#allocation3], 128  }
  0x1d   :  { %134 = vsyncadd [#allocation3], 4294967168 }
  0x1e   :  { %111 = vsyncpa [#allocation3], 1 }

// kernel: visual_encoder_forward.18
= control target key start
LH: loop header
LB: loop body
LE: loop exit
PB: predicated region body
PF: predicated region fallthrough
CT: control target
= control target key end

     0   :  { %s475_s12 = smov 0   ;;  %s597_s0 = inlined_call_operand.vmem [shape: f32[32,256], index: 0, kind: input, shape index: {}]   ;;  %s598_s1 = inlined_call_operand.vmem [shape: f32[256,128], index: 1, kind: input, shape index: {}]   ;;  %s599_s2 = inlined_call_operand.vmem [shape: f32[1,128], index: 2, kind: input, shape index: {}]   ;;  %s600_s3 = inlined_call_operand.vmem [shape: f32[32,128], index: 3, kind: output, shape index: {}]  }
   0x1 LB: > { %s355_s13 = sadd.s32 4294967295, %s453_s12   ;;  %p359_p0 = scmp.ge.s32.totalorder %s453_s12, 1  ;;  %s453_s12 = sphi %s475_s12, %s13_s12  }
   0x2   : > { %p139_p1 = scmp.lt.s32.totalorder %s453_s12, 3 }
   0x4   : > { %p140_p2 = pnand %p359_p0, %p139_p1 }
   0x5   : > { %s360_s21 = sshll.u32 (!%p140_p2), %s355_s13, 1 }
   0x6   : > { %143 = sbr.rel (%p140_p2) target bundleno = 247 (0xf7), region = 32  ;;  %p165_p3 = scmp.lt.s32.totalorder (!%p140_p2), %s360_s21, 3 }
   0xb   : > { %v212_v0 = vld [vmem:[%s598_s1 + $0xf8] sm:$0xff]  ;;  %v211_v2 = vld [vmem:[%s598_s1 + $0xf0] sm:$0xff]  ;;  %v210_v4 = vld [vmem:[%s598_s1 + $0xe8] sm:$0xff]  ;;  %s602_s21 = smov (!%p165_p3, %s360_s21), 3 }
   0xc   : > { %v196_v1 = vld [vmem:[%s598_s1 + $0x78] sm:$0xff]  ;;  %369 = vmatprep.subr.mxu0 %v212_v0  ;;  %407 = vmatprep.subr.mxu1 %v212_v0  ;;  %v195_v3 = vld [vmem:[%s598_s1 + $0x70] sm:$0xff]  ;;  %v194_v5 = vld [vmem:[%s598_s1 + $0x68] sm:$0xff]  ;;  %s368_s18 = sshll.u32 %s602_s21, 4  ;;  %s364_s7 = sshll.u32 %s602_s21, 3 }
   0xd   : > { %370 = vmatpush3.msra.mxu0 %v196_v1  ;;  %423 = vmatpush3.msra.mxu1 %v196_v1  ;;  %v209_v6 = vld [vmem:[%s598_s1 + $0xe0] sm:$0xff]  ;;  %v208_v8 = vld [vmem:[%s598_s1 + $0xd8] sm:$0xff]  ;;  %v207_v10 = vld [vmem:[%s598_s1 + $0xd0] sm:$0xff]  ;;  %s169_s13 = scalar_lea.vmem %s597_s0, %s368_s18  ;;  %s175_s10 = scalar_lea.vmem %s600_s3, %s364_s7 }
   0xe   : > { %371 = vmatprep.subr.mxu0 %v211_v2  ;;  %408 = vmatprep.subr.mxu1 %v211_v2  ;;  %v193_v7 = vld [vmem:[%s598_s1 + $0x60] sm:$0xff]  ;;  %v192_v9 = vld [vmem:[%s598_s1 + $0x58] sm:$0xff]  ;;  %v191_v11 = vld [vmem:[%s598_s1 + $0x50] sm:$0xff] }
   0xf   : > { %372 = vmatpush3.msra.mxu0 %v195_v3  ;;  %424 = vmatpush3.msra.mxu1 %v195_v3  ;;  %v206_v12 = vld [vmem:[%s598_s1 + $0xc8] sm:$0xff]  ;;  %v205_v14 = vld [vmem:[%s598_s1 + $0xc0] sm:$0xff]  ;;  %v204_v16 = vld [vmem:[%s598_s1 + $0xb8] sm:$0xff] }
  0x10   : > { %373 = vmatprep.subr.mxu0 %v210_v4  ;;  %409 = vmatprep.subr.mxu1 %v210_v4  ;;  %v190_v13 = vld [vmem:[%s598_s1 + $0x48] sm:$0xff]  ;;  %v189_v15 = vld [vmem:[%s598_s1 + $0x40] sm:$0xff]  ;;  %v188_v17 = vld [vmem:[%s598_s1 + $0x38] sm:$0xff] }
  0x11   : > { %374 = vmatpush3.msra.mxu0 %v194_v5  ;;  %425 = vmatpush3.msra.mxu1 %v194_v5  ;;  %v203_v18 = vld [vmem:[%s598_s1 + $0xb0] sm:$0xff]  ;;  %v202_v20 = vld [vmem:[%s598_s1 + $0xa8] sm:$0xff]  ;;  %v201_v22 = vld [vmem:[%s598_s1 + $0xa0] sm:$0xff] }
  0x12   : > { %375 = vmatprep.subr.mxu0 %v209_v6  ;;  %410 = vmatprep.subr.mxu1 %v209_v6  ;;  %v187_v19 = vld [vmem:[%s598_s1 + $0x30] sm:$0xff]  ;;  %v186_v21 = vld [vmem:[%s598_s1 + $0x28] sm:$0xff]  ;;  %v185_v23 = vld [vmem:[%s598_s1 + $0x20] sm:$0xff] }
  0x13   : > { %376 = vmatpush3.msra.mxu0 %v193_v7  ;;  %426 = vmatpush3.msra.mxu1 %v193_v7  ;;  %v200_v24 = vld [vmem:[%s598_s1 + $0x98] sm:$0xff]  ;;  %v199_v26 = vld [vmem:[%s598_s1 + $0x90] sm:$0xff]  ;;  %v198_v28 = vld [vmem:[%s598_s1 + $0x88] sm:$0xff] }
  0x14   : > { %377 = vmatprep.subr.mxu0 %v208_v8  ;;  %411 = vmatprep.subr.mxu1 %v208_v8  ;;  %v184_v25 = vld [vmem:[%s598_s1 + $0x18] sm:$0xff]  ;;  %v183_v27 = vld [vmem:[%s598_s1 + $0x10] sm:$0xff]  ;;  %v182_v29 = vld [vmem:[%s598_s1 + $0x8] sm:$0xff] }
  0x15   : > { %378 = vmatpush3.msra.mxu0 %v192_v9  ;;  %427 = vmatpush3.msra.mxu1 %v192_v9  ;;  %v197_v30 = vld [vmem:[%s598_s1 + $0x80] sm:$0xff]  ;;  %v178_v32 = vld [vmem:[%s169_s13 + $0x8] sm:$0xff]  ;;  %v180_v33 = vld [vmem:[%s169_s13 + $0x18] sm:$0xff] }
  0x16   : > { %379 = vmatprep.subr.mxu0 %v207_v10  ;;  %412 = vmatprep.subr.mxu1 %v207_v10  ;;  %v181_v31 = vld [vmem:[%s598_s1] sm:$0xff]  ;;  %v179_v35 = vld [vmem:[%s169_s13 + $0x10] sm:$0xff] }
  0x17   : > { %380 = vmatpush3.msra.mxu0 %v191_v11  ;;  %428 = vmatpush3.msra.mxu1 %v191_v11  ;;  %v177_v34 = vld [vmem:[%s169_s13] sm:$0xff] }
  0x18   : > { %381 = vmatprep.subr.mxu0 %v206_v12  ;;  %413 = vmatprep.subr.mxu1 %v206_v12  ;;  %v365_v38 = vld [vmem:[%s599_s2] ss:$0 sm:$0xff] }
  0x19   : > { %382 = vmatpush3.msra.mxu0 %v190_v13  ;;  %429 = vmatpush3.msra.mxu1 %v190_v13 }
  0x1a   : > { %383 = vmatprep.subr.mxu0 %v205_v14  ;;  %414 = vmatprep.subr.mxu1 %v205_v14 }
  0x1b   : > { %384 = vmatpush3.msra.mxu0 %v189_v15  ;;  %430 = vmatpush3.msra.mxu1 %v189_v15 }
  0x1c   : > { %385 = vmatprep.subr.mxu0 %v204_v16  ;;  %415 = vmatprep.subr.mxu1 %v204_v16 }
  0x1d   : > { %386 = vmatpush3.msra.mxu0 %v188_v17  ;;  %431 = vmatpush3.msra.mxu1 %v188_v17 }
  0x1e   : > { %387 = vmatprep.subr.mxu0 %v203_v18  ;;  %416 = vmatprep.subr.mxu1 %v203_v18 }
  0x1f   : > { %388 = vmatpush3.msra.mxu0 %v187_v19  ;;  %432 = vmatpush3.msra.mxu1 %v187_v19 }
  0x20   : > { %389 = vmatprep.subr.mxu0 %v202_v20  ;;  %417 = vmatprep.subr.mxu1 %v202_v20 }
  0x21   : > { %390 = vmatpush3.msra.mxu0 %v186_v21  ;;  %433 = vmatpush3.msra.mxu1 %v186_v21 }
  0x22   : > { %391 = vmatprep.subr.mxu0 %v201_v22  ;;  %418 = vmatprep.subr.mxu1 %v201_v22 }
  0x23   : > { %392 = vmatpush3.msra.mxu0 %v185_v23  ;;  %434 = vmatpush3.msra.mxu1 %v185_v23 }
  0x24   : > { %393 = vmatprep.subr.mxu0 %v200_v24  ;;  %419 = vmatprep.subr.mxu1 %v200_v24 }
  0x25   : > { %394 = vmatpush3.msra.mxu0 %v184_v25  ;;  %435 = vmatpush3.msra.mxu1 %v184_v25 }
  0x26   : > { %395 = vmatprep.subr.mxu0 %v199_v26  ;;  %420 = vmatprep.subr.mxu1 %v199_v26 }
  0x27   : > { %396 = vmatpush3.msra.mxu0 %v183_v27  ;;  %436 = vmatpush3.msra.mxu1 %v183_v27 }
  0x28   : > { %397 = vmatprep.subr.mxu0 %v198_v28  ;;  %421 = vmatprep.subr.mxu1 %v198_v28 }
  0x29   : > { %398 = vmatpush3.msra.mxu0 %v182_v29  ;;  %437 = vmatpush3.msra.mxu1 %v182_v29 }
  0x2a   : > { %399 = vmatprep.subr.mxu0 %v197_v30  ;;  %422 = vmatprep.subr.mxu1 %v197_v30 }
  0x2b   : > { %400 = vmatpush3.msra.mxu0 %v181_v31  ;;  %438 = vmatpush3.msra.mxu1 %v181_v31 }
  0x2c   : > { %284 = vmatprep.mubr.f32.mxu0 %v178_v32  ;;  %289 = vmatprep.mubr.f32.mxu1 %v180_v33 }
  0x2d   : > { %285 = vmatmul.mubr.f32.vlgmr.msra.gmra.mxu0 %v177_v34  ;;  %290 = vmatmul.mubr.f32.vlgmr.msra.gmra.mxu1 %v179_v35 }
  0xed   : > { %v401_v36 = vpop.f32.mrf.mxu0  ;;  %v404_v37 = vpop.f32.mrf.mxu1 }
  0xef   : > { %v402_v39 = vpop.f32.mrf.mxu0  ;;  %v405_v40 = vpop.f32.mrf.mxu1 }
  0xf0   : > { %v403_v41 = vadd.f32 %v402_v39, %v401_v36  ;;  %v406_v42 = vadd.f32 %v405_v40, %v404_v37 }
  0xf2   : > { %v287_v43 = vadd.f32 %v403_v41, %v365_v38  ;;  %v292_v44 = vadd.f32 %v406_v42, %v365_v38 }
  0xf4   : > { %v295_v45 = vmax.f32 %v287_v43, 0.0  ;;  %v296_v46 = vmax.f32 %v292_v44, 0.0 }
  0xf6   : > { %297 = vst [vmem:[%s175_s10] sm:$0xff] %v295_v45  ;;  %298 = vst [vmem:[%s175_s10 + $0x8] sm:$0xff] %v296_v46 }
  0xf7 PF: > { %s13_s12 = sadd.s32 1, %s453_s12  }
  0xf8   : > { %p10_p4 = scmp.ge.s32.totalorder %s13_s12, 4  }
  0xfa   :  { %12 = sbr.rel (!%p10_p4) target bundleno = 1 (0x1), region = 62 }

</bundles_post_ra>
